<compile_context>
chip_gen: v5e
topology: v5e:2x2
jax: 0.10.0
libtpu: 0.0.40
codegen_flags: <defaults>
</compile_context>

<pallas_src>
import functools

import jax
import jax.numpy as jnp
from jax import lax
from jax.experimental import pallas as pl
from jax.experimental.pallas import tpu as pltpu

NEG_BIG = -1e30  # per-channel "no ReLU" lower bound (gate stays in fp32 in-kernel)


# ----------------------------- Pallas kernels -----------------------------

def _fused_convs_kernel(pz_ref, px_ref, wz_ref, wx_ref,
                        sz_ref, lz_ref, sx_ref, lx_ref,
                        kz_ref, xs_ref):
    """Both 3x3 convs (z-path and x-path) as single K=taps*Cin matmuls + affine gate.

    pz_ref: (Mz, taps*Cin) bf16, px_ref: (Mx, taps*Cin) bf16
    wz_ref/wx_ref: (taps*Cin, Cout) bf16 (BN scale pre-folded)
    s*_ref / l*_ref: (1, Cout) f32 per-channel shift / lower bound (-1e30 = no ReLU)
    kz_ref: (Mz, Cout) bf16, xs_ref: (Mx, Cout) bf16
    """
    kz = jnp.dot(pz_ref[...], wz_ref[...], preferred_element_type=jnp.float32)
    kz_ref[...] = jnp.maximum(kz + sz_ref[...], lz_ref[...]).astype(kz_ref.dtype)
    xs = jnp.dot(px_ref[...], wx_ref[...], preferred_element_type=jnp.float32)
    xs_ref[...] = jnp.maximum(xs + sx_ref[...], lx_ref[...]).astype(xs_ref.dtype)


def _corr_head_kernel(x_ref, k_ref, w1_ref, b1_ref, w2_ref, b2_ref, o_ref):
    """Per-batch depthwise cross-correlation (both branches on lanes) + fused 1x1 head.

    x_ref: (1, Hs, Ws, C) bf16, k_ref: (1, Hk, Wk, C) bf16
    w1/b1/w2/b2: block-diagonal [cls | loc] head params (bf16 weights, f32 biases)
    o_ref: (1, Ho, Wo, Cout) f32

    dj-factorized: one sublane-offset slab load per dj (Wk total) kept in bf16,
    f32 accumulation; the per-batch feature stays in vregs and feeds the head
    matmuls row-by-row (no reshape, no HBM round-trip for the feature).
    """
    _, hs, ws, c = x_ref.shape
    _, hk, wk, _ = k_ref.shape
    _, ho, wo, _ = o_ref.shape

    acc = jnp.zeros((1, ho, wo, c), jnp.float32)
    for dj in range(wk):
        x_dj = x_ref[:, :, dj:dj + wo, :]                       # (1, Hs, Wo, C) bf16
        for di in range(hk):
            kv = k_ref[:, di:di + 1, dj:dj + 1, :].astype(jnp.float32)   # (1,1,1,C)
            acc = acc + x_dj[:, di:di + ho, :, :].astype(jnp.float32) * kv

    w1 = w1_ref[...]                                            # (C, C1) bf16
    b1 = b1_ref[...]                                            # (1, C1) f32
    w2 = w2_ref[...]                                            # (C1, Cout) bf16
    b2 = b2_ref[...]                                            # (1, Cout) f32
    for oi in range(ho):                                        # per-output-row head
        f_row = acc[0, oi].astype(jnp.bfloat16)                 # (Wo, C)
        h = jnp.dot(f_row, w1, preferred_element_type=jnp.float32) + b1
        h = jnp.maximum(h, 0.0).astype(jnp.bfloat16)
        o_ref[0, oi, :, :] = jnp.dot(h, w2, preferred_element_type=jnp.float32) + b2


# ----------------------------- Pallas wrappers -----------------------------

def _build_patches(x_nhwc, kh=3, kw=3):
    """im2col in XLA: (N,Hs,Ws,Cin) -> (N*Ho*Wo, kh*kw*Cin) bf16 lane-dense slab."""
    n, hs, ws, cin = x_nhwc.shape
    ho, wo = hs - kh + 1, ws - kw + 1
    xb = x_nhwc.astype(jnp.bfloat16)
    taps = [xb[:, di:di + ho, dj:dj + wo, :] for di in range(kh) for dj in range(kw)]
    p = jnp.stack(taps, axis=3)                                 # (N, Ho, Wo, taps, Cin)
    return p.reshape(n * ho * wo, kh * kw * cin), (n, ho, wo)


def fused_convs(pz, px, wz, wx, shift_z, lb_z, shift_x, lb_x):
    """One launch for both 3x3 convs (VALID, == F.conv2d) + per-channel affine/ReLU gate."""
    mz, kdim = pz.shape
    mx, _ = px.shape
    cout = wz.shape[-1]
    return pl.pallas_call(
        _fused_convs_kernel,
        out_shape=(jax.ShapeDtypeStruct((mz, cout), jnp.bfloat16),
                   jax.ShapeDtypeStruct((mx, cout), jnp.bfloat16)),
        grid=(1,),
        in_specs=[
            pl.BlockSpec((mz, kdim), lambda i: (0, 0)),
            pl.BlockSpec((mx, kdim), lambda i: (0, 0)),
            pl.BlockSpec((kdim, cout), lambda i: (0, 0)),
            pl.BlockSpec((kdim, cout), lambda i: (0, 0)),
            pl.BlockSpec((1, cout), lambda i: (0, 0)),
            pl.BlockSpec((1, cout), lambda i: (0, 0)),
            pl.BlockSpec((1, cout), lambda i: (0, 0)),
            pl.BlockSpec((1, cout), lambda i: (0, 0)),
        ],
        out_specs=(pl.BlockSpec((mz, cout), lambda i: (0, 0)),
                   pl.BlockSpec((mx, cout), lambda i: (0, 0))),
        compiler_params=pltpu.CompilerParams(dimension_semantics=("arbitrary",)),
    )(pz, px, wz, wx, shift_z, lb_z, shift_x, lb_x)


def corr_head(xs, kz, w1, b1, w2, b2):
    """Per-(batch, channel) valid cross-correlation + fused 1x1 head, batch-parallel."""
    n, hs, ws, c = xs.shape
    _, hk, wk, ck = kz.shape
    assert ck == c
    ho, wo = hs - hk + 1, ws - wk + 1
    c1 = w1.shape[-1]
    cout = w2.shape[-1]
    return pl.pallas_call(
        _corr_head_kernel,
        out_shape=jax.ShapeDtypeStruct((n, ho, wo, cout), jnp.float32),
        grid=(n,),
        in_specs=[
            pl.BlockSpec((1, hs, ws, c), lambda b: (b, 0, 0, 0)),
            pl.BlockSpec((1, hk, wk, c), lambda b: (b, 0, 0, 0)),
            pl.BlockSpec((c, c1), lambda b: (0, 0)),
            pl.BlockSpec((1, c1), lambda b: (0, 0)),
            pl.BlockSpec((c1, cout), lambda b: (0, 0)),
            pl.BlockSpec((1, cout), lambda b: (0, 0)),
        ],
        out_specs=pl.BlockSpec((1, ho, wo, cout), lambda b: (b, 0, 0, 0)),
        compiler_params=pltpu.CompilerParams(dimension_semantics=("parallel",)),
    )(xs, kz, w1, b1, w2, b2)


# ----------------------------- parameters -----------------------------

def make_raw_params(key, cin, hidden, anchor_num):
    """Per-layer parameters mirroring the PyTorch module (inference-mode BN)."""
    cls_out = 2 * anchor_num
    loc_out = 4 * anchor_num
    ks = iter(jax.random.split(key, 48))

    def w(shape, s=0.1):
        return (s * jax.random.normal(next(ks), shape)).astype(jnp.float32)

    def bn(c):  # inference-mode BatchNorm folded to scale/shift
        gamma = 1.0 + 0.1 * jax.random.normal(next(ks), (c,))
        beta = 0.1 * jax.random.normal(next(ks), (c,))
        mean = 0.1 * jax.random.normal(next(ks), (c,))
        var = 1.0 + 0.1 * jnp.abs(jax.random.normal(next(ks), (c,)))
        scale = gamma / jnp.sqrt(var + 1e-5)
        shift = beta - mean * scale
        return scale.astype(jnp.float32), shift.astype(jnp.float32)

    h = hidden
    cls = dict(
        ck_w=w((3, 3, cin, 2 * h)),          # L_DepthCorr.conv_kernel: conv only
        cs_w=w((3, 3, cin, h)),              # L_DepthCorr.conv_search: conv only
        h1_w=w((2 * h, h)),                  # head conv1x1 (no bias) + BN + ReLU
        h2_w=w((h, cls_out)), h2_b=w((cls_out,)),
    )
    cls["h1_scale"], cls["h1_shift"] = bn(h)

    loc = dict(
        ck_w=w((3, 3, cin, h)),              # DepthCorr.conv_kernel: conv + BN + ReLU
        cs_w=w((3, 3, cin, h)),              # DepthCorr.conv_search: conv + BN + ReLU
        h1_w=w((h, h)),
        h2_w=w((h, loc_out)), h2_b=w((loc_out,)),
    )
    loc["ck_scale"], loc["ck_shift"] = bn(h)
    loc["cs_scale"], loc["cs_shift"] = bn(h)
    loc["h1_scale"], loc["h1_shift"] = bn(h)
    return {"cls": cls, "loc": loc}


def fuse_params(raw, cin, hidden, anchor_num):
    """Fold BN into weights, fuse cls+loc branches on the channel axis, cast to bf16."""
    cls_p, loc_p = raw["cls"], raw["loc"]
    h = hidden
    cls_out, loc_out = 2 * anchor_num, 4 * anchor_num
    no_relu = jnp.full((2 * h,), NEG_BIG, jnp.float32)
    relu = jnp.zeros((h,), jnp.float32)

    # z-path 3x3 conv: [cls conv_kernel (plain) | loc conv_kernel (BN folded, ReLU)]
    wz = jnp.concatenate([cls_p["ck_w"], loc_p["ck_w"] * loc_p["ck_scale"]], axis=-1)
    shift_z = jnp.concatenate([jnp.zeros((2 * h,), jnp.float32), loc_p["ck_shift"]])
    lb_z = jnp.concatenate([no_relu, relu])

    # x-path 3x3 conv: cls conv_search columns duplicated-interleaved (channel 2c,2c+1
    # <- column c), so conv2d_dw_group's grouping needs no activation repeat.
    wx = jnp.concatenate([jnp.repeat(cls_p["cs_w"], 2, axis=-1),
                          loc_p["cs_w"] * loc_p["cs_scale"]], axis=-1)
    shift_x = jnp.concatenate([jnp.zeros((2 * h,), jnp.float32), loc_p["cs_shift"]])
    lb_x = jnp.concatenate([no_relu, relu])

    # fused 1x1 head: block-diagonal [cls | loc], BN scale folded into columns.
    w1 = jnp.zeros((3 * h, 2 * h), jnp.float32)
    w1 = w1.at[:2 * h, :h].set(cls_p["h1_w"] * cls_p["h1_scale"])
    w1 = w1.at[2 * h:, h:].set(loc_p["h1_w"] * loc_p["h1_scale"])
    b1 = jnp.concatenate([cls_p["h1_shift"], loc_p["h1_shift"]])

    w2 = jnp.zeros((2 * h, cls_out + loc_out), jnp.float32)
    w2 = w2.at[:h, :cls_out].set(cls_p["h2_w"])
    w2 = w2.at[h:, cls_out:].set(loc_p["h2_w"])
    b2 = jnp.concatenate([cls_p["h2_b"], loc_p["h2_b"]])

    def flat_bf16(w4):  # (3,3,Cin,Cout) -> (9*Cin, Cout) bf16, row = (di*3+dj)*Cin + ci
        return w4.reshape(-1, w4.shape[-1]).astype(jnp.bfloat16)

    as_row = lambda v: v.reshape(1, -1).astype(jnp.float32)
    return dict(
        wz=flat_bf16(wz), shift_z=as_row(shift_z), lb_z=as_row(lb_z),
        wx=flat_bf16(wx), shift_x=as_row(shift_x), lb_x=as_row(lb_x),
        w1=w1.astype(jnp.bfloat16), b1=as_row(b1),
        w2=w2.astype(jnp.bfloat16), b2=as_row(b2),
    )


# ----------------------------- RPN forward -----------------------------

def rpn_forward(fused, z_f_nchw, x_f_nchw, *, cls_out):
    z = jnp.transpose(z_f_nchw, (0, 2, 3, 1)).astype(jnp.float32)  # NCHW -> NHWC
    x = jnp.transpose(x_f_nchw, (0, 2, 3, 1)).astype(jnp.float32)

    # im2col patch slabs (XLA glue, lane-dense K = taps*Cin)
    pz, (n, hz, wz_sp) = _build_patches(z)                         # (72, 144)
    px, (_, hx, wx_sp) = _build_patches(x)                         # (392, 144)

    # one launch: both fused cls+loc 3x3 convs
    kz2d, xs2d = fused_convs(pz, px, fused["wz"], fused["wx"],
                             fused["shift_z"], fused["lb_z"],
                             fused["shift_x"], fused["lb_x"])
    c = fused["wz"].shape[-1]
    kz = kz2d.reshape(n, hz, wz_sp, c)                             # (N, 6, 6, 3H) bf16
    xs = xs2d.reshape(n, hx, wx_sp, c)                             # (N,14,14, 3H) bf16

    # one launch: fused grouped/depthwise correlation + 1x1 head, batch-parallel grid
    out = corr_head(xs, kz, fused["w1"], fused["b1"], fused["w2"], fused["b2"])
    # out: (N, 9, 9, 30)

    # back to NCHW; RPN.forward returns (loc, cls)
    cls = jnp.transpose(out[..., :cls_out], (0, 3, 1, 2))          # (N, 10, 9, 9)
    loc = jnp.transpose(out[..., cls_out:], (0, 3, 1, 2))          # (N, 20, 9, 9)
    return loc, cls


# ----------------------------- pure-JAX reference (for checking) -----------------------------

def reference_forward(raw, z_nchw, x_nchw):
    """fp32 NCHW re-implementation of the PyTorch module."""
    def conv(x, w_hwio):  # VALID, stride 1, cross-correlation (== F.conv2d)
        return lax.conv_general_dilated(
            x, w_hwio, window_strides=(1, 1), padding="VALID",
            dimension_numbers=("NCHW", "HWIO", "NCHW"),
            preferred_element_type=jnp.float32)

    def affine(x, scale, shift):
        return x * scale[None, :, None, None] + shift[None, :, None, None]

    def conv1x1(x, w_io):
        return jnp.einsum("nchw,co->nohw", x, w_io)

    def dw_group(x, k):  # conv2d_dw_group: out channel o <- x channel o//rep, kernel channel o
        n, c, hh, ww = x.shape
        _, kc, hk, wk = k.shape
        rep = kc // c
        xr = jnp.repeat(x, rep, axis=1)
        ho, wo = hh - hk + 1, ww - wk + 1
        out = jnp.zeros((n, kc, ho, wo), jnp.float32)
        for di in range(hk):
            for dj in range(wk):
                out = out + xr[:, :, di:di + ho, dj:dj + wo] * k[:, :, di:di + 1, dj:dj + 1]
        return out

    cls_p, loc_p = raw["cls"], raw["loc"]
    # cls (L_DepthCorr): kernel = make_kernel(z) = plain conv; search = plain conv
    kz = conv(z_nchw, cls_p["ck_w"])
    xs = conv(x_nchw, cls_p["cs_w"])
    feat = dw_group(xs, kz)
    hmid = jnp.maximum(affine(conv1x1(feat, cls_p["h1_w"]),
                              cls_p["h1_scale"], cls_p["h1_shift"]), 0.0)
    cls = conv1x1(hmid, cls_p["h2_w"]) + cls_p["h2_b"][None, :, None, None]
    # loc (DepthCorr): conv+BN+ReLU on both paths
    kz = jnp.maximum(affine(conv(z_nchw, loc_p["ck_w"]), loc_p["ck_scale"], loc_p["ck_shift"]), 0.0)
    xs = jnp.maximum(affine(conv(x_nchw, loc_p["cs_w"]), loc_p["cs_scale"], loc_p["cs_shift"]), 0.0)
    feat = dw_group(xs, kz)
    hmid = jnp.maximum(affine(conv1x1(feat, loc_p["h1_w"]),
                              loc_p["h1_scale"], loc_p["h1_shift"]), 0.0)
    loc = conv1x1(hmid, loc_p["h2_w"]) + loc_p["h2_b"][None, :, None, None]
    return loc, cls


if __name__ == "__main__":
    N, Cin, hidden, anchor = 2, 16, 16, 5
    key = jax.random.PRNGKey(0)
    kp, kz_key, kx_key = jax.random.split(key, 3)
    raw = make_raw_params(kp, Cin, hidden, anchor)
    fused = fuse_params(raw, Cin, hidden, anchor)
    z_f = jax.random.normal(kz_key, (N, Cin, 8, 8), dtype=jnp.float32)    # template features
    x_f = jax.random.normal(kx_key, (N, Cin, 16, 16), dtype=jnp.float32)  # search features

    forward = jax.jit(functools.partial(rpn_forward, cls_out=2 * anchor))
    loc, cls = forward(fused, z_f, x_f)
    jax.block_until_ready((loc, cls))

    assert loc.shape == (N, 4 * anchor, 9, 9), loc.shape
    assert cls.shape == (N, 2 * anchor, 9, 9), cls.shape
    assert bool(jnp.all(jnp.isfinite(loc))) and bool(jnp.all(jnp.isfinite(cls)))

    # numerical check vs the fp32 reference (bf16 MXU operands + bf16 intermediates)
    ref_loc, ref_cls = jax.jit(reference_forward)(raw, z_f, x_f)
    jax.block_until_ready((ref_loc, ref_cls))

    def rel_err(a, b):
        return float(jnp.sqrt(jnp.sum((a - b) ** 2)) / (jnp.sqrt(jnp.sum(b ** 2)) + 1e-8))

    assert rel_err(loc, ref_loc) < 0.05, rel_err(loc, ref_loc)
    assert rel_err(cls, ref_cls) < 0.05, rel_err(cls, ref_cls)
    print("KERNEL_OK")
</pallas_src>

<mosaic_0001>
module attributes {stable_mosaic.version = 11 : i64} {
  func.func @_fused_convs_kernel(%arg0: i32, %arg1: memref<72x144xbf16, #tpu.memory_space<vmem>>, %arg2: memref<392x144xbf16, #tpu.memory_space<vmem>>, %arg3: memref<144x48xbf16, #tpu.memory_space<vmem>>, %arg4: memref<144x48xbf16, #tpu.memory_space<vmem>>, %arg5: memref<1x48xf32, #tpu.memory_space<vmem>>, %arg6: memref<1x48xf32, #tpu.memory_space<vmem>>, %arg7: memref<1x48xf32, #tpu.memory_space<vmem>>, %arg8: memref<1x48xf32, #tpu.memory_space<vmem>>, %arg9: memref<72x48xbf16, #tpu.memory_space<vmem>>, %arg10: memref<392x48xbf16, #tpu.memory_space<vmem>>) attributes {dimension_semantics = [#tpu.dimension_semantics<arbitrary>], iteration_bounds = array<i64: 1>, scalar_prefetch = 0 : i64, scratch_operands = 0 : i64, tpu.core_type = #tpu.core_type<tc>, window_params = [{pipeline_mode = #tpu.pipeline_mode<synchronous>, transform_indices = @transform_0, window_bounds = array<i64: 72, 144>}, {pipeline_mode = #tpu.pipeline_mode<synchronous>, transform_indices = @transform_1, window_bounds = array<i64: 392, 144>}, {pipeline_mode = #tpu.pipeline_mode<synchronous>, transform_indices = @transform_2, window_bounds = array<i64: 144, 48>}, {pipeline_mode = #tpu.pipeline_mode<synchronous>, transform_indices = @transform_3, window_bounds = array<i64: 144, 48>}, {pipeline_mode = #tpu.pipeline_mode<synchronous>, transform_indices = @transform_4, window_bounds = array<i64: 1, 48>}, {pipeline_mode = #tpu.pipeline_mode<synchronous>, transform_indices = @transform_5, window_bounds = array<i64: 1, 48>}, {pipeline_mode = #tpu.pipeline_mode<synchronous>, transform_indices = @transform_6, window_bounds = array<i64: 1, 48>}, {pipeline_mode = #tpu.pipeline_mode<synchronous>, transform_indices = @transform_7, window_bounds = array<i64: 1, 48>}, {pipeline_mode = #tpu.pipeline_mode<synchronous>, transform_indices = @transform_8, window_bounds = array<i64: 72, 48>}, {pipeline_mode = #tpu.pipeline_mode<synchronous>, transform_indices = @transform_9, window_bounds = array<i64: 392, 48>}]} {
    %c0 = arith.constant 0 : index
    %c0_0 = arith.constant 0 : index
    %0 = vector.load %arg1[%c0, %c0_0] : memref<72x144xbf16, #tpu.memory_space<vmem>>, vector<72x144xbf16>
    %c0_1 = arith.constant 0 : index
    %c0_2 = arith.constant 0 : index
    %1 = vector.load %arg3[%c0_1, %c0_2] : memref<144x48xbf16, #tpu.memory_space<vmem>>, vector<144x48xbf16>
    %cst = arith.constant dense<0.000000e+00> : vector<72x48xf32>
    %2 = tpu.matmul %0, %1, %cst {dimension_numbers = #tpu.dot_dimension_numbers<[1], [0], [0], [1], [0, 0, 1, 1], [], []>} : vector<72x144xbf16>, vector<144x48xbf16>, vector<72x48xf32> -> vector<72x48xf32>
    %c0_3 = arith.constant 0 : index
    %c0_4 = arith.constant 0 : index
    %3 = vector.load %arg5[%c0_3, %c0_4] : memref<1x48xf32, #tpu.memory_space<vmem>>, vector<1x48xf32>
    %4 = vector.broadcast %3 : vector<1x48xf32> to vector<72x48xf32>
    %5 = arith.addf %2, %4 : vector<72x48xf32>
    %c0_5 = arith.constant 0 : index
    %c0_6 = arith.constant 0 : index
    %6 = vector.load %arg6[%c0_5, %c0_6] : memref<1x48xf32, #tpu.memory_space<vmem>>, vector<1x48xf32>
    %7 = vector.broadcast %6 : vector<1x48xf32> to vector<72x48xf32>
    %8 = arith.maximumf %5, %7 : vector<72x48xf32>
    %9 = arith.truncf %8 : vector<72x48xf32> to vector<72x48xbf16>
    %c0_7 = arith.constant 0 : index
    %c0_8 = arith.constant 0 : index
    %10 = vector.load %arg9[%c0_7, %c0_8] : memref<72x48xbf16, #tpu.memory_space<vmem>>, vector<72x48xbf16>
    tpu.vector_store %arg9[%c0_7, %c0_8], %9 {strides = array<i32>} : memref<72x48xbf16, #tpu.memory_space<vmem>>, vector<72x48xbf16>,
    %c0_9 = arith.constant 0 : index
    %c0_10 = arith.constant 0 : index
    %11 = vector.load %arg2[%c0_9, %c0_10] : memref<392x144xbf16, #tpu.memory_space<vmem>>, vector<392x144xbf16>
    %c0_11 = arith.constant 0 : index
    %c0_12 = arith.constant 0 : index
    %12 = vector.load %arg4[%c0_11, %c0_12] : memref<144x48xbf16, #tpu.memory_space<vmem>>, vector<144x48xbf16>
    %cst_13 = arith.constant dense<0.000000e+00> : vector<392x48xf32>
    %13 = tpu.matmul %11, %12, %cst_13 {dimension_numbers = #tpu.dot_dimension_numbers<[1], [0], [0], [1], [0, 0, 1, 1], [], []>} : vector<392x144xbf16>, vector<144x48xbf16>, vector<392x48xf32> -> vector<392x48xf32>
    %c0_14 = arith.constant 0 : index
    %c0_15 = arith.constant 0 : index
    %14 = vector.load %arg7[%c0_14, %c0_15] : memref<1x48xf32, #tpu.memory_space<vmem>>, vector<1x48xf32>
    %15 = vector.broadcast %14 : vector<1x48xf32> to vector<392x48xf32>
    %16 = arith.addf %13, %15 : vector<392x48xf32>
    %c0_16 = arith.constant 0 : index
    %c0_17 = arith.constant 0 : index
    %17 = vector.load %arg8[%c0_16, %c0_17] : memref<1x48xf32, #tpu.memory_space<vmem>>, vector<1x48xf32>
    %18 = vector.broadcast %17 : vector<1x48xf32> to vector<392x48xf32>
    %19 = arith.maximumf %16, %18 : vector<392x48xf32>
    %20 = arith.truncf %19 : vector<392x48xf32> to vector<392x48xbf16>
    %c0_18 = arith.constant 0 : index
    %c0_19 = arith.constant 0 : index
    %21 = vector.load %arg10[%c0_18, %c0_19] : memref<392x48xbf16, #tpu.memory_space<vmem>>, vector<392x48xbf16>
    tpu.vector_store %arg10[%c0_18, %c0_19], %20 {strides = array<i32>} : memref<392x48xbf16, #tpu.memory_space<vmem>>, vector<392x48xbf16>,
    return
  }
  func.func @transform_0(%arg0: i32) -> (i32, i32) {
    %c0_i32 = arith.constant 0 : i32
    %c0_i32_0 = arith.constant 0 : i32
    %c0_i32_1 = arith.constant 0 : i32
    return %c0_i32, %c0_i32_0 : i32, i32
  }
  func.func @transform_1(%arg0: i32) -> (i32, i32) {
    %c0_i32 = arith.constant 0 : i32
    %c0_i32_0 = arith.constant 0 : i32
    %c0_i32_1 = arith.constant 0 : i32
    return %c0_i32, %c0_i32_0 : i32, i32
  }
  func.func @transform_2(%arg0: i32) -> (i32, i32) {
    %c0_i32 = arith.constant 0 : i32
    %c0_i32_0 = arith.constant 0 : i32
    %c0_i32_1 = arith.constant 0 : i32
    return %c0_i32, %c0_i32_0 : i32, i32
  }
  func.func @transform_3(%arg0: i32) -> (i32, i32) {
    %c0_i32 = arith.constant 0 : i32
    %c0_i32_0 = arith.constant 0 : i32
    %c0_i32_1 = arith.constant 0 : i32
    return %c0_i32, %c0_i32_0 : i32, i32
  }
  func.func @transform_4(%arg0: i32) -> (i32, i32) {
    %c0_i32 = arith.constant 0 : i32
    %c0_i32_0 = arith.constant 0 : i32
    %c0_i32_1 = arith.constant 0 : i32
    return %c0_i32, %c0_i32_0 : i32, i32
  }
  func.func @transform_5(%arg0: i32) -> (i32, i32) {
    %c0_i32 = arith.constant 0 : i32
    %c0_i32_0 = arith.constant 0 : i32
    %c0_i32_1 = arith.constant 0 : i32
    return %c0_i32, %c0_i32_0 : i32, i32
  }
  func.func @transform_6(%arg0: i32) -> (i32, i32) {
    %c0_i32 = arith.constant 0 : i32
    %c0_i32_0 = arith.constant 0 : i32
    %c0_i32_1 = arith.constant 0 : i32
    return %c0_i32, %c0_i32_0 : i32, i32
  }
  func.func @transform_7(%arg0: i32) -> (i32, i32) {
    %c0_i32 = arith.constant 0 : i32
    %c0_i32_0 = arith.constant 0 : i32
    %c0_i32_1 = arith.constant 0 : i32
    return %c0_i32, %c0_i32_0 : i32, i32
  }
  func.func @transform_8(%arg0: i32) -> (i32, i32) {
    %c0_i32 = arith.constant 0 : i32
    %c0_i32_0 = arith.constant 0 : i32
    %c0_i32_1 = arith.constant 0 : i32
    return %c0_i32, %c0_i32_0 : i32, i32
  }
  func.func @transform_9(%arg0: i32) -> (i32, i32) {
    %c0_i32 = arith.constant 0 : i32
    %c0_i32_0 = arith.constant 0 : i32
    %c0_i32_1 = arith.constant 0 : i32
    return %c0_i32, %c0_i32_0 : i32, i32
  }
}

module attributes {stable_mosaic.version = 11 : i64} {
  func.func @_corr_head_kernel(%arg0: i32, %arg1: memref<1x14x14x48xbf16, #tpu.memory_space<vmem>>, %arg2: memref<1x6x6x48xbf16, #tpu.memory_space<vmem>>, %arg3: memref<48x32xbf16, #tpu.memory_space<vmem>>, %arg4: memref<1x32xf32, #tpu.memory_space<vmem>>, %arg5: memref<32x30xbf16, #tpu.memory_space<vmem>>, %arg6: memref<1x30xf32, #tpu.memory_space<vmem>>, %arg7: memref<1x9x9x30xf32, #tpu.memory_space<vmem>>) attributes {dimension_semantics = [#tpu.dimension_semantics<parallel>], iteration_bounds = array<i64: 2>, scalar_prefetch = 0 : i64, scratch_operands = 0 : i64, tpu.core_type = #tpu.core_type<tc>, window_params = [{transform_indices = @transform_0, window_bounds = array<i64: 1, 14, 14, 48>}, {transform_indices = @transform_1, window_bounds = array<i64: 1, 6, 6, 48>}, {pipeline_mode = #tpu.pipeline_mode<synchronous>, transform_indices = @transform_2, window_bounds = array<i64: 48, 32>}, {pipeline_mode = #tpu.pipeline_mode<synchronous>, transform_indices = @transform_3, window_bounds = array<i64: 1, 32>}, {pipeline_mode = #tpu.pipeline_mode<synchronous>, transform_indices = @transform_4, window_bounds = array<i64: 32, 30>}, {pipeline_mode = #tpu.pipeline_mode<synchronous>, transform_indices = @transform_5, window_bounds = array<i64: 1, 30>}, {transform_indices = @transform_6, window_bounds = array<i64: 1, 9, 9, 30>}]} {
    %cst = arith.constant 0.000000e+00 : f32
    %0 = vector.broadcast %cst : f32 to vector<1x9x9x48xf32>
    %c0 = arith.constant 0 : index
    %c0_0 = arith.constant 0 : index
    %c0_1 = arith.constant 0 : index
    %c0_2 = arith.constant 0 : index
    %1 = vector.load %arg1[%c0, %c0_0, %c0_1, %c0_2] : memref<1x14x14x48xbf16, #tpu.memory_space<vmem>>, vector<1x14x9x48xbf16>
    %c0_3 = arith.constant 0 : index
    %c0_4 = arith.constant 0 : index
    %c0_5 = arith.constant 0 : index
    %c0_6 = arith.constant 0 : index
    %2 = vector.load %arg2[%c0_3, %c0_4, %c0_5, %c0_6] : memref<1x6x6x48xbf16, #tpu.memory_space<vmem>>, vector<1x1x1x48xbf16>
    %3 = arith.extf %2 : vector<1x1x1x48xbf16> to vector<1x1x1x48xf32>
    %4 = vector.extract_strided_slice %1 {offsets = [0, 0, 0, 0], sizes = [1, 9, 9, 48], strides = [1, 1, 1, 1]} : vector<1x14x9x48xbf16> to vector<1x9x9x48xbf16>
    %5 = arith.extf %4 : vector<1x9x9x48xbf16> to vector<1x9x9x48xf32>
    %6 = vector.broadcast %3 : vector<1x1x1x48xf32> to vector<1x9x9x48xf32>
    %7 = arith.mulf %5, %6 : vector<1x9x9x48xf32>
    %8 = arith.addf %0, %7 : vector<1x9x9x48xf32>
    %c0_7 = arith.constant 0 : index
    %c1 = arith.constant 1 : index
    %c0_8 = arith.constant 0 : index
    %c0_9 = arith.constant 0 : index
    %9 = vector.load %arg2[%c0_7, %c1, %c0_8, %c0_9] : memref<1x6x6x48xbf16, #tpu.memory_space<vmem>>, vector<1x1x1x48xbf16>
    %10 = arith.extf %9 : vector<1x1x1x48xbf16> to vector<1x1x1x48xf32>
    %11 = vector.extract_strided_slice %1 {offsets = [0, 1, 0, 0], sizes = [1, 9, 9, 48], strides = [1, 1, 1, 1]} : vector<1x14x9x48xbf16> to vector<1x9x9x48xbf16>
    %12 = arith.extf %11 : vector<1x9x9x48xbf16> to vector<1x9x9x48xf32>
    %13 = vector.broadcast %10 : vector<1x1x1x48xf32> to vector<1x9x9x48xf32>
    %14 = arith.mulf %12, %13 : vector<1x9x9x48xf32>
    %15 = arith.addf %8, %14 : vector<1x9x9x48xf32>
    %c0_10 = arith.constant 0 : index
    %c2 = arith.constant 2 : index
    %c0_11 = arith.constant 0 : index
    %c0_12 = arith.constant 0 : index
    %16 = vector.load %arg2[%c0_10, %c2, %c0_11, %c0_12] : memref<1x6x6x48xbf16, #tpu.memory_space<vmem>>, vector<1x1x1x48xbf16>
    %17 = arith.extf %16 : vector<1x1x1x48xbf16> to vector<1x1x1x48xf32>
    %18 = vector.extract_strided_slice %1 {offsets = [0, 2, 0, 0], sizes = [1, 9, 9, 48], strides = [1, 1, 1, 1]} : vector<1x14x9x48xbf16> to vector<1x9x9x48xbf16>
    %19 = arith.extf %18 : vector<1x9x9x48xbf16> to vector<1x9x9x48xf32>
    %20 = vector.broadcast %17 : vector<1x1x1x48xf32> to vector<1x9x9x48xf32>
    %21 = arith.mulf %19, %20 : vector<1x9x9x48xf32>
    %22 = arith.addf %15, %21 : vector<1x9x9x48xf32>
    %c0_13 = arith.constant 0 : index
    %c3 = arith.constant 3 : index
    %c0_14 = arith.constant 0 : index
    %c0_15 = arith.constant 0 : index
    %23 = vector.load %arg2[%c0_13, %c3, %c0_14, %c0_15] : memref<1x6x6x48xbf16, #tpu.memory_space<vmem>>, vector<1x1x1x48xbf16>
    %24 = arith.extf %23 : vector<1x1x1x48xbf16> to vector<1x1x1x48xf32>
    %25 = vector.extract_strided_slice %1 {offsets = [0, 3, 0, 0], sizes = [1, 9, 9, 48], strides = [1, 1, 1, 1]} : vector<1x14x9x48xbf16> to vector<1x9x9x48xbf16>
    %26 = arith.extf %25 : vector<1x9x9x48xbf16> to vector<1x9x9x48xf32>
    %27 = vector.broadcast %24 : vector<1x1x1x48xf32> to vector<1x9x9x48xf32>
    %28 = arith.mulf %26, %27 : vector<1x9x9x48xf32>
    %29 = arith.addf %22, %28 : vector<1x9x9x48xf32>
    %c0_16 = arith.constant 0 : index
    %c4 = arith.constant 4 : index
    %c0_17 = arith.constant 0 : index
    %c0_18 = arith.constant 0 : index
    %30 = vector.load %arg2[%c0_16, %c4, %c0_17, %c0_18] : memref<1x6x6x48xbf16, #tpu.memory_space<vmem>>, vector<1x1x1x48xbf16>
    %31 = arith.extf %30 : vector<1x1x1x48xbf16> to vector<1x1x1x48xf32>
    %32 = vector.extract_strided_slice %1 {offsets = [0, 4, 0, 0], sizes = [1, 9, 9, 48], strides = [1, 1, 1, 1]} : vector<1x14x9x48xbf16> to vector<1x9x9x48xbf16>
    %33 = arith.extf %32 : vector<1x9x9x48xbf16> to vector<1x9x9x48xf32>
    %34 = vector.broadcast %31 : vector<1x1x1x48xf32> to vector<1x9x9x48xf32>
    %35 = arith.mulf %33, %34 : vector<1x9x9x48xf32>
    %36 = arith.addf %29, %35 : vector<1x9x9x48xf32>
    %c0_19 = arith.constant 0 : index
    %c5 = arith.constant 5 : index
    %c0_20 = arith.constant 0 : index
    %c0_21 = arith.constant 0 : index
    %37 = vector.load %arg2[%c0_19, %c5, %c0_20, %c0_21] : memref<1x6x6x48xbf16, #tpu.memory_space<vmem>>, vector<1x1x1x48xbf16>
    %38 = arith.extf %37 : vector<1x1x1x48xbf16> to vector<1x1x1x48xf32>
    %39 = vector.extract_strided_slice %1 {offsets = [0, 5, 0, 0], sizes = [1, 9, 9, 48], strides = [1, 1, 1, 1]} : vector<1x14x9x48xbf16> to vector<1x9x9x48xbf16>
    %40 = arith.extf %39 : vector<1x9x9x48xbf16> to vector<1x9x9x48xf32>
    %41 = vector.broadcast %38 : vector<1x1x1x48xf32> to vector<1x9x9x48xf32>
    %42 = arith.mulf %40, %41 : vector<1x9x9x48xf32>
    %43 = arith.addf %36, %42 : vector<1x9x9x48xf32>
    %c0_22 = arith.constant 0 : index
    %c0_23 = arith.constant 0 : index
    %c1_24 = arith.constant 1 : index
    %c0_25 = arith.constant 0 : index
    %44 = vector.load %arg1[%c0_22, %c0_23, %c1_24, %c0_25] : memref<1x14x14x48xbf16, #tpu.memory_space<vmem>>, vector<1x14x9x48xbf16>
    %c0_26 = arith.constant 0 : index
    %c0_27 = arith.constant 0 : index
    %c1_28 = arith.constant 1 : index
    %c0_29 = arith.constant 0 : index
    %45 = vector.load %arg2[%c0_26, %c0_27, %c1_28, %c0_29] : memref<1x6x6x48xbf16, #tpu.memory_space<vmem>>, vector<1x1x1x48xbf16>
    %46 = arith.extf %45 : vector<1x1x1x48xbf16> to vector<1x1x1x48xf32>
    %47 = vector.extract_strided_slice %44 {offsets = [0, 0, 0, 0], sizes = [1, 9, 9, 48], strides = [1, 1, 1, 1]} : vector<1x14x9x48xbf16> to vector<1x9x9x48xbf16>
    %48 = arith.extf %47 : vector<1x9x9x48xbf16> to vector<1x9x9x48xf32>
    %49 = vector.broadcast %46 : vector<1x1x1x48xf32> to vector<1x9x9x48xf32>
    %50 = arith.mulf %48, %49 : vector<1x9x9x48xf32>
    %51 = arith.addf %43, %50 : vector<1x9x9x48xf32>
    %c0_30 = arith.constant 0 : index
    %c1_31 = arith.constant 1 : index
    %c1_32 = arith.constant 1 : index
    %c0_33 = arith.constant 0 : index
    %52 = vector.load %arg2[%c0_30, %c1_31, %c1_32, %c0_33] : memref<1x6x6x48xbf16, #tpu.memory_space<vmem>>, vector<1x1x1x48xbf16>
    %53 = arith.extf %52 : vector<1x1x1x48xbf16> to vector<1x1x1x48xf32>
    %54 = vector.extract_strided_slice %44 {offsets = [0, 1, 0, 0], sizes = [1, 9, 9, 48], strides = [1, 1, 1, 1]} : vector<1x14x9x48xbf16> to vector<1x9x9x48xbf16>
    %55 = arith.extf %54 : vector<1x9x9x48xbf16> to vector<1x9x9x48xf32>
    %56 = vector.broadcast %53 : vector<1x1x1x48xf32> to vector<1x9x9x48xf32>
    %57 = arith.mulf %55, %56 : vector<1x9x9x48xf32>
    %58 = arith.addf %51, %57 : vector<1x9x9x48xf32>
    %c0_34 = arith.constant 0 : index
    %c2_35 = arith.constant 2 : index
    %c1_36 = arith.constant 1 : index
    %c0_37 = arith.constant 0 : index
    %59 = vector.load %arg2[%c0_34, %c2_35, %c1_36, %c0_37] : memref<1x6x6x48xbf16, #tpu.memory_space<vmem>>, vector<1x1x1x48xbf16>
    %60 = arith.extf %59 : vector<1x1x1x48xbf16> to vector<1x1x1x48xf32>
    %61 = vector.extract_strided_slice %44 {offsets = [0, 2, 0, 0], sizes = [1, 9, 9, 48], strides = [1, 1, 1, 1]} : vector<1x14x9x48xbf16> to vector<1x9x9x48xbf16>
    %62 = arith.extf %61 : vector<1x9x9x48xbf16> to vector<1x9x9x48xf32>
    %63 = vector.broadcast %60 : vector<1x1x1x48xf32> to vector<1x9x9x48xf32>
    %64 = arith.mulf %62, %63 : vector<1x9x9x48xf32>
    %65 = arith.addf %58, %64 : vector<1x9x9x48xf32>
    %c0_38 = arith.constant 0 : index
    %c3_39 = arith.constant 3 : index
    %c1_40 = arith.constant 1 : index
    %c0_41 = arith.constant 0 : index
    %66 = vector.load %arg2[%c0_38, %c3_39, %c1_40, %c0_41] : memref<1x6x6x48xbf16, #tpu.memory_space<vmem>>, vector<1x1x1x48xbf16>
    %67 = arith.extf %66 : vector<1x1x1x48xbf16> to vector<1x1x1x48xf32>
    %68 = vector.extract_strided_slice %44 {offsets = [0, 3, 0, 0], sizes = [1, 9, 9, 48], strides = [1, 1, 1, 1]} : vector<1x14x9x48xbf16> to vector<1x9x9x48xbf16>
    %69 = arith.extf %68 : vector<1x9x9x48xbf16> to vector<1x9x9x48xf32>
    %70 = vector.broadcast %67 : vector<1x1x1x48xf32> to vector<1x9x9x48xf32>
    %71 = arith.mulf %69, %70 : vector<1x9x9x48xf32>
    %72 = arith.addf %65, %71 : vector<1x9x9x48xf32>
    %c0_42 = arith.constant 0 : index
    %c4_43 = arith.constant 4 : index
    %c1_44 = arith.constant 1 : index
    %c0_45 = arith.constant 0 : index
    %73 = vector.load %arg2[%c0_42, %c4_43, %c1_44, %c0_45] : memref<1x6x6x48xbf16, #tpu.memory_space<vmem>>, vector<1x1x1x48xbf16>
    %74 = arith.extf %73 : vector<1x1x1x48xbf16> to vector<1x1x1x48xf32>
    %75 = vector.extract_strided_slice %44 {offsets = [0, 4, 0, 0], sizes = [1, 9, 9, 48], strides = [1, 1, 1, 1]} : vector<1x14x9x48xbf16> to vector<1x9x9x48xbf16>
    %76 = arith.extf %75 : vector<1x9x9x48xbf16> to vector<1x9x9x48xf32>
    %77 = vector.broadcast %74 : vector<1x1x1x48xf32> to vector<1x9x9x48xf32>
    %78 = arith.mulf %76, %77 : vector<1x9x9x48xf32>
    %79 = arith.addf %72, %78 : vector<1x9x9x48xf32>
    %c0_46 = arith.constant 0 : index
    %c5_47 = arith.constant 5 : index
    %c1_48 = arith.constant 1 : index
    %c0_49 = arith.constant 0 : index
    %80 = vector.load %arg2[%c0_46, %c5_47, %c1_48, %c0_49] : memref<1x6x6x48xbf16, #tpu.memory_space<vmem>>, vector<1x1x1x48xbf16>
    %81 = arith.extf %80 : vector<1x1x1x48xbf16> to vector<1x1x1x48xf32>
    %82 = vector.extract_strided_slice %44 {offsets = [0, 5, 0, 0], sizes = [1, 9, 9, 48], strides = [1, 1, 1, 1]} : vector<1x14x9x48xbf16> to vector<1x9x9x48xbf16>
    %83 = arith.extf %82 : vector<1x9x9x48xbf16> to vector<1x9x9x48xf32>
    %84 = vector.broadcast %81 : vector<1x1x1x48xf32> to vector<1x9x9x48xf32>
    %85 = arith.mulf %83, %84 : vector<1x9x9x48xf32>
    %86 = arith.addf %79, %85 : vector<1x9x9x48xf32>
    %c0_50 = arith.constant 0 : index
    %c0_51 = arith.constant 0 : index
    %c2_52 = arith.constant 2 : index
    %c0_53 = arith.constant 0 : index
    %87 = vector.load %arg1[%c0_50, %c0_51, %c2_52, %c0_53] : memref<1x14x14x48xbf16, #tpu.memory_space<vmem>>, vector<1x14x9x48xbf16>
    %c0_54 = arith.constant 0 : index
    %c0_55 = arith.constant 0 : index
    %c2_56 = arith.constant 2 : index
    %c0_57 = arith.constant 0 : index
    %88 = vector.load %arg2[%c0_54, %c0_55, %c2_56, %c0_57] : memref<1x6x6x48xbf16, #tpu.memory_space<vmem>>, vector<1x1x1x48xbf16>
    %89 = arith.extf %88 : vector<1x1x1x48xbf16> to vector<1x1x1x48xf32>
    %90 = vector.extract_strided_slice %87 {offsets = [0, 0, 0, 0], sizes = [1, 9, 9, 48], strides = [1, 1, 1, 1]} : vector<1x14x9x48xbf16> to vector<1x9x9x48xbf16>
    %91 = arith.extf %90 : vector<1x9x9x48xbf16> to vector<1x9x9x48xf32>
    %92 = vector.broadcast %89 : vector<1x1x1x48xf32> to vector<1x9x9x48xf32>
    %93 = arith.mulf %91, %92 : vector<1x9x9x48xf32>
    %94 = arith.addf %86, %93 : vector<1x9x9x48xf32>
    %c0_58 = arith.constant 0 : index
    %c1_59 = arith.constant 1 : index
    %c2_60 = arith.constant 2 : index
    %c0_61 = arith.constant 0 : index
    %95 = vector.load %arg2[%c0_58, %c1_59, %c2_60, %c0_61] : memref<1x6x6x48xbf16, #tpu.memory_space<vmem>>, vector<1x1x1x48xbf16>
    %96 = arith.extf %95 : vector<1x1x1x48xbf16> to vector<1x1x1x48xf32>
    %97 = vector.extract_strided_slice %87 {offsets = [0, 1, 0, 0], sizes = [1, 9, 9, 48], strides = [1, 1, 1, 1]} : vector<1x14x9x48xbf16> to vector<1x9x9x48xbf16>
    %98 = arith.extf %97 : vector<1x9x9x48xbf16> to vector<1x9x9x48xf32>
    %99 = vector.broadcast %96 : vector<1x1x1x48xf32> to vector<1x9x9x48xf32>
    %100 = arith.mulf %98, %99 : vector<1x9x9x48xf32>
    %101 = arith.addf %94, %100 : vector<1x9x9x48xf32>
    %c0_62 = arith.constant 0 : index
    %c2_63 = arith.constant 2 : index
    %c2_64 = arith.constant 2 : index
    %c0_65 = arith.constant 0 : index
    %102 = vector.load %arg2[%c0_62, %c2_63, %c2_64, %c0_65] : memref<1x6x6x48xbf16, #tpu.memory_space<vmem>>, vector<1x1x1x48xbf16>
    %103 = arith.extf %102 : vector<1x1x1x48xbf16> to vector<1x1x1x48xf32>
    %104 = vector.extract_strided_slice %87 {offsets = [0, 2, 0, 0], sizes = [1, 9, 9, 48], strides = [1, 1, 1, 1]} : vector<1x14x9x48xbf16> to vector<1x9x9x48xbf16>
    %105 = arith.extf %104 : vector<1x9x9x48xbf16> to vector<1x9x9x48xf32>
    %106 = vector.broadcast %103 : vector<1x1x1x48xf32> to vector<1x9x9x48xf32>
    %107 = arith.mulf %105, %106 : vector<1x9x9x48xf32>
    %108 = arith.addf %101, %107 : vector<1x9x9x48xf32>
    %c0_66 = arith.constant 0 : index
    %c3_67 = arith.constant 3 : index
    %c2_68 = arith.constant 2 : index
    %c0_69 = arith.constant 0 : index
    %109 = vector.load %arg2[%c0_66, %c3_67, %c2_68, %c0_69] : memref<1x6x6x48xbf16, #tpu.memory_space<vmem>>, vector<1x1x1x48xbf16>
    %110 = arith.extf %109 : vector<1x1x1x48xbf16> to vector<1x1x1x48xf32>
    %111 = vector.extract_strided_slice %87 {offsets = [0, 3, 0, 0], sizes = [1, 9, 9, 48], strides = [1, 1, 1, 1]} : vector<1x14x9x48xbf16> to vector<1x9x9x48xbf16>
    %112 = arith.extf %111 : vector<1x9x9x48xbf16> to vector<1x9x9x48xf32>
    %113 = vector.broadcast %110 : vector<1x1x1x48xf32> to vector<1x9x9x48xf32>
    %114 = arith.mulf %112, %113 : vector<1x9x9x48xf32>
    %115 = arith.addf %108, %114 : vector<1x9x9x48xf32>
    %c0_70 = arith.constant 0 : index
    %c4_71 = arith.constant 4 : index
    %c2_72 = arith.constant 2 : index
    %c0_73 = arith.constant 0 : index
    %116 = vector.load %arg2[%c0_70, %c4_71, %c2_72, %c0_73] : memref<1x6x6x48xbf16, #tpu.memory_space<vmem>>, vector<1x1x1x48xbf16>
    %117 = arith.extf %116 : vector<1x1x1x48xbf16> to vector<1x1x1x48xf32>
    %118 = vector.extract_strided_slice %87 {offsets = [0, 4, 0, 0], sizes = [1, 9, 9, 48], strides = [1, 1, 1, 1]} : vector<1x14x9x48xbf16> to vector<1x9x9x48xbf16>
    %119 = arith.extf %118 : vector<1x9x9x48xbf16> to vector<1x9x9x48xf32>
    %120 = vector.broadcast %117 : vector<1x1x1x48xf32> to vector<1x9x9x48xf32>
    %121 = arith.mulf %119, %120 : vector<1x9x9x48xf32>
    %122 = arith.addf %115, %121 : vector<1x9x9x48xf32>
    %c0_74 = arith.constant 0 : index
    %c5_75 = arith.constant 5 : index
    %c2_76 = arith.constant 2 : index
    %c0_77 = arith.constant 0 : index
    %123 = vector.load %arg2[%c0_74, %c5_75, %c2_76, %c0_77] : memref<1x6x6x48xbf16, #tpu.memory_space<vmem>>, vector<1x1x1x48xbf16>
    %124 = arith.extf %123 : vector<1x1x1x48xbf16> to vector<1x1x1x48xf32>
    %125 = vector.extract_strided_slice %87 {offsets = [0, 5, 0, 0], sizes = [1, 9, 9, 48], strides = [1, 1, 1, 1]} : vector<1x14x9x48xbf16> to vector<1x9x9x48xbf16>
    %126 = arith.extf %125 : vector<1x9x9x48xbf16> to vector<1x9x9x48xf32>
    %127 = vector.broadcast %124 : vector<1x1x1x48xf32> to vector<1x9x9x48xf32>
    %128 = arith.mulf %126, %127 : vector<1x9x9x48xf32>
    %129 = arith.addf %122, %128 : vector<1x9x9x48xf32>
    %c0_78 = arith.constant 0 : index
    %c0_79 = arith.constant 0 : index
    %c3_80 = arith.constant 3 : index
    %c0_81 = arith.constant 0 : index
    %130 = vector.load %arg1[%c0_78, %c0_79, %c3_80, %c0_81] : memref<1x14x14x48xbf16, #tpu.memory_space<vmem>>, vector<1x14x9x48xbf16>
    %c0_82 = arith.constant 0 : index
    %c0_83 = arith.constant 0 : index
    %c3_84 = arith.constant 3 : index
    %c0_85 = arith.constant 0 : index
    %131 = vector.load %arg2[%c0_82, %c0_83, %c3_84, %c0_85] : memref<1x6x6x48xbf16, #tpu.memory_space<vmem>>, vector<1x1x1x48xbf16>
    %132 = arith.extf %131 : vector<1x1x1x48xbf16> to vector<1x1x1x48xf32>
    %133 = vector.extract_strided_slice %130 {offsets = [0, 0, 0, 0], sizes = [1, 9, 9, 48], strides = [1, 1, 1, 1]} : vector<1x14x9x48xbf16> to vector<1x9x9x48xbf16>
    %134 = arith.extf %133 : vector<1x9x9x48xbf16> to vector<1x9x9x48xf32>
    %135 = vector.broadcast %132 : vector<1x1x1x48xf32> to vector<1x9x9x48xf32>
    %136 = arith.mulf %134, %135 : vector<1x9x9x48xf32>
    %137 = arith.addf %129, %136 : vector<1x9x9x48xf32>
    %c0_86 = arith.constant 0 : index
    %c1_87 = arith.constant 1 : index
    %c3_88 = arith.constant 3 : index
    %c0_89 = arith.constant 0 : index
    %138 = vector.load %arg2[%c0_86, %c1_87, %c3_88, %c0_89] : memref<1x6x6x48xbf16, #tpu.memory_space<vmem>>, vector<1x1x1x48xbf16>
    %139 = arith.extf %138 : vector<1x1x1x48xbf16> to vector<1x1x1x48xf32>
    %140 = vector.extract_strided_slice %130 {offsets = [0, 1, 0, 0], sizes = [1, 9, 9, 48], strides = [1, 1, 1, 1]} : vector<1x14x9x48xbf16> to vector<1x9x9x48xbf16>
    %141 = arith.extf %140 : vector<1x9x9x48xbf16> to vector<1x9x9x48xf32>
    %142 = vector.broadcast %139 : vector<1x1x1x48xf32> to vector<1x9x9x48xf32>
    %143 = arith.mulf %141, %142 : vector<1x9x9x48xf32>
    %144 = arith.addf %137, %143 : vector<1x9x9x48xf32>
    %c0_90 = arith.constant 0 : index
    %c2_91 = arith.constant 2 : index
    %c3_92 = arith.constant 3 : index
    %c0_93 = arith.constant 0 : index
    %145 = vector.load %arg2[%c0_90, %c2_91, %c3_92, %c0_93] : memref<1x6x6x48xbf16, #tpu.memory_space<vmem>>, vector<1x1x1x48xbf16>
    %146 = arith.extf %145 : vector<1x1x1x48xbf16> to vector<1x1x1x48xf32>
    %147 = vector.extract_strided_slice %130 {offsets = [0, 2, 0, 0], sizes = [1, 9, 9, 48], strides = [1, 1, 1, 1]} : vector<1x14x9x48xbf16> to vector<1x9x9x48xbf16>
    %148 = arith.extf %147 : vector<1x9x9x48xbf16> to vector<1x9x9x48xf32>
    %149 = vector.broadcast %146 : vector<1x1x1x48xf32> to vector<1x9x9x48xf32>
    %150 = arith.mulf %148, %149 : vector<1x9x9x48xf32>
    %151 = arith.addf %144, %150 : vector<1x9x9x48xf32>
    %c0_94 = arith.constant 0 : index
    %c3_95 = arith.constant 3 : index
    %c3_96 = arith.constant 3 : index
    %c0_97 = arith.constant 0 : index
    %152 = vector.load %arg2[%c0_94, %c3_95, %c3_96, %c0_97] : memref<1x6x6x48xbf16, #tpu.memory_space<vmem>>, vector<1x1x1x48xbf16>
    %153 = arith.extf %152 : vector<1x1x1x48xbf16> to vector<1x1x1x48xf32>
    %154 = vector.extract_strided_slice %130 {offsets = [0, 3, 0, 0], sizes = [1, 9, 9, 48], strides = [1, 1, 1, 1]} : vector<1x14x9x48xbf16> to vector<1x9x9x48xbf16>
    %155 = arith.extf %154 : vector<1x9x9x48xbf16> to vector<1x9x9x48xf32>
    %156 = vector.broadcast %153 : vector<1x1x1x48xf32> to vector<1x9x9x48xf32>
    %157 = arith.mulf %155, %156 : vector<1x9x9x48xf32>
    %158 = arith.addf %151, %157 : vector<1x9x9x48xf32>
    %c0_98 = arith.constant 0 : index
    %c4_99 = arith.constant 4 : index
    %c3_100 = arith.constant 3 : index
    %c0_101 = arith.constant 0 : index
    %159 = vector.load %arg2[%c0_98, %c4_99, %c3_100, %c0_101] : memref<1x6x6x48xbf16, #tpu.memory_space<vmem>>, vector<1x1x1x48xbf16>
    %160 = arith.extf %159 : vector<1x1x1x48xbf16> to vector<1x1x1x48xf32>
    %161 = vector.extract_strided_slice %130 {offsets = [0, 4, 0, 0], sizes = [1, 9, 9, 48], strides = [1, 1, 1, 1]} : vector<1x14x9x48xbf16> to vector<1x9x9x48xbf16>
    %162 = arith.extf %161 : vector<1x9x9x48xbf16> to vector<1x9x9x48xf32>
    %163 = vector.broadcast %160 : vector<1x1x1x48xf32> to vector<1x9x9x48xf32>
    %164 = arith.mulf %162, %163 : vector<1x9x9x48xf32>
    %165 = arith.addf %158, %164 : vector<1x9x9x48xf32>
    %c0_102 = arith.constant 0 : index
    %c5_103 = arith.constant 5 : index
    %c3_104 = arith.constant 3 : index
    %c0_105 = arith.constant 0 : index
    %166 = vector.load %arg2[%c0_102, %c5_103, %c3_104, %c0_105] : memref<1x6x6x48xbf16, #tpu.memory_space<vmem>>, vector<1x1x1x48xbf16>
    %167 = arith.extf %166 : vector<1x1x1x48xbf16> to vector<1x1x1x48xf32>
    %168 = vector.extract_strided_slice %130 {offsets = [0, 5, 0, 0], sizes = [1, 9, 9, 48], strides = [1, 1, 1, 1]} : vector<1x14x9x48xbf16> to vector<1x9x9x48xbf16>
    %169 = arith.extf %168 : vector<1x9x9x48xbf16> to vector<1x9x9x48xf32>
    %170 = vector.broadcast %167 : vector<1x1x1x48xf32> to vector<1x9x9x48xf32>
    %171 = arith.mulf %169, %170 : vector<1x9x9x48xf32>
    %172 = arith.addf %165, %171 : vector<1x9x9x48xf32>
    %c0_106 = arith.constant 0 : index
    %c0_107 = arith.constant 0 : index
    %c4_108 = arith.constant 4 : index
    %c0_109 = arith.constant 0 : index
    %173 = vector.load %arg1[%c0_106, %c0_107, %c4_108, %c0_109] : memref<1x14x14x48xbf16, #tpu.memory_space<vmem>>, vector<1x14x9x48xbf16>
    %c0_110 = arith.constant 0 : index
    %c0_111 = arith.constant 0 : index
    %c4_112 = arith.constant 4 : index
    %c0_113 = arith.constant 0 : index
    %174 = vector.load %arg2[%c0_110, %c0_111, %c4_112, %c0_113] : memref<1x6x6x48xbf16, #tpu.memory_space<vmem>>, vector<1x1x1x48xbf16>
    %175 = arith.extf %174 : vector<1x1x1x48xbf16> to vector<1x1x1x48xf32>
    %176 = vector.extract_strided_slice %173 {offsets = [0, 0, 0, 0], sizes = [1, 9, 9, 48], strides = [1, 1, 1, 1]} : vector<1x14x9x48xbf16> to vector<1x9x9x48xbf16>
    %177 = arith.extf %176 : vector<1x9x9x48xbf16> to vector<1x9x9x48xf32>
    %178 = vector.broadcast %175 : vector<1x1x1x48xf32> to vector<1x9x9x48xf32>
    %179 = arith.mulf %177, %178 : vector<1x9x9x48xf32>
    %180 = arith.addf %172, %179 : vector<1x9x9x48xf32>
    %c0_114 = arith.constant 0 : index
    %c1_115 = arith.constant 1 : index
    %c4_116 = arith.constant 4 : index
    %c0_117 = arith.constant 0 : index
    %181 = vector.load %arg2[%c0_114, %c1_115, %c4_116, %c0_117] : memref<1x6x6x48xbf16, #tpu.memory_space<vmem>>, vector<1x1x1x48xbf16>
    %182 = arith.extf %181 : vector<1x1x1x48xbf16> to vector<1x1x1x48xf32>
    %183 = vector.extract_strided_slice %173 {offsets = [0, 1, 0, 0], sizes = [1, 9, 9, 48], strides = [1, 1, 1, 1]} : vector<1x14x9x48xbf16> to vector<1x9x9x48xbf16>
    %184 = arith.extf %183 : vector<1x9x9x48xbf16> to vector<1x9x9x48xf32>
    %185 = vector.broadcast %182 : vector<1x1x1x48xf32> to vector<1x9x9x48xf32>
    %186 = arith.mulf %184, %185 : vector<1x9x9x48xf32>
    %187 = arith.addf %180, %186 : vector<1x9x9x48xf32>
    %c0_118 = arith.constant 0 : index
    %c2_119 = arith.constant 2 : index
    %c4_120 = arith.constant 4 : index
    %c0_121 = arith.constant 0 : index
    %188 = vector.load %arg2[%c0_118, %c2_119, %c4_120, %c0_121] : memref<1x6x6x48xbf16, #tpu.memory_space<vmem>>, vector<1x1x1x48xbf16>
    %189 = arith.extf %188 : vector<1x1x1x48xbf16> to vector<1x1x1x48xf32>
    %190 = vector.extract_strided_slice %173 {offsets = [0, 2, 0, 0], sizes = [1, 9, 9, 48], strides = [1, 1, 1, 1]} : vector<1x14x9x48xbf16> to vector<1x9x9x48xbf16>
    %191 = arith.extf %190 : vector<1x9x9x48xbf16> to vector<1x9x9x48xf32>
    %192 = vector.broadcast %189 : vector<1x1x1x48xf32> to vector<1x9x9x48xf32>
    %193 = arith.mulf %191, %192 : vector<1x9x9x48xf32>
    %194 = arith.addf %187, %193 : vector<1x9x9x48xf32>
    %c0_122 = arith.constant 0 : index
    %c3_123 = arith.constant 3 : index
    %c4_124 = arith.constant 4 : index
    %c0_125 = arith.constant 0 : index
    %195 = vector.load %arg2[%c0_122, %c3_123, %c4_124, %c0_125] : memref<1x6x6x48xbf16, #tpu.memory_space<vmem>>, vector<1x1x1x48xbf16>
    %196 = arith.extf %195 : vector<1x1x1x48xbf16> to vector<1x1x1x48xf32>
    %197 = vector.extract_strided_slice %173 {offsets = [0, 3, 0, 0], sizes = [1, 9, 9, 48], strides = [1, 1, 1, 1]} : vector<1x14x9x48xbf16> to vector<1x9x9x48xbf16>
    %198 = arith.extf %197 : vector<1x9x9x48xbf16> to vector<1x9x9x48xf32>
    %199 = vector.broadcast %196 : vector<1x1x1x48xf32> to vector<1x9x9x48xf32>
    %200 = arith.mulf %198, %199 : vector<1x9x9x48xf32>
    %201 = arith.addf %194, %200 : vector<1x9x9x48xf32>
    %c0_126 = arith.constant 0 : index
    %c4_127 = arith.constant 4 : index
    %c4_128 = arith.constant 4 : index
    %c0_129 = arith.constant 0 : index
    %202 = vector.load %arg2[%c0_126, %c4_127, %c4_128, %c0_129] : memref<1x6x6x48xbf16, #tpu.memory_space<vmem>>, vector<1x1x1x48xbf16>
    %203 = arith.extf %202 : vector<1x1x1x48xbf16> to vector<1x1x1x48xf32>
    %204 = vector.extract_strided_slice %173 {offsets = [0, 4, 0, 0], sizes = [1, 9, 9, 48], strides = [1, 1, 1, 1]} : vector<1x14x9x48xbf16> to vector<1x9x9x48xbf16>
    %205 = arith.extf %204 : vector<1x9x9x48xbf16> to vector<1x9x9x48xf32>
    %206 = vector.broadcast %203 : vector<1x1x1x48xf32> to vector<1x9x9x48xf32>
    %207 = arith.mulf %205, %206 : vector<1x9x9x48xf32>
    %208 = arith.addf %201, %207 : vector<1x9x9x48xf32>
    %c0_130 = arith.constant 0 : index
    %c5_131 = arith.constant 5 : index
    %c4_132 = arith.constant 4 : index
    %c0_133 = arith.constant 0 : index
    %209 = vector.load %arg2[%c0_130, %c5_131, %c4_132, %c0_133] : memref<1x6x6x48xbf16, #tpu.memory_space<vmem>>, vector<1x1x1x48xbf16>
    %210 = arith.extf %209 : vector<1x1x1x48xbf16> to vector<1x1x1x48xf32>
    %211 = vector.extract_strided_slice %173 {offsets = [0, 5, 0, 0], sizes = [1, 9, 9, 48], strides = [1, 1, 1, 1]} : vector<1x14x9x48xbf16> to vector<1x9x9x48xbf16>
    %212 = arith.extf %211 : vector<1x9x9x48xbf16> to vector<1x9x9x48xf32>
    %213 = vector.broadcast %210 : vector<1x1x1x48xf32> to vector<1x9x9x48xf32>
    %214 = arith.mulf %212, %213 : vector<1x9x9x48xf32>
    %215 = arith.addf %208, %214 : vector<1x9x9x48xf32>
    %c0_134 = arith.constant 0 : index
    %c0_135 = arith.constant 0 : index
    %c5_136 = arith.constant 5 : index
    %c0_137 = arith.constant 0 : index
    %216 = vector.load %arg1[%c0_134, %c0_135, %c5_136, %c0_137] : memref<1x14x14x48xbf16, #tpu.memory_space<vmem>>, vector<1x14x9x48xbf16>
    %c0_138 = arith.constant 0 : index
    %c0_139 = arith.constant 0 : index
    %c5_140 = arith.constant 5 : index
    %c0_141 = arith.constant 0 : index
    %217 = vector.load %arg2[%c0_138, %c0_139, %c5_140, %c0_141] : memref<1x6x6x48xbf16, #tpu.memory_space<vmem>>, vector<1x1x1x48xbf16>
    %218 = arith.extf %217 : vector<1x1x1x48xbf16> to vector<1x1x1x48xf32>
    %219 = vector.extract_strided_slice %216 {offsets = [0, 0, 0, 0], sizes = [1, 9, 9, 48], strides = [1, 1, 1, 1]} : vector<1x14x9x48xbf16> to vector<1x9x9x48xbf16>
    %220 = arith.extf %219 : vector<1x9x9x48xbf16> to vector<1x9x9x48xf32>
    %221 = vector.broadcast %218 : vector<1x1x1x48xf32> to vector<1x9x9x48xf32>
    %222 = arith.mulf %220, %221 : vector<1x9x9x48xf32>
    %223 = arith.addf %215, %222 : vector<1x9x9x48xf32>
    %c0_142 = arith.constant 0 : index
    %c1_143 = arith.constant 1 : index
    %c5_144 = arith.constant 5 : index
    %c0_145 = arith.constant 0 : index
    %224 = vector.load %arg2[%c0_142, %c1_143, %c5_144, %c0_145] : memref<1x6x6x48xbf16, #tpu.memory_space<vmem>>, vector<1x1x1x48xbf16>
    %225 = arith.extf %224 : vector<1x1x1x48xbf16> to vector<1x1x1x48xf32>
    %226 = vector.extract_strided_slice %216 {offsets = [0, 1, 0, 0], sizes = [1, 9, 9, 48], strides = [1, 1, 1, 1]} : vector<1x14x9x48xbf16> to vector<1x9x9x48xbf16>
    %227 = arith.extf %226 : vector<1x9x9x48xbf16> to vector<1x9x9x48xf32>
    %228 = vector.broadcast %225 : vector<1x1x1x48xf32> to vector<1x9x9x48xf32>
    %229 = arith.mulf %227, %228 : vector<1x9x9x48xf32>
    %230 = arith.addf %223, %229 : vector<1x9x9x48xf32>
    %c0_146 = arith.constant 0 : index
    %c2_147 = arith.constant 2 : index
    %c5_148 = arith.constant 5 : index
    %c0_149 = arith.constant 0 : index
    %231 = vector.load %arg2[%c0_146, %c2_147, %c5_148, %c0_149] : memref<1x6x6x48xbf16, #tpu.memory_space<vmem>>, vector<1x1x1x48xbf16>
    %232 = arith.extf %231 : vector<1x1x1x48xbf16> to vector<1x1x1x48xf32>
    %233 = vector.extract_strided_slice %216 {offsets = [0, 2, 0, 0], sizes = [1, 9, 9, 48], strides = [1, 1, 1, 1]} : vector<1x14x9x48xbf16> to vector<1x9x9x48xbf16>
    %234 = arith.extf %233 : vector<1x9x9x48xbf16> to vector<1x9x9x48xf32>
    %235 = vector.broadcast %232 : vector<1x1x1x48xf32> to vector<1x9x9x48xf32>
    %236 = arith.mulf %234, %235 : vector<1x9x9x48xf32>
    %237 = arith.addf %230, %236 : vector<1x9x9x48xf32>
    %c0_150 = arith.constant 0 : index
    %c3_151 = arith.constant 3 : index
    %c5_152 = arith.constant 5 : index
    %c0_153 = arith.constant 0 : index
    %238 = vector.load %arg2[%c0_150, %c3_151, %c5_152, %c0_153] : memref<1x6x6x48xbf16, #tpu.memory_space<vmem>>, vector<1x1x1x48xbf16>
    %239 = arith.extf %238 : vector<1x1x1x48xbf16> to vector<1x1x1x48xf32>
    %240 = vector.extract_strided_slice %216 {offsets = [0, 3, 0, 0], sizes = [1, 9, 9, 48], strides = [1, 1, 1, 1]} : vector<1x14x9x48xbf16> to vector<1x9x9x48xbf16>
    %241 = arith.extf %240 : vector<1x9x9x48xbf16> to vector<1x9x9x48xf32>
    %242 = vector.broadcast %239 : vector<1x1x1x48xf32> to vector<1x9x9x48xf32>
    %243 = arith.mulf %241, %242 : vector<1x9x9x48xf32>
    %244 = arith.addf %237, %243 : vector<1x9x9x48xf32>
    %c0_154 = arith.constant 0 : index
    %c4_155 = arith.constant 4 : index
    %c5_156 = arith.constant 5 : index
    %c0_157 = arith.constant 0 : index
    %245 = vector.load %arg2[%c0_154, %c4_155, %c5_156, %c0_157] : memref<1x6x6x48xbf16, #tpu.memory_space<vmem>>, vector<1x1x1x48xbf16>
    %246 = arith.extf %245 : vector<1x1x1x48xbf16> to vector<1x1x1x48xf32>
    %247 = vector.extract_strided_slice %216 {offsets = [0, 4, 0, 0], sizes = [1, 9, 9, 48], strides = [1, 1, 1, 1]} : vector<1x14x9x48xbf16> to vector<1x9x9x48xbf16>
    %248 = arith.extf %247 : vector<1x9x9x48xbf16> to vector<1x9x9x48xf32>
    %249 = vector.broadcast %246 : vector<1x1x1x48xf32> to vector<1x9x9x48xf32>
    %250 = arith.mulf %248, %249 : vector<1x9x9x48xf32>
    %251 = arith.addf %244, %250 : vector<1x9x9x48xf32>
    %c0_158 = arith.constant 0 : index
    %c5_159 = arith.constant 5 : index
    %c5_160 = arith.constant 5 : index
    %c0_161 = arith.constant 0 : index
    %252 = vector.load %arg2[%c0_158, %c5_159, %c5_160, %c0_161] : memref<1x6x6x48xbf16, #tpu.memory_space<vmem>>, vector<1x1x1x48xbf16>
    %253 = arith.extf %252 : vector<1x1x1x48xbf16> to vector<1x1x1x48xf32>
    %254 = vector.extract_strided_slice %216 {offsets = [0, 5, 0, 0], sizes = [1, 9, 9, 48], strides = [1, 1, 1, 1]} : vector<1x14x9x48xbf16> to vector<1x9x9x48xbf16>
    %255 = arith.extf %254 : vector<1x9x9x48xbf16> to vector<1x9x9x48xf32>
    %256 = vector.broadcast %253 : vector<1x1x1x48xf32> to vector<1x9x9x48xf32>
    %257 = arith.mulf %255, %256 : vector<1x9x9x48xf32>
    %258 = arith.addf %251, %257 : vector<1x9x9x48xf32>
    %c0_162 = arith.constant 0 : index
    %c0_163 = arith.constant 0 : index
    %259 = vector.load %arg3[%c0_162, %c0_163] : memref<48x32xbf16, #tpu.memory_space<vmem>>, vector<48x32xbf16>
    %c0_164 = arith.constant 0 : index
    %c0_165 = arith.constant 0 : index
    %260 = vector.load %arg4[%c0_164, %c0_165] : memref<1x32xf32, #tpu.memory_space<vmem>>, vector<1x32xf32>
    %c0_166 = arith.constant 0 : index
    %c0_167 = arith.constant 0 : index
    %261 = vector.load %arg5[%c0_166, %c0_167] : memref<32x30xbf16, #tpu.memory_space<vmem>>, vector<32x30xbf16>
    %c0_168 = arith.constant 0 : index
    %c0_169 = arith.constant 0 : index
    %262 = vector.load %arg6[%c0_168, %c0_169] : memref<1x30xf32, #tpu.memory_space<vmem>>, vector<1x30xf32>
    %263 = vector.extract_strided_slice %258 {offsets = [0, 0, 0, 0], sizes = [1, 1, 9, 48], strides = [1, 1, 1, 1]} : vector<1x9x9x48xf32> to vector<1x1x9x48xf32>
    %264 = vector.shape_cast %263 : vector<1x1x9x48xf32> to vector<9x48xf32>
    %265 = arith.truncf %264 : vector<9x48xf32> to vector<9x48xbf16>
    %cst_170 = arith.constant dense<0.000000e+00> : vector<9x32xf32>
    %266 = tpu.matmul %265, %259, %cst_170 {dimension_numbers = #tpu.dot_dimension_numbers<[1], [0], [0], [1], [0, 0, 1, 1], [], []>} : vector<9x48xbf16>, vector<48x32xbf16>, vector<9x32xf32> -> vector<9x32xf32>
    %267 = vector.broadcast %260 : vector<1x32xf32> to vector<9x32xf32>
    %268 = arith.addf %266, %267 : vector<9x32xf32>
    %cst_171 = arith.constant 0.000000e+00 : f32
    %269 = vector.broadcast %cst_171 : f32 to vector<9x32xf32>
    %270 = arith.maximumf %268, %269 : vector<9x32xf32>
    %271 = arith.truncf %270 : vector<9x32xf32> to vector<9x32xbf16>
    %cst_172 = arith.constant dense<0.000000e+00> : vector<9x30xf32>
    %272 = tpu.matmul %271, %261, %cst_172 {dimension_numbers = #tpu.dot_dimension_numbers<[1], [0], [0], [1], [0, 0, 1, 1], [], []>} : vector<9x32xbf16>, vector<32x30xbf16>, vector<9x30xf32> -> vector<9x30xf32>
    %273 = vector.broadcast %262 : vector<1x30xf32> to vector<9x30xf32>
    %274 = arith.addf %272, %273 : vector<9x30xf32>
    %c0_173 = arith.constant 0 : index
    %c0_174 = arith.constant 0 : index
    %c0_175 = arith.constant 0 : index
    %c0_176 = arith.constant 0 : index
    %275 = vector.load %arg7[%c0_173, %c0_174, %c0_175, %c0_176] : memref<1x9x9x30xf32, #tpu.memory_space<vmem>>, vector<1x1x9x30xf32>
    %276 = vector.shape_cast %275 : vector<1x1x9x30xf32> to vector<9x30xf32>
    %277 = vector.shape_cast %274 : vector<9x30xf32> to vector<1x1x9x30xf32>
    tpu.vector_store %arg7[%c0_173, %c0_174, %c0_175, %c0_176], %277 {strides = array<i32>} : memref<1x9x9x30xf32, #tpu.memory_space<vmem>>, vector<1x1x9x30xf32>,
    %278 = vector.extract_strided_slice %258 {offsets = [0, 1, 0, 0], sizes = [1, 1, 9, 48], strides = [1, 1, 1, 1]} : vector<1x9x9x48xf32> to vector<1x1x9x48xf32>
    %279 = vector.shape_cast %278 : vector<1x1x9x48xf32> to vector<9x48xf32>
    %280 = arith.truncf %279 : vector<9x48xf32> to vector<9x48xbf16>
    %cst_177 = arith.constant dense<0.000000e+00> : vector<9x32xf32>
    %281 = tpu.matmul %280, %259, %cst_177 {dimension_numbers = #tpu.dot_dimension_numbers<[1], [0], [0], [1], [0, 0, 1, 1], [], []>} : vector<9x48xbf16>, vector<48x32xbf16>, vector<9x32xf32> -> vector<9x32xf32>
    %282 = vector.broadcast %260 : vector<1x32xf32> to vector<9x32xf32>
    %283 = arith.addf %281, %282 : vector<9x32xf32>
    %cst_178 = arith.constant 0.000000e+00 : f32
    %284 = vector.broadcast %cst_178 : f32 to vector<9x32xf32>
    %285 = arith.maximumf %283, %284 : vector<9x32xf32>
    %286 = arith.truncf %285 : vector<9x32xf32> to vector<9x32xbf16>
    %cst_179 = arith.constant dense<0.000000e+00> : vector<9x30xf32>
    %287 = tpu.matmul %286, %261, %cst_179 {dimension_numbers = #tpu.dot_dimension_numbers<[1], [0], [0], [1], [0, 0, 1, 1], [], []>} : vector<9x32xbf16>, vector<32x30xbf16>, vector<9x30xf32> -> vector<9x30xf32>
    %288 = vector.broadcast %262 : vector<1x30xf32> to vector<9x30xf32>
    %289 = arith.addf %287, %288 : vector<9x30xf32>
    %c0_180 = arith.constant 0 : index
    %c1_181 = arith.constant 1 : index
    %c0_182 = arith.constant 0 : index
    %c0_183 = arith.constant 0 : index
    %290 = vector.load %arg7[%c0_180, %c1_181, %c0_182, %c0_183] : memref<1x9x9x30xf32, #tpu.memory_space<vmem>>, vector<1x1x9x30xf32>
    %291 = vector.shape_cast %290 : vector<1x1x9x30xf32> to vector<9x30xf32>
    %292 = vector.shape_cast %289 : vector<9x30xf32> to vector<1x1x9x30xf32>
    tpu.vector_store %arg7[%c0_180, %c1_181, %c0_182, %c0_183], %292 {strides = array<i32>} : memref<1x9x9x30xf32, #tpu.memory_space<vmem>>, vector<1x1x9x30xf32>,
    %293 = vector.extract_strided_slice %258 {offsets = [0, 2, 0, 0], sizes = [1, 1, 9, 48], strides = [1, 1, 1, 1]} : vector<1x9x9x48xf32> to vector<1x1x9x48xf32>
    %294 = vector.shape_cast %293 : vector<1x1x9x48xf32> to vector<9x48xf32>
    %295 = arith.truncf %294 : vector<9x48xf32> to vector<9x48xbf16>
    %cst_184 = arith.constant dense<0.000000e+00> : vector<9x32xf32>
    %296 = tpu.matmul %295, %259, %cst_184 {dimension_numbers = #tpu.dot_dimension_numbers<[1], [0], [0], [1], [0, 0, 1, 1], [], []>} : vector<9x48xbf16>, vector<48x32xbf16>, vector<9x32xf32> -> vector<9x32xf32>
    %297 = vector.broadcast %260 : vector<1x32xf32> to vector<9x32xf32>
    %298 = arith.addf %296, %297 : vector<9x32xf32>
    %cst_185 = arith.constant 0.000000e+00 : f32
    %299 = vector.broadcast %cst_185 : f32 to vector<9x32xf32>
    %300 = arith.maximumf %298, %299 : vector<9x32xf32>
    %301 = arith.truncf %300 : vector<9x32xf32> to vector<9x32xbf16>
    %cst_186 = arith.constant dense<0.000000e+00> : vector<9x30xf32>
    %302 = tpu.matmul %301, %261, %cst_186 {dimension_numbers = #tpu.dot_dimension_numbers<[1], [0], [0], [1], [0, 0, 1, 1], [], []>} : vector<9x32xbf16>, vector<32x30xbf16>, vector<9x30xf32> -> vector<9x30xf32>
    %303 = vector.broadcast %262 : vector<1x30xf32> to vector<9x30xf32>
    %304 = arith.addf %302, %303 : vector<9x30xf32>
    %c0_187 = arith.constant 0 : index
    %c2_188 = arith.constant 2 : index
    %c0_189 = arith.constant 0 : index
    %c0_190 = arith.constant 0 : index
    %305 = vector.load %arg7[%c0_187, %c2_188, %c0_189, %c0_190] : memref<1x9x9x30xf32, #tpu.memory_space<vmem>>, vector<1x1x9x30xf32>
    %306 = vector.shape_cast %305 : vector<1x1x9x30xf32> to vector<9x30xf32>
    %307 = vector.shape_cast %304 : vector<9x30xf32> to vector<1x1x9x30xf32>
    tpu.vector_store %arg7[%c0_187, %c2_188, %c0_189, %c0_190], %307 {strides = array<i32>} : memref<1x9x9x30xf32, #tpu.memory_space<vmem>>, vector<1x1x9x30xf32>,
    %308 = vector.extract_strided_slice %258 {offsets = [0, 3, 0, 0], sizes = [1, 1, 9, 48], strides = [1, 1, 1, 1]} : vector<1x9x9x48xf32> to vector<1x1x9x48xf32>
    %309 = vector.shape_cast %308 : vector<1x1x9x48xf32> to vector<9x48xf32>
    %310 = arith.truncf %309 : vector<9x48xf32> to vector<9x48xbf16>
    %cst_191 = arith.constant dense<0.000000e+00> : vector<9x32xf32>
    %311 = tpu.matmul %310, %259, %cst_191 {dimension_numbers = #tpu.dot_dimension_numbers<[1], [0], [0], [1], [0, 0, 1, 1], [], []>} : vector<9x48xbf16>, vector<48x32xbf16>, vector<9x32xf32> -> vector<9x32xf32>
    %312 = vector.broadcast %260 : vector<1x32xf32> to vector<9x32xf32>
    %313 = arith.addf %311, %312 : vector<9x32xf32>
    %cst_192 = arith.constant 0.000000e+00 : f32
    %314 = vector.broadcast %cst_192 : f32 to vector<9x32xf32>
    %315 = arith.maximumf %313, %314 : vector<9x32xf32>
    %316 = arith.truncf %315 : vector<9x32xf32> to vector<9x32xbf16>
    %cst_193 = arith.constant dense<0.000000e+00> : vector<9x30xf32>
    %317 = tpu.matmul %316, %261, %cst_193 {dimension_numbers = #tpu.dot_dimension_numbers<[1], [0], [0], [1], [0, 0, 1, 1], [], []>} : vector<9x32xbf16>, vector<32x30xbf16>, vector<9x30xf32> -> vector<9x30xf32>
    %318 = vector.broadcast %262 : vector<1x30xf32> to vector<9x30xf32>
    %319 = arith.addf %317, %318 : vector<9x30xf32>
    %c0_194 = arith.constant 0 : index
    %c3_195 = arith.constant 3 : index
    %c0_196 = arith.constant 0 : index
    %c0_197 = arith.constant 0 : index
    %320 = vector.load %arg7[%c0_194, %c3_195, %c0_196, %c0_197] : memref<1x9x9x30xf32, #tpu.memory_space<vmem>>, vector<1x1x9x30xf32>
    %321 = vector.shape_cast %320 : vector<1x1x9x30xf32> to vector<9x30xf32>
    %322 = vector.shape_cast %319 : vector<9x30xf32> to vector<1x1x9x30xf32>
    tpu.vector_store %arg7[%c0_194, %c3_195, %c0_196, %c0_197], %322 {strides = array<i32>} : memref<1x9x9x30xf32, #tpu.memory_space<vmem>>, vector<1x1x9x30xf32>,
    %323 = vector.extract_strided_slice %258 {offsets = [0, 4, 0, 0], sizes = [1, 1, 9, 48], strides = [1, 1, 1, 1]} : vector<1x9x9x48xf32> to vector<1x1x9x48xf32>
    %324 = vector.shape_cast %323 : vector<1x1x9x48xf32> to vector<9x48xf32>
    %325 = arith.truncf %324 : vector<9x48xf32> to vector<9x48xbf16>
    %cst_198 = arith.constant dense<0.000000e+00> : vector<9x32xf32>
    %326 = tpu.matmul %325, %259, %cst_198 {dimension_numbers = #tpu.dot_dimension_numbers<[1], [0], [0], [1], [0, 0, 1, 1], [], []>} : vector<9x48xbf16>, vector<48x32xbf16>, vector<9x32xf32> -> vector<9x32xf32>
    %327 = vector.broadcast %260 : vector<1x32xf32> to vector<9x32xf32>
    %328 = arith.addf %326, %327 : vector<9x32xf32>
    %cst_199 = arith.constant 0.000000e+00 : f32
    %329 = vector.broadcast %cst_199 : f32 to vector<9x32xf32>
    %330 = arith.maximumf %328, %329 : vector<9x32xf32>
    %331 = arith.truncf %330 : vector<9x32xf32> to vector<9x32xbf16>
    %cst_200 = arith.constant dense<0.000000e+00> : vector<9x30xf32>
    %332 = tpu.matmul %331, %261, %cst_200 {dimension_numbers = #tpu.dot_dimension_numbers<[1], [0], [0], [1], [0, 0, 1, 1], [], []>} : vector<9x32xbf16>, vector<32x30xbf16>, vector<9x30xf32> -> vector<9x30xf32>
    %333 = vector.broadcast %262 : vector<1x30xf32> to vector<9x30xf32>
    %334 = arith.addf %332, %333 : vector<9x30xf32>
    %c0_201 = arith.constant 0 : index
    %c4_202 = arith.constant 4 : index
    %c0_203 = arith.constant 0 : index
    %c0_204 = arith.constant 0 : index
    %335 = vector.load %arg7[%c0_201, %c4_202, %c0_203, %c0_204] : memref<1x9x9x30xf32, #tpu.memory_space<vmem>>, vector<1x1x9x30xf32>
    %336 = vector.shape_cast %335 : vector<1x1x9x30xf32> to vector<9x30xf32>
    %337 = vector.shape_cast %334 : vector<9x30xf32> to vector<1x1x9x30xf32>
    tpu.vector_store %arg7[%c0_201, %c4_202, %c0_203, %c0_204], %337 {strides = array<i32>} : memref<1x9x9x30xf32, #tpu.memory_space<vmem>>, vector<1x1x9x30xf32>,
    %338 = vector.extract_strided_slice %258 {offsets = [0, 5, 0, 0], sizes = [1, 1, 9, 48], strides = [1, 1, 1, 1]} : vector<1x9x9x48xf32> to vector<1x1x9x48xf32>
    %339 = vector.shape_cast %338 : vector<1x1x9x48xf32> to vector<9x48xf32>
    %340 = arith.truncf %339 : vector<9x48xf32> to vector<9x48xbf16>
    %cst_205 = arith.constant dense<0.000000e+00> : vector<9x32xf32>
    %341 = tpu.matmul %340, %259, %cst_205 {dimension_numbers = #tpu.dot_dimension_numbers<[1], [0], [0], [1], [0, 0, 1, 1], [], []>} : vector<9x48xbf16>, vector<48x32xbf16>, vector<9x32xf32> -> vector<9x32xf32>
    %342 = vector.broadcast %260 : vector<1x32xf32> to vector<9x32xf32>
    %343 = arith.addf %341, %342 : vector<9x32xf32>
    %cst_206 = arith.constant 0.000000e+00 : f32
    %344 = vector.broadcast %cst_206 : f32 to vector<9x32xf32>
    %345 = arith.maximumf %343, %344 : vector<9x32xf32>
    %346 = arith.truncf %345 : vector<9x32xf32> to vector<9x32xbf16>
    %cst_207 = arith.constant dense<0.000000e+00> : vector<9x30xf32>
    %347 = tpu.matmul %346, %261, %cst_207 {dimension_numbers = #tpu.dot_dimension_numbers<[1], [0], [0], [1], [0, 0, 1, 1], [], []>} : vector<9x32xbf16>, vector<32x30xbf16>, vector<9x30xf32> -> vector<9x30xf32>
    %348 = vector.broadcast %262 : vector<1x30xf32> to vector<9x30xf32>
    %349 = arith.addf %347, %348 : vector<9x30xf32>
    %c0_208 = arith.constant 0 : index
    %c5_209 = arith.constant 5 : index
    %c0_210 = arith.constant 0 : index
    %c0_211 = arith.constant 0 : index
    %350 = vector.load %arg7[%c0_208, %c5_209, %c0_210, %c0_211] : memref<1x9x9x30xf32, #tpu.memory_space<vmem>>, vector<1x1x9x30xf32>
    %351 = vector.shape_cast %350 : vector<1x1x9x30xf32> to vector<9x30xf32>
    %352 = vector.shape_cast %349 : vector<9x30xf32> to vector<1x1x9x30xf32>
    tpu.vector_store %arg7[%c0_208, %c5_209, %c0_210, %c0_211], %352 {strides = array<i32>} : memref<1x9x9x30xf32, #tpu.memory_space<vmem>>, vector<1x1x9x30xf32>,
    %353 = vector.extract_strided_slice %258 {offsets = [0, 6, 0, 0], sizes = [1, 1, 9, 48], strides = [1, 1, 1, 1]} : vector<1x9x9x48xf32> to vector<1x1x9x48xf32>
    %354 = vector.shape_cast %353 : vector<1x1x9x48xf32> to vector<9x48xf32>
    %355 = arith.truncf %354 : vector<9x48xf32> to vector<9x48xbf16>
    %cst_212 = arith.constant dense<0.000000e+00> : vector<9x32xf32>
    %356 = tpu.matmul %355, %259, %cst_212 {dimension_numbers = #tpu.dot_dimension_numbers<[1], [0], [0], [1], [0, 0, 1, 1], [], []>} : vector<9x48xbf16>, vector<48x32xbf16>, vector<9x32xf32> -> vector<9x32xf32>
    %357 = vector.broadcast %260 : vector<1x32xf32> to vector<9x32xf32>
    %358 = arith.addf %356, %357 : vector<9x32xf32>
    %cst_213 = arith.constant 0.000000e+00 : f32
    %359 = vector.broadcast %cst_213 : f32 to vector<9x32xf32>
    %360 = arith.maximumf %358, %359 : vector<9x32xf32>
    %361 = arith.truncf %360 : vector<9x32xf32> to vector<9x32xbf16>
    %cst_214 = arith.constant dense<0.000000e+00> : vector<9x30xf32>
    %362 = tpu.matmul %361, %261, %cst_214 {dimension_numbers = #tpu.dot_dimension_numbers<[1], [0], [0], [1], [0, 0, 1, 1], [], []>} : vector<9x32xbf16>, vector<32x30xbf16>, vector<9x30xf32> -> vector<9x30xf32>
    %363 = vector.broadcast %262 : vector<1x30xf32> to vector<9x30xf32>
    %364 = arith.addf %362, %363 : vector<9x30xf32>
    %c0_215 = arith.constant 0 : index
    %c6 = arith.constant 6 : index
    %c0_216 = arith.constant 0 : index
    %c0_217 = arith.constant 0 : index
    %365 = vector.load %arg7[%c0_215, %c6, %c0_216, %c0_217] : memref<1x9x9x30xf32, #tpu.memory_space<vmem>>, vector<1x1x9x30xf32>
    %366 = vector.shape_cast %365 : vector<1x1x9x30xf32> to vector<9x30xf32>
    %367 = vector.shape_cast %364 : vector<9x30xf32> to vector<1x1x9x30xf32>
    tpu.vector_store %arg7[%c0_215, %c6, %c0_216, %c0_217], %367 {strides = array<i32>} : memref<1x9x9x30xf32, #tpu.memory_space<vmem>>, vector<1x1x9x30xf32>,
    %368 = vector.extract_strided_slice %258 {offsets = [0, 7, 0, 0], sizes = [1, 1, 9, 48], strides = [1, 1, 1, 1]} : vector<1x9x9x48xf32> to vector<1x1x9x48xf32>
    %369 = vector.shape_cast %368 : vector<1x1x9x48xf32> to vector<9x48xf32>
    %370 = arith.truncf %369 : vector<9x48xf32> to vector<9x48xbf16>
    %cst_218 = arith.constant dense<0.000000e+00> : vector<9x32xf32>
    %371 = tpu.matmul %370, %259, %cst_218 {dimension_numbers = #tpu.dot_dimension_numbers<[1], [0], [0], [1], [0, 0, 1, 1], [], []>} : vector<9x48xbf16>, vector<48x32xbf16>, vector<9x32xf32> -> vector<9x32xf32>
    %372 = vector.broadcast %260 : vector<1x32xf32> to vector<9x32xf32>
    %373 = arith.addf %371, %372 : vector<9x32xf32>
    %cst_219 = arith.constant 0.000000e+00 : f32
    %374 = vector.broadcast %cst_219 : f32 to vector<9x32xf32>
    %375 = arith.maximumf %373, %374 : vector<9x32xf32>
    %376 = arith.truncf %375 : vector<9x32xf32> to vector<9x32xbf16>
    %cst_220 = arith.constant dense<0.000000e+00> : vector<9x30xf32>
    %377 = tpu.matmul %376, %261, %cst_220 {dimension_numbers = #tpu.dot_dimension_numbers<[1], [0], [0], [1], [0, 0, 1, 1], [], []>} : vector<9x32xbf16>, vector<32x30xbf16>, vector<9x30xf32> -> vector<9x30xf32>
    %378 = vector.broadcast %262 : vector<1x30xf32> to vector<9x30xf32>
    %379 = arith.addf %377, %378 : vector<9x30xf32>
    %c0_221 = arith.constant 0 : index
    %c7 = arith.constant 7 : index
    %c0_222 = arith.constant 0 : index
    %c0_223 = arith.constant 0 : index
    %380 = vector.load %arg7[%c0_221, %c7, %c0_222, %c0_223] : memref<1x9x9x30xf32, #tpu.memory_space<vmem>>, vector<1x1x9x30xf32>
    %381 = vector.shape_cast %380 : vector<1x1x9x30xf32> to vector<9x30xf32>
    %382 = vector.shape_cast %379 : vector<9x30xf32> to vector<1x1x9x30xf32>
    tpu.vector_store %arg7[%c0_221, %c7, %c0_222, %c0_223], %382 {strides = array<i32>} : memref<1x9x9x30xf32, #tpu.memory_space<vmem>>, vector<1x1x9x30xf32>,
    %383 = vector.extract_strided_slice %258 {offsets = [0, 8, 0, 0], sizes = [1, 1, 9, 48], strides = [1, 1, 1, 1]} : vector<1x9x9x48xf32> to vector<1x1x9x48xf32>
    %384 = vector.shape_cast %383 : vector<1x1x9x48xf32> to vector<9x48xf32>
    %385 = arith.truncf %384 : vector<9x48xf32> to vector<9x48xbf16>
    %cst_224 = arith.constant dense<0.000000e+00> : vector<9x32xf32>
    %386 = tpu.matmul %385, %259, %cst_224 {dimension_numbers = #tpu.dot_dimension_numbers<[1], [0], [0], [1], [0, 0, 1, 1], [], []>} : vector<9x48xbf16>, vector<48x32xbf16>, vector<9x32xf32> -> vector<9x32xf32>
    %387 = vector.broadcast %260 : vector<1x32xf32> to vector<9x32xf32>
    %388 = arith.addf %386, %387 : vector<9x32xf32>
    %cst_225 = arith.constant 0.000000e+00 : f32
    %389 = vector.broadcast %cst_225 : f32 to vector<9x32xf32>
    %390 = arith.maximumf %388, %389 : vector<9x32xf32>
    %391 = arith.truncf %390 : vector<9x32xf32> to vector<9x32xbf16>
    %cst_226 = arith.constant dense<0.000000e+00> : vector<9x30xf32>
    %392 = tpu.matmul %391, %261, %cst_226 {dimension_numbers = #tpu.dot_dimension_numbers<[1], [0], [0], [1], [0, 0, 1, 1], [], []>} : vector<9x32xbf16>, vector<32x30xbf16>, vector<9x30xf32> -> vector<9x30xf32>
    %393 = vector.broadcast %262 : vector<1x30xf32> to vector<9x30xf32>
    %394 = arith.addf %392, %393 : vector<9x30xf32>
    %c0_227 = arith.constant 0 : index
    %c8 = arith.constant 8 : index
    %c0_228 = arith.constant 0 : index
    %c0_229 = arith.constant 0 : index
    %395 = vector.load %arg7[%c0_227, %c8, %c0_228, %c0_229] : memref<1x9x9x30xf32, #tpu.memory_space<vmem>>, vector<1x1x9x30xf32>
    %396 = vector.shape_cast %395 : vector<1x1x9x30xf32> to vector<9x30xf32>
    %397 = vector.shape_cast %394 : vector<9x30xf32> to vector<1x1x9x30xf32>
    tpu.vector_store %arg7[%c0_227, %c8, %c0_228, %c0_229], %397 {strides = array<i32>} : memref<1x9x9x30xf32, #tpu.memory_space<vmem>>, vector<1x1x9x30xf32>,
    return
  }
  func.func @transform_0(%arg0: i32) -> (i32, i32, i32, i32) {
    %c0_i32 = arith.constant 0 : i32
    %c0_i32_0 = arith.constant 0 : i32
    %c0_i32_1 = arith.constant 0 : i32
    %c0_i32_2 = arith.constant 0 : i32
    return %arg0, %c0_i32, %c0_i32_0, %c0_i32_1 : i32, i32, i32, i32
  }
  func.func @transform_1(%arg0: i32) -> (i32, i32, i32, i32) {
    %c0_i32 = arith.constant 0 : i32
    %c0_i32_0 = arith.constant 0 : i32
    %c0_i32_1 = arith.constant 0 : i32
    %c0_i32_2 = arith.constant 0 : i32
    return %arg0, %c0_i32, %c0_i32_0, %c0_i32_1 : i32, i32, i32, i32
  }
  func.func @transform_2(%arg0: i32) -> (i32, i32) {
    %c0_i32 = arith.constant 0 : i32
    %c0_i32_0 = arith.constant 0 : i32
    %c0_i32_1 = arith.constant 0 : i32
    return %c0_i32, %c0_i32_0 : i32, i32
  }
  func.func @transform_3(%arg0: i32) -> (i32, i32) {
    %c0_i32 = arith.constant 0 : i32
    %c0_i32_0 = arith.constant 0 : i32
    %c0_i32_1 = arith.constant 0 : i32
    return %c0_i32, %c0_i32_0 : i32, i32
  }
  func.func @transform_4(%arg0: i32) -> (i32, i32) {
    %c0_i32 = arith.constant 0 : i32
    %c0_i32_0 = arith.constant 0 : i32
    %c0_i32_1 = arith.constant 0 : i32
    return %c0_i32, %c0_i32_0 : i32, i32
  }
  func.func @transform_5(%arg0: i32) -> (i32, i32) {
    %c0_i32 = arith.constant 0 : i32
    %c0_i32_0 = arith.constant 0 : i32
    %c0_i32_1 = arith.constant 0 : i32
    return %c0_i32, %c0_i32_0 : i32, i32
  }
  func.func @transform_6(%arg0: i32) -> (i32, i32, i32, i32) {
    %c0_i32 = arith.constant 0 : i32
    %c0_i32_0 = arith.constant 0 : i32
    %c0_i32_1 = arith.constant 0 : i32
    %c0_i32_2 = arith.constant 0 : i32
    return %arg0, %c0_i32, %c0_i32_0, %c0_i32_1 : i32, i32, i32, i32
  }
}

</mosaic_0001>

<bundles_post_ra>
// kernel: rpn_forward.2
= control target key start
LH: loop header
LB: loop body
LE: loop exit
PB: predicated region body
PF: predicated region fallthrough
CT: control target
= control target key end

     0   :  { %vm159_vm0 = vcmask 130048   ;;  %vm263_vm1 = vcmask 388096   ;;  %s2410_s2 = inlined_call_operand.vmem [shape: bf16[144,48], index: 2, kind: input, shape index: {}]   ;;  %s2411_s3 = inlined_call_operand.vmem [shape: bf16[144,48], index: 3, kind: input, shape index: {}]   ;;  %s2412_s0 = inlined_call_operand.vmem [shape: bf16[72,144], index: 0, kind: input, shape index: {}]   ;;  %s2413_s1 = inlined_call_operand.vmem [shape: bf16[392,144], index: 1, kind: input, shape index: {}]   ;;  %s2414_s4 = inlined_call_operand.vmem [shape: f32[1,48], index: 4, kind: input, shape index: {}]   ;;  %s2415_s5 = inlined_call_operand.vmem [shape: f32[1,48], index: 5, kind: input, shape index: {}]   ;;  %s2416_s6 = inlined_call_operand.vmem [shape: f32[1,48], index: 6, kind: input, shape index: {}]   ;;  %s2417_s7 = inlined_call_operand.vmem [shape: f32[1,48], index: 7, kind: input, shape index: {}]   ;;  %s2418_s8 = inlined_call_operand.vmem [shape: bf16[72,48], index: 8, kind: output, shape index: {0}]   ;;  %s2419_s9 = inlined_call_operand.vmem [shape: bf16[392,48], index: 9, kind: output, shape index: {1}]  }
   0x1   :  { %v1461_v0 = vld [vmem:[%s2410_s2 + $0x38] sm:$0xff]  ;;  %v1462_v1 = vld [vmem:[%s2410_s2 + $0x40] sm:$0xff]  ;;  %v1124_v4 = vld [vmem:[%s2412_s0 + $0x8] sm:$0xf0] }
   0x2   :  { %v1518_v2 = vld [vmem:[%s2411_s3 + $0x38] sm:$0xff]  ;;  %v1446_v3 = vld [vmem:[%s2412_s0 + $0x4] sm:$0xf]  ;;  %175 = vmatpush.bf16.msra.mxu0 %v1461_v0  ;;  %215 = vmatpush.bf16.msra.mxu1 %v1462_v1  ;;  %v1460_v6 = vld [vmem:[%s2410_s2 + $0x30] sm:$0xff] }
   0x3   :  { %v1127_v5 = vor.u32 %v1446_v3, %v1124_v4  ;;  %v1519_v7 = vld [vmem:[%s2411_s3 + $0x40] sm:$0xff]  ;;  %1520 = vmatpush.bf16.msra.mxu2 %v1518_v2  ;;  %v1517_v8 = vld [vmem:[%s2411_s3 + $0x30] sm:$0xff]  ;;  %v1269_v10 = vld [vmem:[%s2413_s1 + $0x98] sm:$0xf0] }
   0x4   :  { %v1481_v9 = vld [vmem:[%s2413_s1 + $0x94] sm:$0xf]  ;;  %1528 = vmatpush.bf16.msra.mxu3 %v1519_v7  ;;  %v1459_v12 = vld [vmem:[%s2410_s2 + $0x28] sm:$0xff]  ;;  %v1458_v14 = vld [vmem:[%s2410_s2 + $0x20] sm:$0xff] }
   0x5   :  { %v1272_v11 = vor.u32 %v1481_v9, %v1269_v10  ;;  %1188 = vmatmul.msk.bf16.vlgmr.msra.gmra.mxu1 %vm159_vm0, %v1127_v5  ;;  %v1516_v13 = vld [vmem:[%s2411_s3 + $0x28] sm:$0xff]  ;;  %v1515_v15 = vld [vmem:[%s2411_s3 + $0x20] sm:$0xff]  ;;  %v1457_v16 = vld [vmem:[%s2410_s2 + $0x18] sm:$0xff] }
   0x6   :  { %695 = vmatpush.bf16.msrb.mxu1 %v1518_v2  ;;  %176 = vmatpush.bf16.msra.mxu0 %v1460_v6  ;;  %v1448_v17 = vld [vmem:[%s2412_s0 + $0x14] sm:$0xf]  ;;  %v1132_v18 = vld [vmem:[%s2412_s0 + $0x18] sm:$0xf0]  ;;  %v1483_v20 = vld [vmem:[%s2413_s1 + $0xa4] sm:$0xf] }
   0x7   :  { %1521 = vmatpush.bf16.msra.mxu2 %v1517_v8  ;;  %1430 = vmatmul.msk.bf16.vlgmr.msra.gmra.mxu3 %vm159_vm0, %v1272_v11  ;;  %v1514_v19 = vld [vmem:[%s2411_s3 + $0x18] sm:$0xff]  ;;  %v1277_v21 = vld [vmem:[%s2413_s1 + $0xa8] sm:$0xf0]  ;;  %v1135_v22 = vor.u32 %v1448_v17, %v1132_v18  ;;  %v1456_v23 = vld [vmem:[%s2410_s2 + $0x10] sm:$0xff] }
   0x8   :  { %v1513_v24 = vld [vmem:[%s2411_s3 + $0x10] sm:$0xff]  ;;  %v1280_v25 = vor.u32 %v1483_v20, %v1277_v21  ;;  %v1455_v26 = vld [vmem:[%s2410_s2 + $0x8] sm:$0xff]  ;;  %v1454_v28 = vld [vmem:[%s2410_s2] sm:$0xff] }
   0x9   :  { %v1512_v27 = vld [vmem:[%s2411_s3 + $0x8] sm:$0xff]  ;;  %v1511_v29 = vld [vmem:[%s2411_s3] sm:$0xff]  ;;  %v1485_v38 = vld [vmem:[%s2413_s1 + $0xb4] sm:$0xf] }
   0xa   :  { %696 = vmatpush.bf16.msrb.mxu1 %v1517_v8  ;;  %177 = vmatpush.bf16.msra.mxu0 %v1459_v12  ;;  %v1122_v30 = vld [vmem:[%s2412_s0] sm:$0xf]  ;;  %v1447_v31 = vld [vmem:[%s2412_s0 + $0x4] sm:$0xf0]  ;;  %v1450_v36 = vld [vmem:[%s2412_s0 + $0x24] sm:$0xf] }
   0xb   :  { %1522 = vmatpush.bf16.msra.mxu2 %v1516_v13  ;;  %v1275_v32 = vld [vmem:[%s2413_s1 + $0xa0] sm:$0xf]  ;;  %v1484_v33 = vld [vmem:[%s2413_s1 + $0xa4] sm:$0xf0]  ;;  %v1123_v34 = vor.u32 %v1447_v31, %v1122_v30  ;;  %v1140_v37 = vld [vmem:[%s2412_s0 + $0x28] sm:$0xf0] }
   0xc   :  { %v1276_v35 = vor.u32 %v1484_v33, %v1275_v32  ;;  %v1285_v39 = vld [vmem:[%s2413_s1 + $0xb8] sm:$0xf0]  ;;  %v1143_v40 = vor.u32 %v1450_v36, %v1140_v37  ;;  %v1130_v42 = vld [vmem:[%s2412_s0 + $0x10] sm:$0xf]  ;;  %v1449_v43 = vld [vmem:[%s2412_s0 + $0x14] sm:$0xf0] }
   0xd   :  { %v1288_v41 = vor.u32 %v1485_v38, %v1285_v39  ;;  %v1283_v44 = vld [vmem:[%s2413_s1 + $0xb0] sm:$0xf]  ;;  %v1486_v45 = vld [vmem:[%s2413_s1 + $0xb4] sm:$0xf0]  ;;  %v1131_v46 = vor.u32 %v1449_v43, %v1130_v42  ;;  %v1452_v48 = vld [vmem:[%s2412_s0 + $0x34] sm:$0xf] }
   0xe   :  { %697 = vmatpush.bf16.msrb.mxu1 %v1516_v13  ;;  %178 = vmatpush.bf16.msra.mxu0 %v1458_v14  ;;  %v1284_v47 = vor.u32 %v1486_v45, %v1283_v44  ;;  %v1148_v49 = vld [vmem:[%s2412_s0 + $0x38] sm:$0xf0]  ;;  %v1487_v50 = vld [vmem:[%s2413_s1 + $0xc4] sm:$0xf]  ;;  %v1293_v51 = vld [vmem:[%s2413_s1 + $0xc8] sm:$0xf0] }
   0xf   :  { %1523 = vmatpush.bf16.msra.mxu2 %v1515_v15  ;;  %v1151_v52 = vor.u32 %v1452_v48, %v1148_v49  ;;  %v1296_v53 = vor.u32 %v1487_v50, %v1293_v51  ;;  %v1138_v54 = vld [vmem:[%s2412_s0 + $0x20] sm:$0xf]  ;;  %v1451_v55 = vld [vmem:[%s2412_s0 + $0x24] sm:$0xf0]  ;;  %v1489_v62 = vld [vmem:[%s2413_s1 + $0xd4] sm:$0xf] }
  0x10   :  { %v40_v56 = vld [vmem:[%s2412_s0 + $0x40] sm:$0xff]  ;;  %v1488_v58 = vld [vmem:[%s2413_s1 + $0xc4] sm:$0xf0]  ;;  %v1139_v59 = vor.u32 %v1451_v55, %v1138_v54  ;;  %v1301_v63 = vld [vmem:[%s2413_s1 + $0xd8] sm:$0xf0] }
  0x11   :  { %v1291_v57 = vld [vmem:[%s2413_s1 + $0xc0] sm:$0xf]  ;;  %v89_v60 = vunpack.c.h.b16 %v40_v56  ;;  %v1304_v1 = vor.u32 %v1489_v62, %v1301_v63  ;;  %v1146_v2 = vld [vmem:[%s2412_s0 + $0x30] sm:$0xf]  ;;  %v1453_v3 = vld [vmem:[%s2412_s0 + $0x34] sm:$0xf0]  ;;  %v88_v14 = vunpack.c.l.b16 %v40_v56 }
  0x12   :  { %698 = vmatpush.bf16.msrb.mxu1 %v1515_v15  ;;  %179 = vmatpush.bf16.msra.mxu0 %v1457_v16  ;;  %v1292_v61 = vor.u32 %v1488_v58, %v1291_v57  ;;  %v1299_v4 = vld [vmem:[%s2413_s1 + $0xd0] sm:$0xf]  ;;  %v1490_v5 = vld [vmem:[%s2413_s1 + $0xd4] sm:$0xf0]  ;;  %v1147_v6 = vor.u32 %v1453_v3, %v1146_v2  ;;  %v1195_v8 = vld [vmem:[%s2413_s1] sm:$0xf] }
  0x13   :  { %1524 = vmatpush.bf16.msra.mxu2 %v1514_v19  ;;  %v99_v0 = vpack.c.b16 %v89_v60, %v89_v60  ;;  %v1464_v9 = vld [vmem:[%s2413_s1 + $0x4] sm:$0xf0]  ;;  %v1491_v10 = vld [vmem:[%s2413_s1 + $0xe4] sm:$0xf]  ;;  %v1309_v11 = vld [vmem:[%s2413_s1 + $0xe8] sm:$0xf0]  ;;  %v98_v17 = vpack.c.b16 %v88_v14, %v88_v14 }
  0x14   :  { %v1196_v12 = vor.u32 %v1464_v9, %v1195_v8  ;;  %v1312_v13 = vor.u32 %v1491_v10, %v1309_v11  ;;  %v1307_v15 = vld [vmem:[%s2413_s1 + $0xe0] sm:$0xf]  ;;  %v1492_v16 = vld [vmem:[%s2413_s1 + $0xe4] sm:$0xf0]  ;;  %v1466_v20 = vld [vmem:[%s2413_s1 + $0x14] sm:$0xf0] }
  0x15   :  { %1189 = vmatmul.msk.bf16.gmra.mxu1 %vm159_vm0, %v1135_v22  ;;  %v1308_v18 = vor.u32 %v1492_v16, %v1307_v15  ;;  %v1493_v21 = vld [vmem:[%s2413_s1 + $0xf4] sm:$0xf]  ;;  %v1317_v22 = vld [vmem:[%s2413_s1 + $0xf8] sm:$0xf0]  ;;  %v1211_v31 = vld [vmem:[%s2413_s1 + $0x20] sm:$0xf] }
  0x16   :  { %699 = vmatpush.bf16.msrb.mxu1 %v1514_v19  ;;  %180 = vmatpush.bf16.msra.mxu0 %v1456_v23  ;;  %v1203_v19 = vld [vmem:[%s2413_s1 + $0x10] sm:$0xf]  ;;  %v1468_v32 = vld [vmem:[%s2413_s1 + $0x24] sm:$0xf0]  ;;  %v1495_v33 = vld [vmem:[%s2413_s1 + $0x104] sm:$0xf] }
  0x17   :  { %1525 = vmatpush.bf16.msra.mxu2 %v1513_v24  ;;  %1431 = vmatmul.msk.bf16.gmra.mxu3 %vm159_vm0, %v1280_v25  ;;  %v1204_v23 = vor.u32 %v1466_v20, %v1203_v19  ;;  %v1463_v25 = vld [vmem:[%s2413_s1 + $0x4] sm:$0xf]  ;;  %v1465_v37 = vld [vmem:[%s2413_s1 + $0x14] sm:$0xf]  ;;  %v1205_v38 = vld [vmem:[%s2413_s1 + $0x18] sm:$0xf0] }
  0x18   :  { %v1323_v39 = vld [vmem:[%s2413_s1 + $0x100] sm:$0xf]  ;;  %v1219_v43 = vld [vmem:[%s2413_s1 + $0x30] sm:$0xf]  ;;  %v1470_v44 = vld [vmem:[%s2413_s1 + $0x34] sm:$0xf0] }
  0x19   :  { %v1497_v45 = vld [vmem:[%s2413_s1 + $0x114] sm:$0xf]  ;;  %v1331_v54 = vld [vmem:[%s2413_s1 + $0x110] sm:$0xf]  ;;  %v1498_v55 = vld [vmem:[%s2413_s1 + $0x114] sm:$0xf0] }
  0x1a   :  { %700 = vmatpush.bf16.msrb.mxu1 %v1513_v24  ;;  %181 = vmatpush.bf16.msra.mxu0 %v1455_v26  ;;  %v1320_v24 = vor.u32 %v1493_v21, %v1317_v22  ;;  %v1197_v26 = vld [vmem:[%s2413_s1 + $0x8] sm:$0xf0]  ;;  %v1332_v57 = vor.u32 %v1498_v55, %v1331_v54  ;;  %v1227_v58 = vld [vmem:[%s2413_s1 + $0x40] sm:$0xf]  ;;  %v1499_v60 = vld [vmem:[%s2413_s1 + $0x124] sm:$0xf] }
  0x1b   :  { %1526 = vmatpush.bf16.msra.mxu2 %v1512_v27  ;;  %v1500_v8 = vld [vmem:[%s2413_s1 + $0x124] sm:$0xf0]  ;;  %v1897_v15 = vld [vmem:[%s2415_s5] ss:$0 sm:$0xff]  ;;  %v1501_v16 = vld [vmem:[%s2413_s1 + $0x134] sm:$0xf] }
  0x1c   :  { %v1911_v21 = vld [vmem:[%s2416_s6] ss:$0 sm:$0xff]  ;;  %v1357_v54 = vld [vmem:[%s2413_s1 + $0x148] sm:$0xf0] }
  0x1e   :  { %701 = vmatpush.bf16.msrb.mxu1 %v1512_v27  ;;  %182 = vmatpush.bf16.msra.mxu0 %v1454_v28  ;;  %v1315_v27 = vld [vmem:[%s2413_s1 + $0xf0] sm:$0xf]  ;;  %v1494_v28 = vld [vmem:[%s2413_s1 + $0xf4] sm:$0xf0] }
  0x1f   :  { %1527 = vmatpush.bf16.msra.mxu2 %v1511_v29  ;;  %v1316_v30 = vor.u32 %v1494_v28, %v1315_v27  ;;  %v1918_v28 = vld [vmem:[%s2417_s7] ss:$0 sm:$0xff] }
  0x21   :  { %183 = vmatmul.bf16.vlgmr.msra.gmra.mxu0 %v1123_v34  ;;  %v1325_v34 = vld [vmem:[%s2413_s1 + $0x108] sm:$0xf0] }
  0x22   :  { %835 = vmatpush.bf16.msrb.mxu0 %v1519_v7  ;;  %702 = vmatpush.bf16.msrb.mxu1 %v1511_v29  ;;  %v1300_v7 = vor.u32 %v1490_v5, %v1299_v4  ;;  %v1200_v29 = vor.u32 %v1463_v25, %v1197_v26  ;;  %v1328_v36 = vor.u32 %v1495_v33, %v1325_v34  ;;  %v1469_v4 = vld [vmem:[%s2413_s1 + $0x34] sm:$0xf]  ;;  %v1221_v5 = vld [vmem:[%s2413_s1 + $0x38] sm:$0xf0] }
  0x23   :  { %753 = vmatmul.bf16.vlgmr.msra.gmra.mxu2 %v1276_v35  ;;  %v1212_v35 = vor.u32 %v1468_v32, %v1211_v31  ;;  %v1224_v9 = vor.u32 %v1469_v4, %v1221_v5 }
  0x25   :  { %1190 = vmatmul.msk.bf16.gmra.mxu1 %vm159_vm0, %v1143_v40  ;;  %v1496_v40 = vld [vmem:[%s2413_s1 + $0x104] sm:$0xf0] }
  0x26   :  { %v1324_v42 = vor.u32 %v1496_v40, %v1323_v39  ;;  %v1347_v39 = vld [vmem:[%s2413_s1 + $0x130] sm:$0xf]  ;;  %v1502_v40 = vld [vmem:[%s2413_s1 + $0x134] sm:$0xf0] }
  0x27   :  { %1432 = vmatmul.msk.bf16.gmra.mxu3 %vm159_vm0, %v1288_v41  ;;  %v1208_v41 = vor.u32 %v1465_v37, %v1205_v38  ;;  %v1229_v37 = vld [vmem:[%s2413_s1 + $0x48] sm:$0xf0] }
  0x31   :  { %188 = vmatmul.bf16.gmra.mxu0 %v1131_v46  ;;  %v1333_v46 = vld [vmem:[%s2413_s1 + $0x118] sm:$0xf0] }
  0x32   :  { %v1336_v49 = vor.u32 %v1497_v45, %v1333_v46 }
  0x33   :  { %758 = vmatmul.bf16.gmra.mxu2 %v1284_v47  ;;  %v1220_v47 = vor.u32 %v1470_v44, %v1219_v43 }
  0x35   :  { %1191 = vmatmul.msk.bf16.gmra.mxu1 %vm159_vm0, %v1151_v52  ;;  %v1467_v52 = vld [vmem:[%s2413_s1 + $0x24] sm:$0xf] }
  0x37   :  { %1433 = vmatmul.msk.bf16.gmra.mxu3 %vm159_vm0, %v1296_v53  ;;  %v1213_v53 = vld [vmem:[%s2413_s1 + $0x28] sm:$0xf0] }
  0x38   :  { %v1216_v56 = vor.u32 %v1467_v52, %v1213_v53  ;;  %v1503_v53 = vld [vmem:[%s2413_s1 + $0x144] sm:$0xf] }
  0x41   :  { %193 = vmatmul.bf16.gmra.mxu0 %v1139_v59  ;;  %v1472_v59 = vld [vmem:[%s2413_s1 + $0x44] sm:$0xf0] }
  0x42   :  { %v1228_v62 = vor.u32 %v1472_v59, %v1227_v58 }
  0x43   :  { %763 = vmatmul.bf16.gmra.mxu2 %v1292_v61  ;;  %v1341_v61 = vld [vmem:[%s2413_s1 + $0x128] sm:$0xf0] }
  0x45   :  { %1192 = vmatmul.msk.bf16.gmra.mxu1 %vm159_vm0, %v99_v0 }
  0x47   :  { %1434 = vmatmul.msk.bf16.gmra.mxu3 %vm159_vm0, %v1304_v1  ;;  %v1344_v1 = vor.u32 %v1499_v60, %v1341_v61  ;;  %v1360_v61 = vor.u32 %v1503_v53, %v1357_v54  ;;  %v1245_v53 = vld [vmem:[%s2413_s1 + $0x68] sm:$0xf0] }
  0x51   :  { %198 = vmatmul.bf16.gmra.mxu0 %v1147_v6  ;;  %v1879_v6 = vld [vmem:[%s2414_s4] ss:$0 sm:$0xff] }
  0x53   :  { %768 = vmatmul.bf16.gmra.mxu2 %v1300_v7  ;;  %v1339_v7 = vld [vmem:[%s2413_s1 + $0x120] sm:$0xf] }
  0x54   :  { %v1340_v11 = vor.u32 %v1500_v8, %v1339_v7 }
  0x55   :  { %703 = vmatmul.bf16.vlgmr.msrb.gmra.mxu1 %v1196_v12  ;;  %v1235_v12 = vld [vmem:[%s2413_s1 + $0x50] sm:$0xf] }
  0x57   :  { %1435 = vmatmul.msk.bf16.gmra.mxu3 %vm159_vm0, %v1312_v13  ;;  %v1474_v13 = vld [vmem:[%s2413_s1 + $0x54] sm:$0xf0] }
  0x58   :  { %v1236_v19 = vor.u32 %v1474_v13, %v1235_v12  ;;  %v1473_v12 = vld [vmem:[%s2413_s1 + $0x54] sm:$0xf]  ;;  %v1237_v13 = vld [vmem:[%s2413_s1 + $0x58] sm:$0xf0] }
  0x61   :  { %203 = vmatmul.bf16.gmra.mxu0 %v98_v17  ;;  %v1349_v17 = vld [vmem:[%s2413_s1 + $0x138] sm:$0xf0] }
  0x63   :  { %773 = vmatmul.bf16.gmra.mxu2 %v1308_v18 }
  0x65   :  { %708 = vmatmul.bf16.gmra.mxu1 %v1204_v23 }
  0x67   :  { %1436 = vmatmul.msk.bf16.gmra.mxu3 %vm159_vm0, %v1320_v24  ;;  %v1352_v24 = vor.u32 %v1501_v16, %v1349_v17  ;;  %v1355_v16 = vld [vmem:[%s2413_s1 + $0x140] sm:$0xf] }
  0x71   :  { %1421 = vmatmul.msk.bf16.vlgmr.msrb.gmra.mxu0 %vm159_vm0, %v1200_v29 }
  0x73   :  { %778 = vmatmul.bf16.gmra.mxu2 %v1316_v30 }
  0x75   :  { %713 = vmatmul.bf16.gmra.mxu1 %v1212_v35 }
  0x77   :  { %1437 = vmatmul.msk.bf16.gmra.mxu3 %vm159_vm0, %v1328_v36  ;;  %v1471_v36 = vld [vmem:[%s2413_s1 + $0x44] sm:$0xf] }
  0x78   :  { %v1232_v44 = vor.u32 %v1471_v36, %v1229_v37 }
  0x81   :  { %1422 = vmatmul.msk.bf16.gmra.mxu0 %vm159_vm0, %v1208_v41 }
  0x82   :  { %v217_v48 = vpop.f32.mrf.mxu1 }
  0x83   :  { %783 = vmatmul.bf16.gmra.mxu2 %v1324_v42 }
  0x85   :  { %718 = vmatmul.bf16.gmra.mxu1 %v1220_v47  ;;  %v1348_v47 = vor.u32 %v1502_v40, %v1347_v39 }
  0x87   :  { %1438 = vmatmul.msk.bf16.gmra.mxu3 %vm159_vm0, %v1336_v49  ;;  %v1476_v49 = vld [vmem:[%s2413_s1 + $0x64] sm:$0xf0] }
  0x8a   :  { %v219_v50 = vpop.f32.mrf.mxu1  ;;  %v1836_v51 = vpop.f32.mrf.mxu3 }
  0x91   :  { %1423 = vmatmul.msk.bf16.gmra.mxu0 %vm159_vm0, %v1216_v56 }
  0x92   :  { %v1863_v63 = vpop.f32.mrf.mxu1  ;;  %v1865_v0 = vpop.f32.mrf.mxu3 }
  0x93   :  { %788 = vmatmul.bf16.gmra.mxu2 %v1332_v57 }
  0x95   :  { %723 = vmatmul.bf16.gmra.mxu1 %v1228_v62 }
  0x97   :  { %1439 = vmatmul.msk.bf16.gmra.mxu3 %vm159_vm0, %v1344_v1 }
  0x9a   :  { %v1868_v2 = vpop.f32.mrf.mxu1  ;;  %v887_v3 = vpop.f32.mrf.mxu3 }
  0x9e   :  { %v184_v10 = vpop.f32.mrf.mxu0 }
  0x9f   :  { %v185_v14 = vadd.f32 %v1879_v6, %v184_v10 }
  0xa1   :  { %v218_v18 = vadd.f32 %v217_v48, %v185_v14  ;;  %1424 = vmatmul.msk.bf16.gmra.mxu0 %vm159_vm0, %v1224_v9  ;;  %v1243_v48 = vld [vmem:[%s2413_s1 + $0x60] sm:$0xf] }
  0xa2   :  { %v1906_v20 = vpop.f32.mrf.mxu1  ;;  %v889_v22 = vpop.f32.mrf.mxu3  ;;  %v1244_v56 = vor.u32 %v1476_v49, %v1243_v48 }
  0xa3   :  { %793 = vmatmul.bf16.gmra.mxu2 %v1340_v11  ;;  %v245_v23 = vmax.f32 %v218_v18, %v1897_v15 }
  0xa5   :  { %v254_v25 = vpack.c.bf16 %v245_v23, %v245_v23  ;;  %728 = vmatmul.bf16.gmra.mxu1 %v1236_v19 }
  0xa6   :  { %v754_v26 = vpop.f32.mrf.mxu2  ;;  %v186_v29 = vpop.f32.mrf.mxu0 }
  0xa7   :  { %v755_v27 = vadd.f32 %v1911_v21, %v754_v26  ;;  %264 = vst.msk [vmem:[%s2418_s8] sm:$0xf] %vm263_vm1, %v254_v25  ;;  %v187_v30 = vadd.f32 %v1879_v6, %v186_v29  ;;  %1440 = vmatmul.msk.bf16.gmra.mxu3 %vm159_vm0, %v1352_v24  ;;  %v1251_v26 = vld [vmem:[%s2413_s1 + $0x70] sm:$0xf] }
  0xa9   :  { %v888_v31 = vadd.f32 %v887_v3, %v755_v27  ;;  %v220_v32 = vadd.f32 %v219_v50, %v187_v30  ;;  %v1478_v27 = vld [vmem:[%s2413_s1 + $0x74] sm:$0xf0] }
  0xaa   :  { %v1927_v34 = vpop.f32.mrf.mxu1  ;;  %v892_v35 = vpop.f32.mrf.mxu3 }
  0xab   :  { %v985_v33 = vmax.f32 %v888_v31, %v1918_v28  ;;  %v246_v38 = vmax.f32 %v220_v32, %v1897_v15  ;;  %v1505_v31 = vld [vmem:[%s2413_s1 + $0x154] sm:$0xf]  ;;  %v1365_v32 = vld [vmem:[%s2413_s1 + $0x158] sm:$0xf0] }
  0xac   :  { %v1368_v40 = vor.u32 %v1505_v31, %v1365_v32  ;;  %v1253_v31 = vld [vmem:[%s2413_s1 + $0x78] sm:$0xf0] }
  0xad   :  { %v1034_v41 = vpack.c.bf16 %v985_v33, %v985_v33  ;;  %v255_v42 = vpack.c.bf16 %v246_v38, %v246_v38 }
  0xae   :  { %v756_v43 = vpop.f32.mrf.mxu2  ;;  %v189_v46 = vpop.f32.mrf.mxu0 }
  0xaf   :  { %1083 = vst.msk [vmem:[%s2419_s9 + $0x50] sm:$0xf] %vm263_vm1, %v1034_v41  ;;  %v757_v45 = vadd.f32 %v1911_v21, %v756_v43  ;;  %v190_v50 = vadd.f32 %v1879_v6, %v189_v46 }
  0xb0   :  { %265 = vst.msk [vmem:[%s2418_s8 + $0x4] sm:$0xf] %vm263_vm1, %v255_v42 }
  0xb1   :  { %v890_v52 = vadd.f32 %v889_v22, %v757_v45  ;;  %v223_v55 = vadd.f32 %v1863_v63, %v190_v50  ;;  %1425 = vmatmul.msk.bf16.gmra.mxu0 %vm159_vm0, %v1232_v44  ;;  %v1240_v22 = vor.u32 %v1473_v12, %v1237_v13 }
  0xb2   :  { %v1967_v58 = vpop.f32.mrf.mxu1  ;;  %v894_v59 = vpop.f32.mrf.mxu3 }
  0xb3   :  { %v986_v57 = vmax.f32 %v890_v52, %v1918_v28  ;;  %798 = vmatmul.bf16.gmra.mxu2 %v1348_v47  ;;  %v247_v60 = vmax.f32 %v223_v55, %v1897_v15  ;;  %v1475_v52 = vld [vmem:[%s2413_s1 + $0x64] sm:$0xf]  ;;  %v1363_v55 = vld [vmem:[%s2413_s1 + $0x150] sm:$0xf] }
  0xb5   :  { %v1035_v62 = vpack.c.bf16 %v986_v57, %v986_v57  ;;  %v256_v1 = vpack.c.bf16 %v247_v60, %v247_v60  ;;  %733 = vmatmul.bf16.gmra.mxu1 %v1244_v56  ;;  %v1248_v60 = vor.u32 %v1475_v52, %v1245_v53 }
  0xb6   :  { %v759_v3 = vpop.f32.mrf.mxu2  ;;  %v191_v4 = vpop.f32.mrf.mxu0 }
  0xb7   :  { %1084 = vst.msk [vmem:[%s2419_s9 + $0x54] sm:$0xf] %vm263_vm1, %v1035_v62  ;;  %v760_v63 = vadd.f32 %v1911_v21, %v759_v3  ;;  %v192_v5 = vadd.f32 %v1879_v6, %v191_v4  ;;  %1441 = vmatmul.msk.bf16.gmra.mxu3 %vm159_vm0, %v1360_v61  ;;  %v1259_v3 = vld [vmem:[%s2413_s1 + $0x80] sm:$0xf] }
  0xb8   :  { %266 = vst.msk [vmem:[%s2418_s8 + $0x8] sm:$0xf] %vm263_vm1, %v256_v1 }
  0xb9   :  { %v893_v7 = vadd.f32 %v892_v35, %v760_v63  ;;  %v225_v8 = vadd.f32 %v1868_v2, %v192_v5  ;;  %v1504_v2 = vld [vmem:[%s2413_s1 + $0x144] sm:$0xf0]  ;;  %v1252_v35 = vor.u32 %v1478_v27, %v1251_v26 }
  0xba   :  { %v1983_v10 = vpop.f32.mrf.mxu1  ;;  %v897_v11 = vpop.f32.mrf.mxu3  ;;  %v1356_v25 = vor.u32 %v1504_v2, %v1355_v16  ;;  %v1480_v63 = vld [vmem:[%s2413_s1 + $0x84] sm:$0xf0] }
  0xbb   :  { %v987_v9 = vmax.f32 %v893_v7, %v1918_v28  ;;  %v248_v14 = vmax.f32 %v225_v8, %v1897_v15  ;;  %v1507_v7 = vld [vmem:[%s2413_s1 + $0x164] sm:$0xf]  ;;  %v1373_v8 = vld [vmem:[%s2413_s1 + $0x168] sm:$0xf0] }
  0xbc   :  { %v1376_v2 = vor.u32 %v1507_v7, %v1373_v8  ;;  %v321_v7 = vld [vmem:[%s2413_s1 + $0x180] sm:$0xff] }
  0xbd   :  { %v1036_v17 = vpack.c.bf16 %v987_v9, %v987_v9  ;;  %v257_v18 = vpack.c.bf16 %v248_v14, %v248_v14 }
  0xbe   :  { %v761_v19 = vpop.f32.mrf.mxu2  ;;  %v194_v24 = vpop.f32.mrf.mxu0 }
  0xbf   :  { %1085 = vst.msk [vmem:[%s2419_s9 + $0x58] sm:$0xf] %vm263_vm1, %v1036_v17  ;;  %v762_v23 = vadd.f32 %v1911_v21, %v761_v19  ;;  %v195_v29 = vadd.f32 %v1879_v6, %v194_v24 }
  0xc0   :  { %267 = vst.msk [vmem:[%s2418_s8 + $0xc] sm:$0xf] %vm263_vm1, %v257_v18 }
  0xc1   :  { %v895_v30 = vadd.f32 %v894_v59, %v762_v23  ;;  %v228_v33 = vadd.f32 %v1906_v20, %v195_v29  ;;  %1426 = vmatmul.msk.bf16.gmra.mxu0 %vm159_vm0, %v1240_v22 }
  0xc2   :  { %v2023_v37 = vpop.f32.mrf.mxu1  ;;  %v899_v38 = vpop.f32.mrf.mxu3 }
  0xc3   :  { %v988_v36 = vmax.f32 %v895_v30, %v1918_v28  ;;  %803 = vmatmul.bf16.gmra.mxu2 %v1356_v25  ;;  %v249_v39 = vmax.f32 %v228_v33, %v1897_v15  ;;  %v1477_v30 = vld [vmem:[%s2413_s1 + $0x74] sm:$0xf]  ;;  %v1371_v33 = vld [vmem:[%s2413_s1 + $0x160] sm:$0xf] }
  0xc5   :  { %v1037_v41 = vpack.c.bf16 %v988_v36, %v988_v36  ;;  %v258_v42 = vpack.c.bf16 %v249_v39, %v249_v39  ;;  %738 = vmatmul.bf16.gmra.mxu1 %v1252_v35  ;;  %v1256_v39 = vor.u32 %v1477_v30, %v1253_v31 }
  0xc6   :  { %v764_v43 = vpop.f32.mrf.mxu2  ;;  %v196_v44 = vpop.f32.mrf.mxu0 }
  0xc7   :  { %1086 = vst.msk [vmem:[%s2419_s9 + $0x5c] sm:$0xf] %vm263_vm1, %v1037_v41  ;;  %v765_v20 = vadd.f32 %v1911_v21, %v764_v43  ;;  %v197_v45 = vadd.f32 %v1879_v6, %v196_v44  ;;  %1442 = vmatmul.msk.bf16.gmra.mxu3 %vm159_vm0, %v1368_v40  ;;  %v1267_v43 = vld [vmem:[%s2413_s1 + $0x90] sm:$0xf] }
  0xc8   :  { %268 = vst.msk [vmem:[%s2418_s8 + $0x10] sm:$0xf] %vm263_vm1, %v258_v42 }
  0xc9   :  { %v898_v46 = vadd.f32 %v897_v11, %v765_v20  ;;  %v230_v47 = vadd.f32 %v1927_v34, %v197_v45  ;;  %v1506_v34 = vld [vmem:[%s2413_s1 + $0x154] sm:$0xf0]  ;;  %v1260_v11 = vor.u32 %v1480_v63, %v1259_v3  ;;  %v1379_v63 = vld [vmem:[%s2413_s1 + $0x170] sm:$0xf] }
  0xca   :  { %v239_v49 = vpop.f32.mrf.mxu1  ;;  %v902_v50 = vpop.f32.mrf.mxu3  ;;  %v1364_v1 = vor.u32 %v1506_v34, %v1363_v55  ;;  %v1482_v20 = vld [vmem:[%s2413_s1 + $0x94] sm:$0xf0] }
  0xcb   :  { %v989_v48 = vmax.f32 %v898_v46, %v1918_v28  ;;  %v250_v54 = vmax.f32 %v230_v47, %v1897_v15  ;;  %v1509_v46 = vld [vmem:[%s2413_s1 + $0x174] sm:$0xf]  ;;  %v1381_v47 = vld [vmem:[%s2413_s1 + $0x178] sm:$0xf0]  ;;  %v1268_v49 = vor.u32 %v1482_v20, %v1267_v43 }
  0xcd   :  { %v1038_v56 = vpack.c.bf16 %v989_v48, %v989_v48  ;;  %v259_v57 = vpack.c.bf16 %v250_v54, %v250_v54  ;;  %v1384_v54 = vor.u32 %v1509_v46, %v1381_v47 }
  0xce   :  { %v766_v59 = vpop.f32.mrf.mxu2  ;;  %v199_v62 = vpop.f32.mrf.mxu0 }
  0xcf   :  { %1087 = vst.msk [vmem:[%s2419_s9 + $0x60] sm:$0xf] %vm263_vm1, %v1038_v56  ;;  %v767_v61 = vadd.f32 %v1911_v21, %v766_v59  ;;  %v200_v4 = vadd.f32 %v1879_v6, %v199_v62  ;;  %v1479_v62 = vld [vmem:[%s2413_s1 + $0x84] sm:$0xf] }
  0xd0   :  { %269 = vst.msk [vmem:[%s2418_s8 + $0x14] sm:$0xf] %vm263_vm1, %v259_v57 }
  0xd1   :  { %v900_v5 = vadd.f32 %v899_v38, %v767_v61  ;;  %v233_v9 = vadd.f32 %v1967_v58, %v200_v4  ;;  %1427 = vmatmul.msk.bf16.gmra.mxu0 %vm159_vm0, %v1248_v60  ;;  %v1510_v4 = vld [vmem:[%s2413_s1 + $0x174] sm:$0xf0] }
  0xd2   :  { %v2077_v13 = vpop.f32.mrf.mxu1  ;;  %v904_v14 = vpop.f32.mrf.mxu3 }
  0xd3   :  { %v990_v12 = vmax.f32 %v900_v5, %v1918_v28  ;;  %808 = vmatmul.bf16.gmra.mxu2 %v1364_v1  ;;  %v251_v16 = vmax.f32 %v233_v9, %v1897_v15  ;;  %v1261_v1 = vld [vmem:[%s2413_s1 + $0x88] sm:$0xf0]  ;;  %v705_v3 = vadd.f32 %v1911_v21, %v2077_v13  ;;  %v1380_v13 = vor.u32 %v1510_v4, %v1379_v63 }
  0xd4   :  { %v1264_v9 = vor.u32 %v1479_v62, %v1261_v1 }
  0xd5   :  { %v1039_v17 = vpack.c.bf16 %v990_v12, %v990_v12  ;;  %v260_v18 = vpack.c.bf16 %v251_v16, %v251_v16  ;;  %743 = vmatmul.bf16.gmra.mxu1 %v1260_v11  ;;  %v490_v16 = vunpack.c.h.b16 %v321_v7 }
  0xd6   :  { %v769_v19 = vpop.f32.mrf.mxu2  ;;  %v201_v22 = vpop.f32.mrf.mxu0 }
  0xd7   :  { %1088 = vst.msk [vmem:[%s2419_s9 + $0x64] sm:$0xf] %vm263_vm1, %v1039_v17  ;;  %v770_v58 = vadd.f32 %v1911_v21, %v769_v19  ;;  %v202_v23 = vadd.f32 %v1879_v6, %v201_v22  ;;  %1443 = vmatmul.msk.bf16.gmra.mxu3 %vm159_vm0, %v1376_v2 }
  0xd8   :  { %270 = vst.msk [vmem:[%s2418_s8 + $0x18] sm:$0xf] %vm263_vm1, %v260_v18 }
  0xd9   :  { %v903_v24 = vadd.f32 %v902_v50, %v770_v58  ;;  %v235_v25 = vadd.f32 %v1983_v10, %v202_v23  ;;  %v1508_v10 = vld [vmem:[%s2413_s1 + $0x164] sm:$0xf0]  ;;  %v540_v23 = vpack.c.b16 %v490_v16, %v490_v16 }
  0xda   :  { %v2093_v27 = vpop.f32.mrf.mxu1  ;;  %v907_v29 = vpop.f32.mrf.mxu3  ;;  %v1372_v42 = vor.u32 %v1508_v10, %v1371_v33 }
  0xdb   :  { %v991_v26 = vmax.f32 %v903_v24, %v1918_v28  ;;  %v252_v32 = vmax.f32 %v235_v25, %v1897_v15  ;;  %v707_v25 = vadd.f32 %v1911_v21, %v2093_v27 }
  0xdd   :  { %v1040_v35 = vpack.c.bf16 %v991_v26, %v991_v26  ;;  %v261_v36 = vpack.c.bf16 %v252_v32, %v252_v32 }
  0xde   :  { %v771_v38 = vpop.f32.mrf.mxu2  ;;  %v204_v41 = vpop.f32.mrf.mxu0 }
  0xdf   :  { %1089 = vst.msk [vmem:[%s2419_s9 + $0x68] sm:$0xf] %vm263_vm1, %v1040_v35  ;;  %v772_v40 = vadd.f32 %v1911_v21, %v771_v38  ;;  %v205_v44 = vadd.f32 %v1879_v6, %v204_v41 }
  0xe0   :  { %271 = vst.msk [vmem:[%s2418_s8 + $0x1c] sm:$0xf] %vm263_vm1, %v261_v36  ;;  %v489_v36 = vunpack.c.l.b16 %v321_v7 }
  0xe1   :  { %v905_v45 = vadd.f32 %v904_v14, %v772_v40  ;;  %v238_v48 = vadd.f32 %v2023_v37, %v205_v44  ;;  %1428 = vmatmul.msk.bf16.gmra.mxu0 %vm159_vm0, %v1256_v39 }
  0xe2   :  { %v709_v52 = vpop.f32.mrf.mxu1  ;;  %v909_v53 = vpop.f32.mrf.mxu3  ;;  %v539_v20 = vpack.c.b16 %v489_v36, %v489_v36 }
  0xe3   :  { %v992_v50 = vmax.f32 %v905_v45, %v1918_v28  ;;  %813 = vmatmul.bf16.gmra.mxu2 %v1372_v42  ;;  %v253_v6 = vmax.f32 %v238_v48, %v1897_v15  ;;  %v710_v38 = vadd.f32 %v1911_v21, %v709_v52 }
  0xe5   :  { %v1041_v55 = vpack.c.bf16 %v992_v50, %v992_v50  ;;  %v262_v34 = vpack.c.bf16 %v253_v6, %v253_v6  ;;  %748 = vmatmul.bf16.gmra.mxu1 %v1268_v49 }
  0xe6   :  { %v774_v56 = vpop.f32.mrf.mxu2  ;;  %v206_v57 = vpop.f32.mrf.mxu0 }
  0xe7   :  { %1090 = vst.msk [vmem:[%s2419_s9 + $0x6c] sm:$0xf] %vm263_vm1, %v1041_v55  ;;  %v775_v37 = vadd.f32 %v1911_v21, %v774_v56  ;;  %1444 = vmatmul.msk.bf16.gmra.mxu3 %vm159_vm0, %v1384_v54 }
  0xe8   :  { %272 = vst.msk [vmem:[%s2418_s8 + $0x20] sm:$0xf] %vm263_vm1, %v262_v34 }
  0xe9   :  { %v908_v15 = vadd.f32 %v907_v29, %v775_v37 }
  0xea   :  { %v711_v60 = vpop.f32.mrf.mxu1  ;;  %v912_v61 = vpop.f32.mrf.mxu3 }
  0xeb   :  { %v993_v59 = vmax.f32 %v908_v15, %v1918_v28 }
  0xed   :  { %v1042_v5 = vpack.c.bf16 %v993_v59, %v993_v59 }
  0xee   :  { %v776_v8 = vpop.f32.mrf.mxu2  ;;  %v837_v12 = vpop.f32.mrf.mxu0 }
  0xef   :  { %1091 = vst.msk [vmem:[%s2419_s9 + $0x70] sm:$0xf] %vm263_vm1, %v1042_v5  ;;  %v777_v11 = vadd.f32 %v1911_v21, %v776_v8  ;;  %v838_v14 = vadd.f32 %v837_v12, %v705_v3 }
  0xf1   :  { %v910_v2 = vadd.f32 %v909_v53, %v777_v11  ;;  %v965_v17 = vmax.f32 %v838_v14, %v1918_v28  ;;  %1429 = vmatmul.msk.bf16.gmra.mxu0 %vm159_vm0, %v1264_v9  ;;  %v712_v53 = vadd.f32 %v1911_v21, %v711_v60 }
  0xf2   :  { %v714_v19 = vpop.f32.mrf.mxu1  ;;  %v914_v58 = vpop.f32.mrf.mxu3 }
  0xf3   :  { %v994_v18 = vmax.f32 %v910_v2, %v1918_v28  ;;  %818 = vmatmul.bf16.gmra.mxu2 %v1380_v13  ;;  %v1014_v22 = vpack.c.bf16 %v965_v17, %v965_v17  ;;  %v715_v60 = vadd.f32 %v1911_v21, %v714_v19 }
  0xf5   :  { %v1043_v24 = vpack.c.bf16 %v994_v18, %v994_v18  ;;  %1063 = vst.msk [vmem:[%s2419_s9] sm:$0xf] %vm263_vm1, %v1014_v22 }
  0xf6   :  { %v779_v26 = vpop.f32.mrf.mxu2  ;;  %v839_v30 = vpop.f32.mrf.mxu0 }
  0xf7   :  { %1092 = vst.msk [vmem:[%s2419_s9 + $0x74] sm:$0xf] %vm263_vm1, %v1043_v24  ;;  %v780_v29 = vadd.f32 %v1911_v21, %v779_v26  ;;  %v840_v31 = vadd.f32 %v839_v30, %v707_v25  ;;  %1445 = vmatmul.msk.bf16.gmra.mxu3 %vm159_vm0, %v540_v23 }
  0xf9   :  { %v913_v32 = vadd.f32 %v912_v61, %v780_v29  ;;  %v966_v27 = vmax.f32 %v840_v31, %v1918_v28 }
  0xfa   :  { %v716_v10 = vpop.f32.mrf.mxu1  ;;  %v917_v35 = vpop.f32.mrf.mxu3 }
  0xfb   :  { %v995_v33 = vmax.f32 %v913_v32, %v1918_v28  ;;  %v1015_v39 = vpack.c.bf16 %v966_v27, %v966_v27  ;;  %v717_v14 = vadd.f32 %v1911_v21, %v716_v10 }
  0xfd   :  { %v1044_v40 = vpack.c.bf16 %v995_v33, %v995_v33  ;;  %1064 = vst.msk [vmem:[%s2419_s9 + $0x4] sm:$0xf] %vm263_vm1, %v1015_v39 }
  0xfe   :  { %v781_v41 = vpop.f32.mrf.mxu2  ;;  %v842_v43 = vpop.f32.mrf.mxu0 }
  0xff   :  { %1093 = vst.msk [vmem:[%s2419_s9 + $0x78] sm:$0xf] %vm263_vm1, %v1044_v40  ;;  %v782_v42 = vadd.f32 %v1911_v21, %v781_v41  ;;  %v843_v44 = vadd.f32 %v842_v43, %v710_v38 }
 0x101   :  { %v915_v45 = vadd.f32 %v914_v58, %v782_v42  ;;  %v967_v46 = vmax.f32 %v843_v44, %v1918_v28 }
 0x102   :  { %v719_v48 = vpop.f32.mrf.mxu1  ;;  %v919_v49 = vpop.f32.mrf.mxu3 }
 0x103   :  { %v996_v47 = vmax.f32 %v915_v45, %v1918_v28  ;;  %823 = vmatmul.bf16.gmra.mxu2 %v539_v20  ;;  %v1016_v50 = vpack.c.bf16 %v967_v46, %v967_v46  ;;  %v720_v25 = vadd.f32 %v1911_v21, %v719_v48 }
 0x105   :  { %v1045_v52 = vpack.c.bf16 %v996_v47, %v996_v47  ;;  %1065 = vst.msk [vmem:[%s2419_s9 + $0x8] sm:$0xf] %vm263_vm1, %v1016_v50 }
 0x106   :  { %v784_v6 = vpop.f32.mrf.mxu2  ;;  %v844_v55 = vpop.f32.mrf.mxu0 }
 0x107   :  { %1094 = vst.msk [vmem:[%s2419_s9 + $0x7c] sm:$0xf] %vm263_vm1, %v1045_v52  ;;  %v785_v54 = vadd.f32 %v1911_v21, %v784_v6  ;;  %v845_v34 = vadd.f32 %v844_v55, %v712_v53 }
 0x109   :  { %v918_v56 = vadd.f32 %v917_v35, %v785_v54  ;;  %v968_v37 = vmax.f32 %v845_v34, %v1918_v28 }
 0x10a   :  { %v721_v15 = vpop.f32.mrf.mxu1  ;;  %v922_v59 = vpop.f32.mrf.mxu3 }
 0x10b   :  { %v997_v57 = vmax.f32 %v918_v56, %v1918_v28  ;;  %v1017_v61 = vpack.c.bf16 %v968_v37, %v968_v37  ;;  %v722_v41 = vadd.f32 %v1911_v21, %v721_v15 }
 0x10d   :  { %v1046_v62 = vpack.c.bf16 %v997_v57, %v997_v57  ;;  %1066 = vst.msk [vmem:[%s2419_s9 + $0xc] sm:$0xf] %vm263_vm1, %v1017_v61 }
 0x10e   :  { %v786_v1 = vpop.f32.mrf.mxu2  ;;  %v847_v63 = vpop.f32.mrf.mxu0 }
 0x10f   :  { %1095 = vst.msk [vmem:[%s2419_s9 + $0x80] sm:$0xf] %vm263_vm1, %v1046_v62  ;;  %v787_v3 = vadd.f32 %v1911_v21, %v786_v1  ;;  %v848_v4 = vadd.f32 %v847_v63, %v715_v60 }
 0x111   :  { %v920_v5 = vadd.f32 %v919_v49, %v787_v3  ;;  %v969_v7 = vmax.f32 %v848_v4, %v1918_v28 }
 0x112   :  { %v724_v9 = vpop.f32.mrf.mxu1  ;;  %v924_v11 = vpop.f32.mrf.mxu3 }
 0x113   :  { %v998_v8 = vmax.f32 %v920_v5, %v1918_v28  ;;  %v1018_v12 = vpack.c.bf16 %v969_v7, %v969_v7  ;;  %v725_v50 = vadd.f32 %v1911_v21, %v724_v9 }
 0x115   :  { %v1047_v13 = vpack.c.bf16 %v998_v8, %v998_v8  ;;  %1067 = vst.msk [vmem:[%s2419_s9 + $0x10] sm:$0xf] %vm263_vm1, %v1018_v12 }
 0x116   :  { %v789_v16 = vpop.f32.mrf.mxu2  ;;  %v849_v17 = vpop.f32.mrf.mxu0 }
 0x117   :  { %1096 = vst.msk [vmem:[%s2419_s9 + $0x84] sm:$0xf] %vm263_vm1, %v1047_v13  ;;  %v790_v2 = vadd.f32 %v1911_v21, %v789_v16  ;;  %v850_v18 = vadd.f32 %v849_v17, %v717_v14 }
 0x119   :  { %v923_v19 = vadd.f32 %v922_v59, %v790_v2  ;;  %v970_v58 = vmax.f32 %v850_v18, %v1918_v28 }
 0x11a   :  { %v726_v23 = vpop.f32.mrf.mxu1  ;;  %v927_v24 = vpop.f32.mrf.mxu3 }
 0x11b   :  { %v999_v22 = vmax.f32 %v923_v19, %v1918_v28  ;;  %v1019_v26 = vpack.c.bf16 %v970_v58, %v970_v58  ;;  %v727_v62 = vadd.f32 %v1911_v21, %v726_v23 }
 0x11d   :  { %v1048_v29 = vpack.c.bf16 %v999_v22, %v999_v22  ;;  %1068 = vst.msk [vmem:[%s2419_s9 + $0x14] sm:$0xf] %vm263_vm1, %v1019_v26 }
 0x11e   :  { %v791_v30 = vpop.f32.mrf.mxu2  ;;  %v852_v32 = vpop.f32.mrf.mxu0 }
 0x11f   :  { %1097 = vst.msk [vmem:[%s2419_s9 + $0x88] sm:$0xf] %vm263_vm1, %v1048_v29  ;;  %v792_v31 = vadd.f32 %v1911_v21, %v791_v30  ;;  %v853_v27 = vadd.f32 %v852_v32, %v720_v25 }
 0x121   :  { %v925_v33 = vadd.f32 %v924_v11, %v792_v31  ;;  %v971_v10 = vmax.f32 %v853_v27, %v1918_v28 }
 0x122   :  { %v729_v36 = vpop.f32.mrf.mxu1  ;;  %v929_v38 = vpop.f32.mrf.mxu3 }
 0x123   :  { %v1000_v35 = vmax.f32 %v925_v33, %v1918_v28  ;;  %v1020_v39 = vpack.c.bf16 %v971_v10, %v971_v10  ;;  %v730_v12 = vadd.f32 %v1911_v21, %v729_v36 }
 0x125   :  { %v1049_v40 = vpack.c.bf16 %v1000_v35, %v1000_v35  ;;  %1069 = vst.msk [vmem:[%s2419_s9 + $0x18] sm:$0xf] %vm263_vm1, %v1020_v39 }
 0x126   :  { %v794_v42 = vpop.f32.mrf.mxu2  ;;  %v854_v20 = vpop.f32.mrf.mxu0 }
 0x127   :  { %1098 = vst.msk [vmem:[%s2419_s9 + $0x8c] sm:$0xf] %vm263_vm1, %v1049_v40  ;;  %v795_v43 = vadd.f32 %v1911_v21, %v794_v42  ;;  %v855_v44 = vadd.f32 %v854_v20, %v722_v41 }
 0x129   :  { %v928_v45 = vadd.f32 %v927_v24, %v795_v43  ;;  %v972_v46 = vmax.f32 %v855_v44, %v1918_v28 }
 0x12a   :  { %v731_v48 = vpop.f32.mrf.mxu1  ;;  %v932_v49 = vpop.f32.mrf.mxu3 }
 0x12b   :  { %v1001_v47 = vmax.f32 %v928_v45, %v1918_v28  ;;  %v1021_v52 = vpack.c.bf16 %v972_v46, %v972_v46  ;;  %v732_v29 = vadd.f32 %v1911_v21, %v731_v48 }
 0x12d   :  { %v1050_v53 = vpack.c.bf16 %v1001_v47, %v1001_v47  ;;  %1070 = vst.msk [vmem:[%s2419_s9 + $0x1c] sm:$0xf] %vm263_vm1, %v1021_v52 }
 0x12e   :  { %v796_v6 = vpop.f32.mrf.mxu2  ;;  %v857_v55 = vpop.f32.mrf.mxu0 }
 0x12f   :  { %1099 = vst.msk [vmem:[%s2419_s9 + $0x90] sm:$0xf] %vm263_vm1, %v1050_v53  ;;  %v797_v54 = vadd.f32 %v1911_v21, %v796_v6  ;;  %v858_v34 = vadd.f32 %v857_v55, %v725_v50 }
 0x131   :  { %v930_v56 = vadd.f32 %v929_v38, %v797_v54  ;;  %v973_v37 = vmax.f32 %v858_v34, %v1918_v28 }
 0x132   :  { %v734_v15 = vpop.f32.mrf.mxu1  ;;  %v934_v59 = vpop.f32.mrf.mxu3 }
 0x133   :  { %v1002_v57 = vmax.f32 %v930_v56, %v1918_v28  ;;  %v1022_v60 = vpack.c.bf16 %v973_v37, %v973_v37  ;;  %v735_v39 = vadd.f32 %v1911_v21, %v734_v15 }
 0x135   :  { %v1051_v61 = vpack.c.bf16 %v1002_v57, %v1002_v57  ;;  %1071 = vst.msk [vmem:[%s2419_s9 + $0x20] sm:$0xf] %vm263_vm1, %v1022_v60 }
 0x136   :  { %v799_v1 = vpop.f32.mrf.mxu2  ;;  %v859_v63 = vpop.f32.mrf.mxu0 }
 0x137   :  { %1100 = vst.msk [vmem:[%s2419_s9 + $0x94] sm:$0xf] %vm263_vm1, %v1051_v61  ;;  %v800_v3 = vadd.f32 %v1911_v21, %v799_v1  ;;  %v860_v4 = vadd.f32 %v859_v63, %v727_v62 }
 0x139   :  { %v933_v5 = vadd.f32 %v932_v49, %v800_v3  ;;  %v974_v7 = vmax.f32 %v860_v4, %v1918_v28 }
 0x13a   :  { %v736_v9 = vpop.f32.mrf.mxu1  ;;  %v937_v11 = vpop.f32.mrf.mxu3 }
 0x13b   :  { %v1003_v8 = vmax.f32 %v933_v5, %v1918_v28  ;;  %v1023_v13 = vpack.c.bf16 %v974_v7, %v974_v7  ;;  %v737_v53 = vadd.f32 %v1911_v21, %v736_v9 }
 0x13d   :  { %v1052_v14 = vpack.c.bf16 %v1003_v8, %v1003_v8  ;;  %1072 = vst.msk [vmem:[%s2419_s9 + $0x24] sm:$0xf] %vm263_vm1, %v1023_v13 }
 0x13e   :  { %v801_v16 = vpop.f32.mrf.mxu2  ;;  %v862_v17 = vpop.f32.mrf.mxu0 }
 0x13f   :  { %1101 = vst.msk [vmem:[%s2419_s9 + $0x98] sm:$0xf] %vm263_vm1, %v1052_v14  ;;  %v802_v2 = vadd.f32 %v1911_v21, %v801_v16  ;;  %v863_v18 = vadd.f32 %v862_v17, %v730_v12 }
 0x141   :  { %v935_v19 = vadd.f32 %v934_v59, %v802_v2  ;;  %v975_v58 = vmax.f32 %v863_v18, %v1918_v28 }
 0x142   :  { %v739_v23 = vpop.f32.mrf.mxu1  ;;  %v939_v24 = vpop.f32.mrf.mxu3 }
 0x143   :  { %v1004_v22 = vmax.f32 %v935_v19, %v1918_v28  ;;  %v1024_v25 = vpack.c.bf16 %v975_v58, %v975_v58  ;;  %v740_v60 = vadd.f32 %v1911_v21, %v739_v23 }
 0x145   :  { %v1053_v26 = vpack.c.bf16 %v1004_v22, %v1004_v22  ;;  %1073 = vst.msk [vmem:[%s2419_s9 + $0x28] sm:$0xf] %vm263_vm1, %v1024_v25 }
 0x146   :  { %v804_v30 = vpop.f32.mrf.mxu2  ;;  %v864_v32 = vpop.f32.mrf.mxu0 }
 0x147   :  { %1102 = vst.msk [vmem:[%s2419_s9 + $0x9c] sm:$0xf] %vm263_vm1, %v1053_v26  ;;  %v805_v31 = vadd.f32 %v1911_v21, %v804_v30  ;;  %v865_v27 = vadd.f32 %v864_v32, %v732_v29 }
 0x149   :  { %v938_v33 = vadd.f32 %v937_v11, %v805_v31  ;;  %v976_v10 = vmax.f32 %v865_v27, %v1918_v28 }
 0x14a   :  { %v741_v36 = vpop.f32.mrf.mxu1  ;;  %v942_v38 = vpop.f32.mrf.mxu3 }
 0x14b   :  { %v1005_v35 = vmax.f32 %v938_v33, %v1918_v28  ;;  %v1025_v40 = vpack.c.bf16 %v976_v10, %v976_v10  ;;  %v742_v16 = vadd.f32 %v1911_v21, %v741_v36 }
 0x14d   :  { %v1054_v41 = vpack.c.bf16 %v1005_v35, %v1005_v35  ;;  %1074 = vst.msk [vmem:[%s2419_s9 + $0x2c] sm:$0xf] %vm263_vm1, %v1025_v40 }
 0x14e   :  { %v806_v42 = vpop.f32.mrf.mxu2  ;;  %v867_v20 = vpop.f32.mrf.mxu0 }
 0x14f   :  { %1103 = vst.msk [vmem:[%s2419_s9 + $0xa0] sm:$0xf] %vm263_vm1, %v1054_v41  ;;  %v807_v43 = vadd.f32 %v1911_v21, %v806_v42  ;;  %v868_v44 = vadd.f32 %v867_v20, %v735_v39 }
 0x151   :  { %v940_v45 = vadd.f32 %v939_v24, %v807_v43  ;;  %v977_v46 = vmax.f32 %v868_v44, %v1918_v28 }
 0x152   :  { %v744_v48 = vpop.f32.mrf.mxu1  ;;  %v944_v49 = vpop.f32.mrf.mxu3 }
 0x153   :  { %v1006_v47 = vmax.f32 %v940_v45, %v1918_v28  ;;  %v1026_v50 = vpack.c.bf16 %v977_v46, %v977_v46  ;;  %v745_v30 = vadd.f32 %v1911_v21, %v744_v48 }
 0x155   :  { %v1055_v52 = vpack.c.bf16 %v1006_v47, %v1006_v47  ;;  %1075 = vst.msk [vmem:[%s2419_s9 + $0x30] sm:$0xf] %vm263_vm1, %v1026_v50 }
 0x156   :  { %v809_v6 = vpop.f32.mrf.mxu2  ;;  %v869_v55 = vpop.f32.mrf.mxu0 }
 0x157   :  { %1104 = vst.msk [vmem:[%s2419_s9 + $0xa4] sm:$0xf] %vm263_vm1, %v1055_v52  ;;  %v810_v54 = vadd.f32 %v1911_v21, %v809_v6  ;;  %v870_v34 = vadd.f32 %v869_v55, %v737_v53 }
 0x159   :  { %v943_v56 = vadd.f32 %v942_v38, %v810_v54  ;;  %v978_v37 = vmax.f32 %v870_v34, %v1918_v28 }
 0x15a   :  { %v746_v15 = vpop.f32.mrf.mxu1  ;;  %v947_v59 = vpop.f32.mrf.mxu3 }
 0x15b   :  { %v1007_v57 = vmax.f32 %v943_v56, %v1918_v28  ;;  %v1027_v61 = vpack.c.bf16 %v978_v37, %v978_v37  ;;  %v747_v45 = vadd.f32 %v1911_v21, %v746_v15 }
 0x15d   :  { %v1056_v62 = vpack.c.bf16 %v1007_v57, %v1007_v57  ;;  %1076 = vst.msk [vmem:[%s2419_s9 + $0x34] sm:$0xf] %vm263_vm1, %v1027_v61 }
 0x15e   :  { %v811_v1 = vpop.f32.mrf.mxu2  ;;  %v872_v63 = vpop.f32.mrf.mxu0 }
 0x15f   :  { %1105 = vst.msk [vmem:[%s2419_s9 + $0xa8] sm:$0xf] %vm263_vm1, %v1056_v62  ;;  %v812_v3 = vadd.f32 %v1911_v21, %v811_v1  ;;  %v873_v4 = vadd.f32 %v872_v63, %v740_v60 }
 0x161   :  { %v945_v5 = vadd.f32 %v944_v49, %v812_v3  ;;  %v979_v7 = vmax.f32 %v873_v4, %v1918_v28 }
 0x162   :  { %v749_v9 = vpop.f32.mrf.mxu1  ;;  %v949_v11 = vpop.f32.mrf.mxu3 }
 0x163   :  { %v1008_v8 = vmax.f32 %v945_v5, %v1918_v28  ;;  %v1028_v12 = vpack.c.bf16 %v979_v7, %v979_v7  ;;  %v750_v13 = vadd.f32 %v1911_v21, %v749_v9 }
 0x165   :  { %v1057_v14 = vpack.c.bf16 %v1008_v8, %v1008_v8  ;;  %1077 = vst.msk [vmem:[%s2419_s9 + $0x38] sm:$0xf] %vm263_vm1, %v1028_v12  ;;  %v883_v2 = vadd.f32 %v1836_v51, %v750_v13 }
 0x166   :  { %v814_v17 = vpop.f32.mrf.mxu2  ;;  %v874_v19 = vpop.f32.mrf.mxu0 }
 0x167   :  { %1106 = vst.msk [vmem:[%s2419_s9 + $0xac] sm:$0xf] %vm263_vm1, %v1057_v14  ;;  %v815_v18 = vadd.f32 %v1911_v21, %v814_v17  ;;  %v983_v58 = vmax.f32 %v883_v2, %v1918_v28  ;;  %v875_v22 = vadd.f32 %v874_v19, %v742_v16 }
 0x169   :  { %v948_v23 = vadd.f32 %v947_v59, %v815_v18  ;;  %v1032_v24 = vpack.c.bf16 %v983_v58, %v983_v58  ;;  %v980_v25 = vmax.f32 %v875_v22, %v1918_v28 }
 0x16a   :  { %v751_v29 = vpop.f32.mrf.mxu1  ;;  %v952_v51 = vpop.f32.mrf.mxu3 }
 0x16b   :  { %v1009_v26 = vmax.f32 %v948_v23, %v1918_v28  ;;  %1081 = vst.msk [vmem:[%s2419_s9 + $0x48] sm:$0xf] %vm263_vm1, %v1032_v24  ;;  %v1029_v31 = vpack.c.bf16 %v980_v25, %v980_v25  ;;  %v752_v32 = vadd.f32 %v1911_v21, %v751_v29 }
 0x16d   :  { %v1058_v27 = vpack.c.bf16 %v1009_v26, %v1009_v26  ;;  %1078 = vst.msk [vmem:[%s2419_s9 + $0x3c] sm:$0xf] %vm263_vm1, %v1029_v31  ;;  %v885_v33 = vadd.f32 %v1865_v0, %v752_v32 }
 0x16e   :  { %v816_v10 = vpop.f32.mrf.mxu2  ;;  %v877_v36 = vpop.f32.mrf.mxu0 }
 0x16f   :  { %1107 = vst.msk [vmem:[%s2419_s9 + $0xb0] sm:$0xf] %vm263_vm1, %v1058_v27  ;;  %v817_v35 = vadd.f32 %v1911_v21, %v816_v10  ;;  %v984_v38 = vmax.f32 %v885_v33, %v1918_v28  ;;  %v878_v39 = vadd.f32 %v877_v36, %v745_v30 }
 0x171   :  { %v950_v40 = vadd.f32 %v949_v11, %v817_v35  ;;  %v1033_v41 = vpack.c.bf16 %v984_v38, %v984_v38  ;;  %v981_v42 = vmax.f32 %v878_v39, %v1918_v28 }
 0x172   :  { %v954_v20 = vpop.f32.mrf.mxu3 }
 0x173   :  { %v1010_v43 = vmax.f32 %v950_v40, %v1918_v28  ;;  %1082 = vst.msk [vmem:[%s2419_s9 + $0x4c] sm:$0xf] %vm263_vm1, %v1033_v41  ;;  %v1030_v0 = vpack.c.bf16 %v981_v42, %v981_v42 }
 0x175   :  { %v1059_v44 = vpack.c.bf16 %v1010_v43, %v1010_v43  ;;  %1079 = vst.msk [vmem:[%s2419_s9 + $0x40] sm:$0xf] %vm263_vm1, %v1030_v0 }
 0x176   :  { %v819_v46 = vpop.f32.mrf.mxu2  ;;  %v879_v48 = vpop.f32.mrf.mxu0 }
 0x177   :  { %1108 = vst.msk [vmem:[%s2419_s9 + $0xb4] sm:$0xf] %vm263_vm1, %v1059_v44  ;;  %v820_v47 = vadd.f32 %v1911_v21, %v819_v46  ;;  %v880_v49 = vadd.f32 %v879_v48, %v747_v45 }
 0x179   :  { %v953_v50 = vadd.f32 %v952_v51, %v820_v47  ;;  %v982_v52 = vmax.f32 %v880_v49, %v1918_v28 }
 0x17a   :  { %v957_v6 = vpop.f32.mrf.mxu3 }
 0x17b   :  { %v1011_v53 = vmax.f32 %v953_v50, %v1918_v28  ;;  %v1031_v54 = vpack.c.bf16 %v982_v52, %v982_v52 }
 0x17d   :  { %v1060_v55 = vpack.c.bf16 %v1011_v53, %v1011_v53  ;;  %1080 = vst.msk [vmem:[%s2419_s9 + $0x44] sm:$0xf] %vm263_vm1, %v1031_v54 }
 0x17e   :  { %v821_v34 = vpop.f32.mrf.mxu2 }
 0x17f   :  { %1109 = vst.msk [vmem:[%s2419_s9 + $0xb8] sm:$0xf] %vm263_vm1, %v1060_v55  ;;  %v822_v56 = vadd.f32 %v1911_v21, %v821_v34 }
 0x181   :  { %v955_v37 = vadd.f32 %v954_v20, %v822_v56 }
 0x182   :  { %v959_v15 = vpop.f32.mrf.mxu3 }
 0x183   :  { %v1012_v57 = vmax.f32 %v955_v37, %v1918_v28 }
 0x185   :  { %v1061_v59 = vpack.c.bf16 %v1012_v57, %v1012_v57 }
 0x186   :  { %v824_v60 = vpop.f32.mrf.mxu2 }
 0x187   :  { %1110 = vst.msk [vmem:[%s2419_s9 + $0xbc] sm:$0xf] %vm263_vm1, %v1061_v59  ;;  %v825_v61 = vadd.f32 %v1911_v21, %v824_v60 }
 0x189   :  { %v958_v62 = vadd.f32 %v957_v6, %v825_v61 }
 0x18b   :  { %v1013_v1 = vmax.f32 %v958_v62, %v1918_v28 }
 0x18d   :  { %v1062_v3 = vpack.c.bf16 %v1013_v1, %v1013_v1 }
 0x18e   :  { %v826_v63 = vpop.f32.mrf.mxu2 }
 0x18f   :  { %1111 = vst.msk [vmem:[%s2419_s9 + $0xc0] sm:$0xf] %vm263_vm1, %v1062_v3 }

// kernel: rpn_forward.3
= control target key start
LH: loop header
LB: loop body
LE: loop exit
PB: predicated region body
PF: predicated region fallthrough
CT: control target
= control target key end

     0   :  { %s4345_s21 = smov 0   ;;  %s6542_s0 = inlined_call_operand.vmem [shape: bf16[2,14,14,48], index: 0, kind: input, shape index: {}]   ;;  %s6543_s1 = inlined_call_operand.vmem [shape: bf16[2,6,6,48], index: 1, kind: input, shape index: {}]   ;;  %s6544_s2 = inlined_call_operand.vmem [shape: bf16[48,32], index: 2, kind: input, shape index: {}]   ;;  %s6545_s3 = inlined_call_operand.vmem [shape: f32[1,32], index: 3, kind: input, shape index: {}]   ;;  %s6546_s4 = inlined_call_operand.vmem [shape: bf16[32,30], index: 4, kind: input, shape index: {}]   ;;  %s6547_s5 = inlined_call_operand.vmem [shape: f32[1,30], index: 5, kind: input, shape index: {}]   ;;  %s6548_s6 = inlined_call_operand.vmem [shape: f32[2,9,9,30], index: 6, kind: output, shape index: {}]  }
   0x1 LB: > { %s4196_s22 = sadd.s32 4294967295, %s4308_s21   ;;  %p4200_p0 = scmp.ge.s32.totalorder %s4308_s21, 1  ;;  %s4308_s21 = sphi %s4345_s21, %s16_s21  }
   0x2   : > { %p222_p1 = scmp.lt.s32.totalorder %s4308_s21, 3 }
   0x4   : > { %p223_p2 = pnand %p4200_p0, %p222_p1 }
   0x6   : > { %226 = sbr.rel (%p223_p2) target bundleno = 878 (0x36e), region = 44 }
   0xb   : > { %v4356_v0 = vld [vmem:[%s6544_s2 + $0x10] sm:$0xff]  ;;  %p257_p3 = scmp.lt.s32.totalorder %s4196_s22, 1  ;;  %v4362_v1 = vld [vmem:[%s6544_s2 + $0x8] sm:$0xff]  ;;  %v4373_v2 = vld [vmem:[%s6544_s2] sm:$0xff]  ;;  %vm605_vm0 = vcmask 1046528   ;;  %vm1254_vm1 = vcmask 1045504  }
   0xc   : > { %3752 = vmatpush.bf16.msra.mxu0 %v4356_v0  ;;  %6919 = vst [vmem:[#allocation2_spill] sm:$0xff] %v4362_v1  ;;  %3810 = vmatpush.bf16.msra.mxu2 %v4356_v0  ;;  %vm1875_vm2 = vcmask 1044480   ;;  %vm2524_vm3 = vcmask 1043456   ;;  %vm3145_vm4 = vcmask 1042432   ;;  %vm3743_vm5 = vcmask 392192  }
   0xd   : > { %s7297_s22 = smov (!%p257_p3, %s4196_s22), 1  ;;  %6920 = vst [vmem:[#allocation3_spill] sm:$0xff] %v4373_v2  ;;  %vm3779_vm6 = vcmask 261120   ;;  %vm3797_vm7 = vcmask 244736   ;;  %vm3799_vm8 = vcmask 237568  }
   0xe   : > { %s4280_s27 = smul.u32 112, %s7297_s22 }
   0xf   : > { %s4281_s28 = smul.u32 24, %s7297_s22 }
  0x10   : > { %3753 = vmatpush.bf16.msra.mxu0 %v4362_v1  ;;  %s4378_s9 = scalar_lea.vmem %s6542_s0, %s4280_s27  ;;  %3811 = vmatpush.bf16.msra.mxu2 %v4362_v1 }
  0x11   : > { %v4382_v3 = vld [vmem:[%s4378_s9] sm:$0xf]  ;;  %v4385_v4 = vld [vmem:[%s4378_s9 + $0x4] sm:$0x1]  ;;  %v275_v5 = vld [vmem:[%s4378_s9 + $0x8] sm:$0xf]  ;;  %s4391_s12 = scalar_lea.vmem %s6543_s1, %s4281_s28 }
  0x12   : > { %v276_v6 = vld [vmem:[%s4378_s9 + $0xc] sm:$0x1]  ;;  %v277_v7 = vld [vmem:[%s4378_s9 + $0x10] sm:$0xf]  ;;  %v278_v8 = vld [vmem:[%s4378_s9 + $0x14] sm:$0x1]  ;;  %v303_v12 = vunpack.c.l.bf16 %v4382_v3  ;;  %v304_v16 = vunpack.c.l.bf16 %v4385_v4  ;;  %v4405_v17 = vunpack.c.l.bf16 %v275_v5 }
  0x13   : > { %v279_v9 = vld [vmem:[%s4378_s9 + $0x18] sm:$0xf]  ;;  %v280_v10 = vld [vmem:[%s4378_s9 + $0x1c] sm:$0x1]  ;;  %v281_v11 = vld [vmem:[%s4378_s9 + $0x20] sm:$0xf]  ;;  %v4407_v18 = vunpack.c.l.bf16 %v276_v6  ;;  %v4409_v19 = vunpack.c.l.bf16 %v277_v7  ;;  %v4413_v21 = vunpack.c.l.bf16 %v278_v8 }
  0x14   : > { %3754 = vmatpush.bf16.msra.mxu0 %v4373_v2  ;;  %v282_v13 = vld [vmem:[%s4378_s9 + $0x24] sm:$0x1]  ;;  %v283_v14 = vld [vmem:[%s4378_s9 + $0x28] sm:$0xf]  ;;  %v284_v15 = vld [vmem:[%s4378_s9 + $0x2c] sm:$0x1]  ;;  %3812 = vmatpush.bf16.msra.mxu2 %v4373_v2  ;;  %v4415_v22 = vunpack.c.l.bf16 %v279_v9  ;;  %v4417_v23 = vunpack.c.l.bf16 %v280_v10  ;;  %v4419_v24 = vunpack.c.l.bf16 %v281_v11 }
  0x15   : > { %v301_v20 = vld [vmem:[%s4391_s12] sm:$0x1]  ;;  %v4204_v25 = vld [vmem:[%s4391_s12 + $0x4] sm:$0x1]  ;;  %v4205_v26 = vld [vmem:[%s4391_s12 + $0x8] sm:$0x1]  ;;  %v4424_v28 = vunpack.c.l.bf16 %v282_v13  ;;  %v4429_v34 = vunpack.c.l.bf16 %v283_v14  ;;  %v4431_v38 = vunpack.c.l.bf16 %v284_v15 }
  0x16   : > { %6921 = vst [vmem:[#allocation4_spill] sm:$0xff] %v4417_v23  ;;  %v302_v27 = vunpack.c.l.bf16 %v301_v20  ;;  %v360_v29 = vunpack.c.l.bf16 %v4204_v25  ;;  %v402_v30 = vunpack.c.l.bf16 %v4205_v26  ;;  %v4206_v31 = vld [vmem:[%s4391_s12 + $0xc] sm:$0x1]  ;;  %v4207_v32 = vld [vmem:[%s4391_s12 + $0x10] sm:$0x1] }
  0x17   : > { %6922 = vst [vmem:[#allocation5_spill] sm:$0xff] %v4419_v24  ;;  %v4208_v33 = vld [vmem:[%s4391_s12 + $0x14] sm:$0x1]  ;;  %v444_v35 = vunpack.c.l.bf16 %v4206_v31  ;;  %v486_v36 = vunpack.c.l.bf16 %v4207_v32 }
  0x18   : > { %3892 = vmatpush.bf16.msrb.mxu0 %v4356_v0  ;;  %6923 = vst [vmem:[#allocation6_spill] sm:$0xff] %v4424_v28  ;;  %v528_v37 = vunpack.c.l.bf16 %v4208_v33  ;;  %v4433_v39 = vperm.slane %v302_v27, 0  ;;  %v4435_v40 = vperm.slane %v360_v29, 0  ;;  %v4437_v41 = vperm.slane %v402_v30, 0  ;;  %v4496_v33 = vld [vmem:[%s4378_s9] sm:$0xe] }
  0x19   : > { %6924 = vst [vmem:[#allocation7_spill] sm:$0xff] %v4429_v34  ;;  %v4439_v42 = vperm.slane %v444_v35, 0  ;;  %v4441_v43 = vperm.slane %v486_v36, 0  ;;  %v4445_v45 = vperm.slane %v302_v27, 1  ;;  %v4452_v49 = vperm.slane %v360_v29, 1 }
  0x1a   : > { %6925 = vst [vmem:[#allocation8_spill] sm:$0xff] %v4431_v38  ;;  %v4443_v44 = vperm.slane %v528_v37, 0  ;;  %v322_v46 = vmul.f32 %v4433_v39, %v303_v12  ;;  %v323_v47 = vmul.f32 %v4433_v39, %v304_v16  ;;  %v364_v48 = vmul.f32 %v4435_v40, %v4405_v17  ;;  %v4493_v27 = vld [vmem:[%s4391_s12] sm:$0x2] }
  0x1b   : > { %6926 = vst [vmem:[#allocation9_spill] sm:$0xff] %v4433_v39  ;;  %v365_v50 = vmul.f32 %v4435_v40, %v4407_v18  ;;  %v406_v51 = vmul.f32 %v4437_v41, %v4409_v19  ;;  %v407_v52 = vmul.f32 %v4437_v41, %v4413_v21  ;;  %v448_v53 = vmul.f32 %v4439_v42, %v4415_v22 }
  0x1c   : > { %6927 = vst [vmem:[#allocation10_spill] sm:$0xff] %v4435_v40  ;;  %3893 = vmatpush.bf16.msrb.mxu0 %v4362_v1  ;;  %v382_v54 = vadd.f32 %v364_v48, %v322_v46  ;;  %v449_v55 = vmul.f32 %v4439_v42, %v4417_v23  ;;  %v490_v56 = vmul.f32 %v4441_v43, %v4419_v24  ;;  %v4479_v7 = vperm.slane %v402_v30, 1 }
  0x1d   : > { %6928 = vst [vmem:[#allocation11_spill] sm:$0xff] %v4437_v41  ;;  %v491_v57 = vmul.f32 %v4441_v43, %v4424_v28  ;;  %v383_v58 = vadd.f32 %v365_v50, %v323_v47  ;;  %v532_v59 = vmul.f32 %v4443_v44, %v4429_v34  ;;  %v533_v60 = vmul.f32 %v4443_v44, %v4431_v38 }
  0x1e   : > { %6929 = vst [vmem:[#allocation12_spill] sm:$0xff] %v4439_v42  ;;  %v569_v61 = vmul.f32 %v4445_v45, %v303_v12  ;;  %v424_v62 = vadd.f32 %v406_v51, %v382_v54  ;;  %v570_v63 = vmul.f32 %v4445_v45, %v304_v16  ;;  %v670_v3 = vmul.f32 %v4452_v49, %v4405_v17 }
  0x1f   : > { %6930 = vst [vmem:[#allocation13_spill] sm:$0xff] %v4441_v43  ;;  %v671_v4 = vmul.f32 %v4452_v49, %v4407_v18  ;;  %v425_v5 = vadd.f32 %v407_v52, %v383_v58  ;;  %v4481_v8 = vperm.slane %v444_v35, 1  ;;  %v770_v14 = vmul.f32 %v4479_v7, %v4409_v19 }
  0x20   : > { %6931 = vst [vmem:[#allocation14_spill] sm:$0xff] %v4443_v44  ;;  %3894 = vmatpush.bf16.msrb.mxu0 %v4373_v2  ;;  %v606_v6 = vrot.slane %v569_v61, 1  ;;  %v466_v9 = vadd.f32 %v448_v53, %v424_v62  ;;  %v607_v10 = vrot.slane %v570_v63, 1  ;;  %v706_v11 = vrot.slane %v670_v3, 1  ;;  %v4505_v53 = vld [vmem:[%s4378_s9 + $0x4] sm:$0x3] }
  0x21   : > { %6932 = vst [vmem:[#allocation15_spill] sm:$0xff] %v4445_v45  ;;  %v707_v12 = vrot.slane %v671_v4, 1  ;;  %v467_v13 = vadd.f32 %v449_v55, %v425_v5  ;;  %v771_v15 = vmul.f32 %v4479_v7, %v4413_v21  ;;  %v870_v16 = vmul.f32 %v4481_v8, %v4415_v22  ;;  %v1172_v62 = vld [vmem:[%s4378_s9 + $0xc] sm:$0x3]  ;;  %v1173_v63 = vld [vmem:[%s4378_s9 + $0x10] sm:$0xe] }
  0x22   : > { %6933 = vst [vmem:[#allocation16_spill] sm:$0xff] %v4452_v49  ;;  %v508_v20 = vadd.f32 %v490_v56, %v466_v9  ;;  %v608_v25 = vsel %vm605_vm0, %v606_v6, %v607_v10  ;;  %v871_v26 = vmul.f32 %v4481_v8, %v4417_v23  ;;  %v806_v30 = vrot.slane %v770_v14, 1  ;;  %v1171_v56 = vld [vmem:[%s4378_s9 + $0x8] sm:$0xe]  ;;  %v1174_v3 = vld [vmem:[%s4378_s9 + $0x14] sm:$0x3] }
  0x23   : > { %6934 = vst [vmem:[#allocation17_spill] sm:$0xff] %v4479_v7  ;;  %v509_v29 = vadd.f32 %v491_v57, %v467_v13  ;;  %v807_v31 = vrot.slane %v771_v15, 1  ;;  %v906_v32 = vrot.slane %v870_v16, 1  ;;  %v4498_v47 = vperm.slane %v486_v36, 1  ;;  %v1175_v9 = vld [vmem:[%s4378_s9 + $0x18] sm:$0xe] }
  0x24   : > { %6935 = vst [vmem:[#allocation18_spill] sm:$0xff] %v4481_v8  ;;  %v550_v35 = vadd.f32 %v532_v59, %v508_v20  ;;  %v907_v46 = vrot.slane %v871_v26, 1  ;;  %v4500_v48 = vperm.slane %v528_v37, 1  ;;  %v708_v51 = vsel %vm605_vm0, %v706_v11, %v707_v12  ;;  %v1177_v16 = vld [vmem:[%s4378_s9 + $0x20] sm:$0xe] }
  0x25   : > { %6936 = vst [vmem:[#allocation19_spill] sm:$0xff] %v4498_v47  ;;  %v551_v50 = vadd.f32 %v533_v60, %v509_v29  ;;  %v808_v52 = vsel %vm605_vm0, %v806_v30, %v807_v31  ;;  %v6553_v54 = vunpack.c.l.bf16 %v4493_v27  ;;  %v970_v36 = vmul.f32 %v4498_v47, %v4419_v24  ;;  %v1178_v20 = vld [vmem:[%s4378_s9 + $0x24] sm:$0x3]  ;;  %v1179_v30 = vld [vmem:[%s4378_s9 + $0x28] sm:$0xe] }
  0x26   : > { %6937 = vst [vmem:[#allocation20_spill] sm:$0xff] %v4500_v48  ;;  %v651_v55 = vadd.f32 %v608_v25, %v550_v35  ;;  %v971_v37 = vmul.f32 %v4498_v47, %v4424_v28  ;;  %v6552_v57 = vunpack.c.l.bf16 %v4496_v33  ;;  %v908_v59 = vsel %vm605_vm0, %v906_v32, %v907_v46  ;;  %v1180_v32 = vld [vmem:[%s4378_s9 + $0x2c] sm:$0x3] }
  0x27   : > { %v652_v58 = vadd.f32 %v607_v10, %v551_v50  ;;  %v1070_v60 = vmul.f32 %v4500_v48, %v4429_v34  ;;  %v1071_v61 = vmul.f32 %v4500_v48, %v4431_v38  ;;  %v1006_v5 = vrot.slane %v970_v36, 1  ;;  %v1176_v10 = vld [vmem:[%s4378_s9 + $0x1c] sm:$0x3] }
  0x28   : > { %v751_v4 = vadd.f32 %v708_v51, %v651_v55  ;;  %v1007_v6 = vrot.slane %v971_v37, 1  ;;  %v6551_v11 = vunpack.c.l.bf16 %v4505_v53  ;;  %v4527_v25 = vunpack.c.l.bf16 %v1171_v56  ;;  %v4542_v37 = vld [vmem:[%s4391_s12 + $0x4] sm:$0x2]  ;;  %v4545_v56 = vld [vmem:[%s4391_s12 + $0x8] sm:$0x2] }
  0x29   : > { %v752_v13 = vadd.f32 %v707_v12, %v652_v58  ;;  %v1106_v14 = vrot.slane %v1070_v60, 1  ;;  %v1107_v15 = vrot.slane %v1071_v61, 1  ;;  %v4532_v35 = vunpack.c.l.bf16 %v1172_v62 }
  0x2a   : > { %6938 = vst [vmem:[#allocation21_spill] sm:$0xff] %v4527_v25  ;;  %v851_v26 = vadd.f32 %v808_v52, %v751_v4  ;;  %v1008_v29 = vsel %vm605_vm0, %v1006_v5, %v1007_v6  ;;  %v4534_v50 = vunpack.c.l.bf16 %v1173_v63  ;;  %v4537_v55 = vunpack.c.l.bf16 %v1174_v3  ;;  %v4548_v52 = vld [vmem:[%s4391_s12 + $0xc] sm:$0x2] }
  0x2b   : > { %6939 = vst [vmem:[#allocation22_spill] sm:$0xff] %v4532_v35  ;;  %v852_v51 = vadd.f32 %v807_v31, %v752_v13  ;;  %v1108_v12 = vsel %vm605_vm0, %v1106_v14, %v1107_v15  ;;  %v4539_v36 = vunpack.c.l.bf16 %v1175_v9  ;;  %v4550_v60 = vunpack.c.l.bf16 %v1176_v10  ;;  %v4568_v13 = vld [vmem:[%s4391_s12 + $0x10] sm:$0x2] }
  0x2c   : > { %6940 = vst [vmem:[#allocation23_spill] sm:$0xff] %v4534_v50  ;;  %v951_v58 = vadd.f32 %v908_v59, %v851_v26  ;;  %v4552_v61 = vunpack.c.l.bf16 %v1177_v16  ;;  %v4554_v62 = vunpack.c.l.bf16 %v1178_v20  ;;  %v4556_v63 = vunpack.c.l.bf16 %v1179_v30 }
  0x2d   : > { %6941 = vst [vmem:[#allocation24_spill] sm:$0xff] %v4537_v55  ;;  %v952_v31 = vadd.f32 %v907_v46, %v852_v51  ;;  %v4558_v3 = vunpack.c.l.bf16 %v1180_v32  ;;  %v4562_v4 = vperm.slane %v6553_v54, 2  ;;  %v1319_v9 = vunpack.c.l.bf16 %v4542_v37 }
  0x2e   : > { %6942 = vst [vmem:[#allocation25_spill] sm:$0xff] %v4539_v36  ;;  %v1051_v5 = vadd.f32 %v1008_v29, %v951_v58  ;;  %v6550_v59 = vunpack.c.l.bf16 %v4545_v56  ;;  %v6549_v10 = vunpack.c.l.bf16 %v4548_v52  ;;  %v1631_v37 = vunpack.c.l.bf16 %v4568_v13 }
  0x2f   : > { %6943 = vst [vmem:[#allocation26_spill] sm:$0xff] %v4550_v60  ;;  %v1052_v14 = vadd.f32 %v1007_v6, %v952_v31  ;;  %v1218_v46 = vmul.f32 %v4562_v4, %v6552_v57  ;;  %v1219_v16 = vmul.f32 %v4562_v4, %v6551_v11  ;;  %v4576_v26 = vperm.slane %v1319_v9, 2 }
  0x30   : > { %6944 = vst [vmem:[#allocation27_spill] sm:$0xff] %v4552_v61  ;;  %v1151_v20 = vadd.f32 %v1108_v12, %v1051_v5  ;;  %v4580_v29 = vperm.slane %v6550_v59, 2  ;;  %v4584_v6 = vperm.slane %v6549_v10, 2  ;;  %v4603_v1 = vperm.slane %v1631_v37, 2 }
  0x31   : > { %6945 = vst [vmem:[#allocation28_spill] sm:$0xff] %v4554_v62  ;;  %v1152_v30 = vadd.f32 %v1107_v15, %v1052_v14  ;;  %v1255_v32 = vrot.slane %v1218_v46, 2  ;;  %v1256_v51 = vrot.slane %v1219_v16, 2  ;;  %v1323_v58 = vmul.f32 %v4576_v26, %v4527_v25  ;;  %v4601_v14 = vld [vmem:[%s4391_s12 + $0x14] sm:$0x2] }
  0x32   : > { %6946 = vst [vmem:[#allocation29_spill] sm:$0xff] %v4556_v63  ;;  %v1324_v12 = vmul.f32 %v4576_v26, %v4532_v35  ;;  %v1427_v31 = vmul.f32 %v4580_v29, %v4534_v50  ;;  %v1428_v5 = vmul.f32 %v4580_v29, %v4537_v55  ;;  %v1531_v15 = vmul.f32 %v4584_v6, %v4539_v36 }
  0x33   : > { %6947 = vst [vmem:[#allocation30_spill] sm:$0xff] %v4558_v3  ;;  %v1257_v10 = vsel %vm1254_vm1, %v1255_v32, %v1256_v51  ;;  %v1301_v59 = vadd.f32 %v1256_v51, %v1152_v30  ;;  %v1532_v13 = vmul.f32 %v4584_v6, %v4550_v60  ;;  %v1359_v16 = vrot.slane %v1323_v58, 2 }
  0x34   : > { %6948 = vst [vmem:[#allocation31_spill] sm:$0xff] %v4562_v4  ;;  %v1300_v46 = vadd.f32 %v1257_v10, %v1151_v20  ;;  %v1360_v11 = vrot.slane %v1324_v12, 2  ;;  %v1463_v57 = vrot.slane %v1427_v31, 2  ;;  %v1464_v54 = vrot.slane %v1428_v5, 2 }
  0x35   : > { %6949 = vst [vmem:[#allocation32_spill] sm:$0xff] %v4576_v26  ;;  %v1567_v2 = vrot.slane %v1531_v15, 2  ;;  %v1568_v26 = vrot.slane %v1532_v13, 2  ;;  %v1735_v51 = vunpack.c.l.bf16 %v4601_v14  ;;  %v1635_v58 = vmul.f32 %v4603_v1, %v4552_v61 }
  0x36   : > { %6950 = vst [vmem:[#allocation33_spill] sm:$0xff] %v4580_v29  ;;  %v1361_v32 = vsel %vm1254_vm1, %v1359_v16, %v1360_v11  ;;  %v1405_v30 = vadd.f32 %v1360_v11, %v1301_v59  ;;  %v6953_v29 = vunpack.c.l.bf16 %v4493_v27  ;;  %v1465_v10 = vsel %vm1254_vm1, %v1463_v57, %v1464_v54 }
  0x37   : > { %6951 = vst [vmem:[#allocation34_spill] sm:$0xff] %v4584_v6  ;;  %v1404_v6 = vadd.f32 %v1361_v32, %v1300_v46  ;;  %v1569_v20 = vsel %vm1254_vm1, %v1567_v2, %v1568_v26  ;;  %v1636_v31 = vmul.f32 %v4603_v1, %v4554_v62  ;;  %v4617_v5 = vperm.slane %v1735_v51, 2 }
  0x38   : > { %6952 = vst [vmem:[#allocation35_spill] sm:$0xff] %v4603_v1  ;;  %v4609_v4 = vperm.slane %v6953_v29, 3  ;;  %v1509_v12 = vadd.f32 %v1464_v54, %v1405_v30  ;;  %v6956_v11 = vunpack.c.l.bf16 %v4496_v33  ;;  %v1671_v29 = vrot.slane %v1635_v58, 2 }
  0x39   : > { %6955 = vst [vmem:[#allocation37_spill] sm:$0xff] %v4617_v5  ;;  %v1508_v59 = vadd.f32 %v1465_v10, %v1404_v6  ;;  %v6957_v15 = vunpack.c.l.bf16 %v4505_v53  ;;  %v1672_v13 = vrot.slane %v1636_v31, 2  ;;  %v1739_v54 = vmul.f32 %v4617_v5, %v4556_v63 }
  0x3a   : > { %6954 = vst [vmem:[#allocation36_spill] sm:$0xff] %v4609_v4  ;;  %v1839_v27 = vmul.f32 %v4609_v4, %v6956_v11  ;;  %v1613_v2 = vadd.f32 %v1568_v26, %v1509_v12  ;;  %v1740_v14 = vmul.f32 %v4617_v5, %v4558_v3  ;;  %v4629_v32 = vperm.slane %v1319_v9, 3 }
  0x3b   : > { %v1840_v57 = vmul.f32 %v4609_v4, %v6957_v15  ;;  %v1612_v46 = vadd.f32 %v1569_v20, %v1508_v59  ;;  %v1673_v6 = vsel %vm1254_vm1, %v1671_v29, %v1672_v13  ;;  %v1775_v53 = vrot.slane %v1739_v54, 2 }
  0x3c   : > { %v1876_v16 = vrot.slane %v1839_v27, 3  ;;  %6958 = vst [vmem:[#allocation38_spill] sm:$0xff] %v4629_v32  ;;  %v1717_v30 = vadd.f32 %v1672_v13, %v1613_v2  ;;  %v1776_v10 = vrot.slane %v1740_v14, 2  ;;  %v1940_v12 = vmul.f32 %v4629_v32, %v4527_v25 }
  0x3d   : > { %v1877_v33 = vrot.slane %v1840_v57, 3  ;;  %v1716_v58 = vadd.f32 %v1673_v6, %v1612_v46  ;;  %v1941_v31 = vmul.f32 %v4629_v32, %v4532_v35  ;;  %v6959_v9 = vunpack.c.l.bf16 %v4545_v56  ;;  %v2450_v32 = vld [vmem:[%s4378_s9 + $0x2c] sm:$0x7] }
  0x3e   : > { %v1777_v20 = vsel %vm1254_vm1, %v1775_v53, %v1776_v10  ;;  %v1821_v11 = vadd.f32 %v1776_v10, %v1717_v30  ;;  %v6961_v59 = vunpack.c.l.bf16 %v4548_v52  ;;  %v1976_v57 = vrot.slane %v1940_v12, 3  ;;  %v4663_v12 = vld [vmem:[%s4378_s9] sm:$0xc] }
  0x3f   : > { %v1878_v26 = vsel %vm1875_vm2, %v1876_v16, %v1877_v33  ;;  %v4640_v27 = vperm.slane %v6959_v9, 3  ;;  %v1820_v15 = vadd.f32 %v1777_v20, %v1716_v58  ;;  %v1977_v2 = vrot.slane %v1941_v31, 3  ;;  %v4668_v9 = vld [vmem:[%s4378_s9 + $0x4] sm:$0x7] }
  0x40   : > { %v4644_v29 = vperm.slane %v6961_v59, 3  ;;  %v4646_v13 = vperm.slane %v1631_v37, 3  ;;  %v1922_v54 = vadd.f32 %v1877_v33, %v1821_v11  ;;  %v4660_v33 = vld [vmem:[%s4391_s12] sm:$0x4] }
  0x41   : > { %6960 = vst [vmem:[#allocation39_spill] sm:$0xff] %v4640_v27  ;;  %v2040_v14 = vmul.f32 %v4640_v27, %v4534_v50  ;;  %v2041_v46 = vmul.f32 %v4640_v27, %v4537_v55  ;;  %v1921_v52 = vadd.f32 %v1878_v26, %v1820_v15  ;;  %v1978_v16 = vsel %vm1875_vm2, %v1976_v57, %v1977_v2  ;;  %v2449_v27 = vld [vmem:[%s4378_s9 + $0x28] sm:$0xc] }
  0x42   : > { %6962 = vst [vmem:[#allocation40_spill] sm:$0xff] %v4644_v29  ;;  %v2140_v56 = vmul.f32 %v4644_v29, %v4539_v36  ;;  %v2141_v6 = vmul.f32 %v4644_v29, %v4550_v60  ;;  %v2240_v37 = vmul.f32 %v4646_v13, %v4552_v61  ;;  %v2022_v30 = vadd.f32 %v1977_v2, %v1922_v54  ;;  %v2441_v2 = vld [vmem:[%s4378_s9 + $0x8] sm:$0xc]  ;;  %v2442_v54 = vld [vmem:[%s4378_s9 + $0xc] sm:$0x7] }
  0x43   : > { %6963 = vst [vmem:[#allocation41_spill] sm:$0xff] %v4646_v13  ;;  %v2076_v53 = vrot.slane %v2040_v14, 3  ;;  %v2077_v10 = vrot.slane %v2041_v46, 3  ;;  %v2021_v26 = vadd.f32 %v1978_v16, %v1921_v52  ;;  %v2241_v20 = vmul.f32 %v4646_v13, %v4554_v62  ;;  %v2443_v16 = vld [vmem:[%s4378_s9 + $0x10] sm:$0xc] }
  0x44   : > { %v2176_v58 = vrot.slane %v2140_v56, 3  ;;  %v2177_v31 = vrot.slane %v2141_v6, 3  ;;  %v2276_v11 = vrot.slane %v2240_v37, 3  ;;  %v4671_v57 = vperm.slane %v1735_v51, 3 }
  0x45   : > { %v2078_v59 = vsel %vm1875_vm2, %v2076_v53, %v2077_v10  ;;  %v2122_v15 = vadd.f32 %v2077_v10, %v2022_v30  ;;  %v2468_v14 = vunpack.c.l.bf16 %v4660_v33  ;;  %v2277_v52 = vrot.slane %v2241_v20, 3  ;;  %v2444_v53 = vld [vmem:[%s4378_s9 + $0x14] sm:$0x7]  ;;  %v2445_v10 = vld [vmem:[%s4378_s9 + $0x18] sm:$0xc] }
  0x46   : > { %6964 = vst [vmem:[#allocation42_spill] sm:$0xff] %v4671_v57  ;;  %v2121_v46 = vadd.f32 %v2078_v59, %v2021_v26  ;;  %v2178_v56 = vsel %vm1875_vm2, %v2176_v58, %v2177_v31  ;;  %v2340_v30 = vmul.f32 %v4671_v57, %v4556_v63  ;;  %v2341_v51 = vmul.f32 %v4671_v57, %v4558_v3  ;;  %v2446_v33 = vld [vmem:[%s4378_s9 + $0x1c] sm:$0x7]  ;;  %v2447_v20 = vld [vmem:[%s4378_s9 + $0x20] sm:$0xc] }
  0x47   : > { %v2222_v37 = vadd.f32 %v2177_v31, %v2122_v15  ;;  %v2278_v58 = vsel %vm1875_vm2, %v2276_v11, %v2277_v52  ;;  %v2448_v31 = vld [vmem:[%s4378_s9 + $0x24] sm:$0x7]  ;;  %v4690_v15 = vunpack.c.l.bf16 %v2441_v2  ;;  %v4692_v6 = vunpack.c.l.bf16 %v2442_v54  ;;  %v4708_v54 = vld [vmem:[%s4391_s12 + $0x8] sm:$0x4] }
  0x48   : > { %v2221_v59 = vadd.f32 %v2178_v56, %v2121_v46  ;;  %v2376_v29 = vrot.slane %v2340_v30, 3  ;;  %v2377_v57 = vrot.slane %v2341_v51, 3  ;;  %v4696_v26 = vunpack.c.l.bf16 %v2443_v16  ;;  %v4705_v2 = vld [vmem:[%s4391_s12 + $0x4] sm:$0x4] }
  0x49   : > { %v2322_v13 = vadd.f32 %v2277_v52, %v2222_v37  ;;  %v4698_v56 = vunpack.c.l.bf16 %v2444_v53  ;;  %v4700_v11 = vunpack.c.l.bf16 %v2445_v10  ;;  %v4702_v4 = vunpack.c.l.bf16 %v2446_v33  ;;  %v4711_v52 = vld [vmem:[%s4391_s12 + $0xc] sm:$0x4]  ;;  %v4722_v53 = vld [vmem:[%s4391_s12 + $0x14] sm:$0x4] }
  0x4a   : > { %v2321_v46 = vadd.f32 %v2278_v58, %v2221_v59  ;;  %v2378_v37 = vsel %vm1875_vm2, %v2376_v29, %v2377_v57  ;;  %v4714_v51 = vunpack.c.l.bf16 %v2447_v20  ;;  %v4716_v16 = vunpack.c.l.bf16 %v2448_v31  ;;  %v4719_v59 = vld [vmem:[%s4391_s12 + $0x10] sm:$0x4] }
  0x4b   : > { %v2422_v30 = vadd.f32 %v2377_v57, %v2322_v13  ;;  %v4724_v33 = vunpack.c.l.bf16 %v2449_v27  ;;  %v4726_v58 = vunpack.c.l.bf16 %v2450_v32  ;;  %v4728_v5 = vperm.slane %v2468_v14, 4 }
  0x4c   : > { %v2421_v10 = vadd.f32 %v2378_v37, %v2321_v46  ;;  %v2589_v3 = vunpack.c.l.bf16 %v4705_v2  ;;  %v2693_v29 = vunpack.c.l.bf16 %v4708_v54  ;;  %v6591_v13 = vunpack.c.l.bf16 %v4711_v52 }
  0x4d   : > { %6965 = vst [vmem:[#allocation43_spill] sm:$0xff] %v4728_v5  ;;  %v6966_v57 = vunpack.c.l.bf16 %v4663_v12  ;;  %v6967_v31 = vunpack.c.l.bf16 %v4668_v9  ;;  %v6590_v32 = vunpack.c.l.bf16 %v4719_v59  ;;  %v6592_v46 = vunpack.c.l.bf16 %v4722_v53 }
  0x4e   : > { %v4741_v37 = vperm.slane %v2589_v3, 4  ;;  %v4743_v1 = vperm.slane %v2693_v29, 4  ;;  %v4747_v2 = vperm.slane %v6591_v13, 4  ;;  %v4749_v54 = vperm.slane %v2468_v14, 5 }
  0x4f   : > { %v2488_v20 = vmul.f32 %v4728_v5, %v6966_v57  ;;  %v2489_v27 = vmul.f32 %v4728_v5, %v6967_v31  ;;  %v4753_v62 = vperm.slane %v6590_v32, 4  ;;  %v4757_v31 = vperm.slane %v6592_v46, 4 }
  0x50   : > { %6968 = vst [vmem:[#allocation44_spill] sm:$0xff] %v4741_v37  ;;  %v2593_v5 = vmul.f32 %v4741_v37, %v4690_v15  ;;  %v2594_v61 = vmul.f32 %v4741_v37, %v4692_v6  ;;  %v2697_v14 = vmul.f32 %v4743_v1, %v4696_v26  ;;  %v2801_v13 = vmul.f32 %v4747_v2, %v4700_v11 }
  0x51   : > { %6969 = vst [vmem:[#allocation45_spill] sm:$0xff] %v4743_v1  ;;  %v2525_v63 = vrot.slane %v2488_v20, 4  ;;  %v2526_v57 = vrot.slane %v2489_v27, 4  ;;  %v2698_v20 = vmul.f32 %v4743_v1, %v4698_v56  ;;  %v2802_v46 = vmul.f32 %v4747_v2, %v4702_v4 }
  0x52   : > { %6970 = vst [vmem:[#allocation46_spill] sm:$0xff] %v4747_v2  ;;  %v2629_v36 = vrot.slane %v2593_v5, 4  ;;  %v2630_v55 = vrot.slane %v2594_v61, 4  ;;  %v2733_v50 = vrot.slane %v2697_v14, 4  ;;  %v2837_v25 = vrot.slane %v2801_v13, 4 }
  0x53   : > { %6971 = vst [vmem:[#allocation47_spill] sm:$0xff] %v4749_v54  ;;  %v2527_v27 = vsel %vm2524_vm3, %v2525_v63, %v2526_v57  ;;  %v2571_v32 = vadd.f32 %v2526_v57, %v2422_v30  ;;  %v2734_v37 = vrot.slane %v2698_v20, 4  ;;  %v2838_v35 = vrot.slane %v2802_v46, 4 }
  0x54   : > { %6972 = vst [vmem:[#allocation48_spill] sm:$0xff] %v4753_v62  ;;  %v2570_v60 = vadd.f32 %v2527_v27, %v2421_v10  ;;  %v2905_v48 = vmul.f32 %v4753_v62, %v4714_v51  ;;  %v2631_v1 = vsel %vm2524_vm3, %v2629_v36, %v2630_v55  ;;  %v2906_v30 = vmul.f32 %v4753_v62, %v4716_v16 }
  0x55   : > { %6973 = vst [vmem:[#allocation49_spill] sm:$0xff] %v4757_v31  ;;  %v2675_v63 = vadd.f32 %v2630_v55, %v2571_v32  ;;  %v3009_v57 = vmul.f32 %v4757_v31, %v4724_v33  ;;  %v2735_v5 = vsel %vm2524_vm3, %v2733_v50, %v2734_v37  ;;  %v2839_v61 = vsel %vm2524_vm3, %v2837_v25, %v2838_v35 }
  0x56   : > { %v2674_v2 = vadd.f32 %v2631_v1, %v2570_v60  ;;  %v2941_v10 = vrot.slane %v2905_v48, 4  ;;  %v2942_v46 = vrot.slane %v2906_v30, 4  ;;  %v3010_v14 = vmul.f32 %v4757_v31, %v4726_v58 }
  0x57   : > { %v2779_v13 = vadd.f32 %v2734_v37, %v2675_v63  ;;  %v3045_v20 = vrot.slane %v3009_v57, 4  ;;  %v6974_v55 = vunpack.c.l.bf16 %v4663_v12  ;;  %v6975_v27 = vunpack.c.l.bf16 %v4668_v9 }
  0x58   : > { %v2778_v36 = vadd.f32 %v2735_v5, %v2674_v2  ;;  %v2943_v25 = vsel %vm2524_vm3, %v2941_v10, %v2942_v46  ;;  %v3046_v48 = vrot.slane %v3010_v14, 4  ;;  %v4790_v60 = vperm.slane %v2589_v3, 5 }
  0x59   : > { %v3109_v32 = vmul.f32 %v4749_v54, %v6974_v55  ;;  %v3110_v1 = vmul.f32 %v4749_v54, %v6975_v27  ;;  %v2883_v50 = vadd.f32 %v2838_v35, %v2779_v13  ;;  %v4792_v57 = vperm.slane %v2693_v29, 5 }
  0x5a   : > { %6976 = vst [vmem:[#allocation50_spill] sm:$0xff] %v4790_v60  ;;  %v2882_v37 = vadd.f32 %v2839_v61, %v2778_v36  ;;  %v3047_v12 = vsel %vm2524_vm3, %v3045_v20, %v3046_v48  ;;  %v3210_v9 = vmul.f32 %v4790_v60, %v4690_v15  ;;  %v3211_v5 = vmul.f32 %v4790_v60, %v4692_v6 }
  0x5b   : > { %v3146_v63 = vrot.slane %v3109_v32, 5  ;;  %v3147_v30 = vrot.slane %v3110_v1, 5  ;;  %6977 = vst [vmem:[#allocation51_spill] sm:$0xff] %v4792_v57  ;;  %v2987_v2 = vadd.f32 %v2942_v46, %v2883_v50  ;;  %v3310_v3 = vmul.f32 %v4792_v57, %v4696_v26 }
  0x5c   : > { %v2986_v35 = vadd.f32 %v2943_v25, %v2882_v37  ;;  %v3311_v61 = vmul.f32 %v4792_v57, %v4698_v56  ;;  %v3246_v13 = vrot.slane %v3210_v9, 5  ;;  %v3247_v46 = vrot.slane %v3211_v5, 5 }
  0x5d   : > { %v3148_v10 = vsel %vm3145_vm4, %v3146_v63, %v3147_v30  ;;  %v3091_v29 = vadd.f32 %v3046_v48, %v2987_v2  ;;  %v6978_v14 = vunpack.c.l.bf16 %v4711_v52  ;;  %v3346_v55 = vrot.slane %v3310_v3, 5 }
  0x5e   : > { %v3090_v36 = vadd.f32 %v3047_v12, %v2986_v35  ;;  %v3347_v32 = vrot.slane %v3311_v61, 5  ;;  %v6980_v27 = vunpack.c.l.bf16 %v4719_v59  ;;  %v3248_v25 = vsel %vm3145_vm4, %v3246_v13, %v3247_v46  ;;  %v285_v12 = vld [vmem:[%s4378_s9 + $0x30] sm:$0xf]  ;;  %v286_v61 = vld [vmem:[%s4378_s9 + $0x34] sm:$0x1] }
  0x5f   : > { %v4806_v20 = vperm.slane %v6978_v14, 5  ;;  %v3192_v50 = vadd.f32 %v3147_v30, %v3091_v29  ;;  %v6982_v35 = vunpack.c.l.bf16 %v4722_v53 }
  0x60   : > { %v4810_v1 = vperm.slane %v6980_v27, 5  ;;  %v3191_v52 = vadd.f32 %v3148_v10, %v3090_v36  ;;  %v3348_v63 = vsel %vm3145_vm4, %v3346_v55, %v3347_v32  ;;  %v325_v10 = vmul.f32 %v4433_v39, %v4407_v18 }
  0x61   : > { %6979 = vst [vmem:[#allocation52_spill] sm:$0xff] %v4806_v20  ;;  %v3410_v48 = vmul.f32 %v4806_v20, %v4700_v11  ;;  %v3411_v37 = vmul.f32 %v4806_v20, %v4702_v4  ;;  %v3292_v9 = vadd.f32 %v3247_v46, %v3192_v50  ;;  %v4825_v3 = vperm.slane %v6982_v35, 5 }
  0x62   : > { %6981 = vst [vmem:[#allocation53_spill] sm:$0xff] %v4810_v1  ;;  %v3510_v2 = vmul.f32 %v4810_v1, %v4714_v51  ;;  %v3511_v59 = vmul.f32 %v4810_v1, %v4716_v16  ;;  %v3291_v29 = vadd.f32 %v3248_v25, %v3191_v52 }
  0x63   : > { %v3446_v30 = vrot.slane %v3410_v48, 5  ;;  %v3447_v5 = vrot.slane %v3411_v37, 5  ;;  %6983 = vst [vmem:[#allocation54_spill] sm:$0xff] %v4825_v3  ;;  %v3392_v36 = vadd.f32 %v3347_v32, %v3292_v9  ;;  %v3610_v27 = vmul.f32 %v4825_v3, %v4724_v33 }
  0x64   : > { %v3546_v13 = vrot.slane %v3510_v2, 5  ;;  %v3547_v14 = vrot.slane %v3511_v59, 5  ;;  %v3611_v46 = vmul.f32 %v4825_v3, %v4726_v58  ;;  %v3391_v53 = vadd.f32 %v3348_v63, %v3291_v29 }
  0x65   : > { %v3448_v55 = vsel %vm3145_vm4, %v3446_v30, %v3447_v5  ;;  %v4836_v48 = vunpack.c.l.bf16 %v285_v12  ;;  %v4838_v37 = vunpack.c.l.bf16 %v286_v61  ;;  %v3492_v25 = vadd.f32 %v3447_v5, %v3392_v36 }
  0x66   : > { %v3548_v50 = vsel %vm3145_vm4, %v3546_v13, %v3547_v14  ;;  %v3646_v52 = vrot.slane %v3610_v27, 5  ;;  %v3647_v2 = vrot.slane %v3611_v46, 5  ;;  %v324_v32 = vmul.f32 %v4433_v39, %v4405_v17 }
  0x67   : > { %6984 = vst [vmem:[#allocation55_spill] sm:$0xff] %v4836_v48  ;;  %v3491_v59 = vadd.f32 %v3448_v55, %v3391_v53  ;;  %v366_v9 = vmul.f32 %v4435_v40, %v4409_v19  ;;  %v367_v30 = vmul.f32 %v4435_v40, %v4413_v21  ;;  %v408_v63 = vmul.f32 %v4437_v41, %v4415_v22 }
  0x68   : > { %6985 = vst [vmem:[#allocation56_spill] sm:$0xff] %v4838_v37  ;;  %v3592_v12 = vadd.f32 %v3547_v14, %v3492_v25  ;;  %v3648_v35 = vsel %vm3145_vm4, %v3646_v52, %v3647_v2  ;;  %v409_v5 = vmul.f32 %v4437_v41, %v4417_v23  ;;  %v450_v61 = vmul.f32 %v4439_v42, %v4419_v24 }
  0x69   : > { %v3591_v29 = vadd.f32 %v3548_v50, %v3491_v59  ;;  %v384_v13 = vadd.f32 %v366_v9, %v324_v32  ;;  %v385_v36 = vadd.f32 %v367_v30, %v325_v10  ;;  %v451_v55 = vmul.f32 %v4439_v42, %v4424_v28  ;;  %v7002_v42 = vld [vmem:[#allocation28_spill] sm:$0xff] }
  0x6a   : > { %v3692_v27 = vadd.f32 %v3647_v2, %v3592_v12  ;;  %v492_v46 = vmul.f32 %v4441_v43, %v4429_v34  ;;  %v493_v14 = vmul.f32 %v4441_v43, %v4431_v38  ;;  %v534_v53 = vmul.f32 %v4443_v44, %v4836_v48 }
  0x6b   : > { %v3691_v25 = vadd.f32 %v3648_v35, %v3591_v29  ;;  %v426_v52 = vadd.f32 %v408_v63, %v384_v13  ;;  %v427_v41 = vadd.f32 %v409_v5, %v385_v36  ;;  %v535_v50 = vmul.f32 %v4443_v44, %v4838_v37 }
  0x6c   : > { %v571_v10 = vmul.f32 %v4445_v45, %v4405_v17  ;;  %v572_v2 = vmul.f32 %v4445_v45, %v4407_v18  ;;  %v672_v32 = vmul.f32 %v4452_v49, %v4409_v19  ;;  %v673_v59 = vmul.f32 %v4452_v49, %v4413_v21  ;;  %v6994_v45 = vld [vmem:[#allocation32_spill] sm:$0xff] }
  0x6d   : > { %v3721_v9 = vpack.c.bf16 %v3692_v27, %v3691_v25  ;;  %v468_v30 = vadd.f32 %v450_v61, %v426_v52  ;;  %v469_v12 = vadd.f32 %v451_v55, %v427_v41  ;;  %v772_v63 = vmul.f32 %v4479_v7, %v4415_v22 }
  0x6e   : > { %v609_v35 = vrot.slane %v571_v10, 1  ;;  %v610_v5 = vrot.slane %v572_v2, 1  ;;  %v709_v29 = vrot.slane %v672_v32, 1  ;;  %v710_v13 = vrot.slane %v673_v59, 1  ;;  %v6986_v59 = vld [vmem:[#allocation20_spill] sm:$0xff] }
  0x6f   : > { %4231 = vmatmul.msk.bf16.vlgmr.msra.gmra.mxu0 %vm3743_vm5, %v3721_v9  ;;  %v510_v17 = vadd.f32 %v492_v46, %v468_v30  ;;  %v511_v18 = vadd.f32 %v493_v14, %v469_v12  ;;  %v773_v36 = vmul.f32 %v4479_v7, %v4417_v23  ;;  %v809_v44 = vrot.slane %v772_v63, 1  ;;  %v1181_v30 = vld [vmem:[%s4378_s9 + $0x30] sm:$0xe]  ;;  %v6987_v12 = vld [vmem:[#allocation22_spill] sm:$0xff]  ;;  %v6988_v63 = vld [vmem:[#allocation31_spill] sm:$0xff] }
  0x70   : > { %v611_v27 = vsel %vm605_vm0, %v609_v35, %v610_v5  ;;  %v711_v41 = vsel %vm605_vm0, %v709_v29, %v710_v13  ;;  %v872_v61 = vmul.f32 %v4481_v8, %v4419_v24  ;;  %v873_v55 = vmul.f32 %v4481_v8, %v4424_v28  ;;  %3974 = vmatpush.bf16.msra.mxu0 %v4356_v0  ;;  %v7003_v28 = vld [vmem:[#allocation29_spill] sm:$0xff]  ;;  %v7007_v24 = vld [vmem:[#allocation36_spill] sm:$0xff] }
  0x71   : > { %v552_v46 = vadd.f32 %v534_v53, %v510_v17  ;;  %v553_v14 = vadd.f32 %v535_v50, %v511_v18  ;;  %v810_v25 = vrot.slane %v773_v36, 1  ;;  %v972_v52 = vmul.f32 %v4498_v47, %v4429_v34  ;;  %v1182_v50 = vld [vmem:[%s4378_s9 + $0x34] sm:$0x3] }
  0x72   : > { %v909_v10 = vrot.slane %v872_v61, 1  ;;  %v910_v2 = vrot.slane %v873_v55, 1  ;;  %v973_v32 = vmul.f32 %v4498_v47, %v4431_v38  ;;  %v1072_v9 = vmul.f32 %v6986_v59, %v4836_v48  ;;  %v6989_v55 = vld [vmem:[#allocation2_spill] sm:$0xff]  ;;  %v7000_v48 = vld [vmem:[#allocation27_spill] sm:$0xff] }
  0x73   : > { %v1221_v35 = vmul.f32 %v6988_v63, %v6987_v12  ;;  %v653_v29 = vadd.f32 %v611_v27, %v552_v46  ;;  %v654_v0 = vadd.f32 %v610_v5, %v553_v14  ;;  %v1009_v53 = vrot.slane %v972_v52, 1  ;;  %v6992_v14 = vld [vmem:[#allocation21_spill] sm:$0xff] }
  0x74   : > { %v811_v17 = vsel %vm605_vm0, %v809_v44, %v810_v25  ;;  %v911_v18 = vsel %vm605_vm0, %v909_v10, %v910_v2  ;;  %v1010_v36 = vrot.slane %v973_v32, 1  ;;  %v1073_v61 = vmul.f32 %v6986_v59, %v4838_v37  ;;  %3975 = vmatpush.bf16.msra.mxu0 %v6989_v55  ;;  %v6993_v32 = vld [vmem:[#allocation23_spill] sm:$0xff]  ;;  %v6995_v37 = vld [vmem:[#allocation24_spill] sm:$0xff] }
  0x75   : > { %v753_v47 = vadd.f32 %v711_v41, %v653_v29  ;;  %v754_v8 = vadd.f32 %v710_v13, %v654_v0  ;;  %v1109_v7 = vrot.slane %v1072_v9, 1  ;;  %v4898_v49 = vunpack.c.l.bf16 %v1181_v30  ;;  %v6996_v30 = vld [vmem:[#allocation25_spill] sm:$0xff] }
  0x76   : > { %v1011_v27 = vsel %vm605_vm0, %v1009_v53, %v1010_v36  ;;  %v1110_v5 = vrot.slane %v1073_v61, 1  ;;  %v4901_v46 = vunpack.c.l.bf16 %v1182_v50  ;;  %v1220_v44 = vmul.f32 %v6988_v63, %v6992_v14  ;;  %v6997_v29 = vld [vmem:[#allocation33_spill] sm:$0xff]  ;;  %v6998_v53 = vld [vmem:[#allocation26_spill] sm:$0xff]  ;;  %v6999_v61 = vld [vmem:[#allocation3_spill] sm:$0xff] }
  0x77   : > { %6990 = vst [vmem:[#allocation22_spill] sm:$0xff] %v4898_v49  ;;  %v853_v52 = vadd.f32 %v811_v17, %v753_v47  ;;  %v854_v10 = vadd.f32 %v810_v25, %v754_v8  ;;  %v1325_v59 = vmul.f32 %v6994_v45, %v6993_v32  ;;  %v1326_v41 = vmul.f32 %v6994_v45, %v6995_v37  ;;  %v7001_v45 = vld [vmem:[#allocation34_spill] sm:$0xff] }
  0x78   : > { %6991 = vst [vmem:[#allocation2_spill] sm:$0xff] %v4901_v46  ;;  %v1258_v13 = vrot.slane %v1220_v44, 2  ;;  %v1259_v9 = vrot.slane %v1221_v35, 2  ;;  %v1429_v0 = vmul.f32 %v6997_v29, %v6996_v30  ;;  %v1430_v50 = vmul.f32 %v6997_v29, %v6998_v53  ;;  %3976 = vmatpush.bf16.msra.mxu0 %v6999_v61  ;;  %v7004_v61 = vld [vmem:[#allocation35_spill] sm:$0xff] }
  0x79   : > { %v953_v55 = vadd.f32 %v911_v18, %v853_v52  ;;  %v954_v63 = vadd.f32 %v910_v2, %v854_v10  ;;  %v1362_v47 = vrot.slane %v1325_v59, 2  ;;  %v1363_v8 = vrot.slane %v1326_v41, 2  ;;  %v7005_v2 = vld [vmem:[#allocation30_spill] sm:$0xff]  ;;  %v7006_v41 = vld [vmem:[#allocation37_spill] sm:$0xff] }
  0x7a   : > { %v1111_v25 = vsel %vm605_vm0, %v1109_v7, %v1110_v5  ;;  %v1466_v17 = vrot.slane %v1429_v0, 2  ;;  %v1467_v43 = vrot.slane %v1430_v50, 2  ;;  %v1533_v44 = vmul.f32 %v7001_v45, %v7000_v48 }
  0x7b   : > { %v1053_v35 = vadd.f32 %v1011_v27, %v953_v55  ;;  %v1054_v38 = vadd.f32 %v1010_v36, %v954_v63  ;;  %v1534_v34 = vmul.f32 %v7001_v45, %v7002_v42  ;;  %v1260_v29 = vsel %vm1254_vm1, %v1258_v13, %v1259_v9 }
  0x7c   : > { %v1637_v18 = vmul.f32 %v7004_v61, %v7003_v28  ;;  %v1638_v59 = vmul.f32 %v7004_v61, %v7005_v2  ;;  %v1364_v10 = vsel %vm1254_vm1, %v1362_v47, %v1363_v8  ;;  %v1741_v0 = vmul.f32 %v7006_v41, %v4898_v49 }
  0x7d   : > { %v1153_v52 = vadd.f32 %v1111_v25, %v1053_v35  ;;  %v1154_v7 = vadd.f32 %v1110_v5, %v1054_v38  ;;  %v1468_v63 = vsel %vm1254_vm1, %v1466_v17, %v1467_v43  ;;  %v1570_v36 = vrot.slane %v1533_v44, 2  ;;  %v7008_v17 = vld [vmem:[#allocation38_spill] sm:$0xff] }
  0x7e   : > { %v1571_v27 = vrot.slane %v1534_v34, 2  ;;  %v1742_v13 = vmul.f32 %v7006_v41, %v4901_v46  ;;  %v1674_v45 = vrot.slane %v1637_v18, 2  ;;  %v1841_v61 = vmul.f32 %v7007_v24, %v6992_v14 }
  0x7f   : > { %v1302_v50 = vadd.f32 %v1260_v29, %v1153_v52  ;;  %v1303_v55 = vadd.f32 %v1259_v9, %v1154_v7  ;;  %v1675_v25 = vrot.slane %v1638_v59, 2  ;;  %v1778_v38 = vrot.slane %v1741_v0, 2  ;;  %v7009_v29 = vld [vmem:[#allocation39_spill] sm:$0xff] }
  0x80   : > { %v1779_v5 = vrot.slane %v1742_v13, 2  ;;  %v1842_v47 = vmul.f32 %v7007_v24, %v6987_v12  ;;  %v1942_v34 = vmul.f32 %v7008_v17, %v6993_v32  ;;  %v1943_v44 = vmul.f32 %v7008_v17, %v6995_v37  ;;  %v7010_v13 = vld [vmem:[#allocation40_spill] sm:$0xff] }
  0x81   : > { %v1406_v35 = vadd.f32 %v1364_v10, %v1302_v50  ;;  %v1407_v23 = vadd.f32 %v1363_v8, %v1303_v55  ;;  %v1572_v9 = vsel %vm1254_vm1, %v1570_v36, %v1571_v27  ;;  %v2042_v18 = vmul.f32 %v7009_v29, %v6996_v30 }
  0x82   : > { %v2043_v14 = vmul.f32 %v7009_v29, %v6998_v53  ;;  %v1879_v7 = vrot.slane %v1841_v61, 3  ;;  %v1880_v12 = vrot.slane %v1842_v47, 3  ;;  %v1676_v8 = vsel %vm1254_vm1, %v1674_v45, %v1675_v25 }
  0x83   : > { %v1510_v59 = vadd.f32 %v1468_v63, %v1406_v35  ;;  %v1511_v52 = vadd.f32 %v1467_v43, %v1407_v23  ;;  %v1979_v10 = vrot.slane %v1942_v34, 3  ;;  %v1980_v0 = vrot.slane %v1943_v44, 3  ;;  %v7011_v23 = vld [vmem:[#allocation41_spill] sm:$0xff] }
  0x84   : > { %v2142_v50 = vmul.f32 %v7010_v13, %v7000_v48  ;;  %v1780_v17 = vsel %vm1254_vm1, %v1778_v38, %v1779_v5  ;;  %v2143_v24 = vmul.f32 %v7010_v13, %v7002_v42  ;;  %v2079_v29 = vrot.slane %v2042_v18, 3 }
  0x85   : > { %v1614_v55 = vadd.f32 %v1572_v9, %v1510_v59  ;;  %v1615_v36 = vadd.f32 %v1571_v27, %v1511_v52  ;;  %v2080_v63 = vrot.slane %v2043_v14, 3  ;;  %v2242_v43 = vmul.f32 %v7011_v23, %v7003_v28  ;;  %v7012_v27 = vld [vmem:[#allocation42_spill] sm:$0xff]  ;;  %v2451_v14 = vld [vmem:[%s4378_s9 + $0x30] sm:$0xc] }
  0x86   : > { %v2243_v45 = vmul.f32 %v7011_v23, %v7005_v2  ;;  %v1881_v35 = vsel %vm1875_vm2, %v1879_v7, %v1880_v12  ;;  %v2342_v34 = vmul.f32 %v7012_v27, %v4898_v49  ;;  %v1981_v38 = vsel %vm1875_vm2, %v1979_v10, %v1980_v0  ;;  %v2452_v7 = vld [vmem:[%s4378_s9 + $0x34] sm:$0x7] }
  0x87   : > { %v1718_v61 = vadd.f32 %v1676_v8, %v1614_v55  ;;  %v1719_v47 = vadd.f32 %v1675_v25, %v1615_v36  ;;  %v2179_v44 = vrot.slane %v2142_v50, 3  ;;  %v2180_v9 = vrot.slane %v2143_v24, 3  ;;  %v7013_v36 = vld [vmem:[#allocation43_spill] sm:$0xff] }
  0x88   : > { %v2343_v18 = vmul.f32 %v7012_v27, %v4901_v46  ;;  %v2279_v13 = vrot.slane %v2242_v43, 3  ;;  %v2280_v23 = vrot.slane %v2243_v45, 3  ;;  %v2081_v8 = vsel %vm1875_vm2, %v2079_v29, %v2080_v63  ;;  %v7015_v45 = vld [vmem:[#allocation45_spill] sm:$0xff] }
  0x89   : > { %v1822_v59 = vadd.f32 %v1780_v17, %v1718_v61  ;;  %v1823_v52 = vadd.f32 %v1779_v5, %v1719_v47  ;;  %v2379_v25 = vrot.slane %v2342_v34, 3  ;;  %v2490_v41 = vmul.f32 %v7013_v36, %v4690_v15  ;;  %v7014_v5 = vld [vmem:[#allocation44_spill] sm:$0xff] }
  0x8a   : > { %v2380_v55 = vrot.slane %v2343_v18, 3  ;;  %v4964_v50 = vunpack.c.l.bf16 %v2451_v14  ;;  %v2491_v24 = vmul.f32 %v7013_v36, %v4692_v6  ;;  %v2181_v17 = vsel %vm1875_vm2, %v2179_v44, %v2180_v9 }
  0x8b   : > { %v1923_v49 = vadd.f32 %v1881_v35, %v1822_v59  ;;  %v1924_v10 = vadd.f32 %v1880_v12, %v1823_v52  ;;  %v2595_v43 = vmul.f32 %v7014_v5, %v4696_v26  ;;  %v2596_v29 = vmul.f32 %v7014_v5, %v4698_v56  ;;  %v7017_v59 = vld [vmem:[#allocation46_spill] sm:$0xff] }
  0x8c   : > { %v2699_v61 = vmul.f32 %v7015_v45, %v4700_v11  ;;  %v2281_v12 = vsel %vm1875_vm2, %v2279_v13, %v2280_v23  ;;  %v4976_v35 = vunpack.c.l.bf16 %v2452_v7  ;;  %v2381_v18 = vsel %vm1875_vm2, %v2379_v25, %v2380_v55 }
  0x8d   : > { %v2023_v47 = vadd.f32 %v1981_v38, %v1923_v49  ;;  %v2024_v34 = vadd.f32 %v1980_v0, %v1924_v10  ;;  %v2528_v14 = vrot.slane %v2490_v41, 4  ;;  %v2700_v44 = vmul.f32 %v7015_v45, %v4702_v4 }
  0x8e   : > { %7016 = vst [vmem:[#allocation21_spill] sm:$0xff] %v4976_v35  ;;  %v2803_v52 = vmul.f32 %v7017_v59, %v4714_v51  ;;  %v2529_v27 = vrot.slane %v2491_v24, 4  ;;  %v2804_v49 = vmul.f32 %v7017_v59, %v4716_v16  ;;  %v2632_v0 = vrot.slane %v2595_v43, 4 }
  0x8f   : > { %v2123_v36 = vadd.f32 %v2081_v8, %v2023_v47  ;;  %v2124_v5 = vadd.f32 %v2080_v63, %v2024_v34  ;;  %v2633_v38 = vrot.slane %v2596_v29, 4  ;;  %v2736_v13 = vrot.slane %v2699_v61, 4 }
  0x90   : > { %v2907_v7 = vmul.f32 %v4753_v62, %v4724_v33  ;;  %v2737_v10 = vrot.slane %v2700_v44, 4  ;;  %v2908_v45 = vmul.f32 %v4753_v62, %v4726_v58  ;;  %v2840_v46 = vrot.slane %v2803_v52, 4 }
  0x91   : > { %v2223_v25 = vadd.f32 %v2181_v17, %v2123_v36  ;;  %v2224_v41 = vadd.f32 %v2180_v9, %v2124_v5  ;;  %v2841_v2 = vrot.slane %v2804_v49, 4  ;;  %v3011_v63 = vmul.f32 %v4757_v31, %v4964_v50 }
  0x92   : > { %v3012_v8 = vmul.f32 %v4757_v31, %v4976_v35  ;;  %v2944_v29 = vrot.slane %v2907_v7, 4  ;;  %v2945_v61 = vrot.slane %v2908_v45, 4  ;;  %v2530_v47 = vsel %vm2524_vm3, %v2528_v14, %v2529_v27 }
  0x93   : > { %v2323_v24 = vadd.f32 %v2281_v12, %v2223_v25  ;;  %v2324_v43 = vadd.f32 %v2280_v23, %v2224_v41  ;;  %v2634_v9 = vsel %vm2524_vm3, %v2632_v0, %v2633_v38  ;;  %v3111_v36 = vmul.f32 %v4749_v54, %v4690_v15 }
  0x94   : > { %v3112_v17 = vmul.f32 %v4749_v54, %v4692_v6  ;;  %v2738_v44 = vsel %vm2524_vm3, %v2736_v13, %v2737_v10  ;;  %v3212_v12 = vmul.f32 %v4790_v60, %v4696_v26  ;;  %v2842_v23 = vsel %vm2524_vm3, %v2840_v46, %v2841_v2  ;;  %v7026_v54 = vld [vmem:[#allocation13_spill] sm:$0xff] }
  0x95   : > { %v2423_v5 = vadd.f32 %v2381_v18, %v2323_v24  ;;  %v2424_v34 = vadd.f32 %v2380_v55, %v2324_v43  ;;  %v3048_v45 = vrot.slane %v3011_v63, 4  ;;  %v3049_v52 = vrot.slane %v3012_v8, 4 }
  0x96   : > { %v3213_v14 = vmul.f32 %v4790_v60, %v4698_v56  ;;  %v2946_v15 = vsel %vm2524_vm3, %v2944_v29, %v2945_v61  ;;  %v3312_v6 = vmul.f32 %v4792_v57, %v4700_v11  ;;  %v3149_v55 = vrot.slane %v3111_v36, 5  ;;  %v7025_v60 = vld [vmem:[#allocation55_spill] sm:$0xff] }
  0x97   : > { %v2572_v49 = vadd.f32 %v2530_v47, %v2423_v5  ;;  %v2573_v0 = vadd.f32 %v2529_v27, %v2424_v34  ;;  %v3150_v18 = vrot.slane %v3112_v17, 5  ;;  %v3313_v13 = vmul.f32 %v4792_v57, %v4702_v4  ;;  %v7023_v57 = vld [vmem:[#allocation12_spill] sm:$0xff] }
  0x98   : > { %v3412_v46 = vmul.f32 %v4806_v20, %v4714_v51  ;;  %v3249_v41 = vrot.slane %v3212_v12, 5  ;;  %v3413_v63 = vmul.f32 %v4806_v20, %v4716_v16  ;;  %v3250_v27 = vrot.slane %v3213_v14, 5  ;;  %v7022_v20 = vld [vmem:[#allocation7_spill] sm:$0xff] }
  0x99   : > { %v2676_v7 = vadd.f32 %v2634_v9, %v2572_v49  ;;  %v2677_v25 = vadd.f32 %v2633_v38, %v2573_v0  ;;  %v3349_v8 = vrot.slane %v3312_v6, 5  ;;  %v3350_v24 = vrot.slane %v3313_v13, 5 }
  0x9a   : > { %v3512_v43 = vmul.f32 %v4810_v1, %v4724_v33  ;;  %v3449_v36 = vrot.slane %v3412_v46, 5  ;;  %v3513_v17 = vmul.f32 %v4810_v1, %v4726_v58  ;;  %v3450_v5 = vrot.slane %v3413_v63, 5 }
  0x9b   : > { %v2780_v29 = vadd.f32 %v2738_v44, %v2676_v7  ;;  %v2781_v47 = vadd.f32 %v2737_v10, %v2677_v25  ;;  %v3612_v38 = vmul.f32 %v4825_v3, %v4964_v50  ;;  %v5022_v9 = vmul.f32 %v4825_v3, %v4976_v35  ;;  %v7027_v35 = vld [vmem:[#allocation56_spill] sm:$0xff] }
  0x9c   : > { %v3549_v34 = vrot.slane %v3512_v43, 5  ;;  %v3550_v49 = vrot.slane %v3513_v17, 5  ;;  %v3050_v0 = vsel %vm2524_vm3, %v3048_v45, %v3049_v52  ;;  %v3151_v46 = vsel %vm3145_vm4, %v3149_v55, %v3150_v18  ;;  %v7020_v17 = vld [vmem:[#allocation11_spill] sm:$0xff] }
  0x9d   : > { %v2884_v12 = vadd.f32 %v2842_v23, %v2780_v29  ;;  %v2885_v14 = vadd.f32 %v2841_v2, %v2781_v47  ;;  %v3649_v44 = vrot.slane %v3612_v38, 5  ;;  %v3650_v10 = vrot.slane %v5022_v9, 5  ;;  %v7021_v38 = vld [vmem:[#allocation6_spill] sm:$0xff] }
  0x9e   : > { %v3251_v7 = vsel %vm3145_vm4, %v3249_v41, %v3250_v27  ;;  %v3351_v25 = vsel %vm3145_vm4, %v3349_v8, %v3350_v24  ;;  %v3451_v63 = vsel %vm3145_vm4, %v3449_v36, %v3450_v5  ;;  %v3551_v2 = vsel %vm3145_vm4, %v3549_v34, %v3550_v49  ;;  %v7018_v41 = vld [vmem:[#allocation4_spill] sm:$0xff]  ;;  %v7019_v36 = vld [vmem:[#allocation5_spill] sm:$0xff] }
  0x9f   : > { %v2988_v6 = vadd.f32 %v2946_v15, %v2884_v12  ;;  %v2989_v13 = vadd.f32 %v2945_v61, %v2885_v14  ;;  %v326_v45 = vmul.f32 %v4433_v39, %v4409_v19  ;;  %v327_v61 = vmul.f32 %v4433_v39, %v4413_v21  ;;  %v287_v12 = vld [vmem:[%s4378_s9 + $0x38] sm:$0xf]  ;;  %v288_v14 = vld [vmem:[%s4378_s9 + $0x3c] sm:$0x1] }
  0xa0   : > { %v3651_v15 = vsel %vm3145_vm4, %v3649_v44, %v3650_v10  ;;  %v368_v55 = vmul.f32 %v4435_v40, %v4415_v22  ;;  %v369_v8 = vmul.f32 %v4435_v40, %v7018_v41  ;;  %v5042_v29 = vmul.f32 %v4433_v39, %v4415_v22 }
  0xa1   : > { %v3092_v23 = vadd.f32 %v3050_v0, %v2988_v6  ;;  %v3093_v43 = vadd.f32 %v3049_v52, %v2989_v13  ;;  %v410_v34 = vmul.f32 %v7020_v17, %v7019_v36  ;;  %v411_v9 = vmul.f32 %v7020_v17, %v7021_v38 }
  0xa2   : > { %v386_v0 = vadd.f32 %v368_v55, %v326_v45  ;;  %v387_v44 = vadd.f32 %v369_v8, %v327_v61  ;;  %v5052_v6 = vmul.f32 %v4433_v39, %v7018_v41  ;;  %v5056_v13 = vmul.f32 %v4435_v40, %v7019_v36  ;;  %v7024_v61 = vld [vmem:[#allocation8_spill] sm:$0xff] }
  0xa3   : > { %v3193_v47 = vadd.f32 %v3151_v46, %v3092_v23  ;;  %v3194_v52 = vadd.f32 %v3150_v18, %v3093_v43  ;;  %v5058_v23 = vunpack.c.l.bf16 %v287_v12  ;;  %v5060_v43 = vunpack.c.l.bf16 %v288_v14 }
  0xa4   : > { %v428_v3 = vadd.f32 %v410_v34, %v386_v0  ;;  %v429_v1 = vadd.f32 %v411_v9, %v387_v44  ;;  %v452_v45 = vmul.f32 %v7023_v57, %v7022_v20  ;;  %v453_v55 = vmul.f32 %v7023_v57, %v7024_v61  ;;  %v7029_v0 = vld [vmem:[#allocation14_spill] sm:$0xff] }
  0xa5   : > { %v3293_v46 = vadd.f32 %v3251_v7, %v3193_v47  ;;  %v3294_v18 = vadd.f32 %v3250_v27, %v3194_v52  ;;  %v494_v31 = vmul.f32 %v7026_v54, %v7025_v60  ;;  %v495_v27 = vmul.f32 %v7026_v54, %v7027_v35  ;;  %v7028_v52 = vld [vmem:[#allocation15_spill] sm:$0xff] }
  0xa6   : > { %v470_v7 = vadd.f32 %v452_v45, %v428_v3  ;;  %v471_v47 = vadd.f32 %v453_v55, %v429_v1  ;;  %v573_v34 = vmul.f32 %v7028_v52, %v4409_v19  ;;  %v574_v9 = vmul.f32 %v7028_v52, %v4413_v21  ;;  %v7030_v45 = vld [vmem:[#allocation16_spill] sm:$0xff]  ;;  %v7031_v55 = vld [vmem:[#allocation17_spill] sm:$0xff] }
  0xa7   : > { %v3393_v8 = vadd.f32 %v3351_v25, %v3293_v46  ;;  %v3394_v39 = vadd.f32 %v3350_v24, %v3294_v18  ;;  %v536_v25 = vmul.f32 %v7029_v0, %v5058_v23  ;;  %v537_v24 = vmul.f32 %v7029_v0, %v5060_v43 }
  0xa8   : > { %v512_v44 = vadd.f32 %v494_v31, %v470_v7  ;;  %v513_v46 = vadd.f32 %v495_v27, %v471_v47  ;;  %v612_v18 = vrot.slane %v573_v34, 1  ;;  %v613_v62 = vrot.slane %v574_v9, 1 }
  0xa9   : > { %v3493_v12 = vadd.f32 %v3451_v63, %v3393_v8  ;;  %v3494_v14 = vadd.f32 %v3450_v5, %v3394_v39  ;;  %v674_v19 = vmul.f32 %v7030_v45, %v4415_v22  ;;  %v675_v21 = vmul.f32 %v7030_v45, %v7018_v41 }
  0xaa   : > { %v554_v63 = vadd.f32 %v536_v25, %v512_v44  ;;  %v555_v39 = vadd.f32 %v537_v24, %v513_v46  ;;  %v614_v5 = vsel %vm605_vm0, %v612_v18, %v613_v62  ;;  %v774_v8 = vmul.f32 %v7031_v55, %v7019_v36  ;;  %v7033_v46 = vld [vmem:[#allocation19_spill] sm:$0xff] }
  0xab   : > { %v3593_v3 = vadd.f32 %v3551_v2, %v3493_v12  ;;  %v3594_v1 = vadd.f32 %v3550_v49, %v3494_v14  ;;  %v712_v27 = vrot.slane %v674_v19, 1  ;;  %v713_v7 = vrot.slane %v675_v21, 1  ;;  %v7032_v14 = vld [vmem:[#allocation18_spill] sm:$0xff] }
  0xac   : > { %v655_v47 = vadd.f32 %v614_v5, %v554_v63  ;;  %v656_v2 = vadd.f32 %v613_v62, %v555_v39  ;;  %v775_v49 = vmul.f32 %v7031_v55, %v7021_v38  ;;  %v812_v34 = vrot.slane %v774_v8, 1  ;;  %v7034_v39 = vld [vmem:[#allocation20_spill] sm:$0xff]  ;;  %v289_v8 = vld [vmem:[%s4378_s9 + $0x40] sm:$0xf] }
  0xad   : > { %v3693_v52 = vadd.f32 %v3651_v15, %v3593_v3  ;;  %v3694_v31 = vadd.f32 %v3650_v10, %v3594_v1  ;;  %v714_v12 = vsel %vm605_vm0, %v712_v27, %v713_v7  ;;  %v874_v25 = vmul.f32 %v7032_v14, %v7022_v20 }
  0xae   : > { %v875_v24 = vmul.f32 %v7032_v14, %v7024_v61  ;;  %v755_v15 = vadd.f32 %v714_v12, %v655_v47  ;;  %v756_v10 = vadd.f32 %v713_v7, %v656_v2  ;;  %v813_v44 = vrot.slane %v775_v49, 1 }
  0xaf   : > { %v3801_v9 = vpack.c.bf16 %v3694_v31, %v3693_v52  ;;  %v974_v62 = vmul.f32 %v7033_v46, %v7025_v60  ;;  %v912_v18 = vrot.slane %v874_v25, 1  ;;  %v975_v52 = vmul.f32 %v7033_v46, %v7027_v35  ;;  %v290_v25 = vld [vmem:[%s4378_s9 + $0x44] sm:$0x1] }
  0xb0   : > { %v913_v3 = vrot.slane %v875_v24, 1  ;;  %v371_v1 = vmul.f32 %v4435_v40, %v7021_v38  ;;  %v814_v19 = vsel %vm605_vm0, %v812_v34, %v813_v44  ;;  %v856_v21 = vadd.f32 %v813_v44, %v756_v10  ;;  %v7042_v46 = vld [vmem:[#allocation22_spill] sm:$0xff] }
  0xb1   : > { %4241 = vmatmul.msk.bf16.vlgmr.msra.gmra.mxu2 %vm3743_vm5, %v3801_v9  ;;  %v1012_v63 = vrot.slane %v974_v62, 1  ;;  %v1074_v5 = vmul.f32 %v7034_v39, %v5058_v23  ;;  %v855_v31 = vadd.f32 %v814_v19, %v755_v15  ;;  %v1013_v7 = vrot.slane %v975_v52, 1  ;;  %v7035_v9 = vld [vmem:[#allocation31_spill] sm:$0xff] }
  0xb2   : > { %v914_v27 = vsel %vm605_vm0, %v912_v18, %v913_v3  ;;  %v1075_v47 = vmul.f32 %v7034_v39, %v5060_v43  ;;  %v956_v2 = vadd.f32 %v913_v3, %v856_v21  ;;  %v1222_v12 = vmul.f32 %v7035_v9, %v6993_v32  ;;  %v7037_v3 = vld [vmem:[#allocation32_spill] sm:$0xff]  ;;  %v7041_v39 = vld [vmem:[#allocation30_spill] sm:$0xff] }
  0xb3   : > { %v1112_v49 = vrot.slane %v1074_v5, 1  ;;  %v1223_v34 = vmul.f32 %v7035_v9, %v6995_v37  ;;  %v955_v24 = vadd.f32 %v914_v27, %v855_v31  ;;  %v1014_v10 = vsel %vm605_vm0, %v1012_v63, %v1013_v7 }
  0xb4   : > { %v1113_v15 = vrot.slane %v1075_v47, 1  ;;  %v5112_v44 = vunpack.c.l.bf16 %v289_v8  ;;  %v1056_v62 = vadd.f32 %v1013_v7, %v956_v2  ;;  %v1261_v18 = vrot.slane %v1222_v12, 2  ;;  %v7039_v7 = vld [vmem:[#allocation33_spill] sm:$0xff] }
  0xb5   : > { %v1262_v52 = vrot.slane %v1223_v34, 2  ;;  %v1327_v19 = vmul.f32 %v7037_v3, %v6996_v30  ;;  %v1055_v21 = vadd.f32 %v1014_v10, %v955_v24  ;;  %v1328_v40 = vmul.f32 %v7037_v3, %v6998_v53  ;;  %v1183_v12 = vld [vmem:[%s4378_s9 + $0x38] sm:$0xe]  ;;  %v1184_v10 = vld [vmem:[%s4378_s9 + $0x3c] sm:$0x3] }
  0xb6   : > { %7036 = vst [vmem:[#allocation23_spill] sm:$0xff] %v5112_v44  ;;  %v1114_v5 = vsel %vm605_vm0, %v1112_v49, %v1113_v15  ;;  %v5119_v31 = vunpack.c.l.bf16 %v290_v25  ;;  %v1156_v63 = vadd.f32 %v1113_v15, %v1056_v62  ;;  %v1431_v47 = vmul.f32 %v7039_v7, %v7000_v48 }
  0xb7   : > { %v1263_v27 = vsel %vm1254_vm1, %v1261_v18, %v1262_v52  ;;  %v1365_v8 = vrot.slane %v1327_v19, 2  ;;  %v1155_v2 = vadd.f32 %v1114_v5, %v1055_v21  ;;  %v1366_v34 = vrot.slane %v1328_v40, 2  ;;  %v7040_v21 = vld [vmem:[#allocation34_spill] sm:$0xff] }
  0xb8   : > { %7038 = vst [vmem:[#allocation24_spill] sm:$0xff] %v5119_v31  ;;  %v1432_v24 = vmul.f32 %v7039_v7, %v7002_v42  ;;  %v388_v49 = vadd.f32 %v5056_v13, %v5042_v29  ;;  %v5130_v3 = vunpack.c.l.bf16 %v1183_v12  ;;  %v1305_v25 = vadd.f32 %v1262_v52, %v1156_v63  ;;  %v7043_v29 = vld [vmem:[#allocation35_spill] sm:$0xff]  ;;  %v7044_v12 = vld [vmem:[#allocation2_spill] sm:$0xff] }
  0xb9   : > { %v1469_v15 = vrot.slane %v1431_v47, 2  ;;  %v389_v62 = vadd.f32 %v371_v1, %v5052_v6  ;;  %v1304_v18 = vadd.f32 %v1263_v27, %v1155_v2  ;;  %v1367_v19 = vsel %vm1254_vm1, %v1365_v8, %v1366_v34 }
  0xba   : > { %v1470_v9 = vrot.slane %v1432_v24, 2  ;;  %v1535_v40 = vmul.f32 %v7040_v21, %v7003_v28  ;;  %v1409_v5 = vadd.f32 %v1366_v34, %v1305_v25  ;;  %v1536_v7 = vmul.f32 %v7040_v21, %v7041_v39  ;;  %v7046_v25 = vld [vmem:[#allocation37_spill] sm:$0xff] }
  0xbb   : > { %v1639_v13 = vmul.f32 %v7043_v29, %v7042_v46  ;;  %v1640_v52 = vmul.f32 %v7043_v29, %v7044_v12  ;;  %v5142_v63 = vunpack.c.l.bf16 %v1184_v10  ;;  %v1408_v6 = vadd.f32 %v1367_v19, %v1304_v18 }
  0xbc   : > { %v1471_v1 = vsel %vm1254_vm1, %v1469_v15, %v1470_v9  ;;  %v1573_v27 = vrot.slane %v1535_v40, 2  ;;  %v1513_v8 = vadd.f32 %v1470_v9, %v1409_v5  ;;  %v1574_v47 = vrot.slane %v1536_v7, 2  ;;  %v7047_v9 = vld [vmem:[#allocation36_spill] sm:$0xff] }
  0xbd   : > { %7045 = vst [vmem:[#allocation25_spill] sm:$0xff] %v5142_v63  ;;  %v1677_v2 = vrot.slane %v1639_v13, 2  ;;  %v1678_v24 = vrot.slane %v1640_v52, 2  ;;  %v1512_v34 = vadd.f32 %v1471_v1, %v1408_v6  ;;  %v1743_v21 = vmul.f32 %v7046_v25, %v5130_v3  ;;  %v7048_v1 = vld [vmem:[#allocation38_spill] sm:$0xff] }
  0xbe   : > { %v1744_v14 = vmul.f32 %v7046_v25, %v5142_v63  ;;  %v412_v29 = vmul.f32 %v7020_v17, %v7022_v20  ;;  %v1575_v10 = vsel %vm1254_vm1, %v1573_v27, %v1574_v47  ;;  %v1617_v18 = vadd.f32 %v1574_v47, %v1513_v8 }
  0xbf   : > { %v1679_v15 = vsel %vm1254_vm1, %v1677_v2, %v1678_v24  ;;  %v1843_v7 = vmul.f32 %v7047_v9, %v6993_v32  ;;  %v1616_v19 = vadd.f32 %v1575_v10, %v1512_v34  ;;  %v1781_v40 = vrot.slane %v1743_v21, 2 }
  0xc0   : > { %v1782_v5 = vrot.slane %v1744_v14, 2  ;;  %v1844_v13 = vmul.f32 %v7047_v9, %v6995_v37  ;;  %v1721_v52 = vadd.f32 %v1678_v24, %v1617_v18  ;;  %v1944_v25 = vmul.f32 %v7048_v1, %v6996_v30  ;;  %v7049_v37 = vld [vmem:[#allocation39_spill] sm:$0xff] }
  0xc1   : > { %v1882_v6 = vrot.slane %v1843_v7, 3  ;;  %v1945_v27 = vmul.f32 %v7048_v1, %v6998_v53  ;;  %v1720_v8 = vadd.f32 %v1679_v15, %v1616_v19  ;;  %v413_v32 = vmul.f32 %v7020_v17, %v7024_v61 }
  0xc2   : > { %v1783_v47 = vsel %vm1254_vm1, %v1781_v40, %v1782_v5  ;;  %v1883_v2 = vrot.slane %v1844_v13, 3  ;;  %v1825_v21 = vadd.f32 %v1782_v5, %v1721_v52  ;;  %v1982_v14 = vrot.slane %v1944_v25, 3  ;;  %v7050_v13 = vld [vmem:[#allocation40_spill] sm:$0xff] }
  0xc3   : > { %v1983_v34 = vrot.slane %v1945_v27, 3  ;;  %v2044_v24 = vmul.f32 %v7049_v37, %v7000_v48  ;;  %v1824_v10 = vadd.f32 %v1783_v47, %v1720_v8  ;;  %v2045_v7 = vmul.f32 %v7049_v37, %v7002_v42 }
  0xc4   : > { %v1884_v18 = vsel %vm1875_vm2, %v1882_v6, %v1883_v2  ;;  %v430_v1 = vadd.f32 %v412_v29, %v388_v49  ;;  %v1926_v15 = vadd.f32 %v1883_v2, %v1825_v21  ;;  %v2144_v17 = vmul.f32 %v7050_v13, %v7003_v28  ;;  %v7051_v6 = vld [vmem:[#allocation41_spill] sm:$0xff] }
  0xc5   : > { %v1984_v19 = vsel %vm1875_vm2, %v1982_v14, %v1983_v34  ;;  %v2082_v40 = vrot.slane %v2044_v24, 3  ;;  %v1925_v5 = vadd.f32 %v1884_v18, %v1824_v10  ;;  %v2083_v25 = vrot.slane %v2045_v7, 3 }
  0xc6   : > { %v2145_v52 = vmul.f32 %v7050_v13, %v7041_v39  ;;  %v431_v27 = vadd.f32 %v413_v32, %v389_v62  ;;  %v2026_v8 = vadd.f32 %v1983_v34, %v1926_v15  ;;  %v2182_v47 = vrot.slane %v2144_v17, 3  ;;  %v7052_v62 = vld [vmem:[#allocation42_spill] sm:$0xff]  ;;  %v7060_v13 = vld [vmem:[#allocation49_spill] sm:$0xff] }
  0xc7   : > { %v2244_v9 = vmul.f32 %v7051_v6, %v7042_v46  ;;  %v2245_v49 = vmul.f32 %v7051_v6, %v7044_v12  ;;  %v2025_v29 = vadd.f32 %v1984_v19, %v1925_v5  ;;  %v2084_v2 = vsel %vm1875_vm2, %v2082_v40, %v2083_v25 }
  0xc8   : > { %v2183_v21 = vrot.slane %v2145_v52, 3  ;;  %v454_v14 = vmul.f32 %v7023_v57, %v7025_v60  ;;  %v2126_v24 = vadd.f32 %v2083_v25, %v2026_v8  ;;  %v2344_v32 = vmul.f32 %v7052_v62, %v5130_v3  ;;  %v7053_v25 = vld [vmem:[#allocation43_spill] sm:$0xff] }
  0xc9   : > { %v2282_v10 = vrot.slane %v2244_v9, 3  ;;  %v2283_v18 = vrot.slane %v2245_v49, 3  ;;  %v2125_v17 = vadd.f32 %v2084_v2, %v2025_v29  ;;  %v2345_v7 = vmul.f32 %v7052_v62, %v5142_v63  ;;  %v7054_v62 = vld [vmem:[#allocation44_spill] sm:$0xff] }
  0xca   : > { %v2184_v34 = vsel %vm1875_vm2, %v2182_v47, %v2183_v21  ;;  %v455_v15 = vmul.f32 %v7023_v57, %v7027_v35  ;;  %v2226_v19 = vadd.f32 %v2183_v21, %v2126_v24  ;;  %v2382_v5 = vrot.slane %v2344_v32, 3 }
  0xcb   : > { %v2284_v40 = vsel %vm1875_vm2, %v2282_v10, %v2283_v18  ;;  %v2492_v9 = vmul.f32 %v7053_v25, %v4696_v26  ;;  %v2225_v52 = vadd.f32 %v2184_v34, %v2125_v17  ;;  %v2383_v8 = vrot.slane %v2345_v7, 3 }
  0xcc   : > { %v2493_v49 = vmul.f32 %v7053_v25, %v4698_v56  ;;  %v472_v47 = vadd.f32 %v454_v14, %v430_v1  ;;  %v2326_v29 = vadd.f32 %v2283_v18, %v2226_v19  ;;  %v2597_v6 = vmul.f32 %v7054_v62, %v4700_v11  ;;  %v7055_v25 = vld [vmem:[#allocation45_spill] sm:$0xff] }
  0xcd   : > { %v2531_v2 = vrot.slane %v2492_v9, 4  ;;  %v2598_v21 = vmul.f32 %v7054_v62, %v4702_v4  ;;  %v2325_v24 = vadd.f32 %v2284_v40, %v2225_v52  ;;  %v2384_v10 = vsel %vm1875_vm2, %v2382_v5, %v2383_v8  ;;  %v2453_v18 = vld [vmem:[%s4378_s9 + $0x38] sm:$0xc] }
  0xce   : > { %v2532_v32 = vrot.slane %v2493_v49, 4  ;;  %v473_v17 = vadd.f32 %v455_v15, %v431_v27  ;;  %v2426_v34 = vadd.f32 %v2383_v8, %v2326_v29  ;;  %v2635_v7 = vrot.slane %v2597_v6, 4  ;;  %v4279_v27 = vld [vmem:[%s6546_s4 + $0x8] sm:$0xff]  ;;  %v2454_v15 = vld [vmem:[%s4378_s9 + $0x3c] sm:$0x7] }
  0xcf   : > { %v2636_v57 = vrot.slane %v2598_v21, 4  ;;  %v2701_v1 = vmul.f32 %v7055_v25, %v4714_v51  ;;  %v2425_v14 = vadd.f32 %v2384_v10, %v2325_v24  ;;  %v2702_v9 = vmul.f32 %v7055_v25, %v4716_v16  ;;  %3789 = vmatpush.bf16.msra.mxu1 %v4279_v27  ;;  %3831 = vmatpush.bf16.msra.mxu3 %v4279_v27 }
  0xd0   : > { %v2533_v19 = vsel %vm2524_vm3, %v2531_v2, %v2532_v32  ;;  %v496_v40 = vmul.f32 %v7026_v54, %v5058_v23  ;;  %v5210_v6 = vunpack.c.l.bf16 %v2453_v18  ;;  %v2575_v5 = vadd.f32 %v2532_v32, %v2426_v34  ;;  %v7057_v18 = vld [vmem:[#allocation48_spill] sm:$0xff]  ;;  %v7058_v32 = vld [vmem:[#allocation21_spill] sm:$0xff]  ;;  %3913 = vmatpush.bf16.msrb.mxu2 %v4279_v27 }
  0xd1   : > { %v2637_v52 = vsel %vm2524_vm3, %v2635_v7, %v2636_v57  ;;  %v497_v8 = vmul.f32 %v7026_v54, %v5060_v43  ;;  %v2574_v49 = vadd.f32 %v2533_v19, %v2425_v14  ;;  %v2739_v29 = vrot.slane %v2701_v1, 4 }
  0xd2   : > { %7056 = vst [vmem:[#allocation26_spill] sm:$0xff] %v5210_v6  ;;  %v2740_v2 = vrot.slane %v2702_v9, 4  ;;  %v2805_v21 = vmul.f32 %v7017_v59, %v4724_v33  ;;  %v2679_v24 = vadd.f32 %v2636_v57, %v2575_v5  ;;  %v2806_v10 = vmul.f32 %v7017_v59, %v4726_v58  ;;  %v4278_v57 = vld [vmem:[%s6546_s4] sm:$0xff] }
  0xd3   : > { %v2909_v25 = vmul.f32 %v7057_v18, %v4964_v50  ;;  %v2910_v34 = vmul.f32 %v7057_v18, %v7058_v32  ;;  %v5223_v7 = vunpack.c.l.bf16 %v2454_v15  ;;  %v2678_v54 = vadd.f32 %v2637_v52, %v2574_v49  ;;  %3790 = vmatpush.bf16.msra.mxu1 %v4278_v57  ;;  %3832 = vmatpush.bf16.msra.mxu3 %v4278_v57 }
  0xd4   : > { %v2741_v1 = vsel %vm2524_vm3, %v2739_v29, %v2740_v2  ;;  %v2843_v14 = vrot.slane %v2805_v21, 4  ;;  %v2783_v19 = vadd.f32 %v2740_v2, %v2679_v24  ;;  %v2844_v9 = vrot.slane %v2806_v10, 4  ;;  %v7061_v2 = vld [vmem:[#allocation47_spill] sm:$0xff]  ;;  %3914 = vmatpush.bf16.msrb.mxu2 %v4278_v57 }
  0xd5   : > { %7059 = vst [vmem:[#allocation3_spill] sm:$0xff] %v5223_v7  ;;  %v2947_v5 = vrot.slane %v2909_v25, 4  ;;  %v2948_v59 = vrot.slane %v2910_v34, 4  ;;  %v2782_v62 = vadd.f32 %v2741_v1, %v2678_v54  ;;  %v3013_v18 = vmul.f32 %v7060_v13, %v5210_v6  ;;  %v5242_v54 = vld [vmem:[%s6544_s2 + $0x10] sm:$0xff] }
  0xd6   : > { %v3014_v15 = vmul.f32 %v7060_v13, %v5223_v7  ;;  %v5233_v52 = vadd.f32 %v496_v40, %v472_v47  ;;  %v2845_v49 = vsel %vm2524_vm3, %v2843_v14, %v2844_v9  ;;  %v2887_v29 = vadd.f32 %v2844_v9, %v2783_v19  ;;  %v7062_v19 = vld [vmem:[#allocation50_spill] sm:$0xff] }
  0xd7   : > { %v2949_v21 = vsel %vm2524_vm3, %v2947_v5, %v2948_v59  ;;  %v3113_v24 = vmul.f32 %v7061_v2, %v4696_v26  ;;  %3851 = vmatpush.bf16.msrb.mxu1 %v5242_v54  ;;  %v2886_v25 = vadd.f32 %v2845_v49, %v2782_v62  ;;  %v3051_v10 = vrot.slane %v3013_v18, 4  ;;  %3872 = vmatpush.bf16.msrb.mxu3 %v4279_v27  ;;  %v7063_v18 = vld [vmem:[#allocation51_spill] sm:$0xff] }
  0xd8   : > { %v3052_v47 = vrot.slane %v3014_v15, 4  ;;  %v515_v40 = vadd.f32 %v497_v8, %v473_v17  ;;  %v2991_v34 = vadd.f32 %v2948_v59, %v2887_v29  ;;  %v3114_v1 = vmul.f32 %v7061_v2, %v4698_v56  ;;  %3995 = vmatpush.bf16.msra.mxu2 %v4279_v27  ;;  %v5259_v49 = vld [vmem:[%s6544_s2 + $0x8] sm:$0xff]  ;;  %v7065_v2 = vld [vmem:[#allocation53_spill] sm:$0xff] }
  0xd9   : > { %v3152_v14 = vrot.slane %v3113_v24, 5  ;;  %v3214_v26 = vmul.f32 %v7062_v19, %v4700_v11  ;;  %v2990_v9 = vadd.f32 %v2949_v21, %v2886_v25  ;;  %v3215_v62 = vmul.f32 %v7062_v19, %v4702_v4  ;;  %v7064_v25 = vld [vmem:[#allocation52_spill] sm:$0xff] }
  0xda   : > { %v3053_v5 = vsel %vm2524_vm3, %v3051_v10, %v3052_v47  ;;  %v3314_v17 = vmul.f32 %v7063_v18, %v4714_v51  ;;  %v3095_v59 = vadd.f32 %v3052_v47, %v2991_v34  ;;  %v3153_v8 = vrot.slane %v3114_v1, 5 }
  0xdb   : > { %v3252_v15 = vrot.slane %v3214_v26, 5  ;;  %v3315_v56 = vmul.f32 %v7063_v18, %v4716_v16  ;;  %3852 = vmatpush.bf16.msrb.mxu1 %v5259_v49  ;;  %v3094_v29 = vadd.f32 %v3053_v5, %v2990_v9  ;;  %v3253_v21 = vrot.slane %v3215_v62, 5  ;;  %3873 = vmatpush.bf16.msrb.mxu3 %v4278_v57 }
  0xdc   : > { %v3352_v24 = vrot.slane %v3314_v17, 5  ;;  %v3414_v10 = vmul.f32 %v7064_v25, %v4724_v33  ;;  %v3154_v27 = vsel %vm3145_vm4, %v3152_v14, %v3153_v8  ;;  %v3196_v47 = vadd.f32 %v3153_v8, %v3095_v59  ;;  %3996 = vmatpush.bf16.msra.mxu2 %v4278_v57  ;;  %v5276_v59 = vld [vmem:[%s6544_s2] sm:$0xff] }
  0xdd   : > { %v3353_v34 = vrot.slane %v3315_v56, 5  ;;  %v3415_v1 = vmul.f32 %v7064_v25, %v4726_v58  ;;  %v3195_v26 = vadd.f32 %v3154_v27, %v3094_v29  ;;  %v3254_v18 = vsel %vm3145_vm4, %v3252_v15, %v3253_v21  ;;  %v7066_v56 = vld [vmem:[#allocation54_spill] sm:$0xff] }
  0xde   : > { %v3452_v19 = vrot.slane %v3414_v10, 5  ;;  %v3514_v9 = vmul.f32 %v7065_v2, %v4964_v50  ;;  %v3296_v5 = vadd.f32 %v3253_v21, %v3196_v47  ;;  %v3515_v14 = vmul.f32 %v7065_v2, %v7058_v32 }
  0xdf   : > { %v3354_v62 = vsel %vm3145_vm4, %v3352_v24, %v3353_v34  ;;  %v3453_v17 = vrot.slane %v3415_v1, 5  ;;  %3853 = vmatpush.bf16.msrb.mxu1 %v5276_v59  ;;  %v3295_v8 = vadd.f32 %v3254_v18, %v3195_v26  ;;  %v3614_v29 = vmul.f32 %v7066_v56, %v5210_v6 }
  0xe0   : > { %v3552_v15 = vrot.slane %v3514_v9, 5  ;;  %v3615_v57 = vmul.f32 %v7066_v56, %v5223_v7  ;;  %v3396_v21 = vadd.f32 %v3353_v34, %v3296_v5  ;;  %v3553_v10 = vrot.slane %v3515_v14, 5  ;;  %v7067_v56 = vld [vmem:[#allocation15_spill] sm:$0xff] }
  0xe1   : > { %v3454_v24 = vsel %vm3145_vm4, %v3452_v19, %v3453_v17  ;;  %v538_v27 = vmul.f32 %v7029_v0, %v5112_v44  ;;  %v3395_v47 = vadd.f32 %v3354_v62, %v3295_v8  ;;  %v3652_v1 = vrot.slane %v3614_v29, 5 }
  0xe2   : > { %v3653_v2 = vrot.slane %v3615_v57, 5  ;;  %v539_v18 = vmul.f32 %v7029_v0, %v5119_v31  ;;  %v3496_v26 = vadd.f32 %v3453_v17, %v3396_v21  ;;  %v3554_v9 = vsel %vm3145_vm4, %v3552_v15, %v3553_v10 }
  0xe3   : > { %v556_v25 = vadd.f32 %v538_v27, %v5233_v52  ;;  %v575_v34 = vmul.f32 %v7067_v56, %v4415_v22  ;;  %v3495_v5 = vadd.f32 %v3454_v24, %v3395_v47  ;;  %v576_v62 = vmul.f32 %v7067_v56, %v7018_v41  ;;  %v4291_v47 = vld [vmem:[%s6545_s3] ss:$0 sm:$0xff] }
  0xe4   : > { %v3654_v19 = vsel %vm3145_vm4, %v3652_v1, %v3653_v2  ;;  %v557_v14 = vadd.f32 %v539_v18, %v515_v40  ;;  %v3596_v8 = vadd.f32 %v3553_v10, %v3496_v26  ;;  %v676_v57 = vmul.f32 %v7030_v45, %v7019_v36  ;;  %v7068_v10 = vld [vmem:[#allocation18_spill] sm:$0xff] }
  0xe5   : > { %v615_v29 = vrot.slane %v575_v34, 1  ;;  %v677_v17 = vmul.f32 %v7030_v45, %v7021_v38  ;;  %v3595_v15 = vadd.f32 %v3554_v9, %v3495_v5  ;;  %v616_v52 = vrot.slane %v576_v62, 1 }
  0xe6   : > { %v776_v22 = vmul.f32 %v7031_v55, %v7022_v20  ;;  %v777_v21 = vmul.f32 %v7031_v55, %v7024_v61  ;;  %v5303_v40 = vadd.f32 %v3653_v2, %v3596_v8  ;;  %v715_v24 = vrot.slane %v676_v57, 1 }
  0xe7   : > { %v716_v41 = vrot.slane %v677_v17, 1  ;;  %v876_v27 = vmul.f32 %v7068_v10, %v7025_v60  ;;  %v5310_v1 = vadd.f32 %v3654_v19, %v3595_v15  ;;  %v617_v18 = vsel %vm605_vm0, %v615_v29, %v616_v52  ;;  %v7069_v19 = vld [vmem:[#allocation19_spill] sm:$0xff] }
  0xe8   : > { %v658_v26 = vadd.f32 %v616_v52, %v557_v14  ;;  %v815_v9 = vrot.slane %v776_v22, 1  ;;  %v657_v34 = vadd.f32 %v617_v18, %v556_v25  ;;  %v816_v5 = vrot.slane %v777_v21, 1  ;;  %v1185_v22 = vld [vmem:[%s4378_s9 + $0x40] sm:$0xe] }
  0xe9   : > { %v717_v2 = vsel %vm605_vm0, %v715_v24, %v716_v41  ;;  %v877_v62 = vmul.f32 %v7068_v10, %v7027_v35  ;;  %v915_v17 = vrot.slane %v876_v27, 1  ;;  %v976_v15 = vmul.f32 %v7069_v19, %v5058_v23  ;;  %v7070_v10 = vld [vmem:[#allocation20_spill] sm:$0xff] }
  0xea   : > { %v758_v57 = vadd.f32 %v716_v41, %v658_v26  ;;  %v757_v55 = vadd.f32 %v717_v2, %v657_v34  ;;  %v817_v14 = vsel %vm605_vm0, %v815_v9, %v816_v5  ;;  %v977_v52 = vmul.f32 %v7069_v19, %v5060_v43  ;;  %v1186_v41 = vld [vmem:[%s4378_s9 + $0x44] sm:$0x3] }
  0xeb   : > { %v916_v25 = vrot.slane %v877_v62, 1  ;;  %v1015_v18 = vrot.slane %v976_v15, 1  ;;  %v1076_v8 = vmul.f32 %v7070_v10, %v5112_v44  ;;  %v1077_v34 = vmul.f32 %v7070_v10, %v5119_v31 }
  0xec   : > { %v3756_v29 = vpop.f32.mrf.mxu0  ;;  %v858_v24 = vadd.f32 %v816_v5, %v758_v57  ;;  %v857_v27 = vadd.f32 %v817_v14, %v757_v55  ;;  %v1016_v45 = vrot.slane %v977_v52, 1  ;;  %v5330_v56 = vunpack.c.l.bf16 %v1185_v22  ;;  %v7073_v55 = vld [vmem:[#allocation31_spill] sm:$0xff]  ;;  %v7074_v52 = vld [vmem:[#allocation32_spill] sm:$0xff] }
  0xed   : > { %v3757_v21 = vadd.f32 %v4291_v47, %v3756_v29  ;;  %v917_v26 = vsel %vm605_vm0, %v915_v17, %v916_v25  ;;  %v1115_v62 = vrot.slane %v1076_v8, 1  ;;  %v1116_v57 = vrot.slane %v1077_v34, 1 }
  0xee   : > { %v958_v2 = vadd.f32 %v916_v25, %v858_v24  ;;  %7071 = vst [vmem:[#allocation27_spill] sm:$0xff] %v5330_v56  ;;  %v957_v29 = vadd.f32 %v917_v26, %v857_v27  ;;  %v1017_v5 = vsel %vm605_vm0, %v1015_v18, %v1016_v45  ;;  %v5333_v15 = vunpack.c.l.bf16 %v1186_v41  ;;  %v7075_v24 = vld [vmem:[#allocation33_spill] sm:$0xff] }
  0xef   : > { %v3761_v9 = vmax.f32 %v3757_v21, 0.0  ;;  %v1224_v17 = vmul.f32 %v7073_v55, %v6996_v30  ;;  %v1225_v14 = vmul.f32 %v7073_v55, %v6998_v53  ;;  %v1329_v25 = vmul.f32 %v7074_v52, %v7000_v48 }
  0xf0   : > { %7072 = vst [vmem:[#allocation28_spill] sm:$0xff] %v5333_v15  ;;  %v1058_v19 = vadd.f32 %v1016_v45, %v958_v2  ;;  %v1057_v8 = vadd.f32 %v1017_v5, %v957_v29  ;;  %v1117_v22 = vsel %vm605_vm0, %v1115_v62, %v1116_v57  ;;  %v1330_v21 = vmul.f32 %v7074_v52, %v7002_v42  ;;  %v7076_v52 = vld [vmem:[#allocation34_spill] sm:$0xff] }
  0xf1   : > { %v1433_v18 = vmul.f32 %v7075_v24, %v7003_v28  ;;  %v1264_v45 = vrot.slane %v1224_v17, 2  ;;  %v1265_v27 = vrot.slane %v1225_v14, 2  ;;  %v1368_v26 = vrot.slane %v1329_v25, 2 }
  0xf2   : > { %v1158_v41 = vadd.f32 %v1116_v57, %v1058_v19  ;;  %v1157_v2 = vadd.f32 %v1117_v22, %v1057_v8  ;;  %v1369_v10 = vrot.slane %v1330_v21, 2  ;;  %v1434_v55 = vmul.f32 %v7075_v24, %v7041_v39  ;;  %v7077_v22 = vld [vmem:[#allocation35_spill] sm:$0xff] }
  0xf3   : > { %v1472_v0 = vrot.slane %v1433_v18, 2  ;;  %v1266_v62 = vsel %vm1254_vm1, %v1264_v45, %v1265_v27  ;;  %v1537_v31 = vmul.f32 %v7076_v52, %v7042_v46  ;;  %v1538_v17 = vmul.f32 %v7076_v52, %v7044_v12 }
  0xf4   : > { %v3758_v34 = vpop.f32.mrf.mxu0  ;;  %v1307_v5 = vadd.f32 %v1265_v27, %v1158_v41  ;;  %v1306_v44 = vadd.f32 %v1266_v62, %v1157_v2  ;;  %v1370_v19 = vsel %vm1254_vm1, %v1368_v26, %v1369_v10  ;;  %v1473_v57 = vrot.slane %v1434_v55, 2  ;;  %v7078_v55 = vld [vmem:[#allocation37_spill] sm:$0xff] }
  0xf5   : > { %v3759_v29 = vadd.f32 %v4291_v47, %v3758_v34  ;;  %v1576_v8 = vrot.slane %v1537_v31, 2  ;;  %v1641_v21 = vmul.f32 %v7077_v22, %v5130_v3  ;;  %v1577_v41 = vrot.slane %v1538_v17, 2 }
  0xf6   : > { %v1411_v25 = vadd.f32 %v1369_v10, %v1307_v5  ;;  %v1410_v47 = vadd.f32 %v1370_v19, %v1306_v44  ;;  %v1474_v18 = vsel %vm1254_vm1, %v1472_v0, %v1473_v57  ;;  %v1642_v45 = vmul.f32 %v7077_v22, %v5142_v63  ;;  %v7079_v5 = vld [vmem:[#allocation36_spill] sm:$0xff] }
  0xf7   : > { %v3762_v14 = vmax.f32 %v3759_v29, 0.0  ;;  %v1680_v26 = vrot.slane %v1641_v21, 2  ;;  %v1745_v2 = vmul.f32 %v7078_v55, %v5330_v56  ;;  %v1578_v10 = vsel %vm1254_vm1, %v1576_v8, %v1577_v41 }
  0xf8   : > { %v1515_v34 = vadd.f32 %v1473_v57, %v1411_v25  ;;  %v1514_v62 = vadd.f32 %v1474_v18, %v1410_v47  ;;  %v1681_v31 = vrot.slane %v1642_v45, 2  ;;  %v1746_v29 = vmul.f32 %v7078_v55, %v5333_v15  ;;  %v7080_v25 = vld [vmem:[#allocation38_spill] sm:$0xff] }
  0xf9   : > { %v3763_v27 = vpack.c.bf16 %v3762_v14, %v3761_v9  ;;  %v1784_v44 = vrot.slane %v1745_v2, 2  ;;  %v1845_v19 = vmul.f32 %v7079_v5, %v6996_v30  ;;  %v1846_v9 = vmul.f32 %v7079_v5, %v6998_v53  ;;  %v7089_v55 = vld [vmem:[#allocation46_spill] sm:$0xff] }
  0xfa   : > { %v1619_v0 = vadd.f32 %v1577_v41, %v1515_v34  ;;  %v1618_v57 = vadd.f32 %v1578_v10, %v1514_v62  ;;  %v1682_v17 = vsel %vm1254_vm1, %v1680_v26, %v1681_v31  ;;  %v1785_v14 = vrot.slane %v1746_v29, 2  ;;  %v7081_v29 = vld [vmem:[#allocation40_spill] sm:$0xff] }
  0xfb   : > { %4240 = vmatmul.msk.bf16.vlgmr.msra.gmra.mxu1 %vm3779_vm6, %v3763_v27  ;;  %v1946_v8 = vmul.f32 %v7080_v25, %v7000_v48  ;;  %v1885_v47 = vrot.slane %v1845_v19, 3  ;;  %v1886_v18 = vrot.slane %v1846_v9, 3  ;;  %v1947_v41 = vmul.f32 %v7080_v25, %v7002_v42 }
  0xfc   : > { %3933 = vmatpush.bf16.msra.mxu1 %v5242_v54  ;;  %v1723_v21 = vadd.f32 %v1681_v31, %v1619_v0  ;;  %v1722_v45 = vadd.f32 %v1682_v17, %v1618_v57  ;;  %v1786_v30 = vsel %vm1254_vm1, %v1784_v44, %v1785_v14  ;;  %v2046_v53 = vmul.f32 %v7049_v37, %v7003_v28  ;;  %v7082_v17 = vld [vmem:[#allocation41_spill] sm:$0xff] }
  0xfd   : > { %v1985_v27 = vrot.slane %v1946_v8, 3  ;;  %v1887_v26 = vsel %vm1875_vm2, %v1885_v47, %v1886_v18  ;;  %v1986_v2 = vrot.slane %v1947_v41, 3  ;;  %v2047_v62 = vmul.f32 %v7049_v37, %v7041_v39 }
  0xfe   : > { %v1827_v34 = vadd.f32 %v1785_v14, %v1723_v21  ;;  %v1826_v10 = vadd.f32 %v1786_v30, %v1722_v45  ;;  %v2085_v31 = vrot.slane %v2046_v53, 3  ;;  %v2146_v0 = vmul.f32 %v7081_v29, %v7042_v46  ;;  %v2455_v45 = vld [vmem:[%s4378_s9 + $0x40] sm:$0xc]  ;;  %v2456_v30 = vld [vmem:[%s4378_s9 + $0x44] sm:$0x7] }
  0xff   : > { %v2147_v44 = vmul.f32 %v7081_v29, %v7044_v12  ;;  %v1987_v9 = vsel %vm1875_vm2, %v1985_v27, %v1986_v2  ;;  %v2086_v57 = vrot.slane %v2047_v62, 3  ;;  %v2246_v14 = vmul.f32 %v7082_v17, %v5130_v3 }
 0x100   : > { %3934 = vmatpush.bf16.msra.mxu1 %v5259_v49  ;;  %v1928_v19 = vadd.f32 %v1886_v18, %v1827_v34  ;;  %v1927_v8 = vadd.f32 %v1887_v26, %v1826_v10  ;;  %v2185_v21 = vrot.slane %v2146_v0, 3  ;;  %v2247_v41 = vmul.f32 %v7082_v17, %v5142_v63  ;;  %v7083_v18 = vld [vmem:[#allocation42_spill] sm:$0xff] }
 0x101   : > { %v2186_v47 = vrot.slane %v2147_v44, 3  ;;  %v2087_v29 = vsel %vm1875_vm2, %v2085_v31, %v2086_v57  ;;  %v2285_v37 = vrot.slane %v2246_v14, 3  ;;  %v2346_v34 = vmul.f32 %v7083_v18, %v5330_v56 }
 0x102   : > { %v2028_v53 = vadd.f32 %v1986_v2, %v1928_v19  ;;  %v2027_v27 = vadd.f32 %v1987_v9, %v1927_v8  ;;  %v2286_v25 = vrot.slane %v2247_v41, 3  ;;  %v2347_v26 = vmul.f32 %v7083_v18, %v5333_v15  ;;  %v7086_v9 = vld [vmem:[#allocation43_spill] sm:$0xff]  ;;  %v7087_v18 = vld [vmem:[#allocation44_spill] sm:$0xff] }
 0x103   : > { %v2187_v62 = vsel %vm1875_vm2, %v2185_v21, %v2186_v47  ;;  %v2385_v0 = vrot.slane %v2346_v34, 3  ;;  %v5400_v44 = vunpack.c.l.bf16 %v2455_v45  ;;  %v5402_v2 = vunpack.c.l.bf16 %v2456_v30 }
 0x104   : > { %3935 = vmatpush.bf16.msra.mxu1 %v5276_v59  ;;  %v2128_v10 = vadd.f32 %v2086_v57, %v2028_v53  ;;  %v2127_v31 = vadd.f32 %v2087_v29, %v2027_v27  ;;  %v2287_v19 = vsel %vm1875_vm2, %v2285_v37, %v2286_v25  ;;  %v2386_v14 = vrot.slane %v2347_v26, 3  ;;  %v7088_v37 = vld [vmem:[#allocation45_spill] sm:$0xff] }
 0x105   : > { %7084 = vst [vmem:[#allocation29_spill] sm:$0xff] %v5400_v44  ;;  %v2494_v8 = vmul.f32 %v7086_v9, %v4700_v11  ;;  %v2495_v41 = vmul.f32 %v7086_v9, %v4702_v4  ;;  %v2599_v17 = vmul.f32 %v7087_v18, %v4714_v51  ;;  %v2600_v57 = vmul.f32 %v7087_v18, %v4716_v16 }
 0x106   : > { %7085 = vst [vmem:[#allocation4_spill] sm:$0xff] %v5402_v2  ;;  %v2228_v21 = vadd.f32 %v2186_v47, %v2128_v10  ;;  %v2227_v45 = vadd.f32 %v2187_v62, %v2127_v31  ;;  %v2387_v30 = vsel %vm1875_vm2, %v2385_v0, %v2386_v14  ;;  %v2703_v53 = vmul.f32 %v7088_v37, %v4724_v33 }
 0x107   : > { %v2534_v29 = vrot.slane %v2494_v8, 4  ;;  %v2535_v27 = vrot.slane %v2495_v41, 4  ;;  %v2638_v26 = vrot.slane %v2599_v17, 4  ;;  %v2639_v47 = vrot.slane %v2600_v57, 4  ;;  %v7091_v41 = vld [vmem:[#allocation48_spill] sm:$0xff] }
 0x108   : > { %v2328_v34 = vadd.f32 %v2286_v25, %v2228_v21  ;;  %v2327_v10 = vadd.f32 %v2287_v19, %v2227_v45  ;;  %v2704_v9 = vmul.f32 %v7088_v37, %v4726_v58  ;;  %v2742_v5 = vrot.slane %v2703_v53, 4 }
 0x109   : > { %v2807_v15 = vmul.f32 %v7089_v55, %v4964_v50  ;;  %v7090_v62 = vpack.c.bf16 %v5303_v40, %v5310_v1  ;;  %v2536_v31 = vsel %vm2524_vm3, %v2534_v29, %v2535_v27  ;;  %v2640_v25 = vsel %vm2524_vm3, %v2638_v26, %v2639_v47 }
 0x10a   : > { %v2428_v0 = vadd.f32 %v2386_v14, %v2328_v34  ;;  %v2808_v17 = vmul.f32 %v7089_v55, %v7058_v32  ;;  %v2427_v19 = vadd.f32 %v2387_v30, %v2327_v10  ;;  %v2743_v8 = vrot.slane %v2704_v9, 4 }
 0x10b   : > { %4245 = vmatmul.msk.bf16.vlgmr.msrb.gmra.mxu1 %vm3743_vm5, %v7090_v62  ;;  %v2846_v21 = vrot.slane %v2807_v15, 4  ;;  %v2911_v57 = vmul.f32 %v7091_v41, %v5210_v6  ;;  %v2912_v1 = vmul.f32 %v7091_v41, %v5223_v7  ;;  %v3015_v14 = vmul.f32 %v7060_v13, %v5400_v44 }
 0x10c   : > { %4015 = vmatpush.bf16.msrb.mxu1 %v5242_v54  ;;  %v2577_v45 = vadd.f32 %v2535_v27, %v2428_v0  ;;  %v2847_v40 = vrot.slane %v2808_v17, 4  ;;  %v2576_v29 = vadd.f32 %v2536_v31, %v2427_v19  ;;  %v2744_v53 = vsel %vm2524_vm3, %v2742_v5, %v2743_v8  ;;  %v7092_v0 = vld [vmem:[#allocation47_spill] sm:$0xff]  ;;  %v7093_v19 = vld [vmem:[#allocation50_spill] sm:$0xff] }
 0x10d   : > { %v2950_v34 = vrot.slane %v2911_v57, 4  ;;  %v3016_v15 = vmul.f32 %v7060_v13, %v5402_v2  ;;  %v2951_v26 = vrot.slane %v2912_v1, 4  ;;  %v3054_v10 = vrot.slane %v3015_v14, 4 }
 0x10e   : > { %v2681_v9 = vadd.f32 %v2639_v47, %v2577_v45  ;;  %v2848_v30 = vsel %vm2524_vm3, %v2846_v21, %v2847_v40  ;;  %v2680_v27 = vadd.f32 %v2640_v25, %v2576_v29  ;;  %v3115_v17 = vmul.f32 %v7092_v0, %v4700_v11 }
 0x10f   : > { %v3055_v62 = vrot.slane %v3016_v15, 4  ;;  %v3116_v41 = vmul.f32 %v7092_v0, %v4702_v4  ;;  %v2952_v31 = vsel %vm2524_vm3, %v2950_v34, %v2951_v26  ;;  %v3216_v47 = vmul.f32 %v7093_v19, %v4714_v51  ;;  %v7094_v4 = vld [vmem:[#allocation51_spill] sm:$0xff]  ;;  %v7095_v0 = vld [vmem:[#allocation52_spill] sm:$0xff] }
 0x110   : > { %4016 = vmatpush.bf16.msrb.mxu1 %v5259_v49  ;;  %v2785_v5 = vadd.f32 %v2743_v8, %v2681_v9  ;;  %v3217_v21 = vmul.f32 %v7093_v19, %v4716_v16  ;;  %v2784_v57 = vadd.f32 %v2744_v53, %v2680_v27  ;;  %v3155_v45 = vrot.slane %v3115_v17, 5 }
 0x111   : > { %v3056_v25 = vsel %vm2524_vm3, %v3054_v10, %v3055_v62  ;;  %v3156_v1 = vrot.slane %v3116_v41, 5  ;;  %v3255_v14 = vrot.slane %v3216_v47, 5  ;;  %v3316_v15 = vmul.f32 %v7094_v4, %v4724_v33 }
 0x112   : > { %v2889_v11 = vadd.f32 %v2847_v40, %v2785_v5  ;;  %v3256_v29 = vrot.slane %v3217_v21, 5  ;;  %v2888_v8 = vadd.f32 %v2848_v30, %v2784_v57  ;;  %v3317_v9 = vmul.f32 %v7094_v4, %v4726_v58  ;;  %v7096_v5 = vld [vmem:[#allocation53_spill] sm:$0xff] }
 0x113   : > { %v3157_v34 = vsel %vm3145_vm4, %v3155_v45, %v3156_v1  ;;  %v3416_v19 = vmul.f32 %v7095_v0, %v4964_v50  ;;  %v3355_v40 = vrot.slane %v3316_v15, 5  ;;  %v3417_v10 = vmul.f32 %v7095_v0, %v7058_v32 }
 0x114   : > { %4017 = vmatpush.bf16.msrb.mxu1 %v5276_v59  ;;  %v2993_v53 = vadd.f32 %v2951_v26, %v2889_v11  ;;  %v3257_v41 = vsel %vm3145_vm4, %v3255_v14, %v3256_v29  ;;  %v2992_v30 = vadd.f32 %v2952_v31, %v2888_v8  ;;  %v3356_v27 = vrot.slane %v3317_v9, 5  ;;  %v7097_v26 = vld [vmem:[#allocation54_spill] sm:$0xff]  ;;  %v291_v8 = vld [vmem:[%s4378_s9 + $0x48] sm:$0xf] }
 0x115   : > { %v3455_v17 = vrot.slane %v3416_v19, 5  ;;  %v3516_v47 = vmul.f32 %v7096_v5, %v5210_v6  ;;  %v3456_v57 = vrot.slane %v3417_v10, 5  ;;  %v3517_v45 = vmul.f32 %v7096_v5, %v5223_v7  ;;  %v292_v19 = vld [vmem:[%s4378_s9 + $0x4c] sm:$0x1]  ;;  %v7098_v5 = vld [vmem:[#allocation9_spill] sm:$0xff] }
 0x116   : > { %v3097_v21 = vadd.f32 %v3055_v62, %v2993_v53  ;;  %v3616_v11 = vmul.f32 %v7097_v26, %v5400_v44  ;;  %v3096_v14 = vadd.f32 %v3056_v25, %v2992_v30  ;;  %v3357_v15 = vsel %vm3145_vm4, %v3355_v40, %v3356_v27  ;;  %v7105_v44 = vld [vmem:[#allocation14_spill] sm:$0xff] }
 0x117   : > { %v3555_v4 = vrot.slane %v3516_v47, 5  ;;  %v3617_v31 = vmul.f32 %v7097_v26, %v5402_v2  ;;  %v3457_v0 = vsel %vm3145_vm4, %v3455_v17, %v3456_v57  ;;  %v3556_v62 = vrot.slane %v3517_v45, 5  ;;  %v7103_v2 = vld [vmem:[#allocation13_spill] sm:$0xff] }
 0x118   : > { %v3198_v9 = vadd.f32 %v3156_v1, %v3097_v21  ;;  %v3655_v53 = vrot.slane %v3616_v11, 5  ;;  %v3197_v10 = vadd.f32 %v3157_v34, %v3096_v14  ;;  %v330_v7 = vmul.f32 %v7098_v5, %v7019_v36  ;;  %v7099_v21 = vld [vmem:[#allocation10_spill] sm:$0xff]  ;;  %v7100_v14 = vld [vmem:[#allocation11_spill] sm:$0xff] }
 0x119   : > { %v3656_v13 = vrot.slane %v3617_v31, 5  ;;  %v331_v25 = vmul.f32 %v7098_v5, %v7021_v38  ;;  %v3557_v30 = vsel %vm3145_vm4, %v3555_v4, %v3556_v62  ;;  %v5478_v47 = vunpack.c.l.bf16 %v291_v8  ;;  %v7101_v4 = vld [vmem:[#allocation12_spill] sm:$0xff]  ;;  %v7102_v5 = vld [vmem:[#allocation23_spill] sm:$0xff] }
 0x11a   : > { %v3298_v40 = vadd.f32 %v3256_v29, %v3198_v9  ;;  %v5480_v26 = vunpack.c.l.bf16 %v292_v19  ;;  %v3297_v1 = vadd.f32 %v3257_v41, %v3197_v10  ;;  %v372_v34 = vmul.f32 %v7099_v21, %v7022_v20 }
 0x11b   : > { %v3657_v17 = vsel %vm3145_vm4, %v3655_v53, %v3656_v13  ;;  %v373_v45 = vmul.f32 %v7099_v21, %v7024_v61  ;;  %v414_v31 = vmul.f32 %v7100_v14, %v7025_v60  ;;  %v415_v29 = vmul.f32 %v7100_v14, %v7027_v35 }
 0x11c   : > { %v3398_v11 = vadd.f32 %v3356_v27, %v3298_v40  ;;  %v456_v8 = vmul.f32 %v7101_v4, %v5058_v23  ;;  %v3397_v19 = vadd.f32 %v3357_v15, %v3297_v1  ;;  %v390_v41 = vadd.f32 %v372_v34, %v330_v7  ;;  %v7104_v27 = vld [vmem:[#allocation24_spill] sm:$0xff] }
 0x11d   : > { %v391_v9 = vadd.f32 %v373_v45, %v331_v25  ;;  %v457_v53 = vmul.f32 %v7101_v4, %v5060_v43  ;;  %v498_v21 = vmul.f32 %v7103_v2, %v7102_v5  ;;  %v499_v40 = vmul.f32 %v7103_v2, %v7104_v27  ;;  %v7106_v25 = vld [vmem:[#allocation15_spill] sm:$0xff]  ;;  %v7107_v34 = vld [vmem:[#allocation16_spill] sm:$0xff] }
 0x11e   : > { %v3498_v10 = vadd.f32 %v3456_v57, %v3398_v11  ;;  %v540_v55 = vmul.f32 %v7105_v44, %v5478_v47  ;;  %v3497_v14 = vadd.f32 %v3457_v0, %v3397_v19  ;;  %v432_v6 = vadd.f32 %v414_v31, %v390_v41 }
 0x11f   : > { %v433_v32 = vadd.f32 %v415_v29, %v391_v9  ;;  %v541_v7 = vmul.f32 %v7105_v44, %v5480_v26  ;;  %v577_v1 = vmul.f32 %v7106_v25, %v7019_v36  ;;  %v578_v57 = vmul.f32 %v7106_v25, %v7021_v38  ;;  %v7108_v38 = vld [vmem:[#allocation17_spill] sm:$0xff] }
 0x120   : > { %v3598_v15 = vadd.f32 %v3556_v62, %v3498_v10  ;;  %v678_v45 = vmul.f32 %v7107_v34, %v7022_v20  ;;  %v3597_v11 = vadd.f32 %v3557_v30, %v3497_v14  ;;  %v474_v2 = vadd.f32 %v456_v8, %v432_v6 }
 0x121   : > { %v475_v4 = vadd.f32 %v457_v53, %v433_v32  ;;  %v679_v0 = vmul.f32 %v7107_v34, %v7024_v61  ;;  %v618_v29 = vrot.slane %v577_v1, 1  ;;  %v619_v19 = vrot.slane %v578_v57, 1  ;;  %v7109_v32 = vld [vmem:[#allocation18_spill] sm:$0xff]  ;;  %v7110_v1 = vld [vmem:[#allocation19_spill] sm:$0xff] }
 0x122   : > { %v3698_v31 = vadd.f32 %v3656_v13, %v3598_v15  ;;  %v718_v41 = vrot.slane %v678_v45, 1  ;;  %v3697_v62 = vadd.f32 %v3657_v17, %v3597_v11  ;;  %v516_v9 = vadd.f32 %v498_v21, %v474_v2  ;;  %v7111_v45 = vld [vmem:[#allocation20_spill] sm:$0xff] }
 0x123   : > { %v517_v10 = vadd.f32 %v499_v40, %v475_v4  ;;  %v719_v36 = vrot.slane %v679_v0, 1  ;;  %v620_v44 = vsel %vm605_vm0, %v618_v29, %v619_v19  ;;  %v778_v25 = vmul.f32 %v7108_v38, %v7025_v60 }
 0x124   : > { %v779_v6 = vmul.f32 %v7108_v38, %v7027_v35  ;;  %v878_v30 = vmul.f32 %v7109_v32, %v5058_v23  ;;  %v3883_v14 = vpack.c.bf16 %v3698_v31, %v3697_v62  ;;  %v558_v13 = vadd.f32 %v540_v55, %v516_v9  ;;  %v1188_v62 = vld [vmem:[%s4378_s9 + $0x4c] sm:$0x3] }
 0x125   : > { %v559_v8 = vadd.f32 %v541_v7, %v517_v10  ;;  %v720_v53 = vsel %vm605_vm0, %v718_v41, %v719_v36  ;;  %v818_v17 = vrot.slane %v778_v25, 1  ;;  %v879_v21 = vmul.f32 %v7109_v32, %v5060_v43  ;;  %v1187_v41 = vld [vmem:[%s4378_s9 + $0x48] sm:$0xe] }
 0x126   : > { %v819_v2 = vrot.slane %v779_v6, 1  ;;  %v918_v4 = vrot.slane %v878_v30, 1  ;;  %4249 = vmatmul.msk.bf16.vlgmr.msrb.gmra.mxu0 %vm3743_vm5, %v3883_v14  ;;  %v659_v40 = vadd.f32 %v620_v44, %v558_v13  ;;  %v978_v57 = vmul.f32 %v7110_v1, %v7102_v5  ;;  %v7112_v30 = vld [vmem:[#allocation31_spill] sm:$0xff] }
 0x127   : > { %v660_v15 = vadd.f32 %v619_v19, %v559_v8  ;;  %v979_v55 = vmul.f32 %v7110_v1, %v7104_v27  ;;  %v919_v25 = vrot.slane %v879_v21, 1  ;;  %v1078_v11 = vmul.f32 %v7111_v45, %v5478_v47  ;;  %4056 = vmatpush.bf16.msrb.mxu0 %v5242_v54 }
 0x128   : > { %v820_v7 = vsel %vm605_vm0, %v818_v17, %v819_v2  ;;  %v1079_v0 = vmul.f32 %v7111_v45, %v5480_v26  ;;  %v759_v31 = vadd.f32 %v720_v53, %v659_v40  ;;  %v1018_v29 = vrot.slane %v978_v57, 1 }
 0x129   : > { %v760_v44 = vadd.f32 %v719_v36, %v660_v15  ;;  %v1019_v19 = vrot.slane %v979_v55, 1  ;;  %v920_v9 = vsel %vm605_vm0, %v918_v4, %v919_v25  ;;  %v1118_v10 = vrot.slane %v1078_v11, 1  ;;  %v7115_v55 = vld [vmem:[#allocation32_spill] sm:$0xff] }
 0x12a   : > { %v1119_v6 = vrot.slane %v1079_v0, 1  ;;  %v1226_v14 = vmul.f32 %v7112_v30, %v7000_v48  ;;  %v859_v13 = vadd.f32 %v820_v7, %v759_v31  ;;  %v1227_v54 = vmul.f32 %v7112_v30, %v7002_v42 }
 0x12b   : > { %v860_v8 = vadd.f32 %v819_v2, %v760_v44  ;;  %v1020_v17 = vsel %vm605_vm0, %v1018_v29, %v1019_v19  ;;  %v5541_v21 = vunpack.c.l.bf16 %v1187_v41  ;;  %v5543_v40 = vunpack.c.l.bf16 %v1188_v62  ;;  %4057 = vmatpush.bf16.msrb.mxu0 %v5259_v49 }
 0x12c   : > { %v1120_v36 = vsel %vm605_vm0, %v1118_v10, %v1119_v6  ;;  %v1267_v53 = vrot.slane %v1226_v14, 2  ;;  %v959_v4 = vadd.f32 %v920_v9, %v859_v13  ;;  %v1268_v57 = vrot.slane %v1227_v54, 2 }
 0x12d   : > { %7113 = vst [vmem:[#allocation5_spill] sm:$0xff] %v5541_v21  ;;  %v960_v15 = vadd.f32 %v919_v25, %v860_v8  ;;  %v1331_v2 = vmul.f32 %v7115_v55, %v7003_v28  ;;  %v1332_v7 = vmul.f32 %v7115_v55, %v7041_v39  ;;  %v1435_v11 = vmul.f32 %v7075_v24, %v7042_v46 }
 0x12e   : > { %7114 = vst [vmem:[#allocation6_spill] sm:$0xff] %v5543_v40  ;;  %v1436_v0 = vmul.f32 %v7075_v24, %v7044_v12  ;;  %v1539_v31 = vmul.f32 %v7076_v52, %v5130_v3  ;;  %v1059_v44 = vadd.f32 %v1020_v17, %v959_v4  ;;  %v1269_v25 = vsel %vm1254_vm1, %v1267_v53, %v1268_v57  ;;  %v7116_v4 = vld [vmem:[#allocation28_spill] sm:$0xff]  ;;  %v7135_v24 = vld [vmem:[#allocation47_spill] sm:$0xff] }
 0x12f   : > { %v1060_v49 = vadd.f32 %v1019_v19, %v960_v15  ;;  %v1371_v29 = vrot.slane %v1331_v2, 2  ;;  %v1372_v41 = vrot.slane %v1332_v7, 2  ;;  %v1475_v62 = vrot.slane %v1435_v11, 2  ;;  %4058 = vmatpush.bf16.msrb.mxu0 %v5276_v59 }
 0x130   : > { %v1476_v9 = vrot.slane %v1436_v0, 2  ;;  %v1540_v10 = vmul.f32 %v7076_v52, %v5142_v63  ;;  %v1159_v14 = vadd.f32 %v1120_v36, %v1059_v44  ;;  %v1579_v8 = vrot.slane %v1539_v31, 2  ;;  %v7117_v0 = vld [vmem:[#allocation37_spill] sm:$0xff]  ;;  %v7118_v44 = vld [vmem:[#allocation36_spill] sm:$0xff] }
 0x131   : > { %v1160_v13 = vadd.f32 %v1119_v6, %v1060_v49  ;;  %v1643_v54 = vmul.f32 %v7077_v22, %v5330_v56  ;;  %v1373_v17 = vsel %vm1254_vm1, %v1371_v29, %v1372_v41  ;;  %v1644_v15 = vmul.f32 %v7077_v22, %v7116_v4 }
 0x132   : > { %v1477_v19 = vsel %vm1254_vm1, %v1475_v62, %v1476_v9  ;;  %v1580_v53 = vrot.slane %v1540_v10, 2  ;;  %v1308_v2 = vadd.f32 %v1269_v25, %v1159_v14  ;;  %v1747_v59 = vmul.f32 %v7117_v0, %v5541_v21 }
 0x133   : > { %v1309_v7 = vadd.f32 %v1268_v57, %v1160_v13  ;;  %v1683_v11 = vrot.slane %v1643_v54, 2  ;;  %v1684_v36 = vrot.slane %v1644_v15, 2  ;;  %v1748_v31 = vmul.f32 %v7117_v0, %v5543_v40  ;;  %v7119_v54 = vld [vmem:[#allocation38_spill] sm:$0xff] }
 0x134   : > { %v1581_v6 = vsel %vm1254_vm1, %v1579_v8, %v1580_v53  ;;  %v1847_v49 = vmul.f32 %v7118_v44, %v7000_v48  ;;  %v1412_v29 = vadd.f32 %v1373_v17, %v1308_v2  ;;  %v1787_v10 = vrot.slane %v1747_v59, 2  ;;  %v7120_v17 = vld [vmem:[#allocation39_spill] sm:$0xff] }
 0x135   : > { %v1413_v62 = vadd.f32 %v1372_v41, %v1309_v7  ;;  %v1848_v25 = vmul.f32 %v7118_v44, %v7002_v42  ;;  %v1685_v57 = vsel %vm1254_vm1, %v1683_v11, %v1684_v36  ;;  %v1788_v14 = vrot.slane %v1748_v31, 2 }
 0x136   : > { %v1888_v13 = vrot.slane %v1847_v49, 3  ;;  %v1948_v8 = vmul.f32 %v7119_v54, %v7003_v28  ;;  %v1516_v15 = vadd.f32 %v1477_v19, %v1412_v29  ;;  %v1949_v0 = vmul.f32 %v7119_v54, %v7041_v39  ;;  %v7121_v49 = vld [vmem:[#allocation40_spill] sm:$0xff]  ;;  %v2458_v54 = vld [vmem:[%s4378_s9 + $0x4c] sm:$0x7] }
 0x137   : > { %v1517_v22 = vadd.f32 %v1476_v9, %v1413_v62  ;;  %v1889_v52 = vrot.slane %v1848_v25, 3  ;;  %v1789_v48 = vsel %vm1254_vm1, %v1787_v10, %v1788_v14  ;;  %v2048_v2 = vmul.f32 %v7120_v17, %v7042_v46 }
 0x138   : > { %v1988_v41 = vrot.slane %v1948_v8, 3  ;;  %v2049_v42 = vmul.f32 %v7120_v17, %v7044_v12  ;;  %v1620_v7 = vadd.f32 %v1581_v6, %v1516_v15  ;;  %v1989_v31 = vrot.slane %v1949_v0, 3  ;;  %v7122_v6 = vld [vmem:[#allocation41_spill] sm:$0xff] }
 0x139   : > { %v1621_v11 = vadd.f32 %v1580_v53, %v1517_v22  ;;  %v1890_v59 = vsel %vm1875_vm2, %v1888_v13, %v1889_v52  ;;  %v2088_v19 = vrot.slane %v2048_v2, 3  ;;  %v2148_v29 = vmul.f32 %v7121_v49, %v5130_v3 }
 0x13a   : > { %v2089_v9 = vrot.slane %v2049_v42, 3  ;;  %v2149_v62 = vmul.f32 %v7121_v49, %v5142_v63  ;;  %v1724_v10 = vadd.f32 %v1685_v57, %v1620_v7  ;;  %v1990_v8 = vsel %vm1875_vm2, %v1988_v41, %v1989_v31  ;;  %v7123_v49 = vld [vmem:[#allocation42_spill] sm:$0xff]  ;;  %v2457_v7 = vld [vmem:[%s4378_s9 + $0x48] sm:$0xc] }
 0x13b   : > { %v1725_v25 = vadd.f32 %v1684_v36, %v1621_v11  ;;  %v2248_v22 = vmul.f32 %v7122_v6, %v5330_v56  ;;  %v2188_v0 = vrot.slane %v2148_v29, 3  ;;  %v2249_v15 = vmul.f32 %v7122_v6, %v7116_v4  ;;  %v7133_v56 = vld [vmem:[#allocation4_spill] sm:$0xff] }
 0x13c   : > { %v2090_v53 = vsel %vm1875_vm2, %v2088_v19, %v2089_v9  ;;  %v2189_v13 = vrot.slane %v2149_v62, 3  ;;  %v1828_v2 = vadd.f32 %v1789_v48, %v1724_v10  ;;  %v2348_v57 = vmul.f32 %v7123_v49, %v5541_v21  ;;  %v7124_v19 = vld [vmem:[#allocation43_spill] sm:$0xff] }
 0x13d   : > { %v1829_v42 = vadd.f32 %v1788_v14, %v1725_v25  ;;  %v2288_v17 = vrot.slane %v2248_v22, 3  ;;  %v2289_v41 = vrot.slane %v2249_v15, 3  ;;  %v2349_v11 = vmul.f32 %v7123_v49, %v5543_v40 }
 0x13e   : > { %v2190_v36 = vsel %vm1875_vm2, %v2188_v0, %v2189_v13  ;;  %v2496_v29 = vmul.f32 %v7124_v19, %v4714_v51  ;;  %v1929_v62 = vadd.f32 %v1890_v59, %v1828_v2  ;;  %v2388_v6 = vrot.slane %v2348_v57, 3 }
 0x13f   : > { %v1930_v44 = vadd.f32 %v1889_v52, %v1829_v42  ;;  %v2497_v14 = vmul.f32 %v7124_v19, %v4716_v16  ;;  %v2290_v48 = vsel %vm1875_vm2, %v2288_v17, %v2289_v41  ;;  %v2389_v10 = vrot.slane %v2349_v11, 3  ;;  %v7129_v11 = vld [vmem:[#allocation46_spill] sm:$0xff] }
 0x140   : > { %v2537_v25 = vrot.slane %v2496_v29, 4  ;;  %v5608_v22 = vunpack.c.l.bf16 %v2457_v7  ;;  %v2029_v0 = vadd.f32 %v1990_v8, %v1929_v62  ;;  %v5610_v49 = vunpack.c.l.bf16 %v2458_v54  ;;  %v7127_v8 = vld [vmem:[#allocation21_spill] sm:$0xff] }
 0x141   : > { %v2030_v15 = vadd.f32 %v1989_v31, %v1930_v44  ;;  %v2538_v21 = vrot.slane %v2497_v14, 4  ;;  %v2390_v40 = vsel %vm1875_vm2, %v2388_v6, %v2389_v10  ;;  %v2601_v52 = vmul.f32 %v7087_v18, %v4724_v33  ;;  %v7128_v6 = vld [vmem:[#allocation26_spill] sm:$0xff] }
 0x142   : > { %7125 = vst [vmem:[#allocation7_spill] sm:$0xff] %v5608_v22  ;;  %v2602_v59 = vmul.f32 %v7087_v18, %v4726_v58  ;;  %v2705_v17 = vmul.f32 %v7088_v37, %v4964_v50  ;;  %v2129_v2 = vadd.f32 %v2090_v53, %v2029_v0  ;;  %v2706_v44 = vmul.f32 %v7088_v37, %v7127_v8  ;;  %v7130_v18 = vld [vmem:[#allocation3_spill] sm:$0xff]  ;;  %v7131_v0 = vld [vmem:[#allocation29_spill] sm:$0xff] }
 0x143   : > { %7126 = vst [vmem:[#allocation8_spill] sm:$0xff] %v5610_v49  ;;  %v2130_v42 = vadd.f32 %v2089_v9, %v2030_v15  ;;  %v2539_v57 = vsel %vm2524_vm3, %v2537_v25, %v2538_v21  ;;  %v2641_v54 = vrot.slane %v2601_v52, 4  ;;  %v2809_v29 = vmul.f32 %v7129_v11, %v7128_v6  ;;  %v7132_v25 = vld [vmem:[#allocation48_spill] sm:$0xff] }
 0x144   : > { %v2642_v31 = vrot.slane %v2602_v59, 4  ;;  %v2745_v7 = vrot.slane %v2705_v17, 4  ;;  %v2229_v62 = vadd.f32 %v2190_v36, %v2129_v2  ;;  %v2746_v19 = vrot.slane %v2706_v44, 4  ;;  %v7134_v2 = vld [vmem:[#allocation49_spill] sm:$0xff] }
 0x145   : > { %v2230_v14 = vadd.f32 %v2189_v13, %v2130_v42  ;;  %v2810_v4 = vmul.f32 %v7129_v11, %v7130_v18  ;;  %v2849_v9 = vrot.slane %v2809_v29, 4  ;;  %v2913_v15 = vmul.f32 %v7132_v25, %v7131_v0 }
 0x146   : > { %v2643_v53 = vsel %vm2524_vm3, %v2641_v54, %v2642_v31  ;;  %v2914_v52 = vmul.f32 %v7132_v25, %v7133_v56  ;;  %v2329_v59 = vadd.f32 %v2290_v48, %v2229_v62  ;;  %v2747_v37 = vsel %vm2524_vm3, %v2745_v7, %v2746_v19 }
 0x147   : > { %v2330_v17 = vadd.f32 %v2289_v41, %v2230_v14  ;;  %v2850_v63 = vrot.slane %v2810_v4, 4  ;;  %v2953_v36 = vrot.slane %v2913_v15, 4  ;;  %v3017_v42 = vmul.f32 %v7134_v2, %v5608_v22 }
 0x148   : > { %v2954_v13 = vrot.slane %v2914_v52, 4  ;;  %v3018_v44 = vmul.f32 %v7134_v2, %v5610_v49  ;;  %v2429_v54 = vadd.f32 %v2390_v40, %v2329_v59  ;;  %v3117_v25 = vmul.f32 %v7135_v24, %v4714_v51  ;;  %v7136_v52 = vld [vmem:[#allocation50_spill] sm:$0xff]  ;;  %v7137_v51 = vld [vmem:[#allocation51_spill] sm:$0xff] }
 0x149   : > { %v2430_v29 = vadd.f32 %v2389_v10, %v2330_v17  ;;  %v2851_v11 = vsel %vm2524_vm3, %v2849_v9, %v2850_v63  ;;  %v3057_v48 = vrot.slane %v3017_v42, 4  ;;  %v3118_v4 = vmul.f32 %v7135_v24, %v4716_v16  ;;  %v293_v24 = vld [vmem:[%s4378_s9 + $0x50] sm:$0xf] }
 0x14a   : > { %v2955_v41 = vsel %vm2524_vm3, %v2953_v36, %v2954_v13  ;;  %v3058_v7 = vrot.slane %v3018_v44, 4  ;;  %v2578_v62 = vadd.f32 %v2539_v57, %v2429_v54  ;;  %v3158_v15 = vrot.slane %v3117_v25, 5  ;;  %v7138_v44 = vld [vmem:[#allocation52_spill] sm:$0xff] }
 0x14b   : > { %v2579_v14 = vadd.f32 %v2538_v21, %v2430_v29  ;;  %v3218_v2 = vmul.f32 %v7136_v52, %v4724_v33  ;;  %v3159_v10 = vrot.slane %v3118_v4, 5  ;;  %v3219_v9 = vmul.f32 %v7136_v52, %v4726_v58 }
 0x14c   : > { %v3059_v40 = vsel %vm2524_vm3, %v3057_v48, %v3058_v7  ;;  %v3318_v59 = vmul.f32 %v7137_v51, %v4964_v50  ;;  %v2682_v17 = vadd.f32 %v2643_v53, %v2578_v62  ;;  %v3319_v16 = vmul.f32 %v7137_v51, %v7127_v8 }
 0x14d   : > { %v2683_v36 = vadd.f32 %v2642_v31, %v2579_v14  ;;  %v3258_v42 = vrot.slane %v3218_v2, 5  ;;  %v3160_v21 = vsel %vm3145_vm4, %v3158_v15, %v3159_v10  ;;  %v3259_v57 = vrot.slane %v3219_v9, 5  ;;  %v7139_v2 = vld [vmem:[#allocation53_spill] sm:$0xff] }
 0x14e   : > { %v3358_v25 = vrot.slane %v3318_v59, 5  ;;  %v3418_v54 = vmul.f32 %v7138_v44, %v7128_v6  ;;  %v2786_v29 = vadd.f32 %v2747_v37, %v2682_v17  ;;  %v3359_v4 = vrot.slane %v3319_v16, 5 }
 0x14f   : > { %v2787_v48 = vadd.f32 %v2746_v19, %v2683_v36  ;;  %v3419_v52 = vmul.f32 %v7138_v44, %v7130_v18  ;;  %v3260_v31 = vsel %vm3145_vm4, %v3258_v42, %v3259_v57  ;;  %v3518_v62 = vmul.f32 %v7139_v2, %v7131_v0  ;;  %v7140_v36 = vld [vmem:[#allocation54_spill] sm:$0xff]  ;;  %v294_v0 = vld [vmem:[%s4378_s9 + $0x54] sm:$0x1] }
 0x150   : > { %v3458_v53 = vrot.slane %v3418_v54, 5  ;;  %v3519_v14 = vmul.f32 %v7139_v2, %v7133_v56  ;;  %v2890_v15 = vadd.f32 %v2851_v11, %v2786_v29  ;;  %v3360_v37 = vsel %vm3145_vm4, %v3358_v25, %v3359_v4  ;;  %v7141_v11 = vld [vmem:[#allocation9_spill] sm:$0xff] }
 0x151   : > { %v2891_v9 = vadd.f32 %v2850_v63, %v2787_v48  ;;  %v3459_v19 = vrot.slane %v3419_v52, 5  ;;  %v3558_v59 = vrot.slane %v3518_v62, 5  ;;  %v3618_v16 = vmul.f32 %v7140_v36, %v5608_v22 }
 0x152   : > { %v3559_v17 = vrot.slane %v3519_v14, 5  ;;  %v3619_v42 = vmul.f32 %v7140_v36, %v5610_v49  ;;  %v2994_v54 = vadd.f32 %v2955_v41, %v2890_v15  ;;  %v332_v63 = vmul.f32 %v7141_v11, %v7022_v20  ;;  %v7142_v36 = vld [vmem:[#allocation10_spill] sm:$0xff] }
 0x153   : > { %v2995_v44 = vadd.f32 %v2954_v13, %v2891_v9  ;;  %v3460_v51 = vsel %vm3145_vm4, %v3458_v53, %v3459_v19  ;;  %v3658_v52 = vrot.slane %v3618_v16, 5  ;;  %v333_v48 = vmul.f32 %v7141_v11, %v7024_v61 }
 0x154   : > { %v3560_v25 = vsel %vm3145_vm4, %v3558_v59, %v3559_v17  ;;  %v3659_v29 = vrot.slane %v3619_v42, 5  ;;  %v3098_v62 = vadd.f32 %v3059_v40, %v2994_v54  ;;  %v374_v41 = vmul.f32 %v7142_v36, %v7025_v60  ;;  %v7143_v59 = vld [vmem:[#allocation11_spill] sm:$0xff] }
 0x155   : > { %v3099_v14 = vadd.f32 %v3058_v7, %v2995_v44  ;;  %v375_v13 = vmul.f32 %v7142_v36, %v7027_v35  ;;  %v5679_v15 = vunpack.c.l.bf16 %v293_v24  ;;  %v5681_v9 = vunpack.c.l.bf16 %v294_v0  ;;  %v7144_v44 = vld [vmem:[#allocation12_spill] sm:$0xff]  ;;  %v7145_v24 = vld [vmem:[#allocation13_spill] sm:$0xff] }
 0x156   : > { %v3660_v53 = vsel %vm3145_vm4, %v3658_v52, %v3659_v29  ;;  %v416_v16 = vmul.f32 %v7143_v59, %v5058_v23  ;;  %v3199_v42 = vadd.f32 %v3160_v21, %v3098_v62  ;;  %v392_v11 = vadd.f32 %v374_v41, %v332_v63  ;;  %v7146_v63 = vld [vmem:[#allocation14_spill] sm:$0xff] }
 0x157   : > { %v3200_v2 = vadd.f32 %v3159_v10, %v3099_v14  ;;  %v393_v40 = vadd.f32 %v375_v13, %v333_v48  ;;  %v417_v7 = vmul.f32 %v7143_v59, %v5060_v43  ;;  %v458_v54 = vmul.f32 %v7144_v44, %v7102_v5  ;;  %v7147_v14 = vld [vmem:[#allocation15_spill] sm:$0xff] }
 0x158   : > { %v459_v52 = vmul.f32 %v7144_v44, %v7104_v27  ;;  %v500_v0 = vmul.f32 %v7145_v24, %v5478_v47  ;;  %v3299_v36 = vadd.f32 %v3260_v31, %v3199_v42  ;;  %v434_v22 = vadd.f32 %v416_v16, %v392_v11 }
 0x159   : > { %v3300_v49 = vadd.f32 %v3259_v57, %v3200_v2  ;;  %v501_v10 = vmul.f32 %v7145_v24, %v5480_v26  ;;  %v435_v21 = vadd.f32 %v417_v7, %v393_v40  ;;  %v542_v48 = vmul.f32 %v7146_v63, %v5679_v15 }
 0x15a   : > { %v543_v62 = vmul.f32 %v7146_v63, %v5681_v9  ;;  %v579_v41 = vmul.f32 %v7147_v14, %v7022_v20  ;;  %v3399_v13 = vadd.f32 %v3360_v37, %v3299_v36  ;;  %v476_v59 = vadd.f32 %v458_v54, %v434_v22 }
 0x15b   : > { %v3400_v44 = vadd.f32 %v3359_v4, %v3300_v49  ;;  %v580_v57 = vmul.f32 %v7147_v14, %v7024_v61  ;;  %v477_v31 = vadd.f32 %v459_v52, %v435_v21  ;;  %v680_v11 = vmul.f32 %v7107_v34, %v7025_v60 }
 0x15c   : > { %v621_v2 = vrot.slane %v579_v41, 1  ;;  %v681_v16 = vmul.f32 %v7107_v34, %v7027_v35  ;;  %v3499_v42 = vadd.f32 %v3460_v51, %v3399_v13  ;;  %v518_v7 = vadd.f32 %v500_v0, %v476_v59 }
 0x15d   : > { %v3500_v40 = vadd.f32 %v3459_v19, %v3400_v44  ;;  %v622_v63 = vrot.slane %v580_v57, 1  ;;  %v519_v24 = vadd.f32 %v501_v10, %v477_v31  ;;  %v721_v20 = vrot.slane %v680_v11, 1 }
 0x15e   : > { %v722_v37 = vrot.slane %v681_v16, 1  ;;  %v780_v49 = vmul.f32 %v7108_v38, %v5058_v23  ;;  %v3599_v22 = vadd.f32 %v3560_v25, %v3499_v42  ;;  %v560_v4 = vadd.f32 %v542_v48, %v518_v7  ;;  %v1189_v7 = vld [vmem:[%s4378_s9 + $0x50] sm:$0xe] }
 0x15f   : > { %v3600_v61 = vadd.f32 %v3559_v17, %v3500_v40  ;;  %v623_v36 = vsel %vm605_vm0, %v621_v2, %v622_v63  ;;  %v561_v54 = vadd.f32 %v543_v62, %v519_v24  ;;  %v781_v51 = vmul.f32 %v7108_v38, %v5060_v43 }
 0x160   : > { %v723_v52 = vsel %vm605_vm0, %v721_v20, %v722_v37  ;;  %v821_v19 = vrot.slane %v780_v49, 1  ;;  %v3699_v59 = vadd.f32 %v3660_v53, %v3599_v22  ;;  %v661_v0 = vadd.f32 %v623_v36, %v560_v4  ;;  %v4296_v49 = vld [vmem:[%s6544_s2 + $0x10] sm:$0xff] }
 0x161   : > { %v3700_v44 = vadd.f32 %v3659_v29, %v3600_v61  ;;  %v880_v10 = vmul.f32 %v7109_v32, %v7102_v5  ;;  %v662_v21 = vadd.f32 %v622_v63, %v561_v54  ;;  %v822_v41 = vrot.slane %v781_v51, 1  ;;  %v1190_v54 = vld [vmem:[%s4378_s9 + $0x54] sm:$0x3] }
 0x162   : > { %v881_v17 = vmul.f32 %v7109_v32, %v7104_v27  ;;  %v980_v25 = vmul.f32 %v7110_v1, %v5478_v47  ;;  %v761_v48 = vadd.f32 %v723_v52, %v661_v0  ;;  %v981_v53 = vmul.f32 %v7110_v1, %v5480_v26 }
 0x163   : > { %v3924_v24 = vpack.c.bf16 %v3700_v44, %v3699_v59  ;;  %v921_v62 = vrot.slane %v880_v10, 1  ;;  %v762_v29 = vadd.f32 %v722_v37, %v662_v21  ;;  %v823_v13 = vsel %vm605_vm0, %v821_v19, %v822_v41 }
 0x164   : > { %v922_v57 = vrot.slane %v881_v17, 1  ;;  %v1021_v31 = vrot.slane %v980_v25, 1  ;;  %v861_v63 = vadd.f32 %v823_v13, %v761_v48  ;;  %v1022_v2 = vrot.slane %v981_v53, 1  ;;  %v4297_v48 = vld [vmem:[%s6544_s2 + $0x8] sm:$0xff] }
 0x165   : > { %4253 = vmatmul.msk.bf16.vlgmr.msra.gmra.mxu1 %vm3743_vm5, %v3924_v24  ;;  %v1080_v11 = vmul.f32 %v7111_v45, %v5679_v15  ;;  %v1081_v16 = vmul.f32 %v7111_v45, %v5681_v9  ;;  %v862_v42 = vadd.f32 %v822_v41, %v762_v29  ;;  %v1228_v20 = vmul.f32 %v7112_v30, %v7003_v28  ;;  %v7150_v29 = vld [vmem:[#allocation33_spill] sm:$0xff] }
 0x166   : > { %v923_v40 = vsel %vm605_vm0, %v921_v62, %v922_v57  ;;  %v1229_v37 = vmul.f32 %v7112_v30, %v7041_v39  ;;  %4097 = vmatpush.bf16.msra.mxu1 %v4296_v49  ;;  %v1023_v61 = vsel %vm605_vm0, %v1021_v31, %v1022_v2  ;;  %v1333_v59 = vmul.f32 %v7115_v55, %v7042_v46 }
 0x167   : > { %v961_v22 = vadd.f32 %v923_v40, %v861_v63  ;;  %v1121_v4 = vrot.slane %v1080_v11, 1  ;;  %v1122_v36 = vrot.slane %v1081_v16, 1  ;;  %v962_v52 = vadd.f32 %v922_v57, %v862_v42  ;;  %v7151_v57 = vld [vmem:[#allocation25_spill] sm:$0xff]  ;;  %v7153_v11 = vld [vmem:[#allocation34_spill] sm:$0xff]  ;;  %v7154_v42 = vld [vmem:[#allocation28_spill] sm:$0xff] }
 0x168   : > { %v1270_v51 = vrot.slane %v1228_v20, 2  ;;  %v1271_v19 = vrot.slane %v1229_v37, 2  ;;  %v1334_v10 = vmul.f32 %v7115_v55, %v7044_v12  ;;  %v5743_v21 = vunpack.c.l.bf16 %v1189_v7  ;;  %v7155_v7 = vld [vmem:[#allocation5_spill] sm:$0xff]  ;;  %v7156_v20 = vld [vmem:[#allocation35_spill] sm:$0xff] }
 0x169   : > { %v1061_v44 = vadd.f32 %v1023_v61, %v961_v22  ;;  %v1123_v0 = vsel %vm605_vm0, %v1121_v4, %v1122_v36  ;;  %v1062_v41 = vadd.f32 %v1022_v2, %v962_v52  ;;  %v1374_v25 = vrot.slane %v1333_v59, 2  ;;  %v7152_v2 = vld [vmem:[#allocation27_spill] sm:$0xff]  ;;  %v7157_v59 = vld [vmem:[#allocation6_spill] sm:$0xff] }
 0x16a   : > { %7148 = vst [vmem:[#allocation55_spill] sm:$0xff] %v5743_v21  ;;  %v1272_v17 = vsel %vm1254_vm1, %v1270_v51, %v1271_v19  ;;  %v5746_v24 = vunpack.c.l.bf16 %v1190_v54  ;;  %4098 = vmatpush.bf16.msra.mxu1 %v4297_v48  ;;  %v1375_v53 = vrot.slane %v1334_v10, 2  ;;  %v1437_v13 = vmul.f32 %v7150_v29, %v5130_v3 }
 0x16b   : > { %v1161_v62 = vadd.f32 %v1123_v0, %v1061_v44  ;;  %v1438_v31 = vmul.f32 %v7150_v29, %v7151_v57  ;;  %v1162_v63 = vadd.f32 %v1122_v36, %v1062_v41  ;;  %v1541_v16 = vmul.f32 %v7153_v11, %v7152_v2  ;;  %v4298_v44 = vld [vmem:[%s6544_s2] sm:$0xff] }
 0x16c   : > { %7149 = vst [vmem:[#allocation56_spill] sm:$0xff] %v5746_v24  ;;  %v1542_v40 = vmul.f32 %v7153_v11, %v7154_v42  ;;  %v1645_v37 = vmul.f32 %v7156_v20, %v7155_v7  ;;  %v1376_v22 = vsel %vm1254_vm1, %v1374_v25, %v1375_v53  ;;  %v1478_v61 = vrot.slane %v1437_v13, 2  ;;  %v7174_v11 = vld [vmem:[#allocation8_spill] sm:$0xff] }
 0x16d   : > { %v1310_v49 = vadd.f32 %v1272_v17, %v1161_v62  ;;  %v1479_v4 = vrot.slane %v1438_v31, 2  ;;  %v1311_v54 = vadd.f32 %v1271_v19, %v1162_v63  ;;  %v1582_v52 = vrot.slane %v1541_v16, 2  ;;  %v7158_v17 = vld [vmem:[#allocation37_spill] sm:$0xff]  ;;  %v7159_v16 = vld [vmem:[#allocation36_spill] sm:$0xff] }
 0x16e   : > { %v1583_v51 = vrot.slane %v1542_v40, 2  ;;  %v1646_v36 = vmul.f32 %v7156_v20, %v7157_v59  ;;  %4099 = vmatpush.bf16.msra.mxu1 %v4298_v44  ;;  %v1686_v41 = vrot.slane %v1645_v37, 2  ;;  %v1749_v25 = vmul.f32 %v7158_v17, %v5743_v21 }
 0x16f   : > { %v1414_v0 = vadd.f32 %v1376_v22, %v1310_v49  ;;  %v1480_v10 = vsel %vm1254_vm1, %v1478_v61, %v1479_v4  ;;  %v1415_v48 = vadd.f32 %v1375_v53, %v1311_v54  ;;  %v1750_v13 = vmul.f32 %v7158_v17, %v5746_v24  ;;  %v7160_v53 = vld [vmem:[#allocation38_spill] sm:$0xff]  ;;  %v7161_v17 = vld [vmem:[#allocation39_spill] sm:$0xff] }
 0x170   : > { %v1584_v19 = vsel %vm1254_vm1, %v1582_v52, %v1583_v51  ;;  %v1687_v62 = vrot.slane %v1646_v36, 2  ;;  %v1790_v63 = vrot.slane %v1749_v25, 2  ;;  %v1849_v40 = vmul.f32 %v7159_v16, %v7003_v28 }
 0x171   : > { %v1518_v31 = vadd.f32 %v1480_v10, %v1414_v0  ;;  %v1850_v49 = vmul.f32 %v7159_v16, %v7041_v39  ;;  %v1519_v22 = vadd.f32 %v1479_v4, %v1415_v48  ;;  %v1791_v61 = vrot.slane %v1750_v13, 2 }
 0x172   : > { %v1688_v37 = vsel %vm1254_vm1, %v1686_v41, %v1687_v62  ;;  %v1950_v54 = vmul.f32 %v7160_v53, %v7042_v46  ;;  %v1891_v36 = vrot.slane %v1849_v40, 3  ;;  %v1951_v0 = vmul.f32 %v7160_v53, %v7044_v12  ;;  %v7162_v40 = vld [vmem:[#allocation40_spill] sm:$0xff] }
 0x173   : > { %v1622_v52 = vadd.f32 %v1584_v19, %v1518_v31  ;;  %v1892_v44 = vrot.slane %v1850_v49, 3  ;;  %v1623_v10 = vadd.f32 %v1583_v51, %v1519_v22  ;;  %v1792_v25 = vsel %vm1254_vm1, %v1790_v63, %v1791_v61 }
 0x174   : > { %v1991_v28 = vrot.slane %v1950_v54, 3  ;;  %v2050_v39 = vmul.f32 %v7161_v17, %v5130_v3  ;;  %v1992_v48 = vrot.slane %v1951_v0, 3  ;;  %v2051_v13 = vmul.f32 %v7161_v17, %v7151_v57 }
 0x175   : > { %v1726_v4 = vadd.f32 %v1688_v37, %v1622_v52  ;;  %v1893_v41 = vsel %vm1875_vm2, %v1891_v36, %v1892_v44  ;;  %v1727_v19 = vadd.f32 %v1687_v62, %v1623_v10  ;;  %v2150_v49 = vmul.f32 %v7162_v40, %v7152_v2  ;;  %v7163_v37 = vld [vmem:[#allocation41_spill] sm:$0xff] }
 0x176   : > { %v2091_v31 = vrot.slane %v2050_v39, 3  ;;  %v2151_v51 = vmul.f32 %v7162_v40, %v7154_v42  ;;  %v1993_v22 = vsel %vm1875_vm2, %v1991_v28, %v1992_v48  ;;  %v2092_v54 = vrot.slane %v2051_v13, 3 }
 0x177   : > { %v1830_v63 = vadd.f32 %v1792_v25, %v1726_v4  ;;  %v2250_v52 = vmul.f32 %v7163_v37, %v7155_v7  ;;  %v1831_v36 = vadd.f32 %v1791_v61, %v1727_v19  ;;  %v2191_v0 = vrot.slane %v2150_v49, 3  ;;  %v7164_v25 = vld [vmem:[#allocation42_spill] sm:$0xff] }
 0x178   : > { %v2192_v53 = vrot.slane %v2151_v51, 3  ;;  %v2251_v62 = vmul.f32 %v7163_v37, %v7157_v59  ;;  %v2093_v39 = vsel %vm1875_vm2, %v2091_v31, %v2092_v54  ;;  %v2350_v4 = vmul.f32 %v7164_v25, %v5743_v21  ;;  %v2459_v51 = vld [vmem:[%s4378_s9 + $0x50] sm:$0xc]  ;;  %v7165_v37 = vld [vmem:[#allocation43_spill] sm:$0xff] }
 0x179   : > { %v1931_v10 = vadd.f32 %v1893_v41, %v1830_v63  ;;  %v2291_v17 = vrot.slane %v2250_v52, 3  ;;  %v1932_v28 = vadd.f32 %v1892_v44, %v1831_v36  ;;  %v2351_v61 = vmul.f32 %v7164_v25, %v5746_v24  ;;  %v2460_v44 = vld [vmem:[%s4378_s9 + $0x54] sm:$0x7] }
 0x17a   : > { %v2193_v13 = vsel %vm1875_vm2, %v2191_v0, %v2192_v53  ;;  %v2292_v40 = vrot.slane %v2251_v62, 3  ;;  %v2391_v49 = vrot.slane %v2350_v4, 3  ;;  %v2498_v41 = vmul.f32 %v7165_v37, %v4724_v33  ;;  %v7166_v36 = vld [vmem:[#allocation44_spill] sm:$0xff] }
 0x17b   : > { %v2031_v19 = vadd.f32 %v1993_v22, %v1931_v10  ;;  %v2499_v31 = vmul.f32 %v7165_v37, %v4726_v58  ;;  %v2032_v63 = vadd.f32 %v1992_v48, %v1932_v28  ;;  %v2392_v16 = vrot.slane %v2351_v61, 3 }
 0x17c   : > { %v2293_v52 = vsel %vm1875_vm2, %v2291_v17, %v2292_v40  ;;  %v2603_v0 = vmul.f32 %v7166_v36, %v4964_v50  ;;  %v2540_v20 = vrot.slane %v2498_v41, 4  ;;  %v2604_v22 = vmul.f32 %v7166_v36, %v7127_v8 }
 0x17d   : > { %v2131_v62 = vadd.f32 %v2093_v39, %v2031_v19  ;;  %v2541_v25 = vrot.slane %v2499_v31, 4  ;;  %v2132_v10 = vadd.f32 %v2092_v54, %v2032_v63  ;;  %v2393_v4 = vsel %vm1875_vm2, %v2391_v49, %v2392_v16  ;;  %v7169_v39 = vld [vmem:[#allocation45_spill] sm:$0xff]  ;;  %v7171_v54 = vld [vmem:[#allocation46_spill] sm:$0xff] }
 0x17e   : > { %v2644_v24 = vrot.slane %v2603_v0, 4  ;;  %v5815_v21 = vunpack.c.l.bf16 %v2459_v51  ;;  %v2645_v28 = vrot.slane %v2604_v22, 4  ;;  %v5818_v61 = vunpack.c.l.bf16 %v2460_v44  ;;  %v7170_v31 = vld [vmem:[#allocation29_spill] sm:$0xff]  ;;  %v7173_v0 = vld [vmem:[#allocation48_spill] sm:$0xff] }
 0x17f   : > { %v2231_v48 = vadd.f32 %v2193_v13, %v2131_v62  ;;  %v2542_v17 = vsel %vm2524_vm3, %v2540_v20, %v2541_v25  ;;  %v2232_v37 = vadd.f32 %v2192_v53, %v2132_v10  ;;  %v2707_v19 = vmul.f32 %v7169_v39, %v7128_v6  ;;  %v7172_v20 = vld [vmem:[#allocation7_spill] sm:$0xff] }
 0x180   : > { %7167 = vst [vmem:[#allocation30_spill] sm:$0xff] %v5815_v21  ;;  %v2708_v41 = vmul.f32 %v7169_v39, %v7130_v18  ;;  %v2811_v63 = vmul.f32 %v7171_v54, %v7170_v31  ;;  %v2646_v51 = vsel %vm2524_vm3, %v2644_v24, %v2645_v28  ;;  %v2812_v13 = vmul.f32 %v7171_v54, %v7133_v56  ;;  %v7175_v24 = vld [vmem:[#allocation49_spill] sm:$0xff] }
 0x181   : > { %7168 = vst [vmem:[#allocation22_spill] sm:$0xff] %v5818_v61  ;;  %v2331_v49 = vadd.f32 %v2293_v52, %v2231_v48  ;;  %v2915_v44 = vmul.f32 %v7173_v0, %v7172_v20  ;;  %v2332_v62 = vadd.f32 %v2292_v40, %v2232_v37  ;;  %v2748_v53 = vrot.slane %v2707_v19, 4 }
 0x182   : > { %v2749_v22 = vrot.slane %v2708_v41, 4  ;;  %v2852_v10 = vrot.slane %v2811_v63, 4  ;;  %v2853_v59 = vrot.slane %v2812_v13, 4  ;;  %v2916_v39 = vmul.f32 %v7173_v0, %v7174_v11  ;;  %v7185_v0 = vld [vmem:[#allocation12_spill] sm:$0xff] }
 0x183   : > { %v2431_v36 = vadd.f32 %v2393_v4, %v2331_v49  ;;  %v2956_v7 = vrot.slane %v2915_v44, 4  ;;  %v2432_v42 = vadd.f32 %v2392_v16, %v2332_v62  ;;  %v3019_v48 = vmul.f32 %v7175_v24, %v5815_v21  ;;  %v7176_v4 = vld [vmem:[#allocation47_spill] sm:$0xff] }
 0x184   : > { %v2750_v52 = vsel %vm2524_vm3, %v2748_v53, %v2749_v22  ;;  %v3020_v54 = vmul.f32 %v7175_v24, %v5818_v61  ;;  %v2854_v40 = vsel %vm2524_vm3, %v2852_v10, %v2853_v59  ;;  %v2957_v37 = vrot.slane %v2916_v39, 4  ;;  %v7177_v53 = vld [vmem:[#allocation50_spill] sm:$0xff] }
 0x185   : > { %v2580_v29 = vadd.f32 %v2542_v17, %v2431_v36  ;;  %v3119_v19 = vmul.f32 %v7176_v4, %v4724_v33  ;;  %v2581_v41 = vadd.f32 %v2541_v25, %v2432_v42  ;;  %v3060_v63 = vrot.slane %v3019_v48, 4 }
 0x186   : > { %v3061_v49 = vrot.slane %v3020_v54, 4  ;;  %v3120_v16 = vmul.f32 %v7176_v4, %v4726_v58  ;;  %v2958_v44 = vsel %vm2524_vm3, %v2956_v7, %v2957_v37  ;;  %v3220_v24 = vmul.f32 %v7177_v53, %v4964_v50  ;;  %v7178_v54 = vld [vmem:[#allocation51_spill] sm:$0xff]  ;;  %v296_v4 = vld [vmem:[%s4378_s9 + $0x5c] sm:$0x1] }
 0x187   : > { %v2684_v13 = vadd.f32 %v2646_v51, %v2580_v29  ;;  %v3161_v62 = vrot.slane %v3119_v19, 5  ;;  %v2685_v36 = vadd.f32 %v2645_v28, %v2581_v41  ;;  %v3221_v33 = vmul.f32 %v7177_v53, %v7127_v8  ;;  %v7179_v28 = vld [vmem:[#allocation52_spill] sm:$0xff]  ;;  %v7180_v53 = vld [vmem:[#allocation53_spill] sm:$0xff] }
 0x188   : > { %v3062_v17 = vsel %vm2524_vm3, %v3060_v63, %v3061_v49  ;;  %v3162_v39 = vrot.slane %v3120_v16, 5  ;;  %v3261_v25 = vrot.slane %v3220_v24, 5  ;;  %v3320_v10 = vmul.f32 %v7178_v54, %v7128_v6 }
 0x189   : > { %v2788_v42 = vadd.f32 %v2750_v52, %v2684_v13  ;;  %v3321_v58 = vmul.f32 %v7178_v54, %v7130_v18  ;;  %v2789_v29 = vadd.f32 %v2749_v22, %v2685_v36  ;;  %v3262_v51 = vrot.slane %v3221_v33, 5 }
 0x18a   : > { %v3163_v7 = vsel %vm3145_vm4, %v3161_v62, %v3162_v39  ;;  %v3420_v48 = vmul.f32 %v7179_v28, %v7170_v31  ;;  %v3361_v41 = vrot.slane %v3320_v10, 5  ;;  %v3421_v52 = vmul.f32 %v7179_v28, %v7133_v56  ;;  %v7181_v10 = vld [vmem:[#allocation54_spill] sm:$0xff] }
 0x18b   : > { %v2892_v19 = vadd.f32 %v2854_v40, %v2788_v42  ;;  %v3362_v63 = vrot.slane %v3321_v58, 5  ;;  %v2893_v24 = vadd.f32 %v2853_v59, %v2789_v29  ;;  %v3263_v16 = vsel %vm3145_vm4, %v3261_v25, %v3262_v51 }
 0x18c   : > { %v3461_v13 = vrot.slane %v3420_v48, 5  ;;  %v3520_v54 = vmul.f32 %v7180_v53, %v7172_v20  ;;  %v3462_v36 = vrot.slane %v3421_v52, 5  ;;  %v3521_v40 = vmul.f32 %v7180_v53, %v7174_v11  ;;  %v295_v53 = vld [vmem:[%s4378_s9 + $0x58] sm:$0xf] }
 0x18d   : > { %v2996_v22 = vadd.f32 %v2958_v44, %v2892_v19  ;;  %v3363_v62 = vsel %vm3145_vm4, %v3361_v41, %v3362_v63  ;;  %v2997_v33 = vadd.f32 %v2957_v37, %v2893_v24  ;;  %v3620_v59 = vmul.f32 %v7181_v10, %v5815_v21  ;;  %v7182_v44 = vld [vmem:[#allocation9_spill] sm:$0xff] }
 0x18e   : > { %v3561_v42 = vrot.slane %v3520_v54, 5  ;;  %v3621_v25 = vmul.f32 %v7181_v10, %v5818_v61  ;;  %v3463_v29 = vsel %vm3145_vm4, %v3461_v13, %v3462_v36  ;;  %v3562_v48 = vrot.slane %v3521_v40, 5  ;;  %v7183_v10 = vld [vmem:[#allocation10_spill] sm:$0xff]  ;;  %v7186_v11 = vld [vmem:[#allocation13_spill] sm:$0xff] }
 0x18f   : > { %v3100_v58 = vadd.f32 %v3062_v17, %v2996_v22  ;;  %v334_v19 = vmul.f32 %v7182_v44, %v7025_v60  ;;  %v3101_v41 = vadd.f32 %v3061_v49, %v2997_v33  ;;  %v3661_v52 = vrot.slane %v3620_v59, 5  ;;  %v7184_v49 = vld [vmem:[#allocation11_spill] sm:$0xff] }
 0x190   : > { %v3662_v28 = vrot.slane %v3621_v25, 5  ;;  %v335_v37 = vmul.f32 %v7182_v44, %v7027_v35  ;;  %v3563_v24 = vsel %vm3145_vm4, %v3561_v42, %v3562_v48  ;;  %v376_v17 = vmul.f32 %v7183_v10, %v5058_v23 }
 0x191   : > { %v3201_v54 = vadd.f32 %v3163_v7, %v3100_v58  ;;  %v377_v13 = vmul.f32 %v7183_v10, %v5060_v43  ;;  %v3202_v22 = vadd.f32 %v3162_v39, %v3101_v41  ;;  %v418_v33 = vmul.f32 %v7184_v49, %v7102_v5 }
 0x192   : > { %v3663_v40 = vsel %vm3145_vm4, %v3661_v52, %v3662_v28  ;;  %v419_v59 = vmul.f32 %v7184_v49, %v7104_v27  ;;  %v394_v7 = vadd.f32 %v376_v17, %v334_v19  ;;  %v5885_v42 = vunpack.c.l.bf16 %v295_v53 }
 0x193   : > { %v3301_v25 = vadd.f32 %v3263_v16, %v3201_v54  ;;  %v395_v58 = vadd.f32 %v377_v13, %v335_v37  ;;  %v3302_v44 = vadd.f32 %v3262_v51, %v3202_v22  ;;  %v5887_v61 = vunpack.c.l.bf16 %v296_v4  ;;  %v7187_v51 = vld [vmem:[#allocation14_spill] sm:$0xff] }
 0x194   : > { %v460_v10 = vmul.f32 %v7185_v0, %v5478_v47  ;;  %v461_v39 = vmul.f32 %v7185_v0, %v5480_v26  ;;  %v436_v52 = vadd.f32 %v418_v33, %v394_v7  ;;  %v502_v49 = vmul.f32 %v7186_v11, %v5679_v15 }
 0x195   : > { %v3401_v41 = vadd.f32 %v3363_v62, %v3301_v25  ;;  %v437_v21 = vadd.f32 %v419_v59, %v395_v58  ;;  %v3402_v16 = vadd.f32 %v3362_v63, %v3302_v44  ;;  %v503_v53 = vmul.f32 %v7186_v11, %v5681_v9 }
 0x196   : > { %v544_v4 = vmul.f32 %v7187_v51, %v5885_v42  ;;  %v545_v19 = vmul.f32 %v7187_v51, %v5887_v61  ;;  %v478_v54 = vadd.f32 %v460_v10, %v436_v52  ;;  %v581_v62 = vmul.f32 %v7147_v14, %v7025_v60 }
 0x197   : > { %v3501_v37 = vadd.f32 %v3463_v29, %v3401_v41  ;;  %v479_v17 = vadd.f32 %v461_v39, %v437_v21  ;;  %v3502_v13 = vadd.f32 %v3462_v36, %v3402_v16  ;;  %v582_v22 = vmul.f32 %v7147_v14, %v7027_v35 }
 0x198   : > { %v682_v63 = vmul.f32 %v7107_v34, %v5058_v23  ;;  %v683_v44 = vmul.f32 %v7107_v34, %v5060_v43  ;;  %v520_v59 = vadd.f32 %v502_v49, %v478_v54  ;;  %v624_v7 = vrot.slane %v581_v62, 1 }
 0x199   : > { %v3601_v33 = vadd.f32 %v3563_v24, %v3501_v37  ;;  %v521_v25 = vadd.f32 %v503_v53, %v479_v17  ;;  %v3602_v29 = vadd.f32 %v3562_v48, %v3502_v13  ;;  %v625_v10 = vrot.slane %v582_v22, 1 }
 0x19a   : > { %v724_v21 = vrot.slane %v682_v63, 1  ;;  %v725_v58 = vrot.slane %v683_v44, 1  ;;  %v562_v60 = vadd.f32 %v544_v4, %v520_v59  ;;  %v782_v35 = vmul.f32 %v7108_v38, %v7102_v5 }
 0x19b   : > { %v3701_v39 = vadd.f32 %v3663_v40, %v3601_v33  ;;  %v563_v36 = vadd.f32 %v545_v19, %v521_v25  ;;  %v3702_v41 = vadd.f32 %v3662_v28, %v3602_v29  ;;  %v626_v52 = vsel %vm605_vm0, %v624_v7, %v625_v10 }
 0x19c   : > { %v726_v16 = vsel %vm605_vm0, %v724_v21, %v725_v58  ;;  %v783_v24 = vmul.f32 %v7108_v38, %v7104_v27  ;;  %v663_v49 = vadd.f32 %v626_v52, %v562_v60  ;;  %v824_v48 = vrot.slane %v782_v35, 1  ;;  %v1191_v52 = vld [vmem:[%s4378_s9 + $0x58] sm:$0xe] }
 0x19d   : > { %v664_v53 = vadd.f32 %v625_v10, %v563_v36  ;;  %v882_v37 = vmul.f32 %v7109_v32, %v5478_v47  ;;  %v3965_v40 = vpack.c.bf16 %v3702_v41, %v3701_v39  ;;  %v883_v19 = vmul.f32 %v7109_v32, %v5480_v26 }
 0x19e   : > { %v825_v4 = vrot.slane %v783_v24, 1  ;;  %v982_v28 = vmul.f32 %v7110_v1, %v5679_v15  ;;  %v763_v54 = vadd.f32 %v726_v16, %v663_v49  ;;  %v983_v13 = vmul.f32 %v7110_v1, %v5681_v9 }
 0x19f   : > { %v764_v17 = vadd.f32 %v725_v58, %v664_v53  ;;  %v924_v62 = vrot.slane %v882_v37, 1  ;;  %4257 = vmatmul.msk.bf16.vlgmr.msra.gmra.mxu0 %vm3743_vm5, %v3965_v40  ;;  %v925_v63 = vrot.slane %v883_v19, 1  ;;  %v1082_v33 = vmul.f32 %v7111_v45, %v5885_v42  ;;  %v7188_v19 = vld [vmem:[#allocation33_spill] sm:$0xff] }
 0x1a0   : > { %v826_v22 = vsel %vm605_vm0, %v824_v48, %v825_v4  ;;  %v1024_v44 = vrot.slane %v982_v28, 1  ;;  %v1025_v7 = vrot.slane %v983_v13, 1  ;;  %v1083_v29 = vmul.f32 %v7111_v45, %v5887_v61  ;;  %v7189_v13 = vld [vmem:[#allocation28_spill] sm:$0xff] }
 0x1a1   : > { %v863_v59 = vadd.f32 %v826_v22, %v763_v54  ;;  %v864_v25 = vadd.f32 %v825_v4, %v764_v17  ;;  %v926_v10 = vsel %vm605_vm0, %v924_v62, %v925_v63  ;;  %v1124_v21 = vrot.slane %v1082_v33, 1  ;;  %v1192_v4 = vld [vmem:[%s4378_s9 + $0x5c] sm:$0x3] }
 0x1a2   : > { %v1230_v58 = vmul.f32 %v7112_v30, %v7042_v46  ;;  %v1231_v39 = vmul.f32 %v7112_v30, %v7044_v12  ;;  %v1026_v35 = vsel %vm605_vm0, %v1024_v44, %v1025_v7  ;;  %v1125_v41 = vrot.slane %v1083_v29, 1 }
 0x1a3   : > { %v963_v60 = vadd.f32 %v926_v10, %v863_v59  ;;  %v964_v36 = vadd.f32 %v925_v63, %v864_v25  ;;  %v1335_v49 = vmul.f32 %v7115_v55, %v5130_v3  ;;  %v1336_v53 = vmul.f32 %v7115_v55, %v7151_v57  ;;  %v7192_v10 = vld [vmem:[#allocation5_spill] sm:$0xff] }
 0x1a4   : > { %v1273_v16 = vrot.slane %v1230_v58, 2  ;;  %v1274_v24 = vrot.slane %v1231_v39, 2  ;;  %v1126_v40 = vsel %vm605_vm0, %v1124_v21, %v1125_v41  ;;  %v1439_v28 = vmul.f32 %v7188_v19, %v7152_v2  ;;  %v7193_v21 = vld [vmem:[#allocation34_spill] sm:$0xff] }
 0x1a5   : > { %v1063_v48 = vadd.f32 %v1026_v35, %v963_v60  ;;  %v1064_v37 = vadd.f32 %v1025_v7, %v964_v36  ;;  %v1377_v17 = vrot.slane %v1335_v49, 2  ;;  %v1378_v62 = vrot.slane %v1336_v53, 2  ;;  %v7194_v36 = vld [vmem:[#allocation6_spill] sm:$0xff]  ;;  %v7196_v49 = vld [vmem:[#allocation35_spill] sm:$0xff] }
 0x1a6   : > { %v1275_v54 = vsel %vm1254_vm1, %v1273_v16, %v1274_v24  ;;  %v1440_v22 = vmul.f32 %v7188_v19, %v7189_v13  ;;  %v1481_v33 = vrot.slane %v1439_v28, 2  ;;  %v5947_v59 = vunpack.c.l.bf16 %v1191_v52  ;;  %v7195_v16 = vld [vmem:[#allocation55_spill] sm:$0xff] }
 0x1a7   : > { %v1163_v63 = vadd.f32 %v1126_v40, %v1063_v48  ;;  %v1164_v44 = vadd.f32 %v1125_v41, %v1064_v37  ;;  %v1379_v25 = vsel %vm1254_vm1, %v1377_v17, %v1378_v62  ;;  %v5950_v29 = vunpack.c.l.bf16 %v1192_v4  ;;  %v7197_v48 = vld [vmem:[#allocation56_spill] sm:$0xff]  ;;  %v7198_v40 = vld [vmem:[#allocation37_spill] sm:$0xff] }
 0x1a8   : > { %7190 = vst [vmem:[#allocation2_spill] sm:$0xff] %v5947_v59  ;;  %v1482_v7 = vrot.slane %v1440_v22, 2  ;;  %v1543_v58 = vmul.f32 %v7193_v21, %v7192_v10  ;;  %v1544_v35 = vmul.f32 %v7193_v21, %v7194_v36  ;;  %v1647_v53 = vmul.f32 %v7196_v49, %v7195_v16  ;;  %v7199_v21 = vld [vmem:[#allocation36_spill] sm:$0xff] }
 0x1a9   : > { %7191 = vst [vmem:[#allocation23_spill] sm:$0xff] %v5950_v29  ;;  %v1312_v39 = vadd.f32 %v1275_v54, %v1163_v63  ;;  %v1313_v60 = vadd.f32 %v1274_v24, %v1164_v44  ;;  %v1648_v37 = vmul.f32 %v7196_v49, %v7197_v48  ;;  %v1751_v4 = vmul.f32 %v7198_v40, %v5947_v59 }
 0x1aa   : > { %v1483_v41 = vsel %vm1254_vm1, %v1481_v33, %v1482_v7  ;;  %v1585_v52 = vrot.slane %v1543_v58, 2  ;;  %v1586_v22 = vrot.slane %v1544_v35, 2  ;;  %v1689_v54 = vrot.slane %v1647_v53, 2 }
 0x1ab   : > { %v1416_v28 = vadd.f32 %v1379_v25, %v1312_v39  ;;  %v1417_v17 = vadd.f32 %v1378_v62, %v1313_v60  ;;  %v1690_v24 = vrot.slane %v1648_v37, 2  ;;  %v1752_v63 = vmul.f32 %v7198_v40, %v5950_v29  ;;  %v7200_v60 = vld [vmem:[#allocation38_spill] sm:$0xff]  ;;  %v2461_v40 = vld [vmem:[%s4378_s9 + $0x58] sm:$0xc] }
 0x1ac   : > { %v1793_v44 = vrot.slane %v1751_v4, 2  ;;  %v1851_v19 = vmul.f32 %v7199_v21, %v7042_v46  ;;  %v1587_v55 = vsel %vm1254_vm1, %v1585_v52, %v1586_v22  ;;  %v1852_v49 = vmul.f32 %v7199_v21, %v7044_v12  ;;  %v7201_v52 = vld [vmem:[#allocation39_spill] sm:$0xff]  ;;  %v7203_v21 = vld [vmem:[#allocation41_spill] sm:$0xff] }
 0x1ad   : > { %v1520_v33 = vadd.f32 %v1483_v41, %v1416_v28  ;;  %v1521_v58 = vadd.f32 %v1482_v7, %v1417_v17  ;;  %v1691_v25 = vsel %vm1254_vm1, %v1689_v54, %v1690_v24  ;;  %v1794_v62 = vrot.slane %v1752_v63, 2 }
 0x1ae   : > { %v1894_v39 = vrot.slane %v1851_v19, 3  ;;  %v1952_v35 = vmul.f32 %v7200_v60, %v5130_v3  ;;  %v1895_v4 = vrot.slane %v1852_v49, 3  ;;  %v1953_v46 = vmul.f32 %v7200_v60, %v7151_v57  ;;  %v7202_v49 = vld [vmem:[#allocation40_spill] sm:$0xff] }
 0x1af   : > { %v1624_v53 = vadd.f32 %v1587_v55, %v1520_v33  ;;  %v1625_v37 = vadd.f32 %v1586_v22, %v1521_v58  ;;  %v1795_v7 = vsel %vm1254_vm1, %v1793_v44, %v1794_v62  ;;  %v2052_v28 = vmul.f32 %v7201_v52, %v7152_v2 }
 0x1b0   : > { %v1994_v41 = vrot.slane %v1952_v35, 3  ;;  %v2053_v12 = vmul.f32 %v7201_v52, %v7189_v13  ;;  %v1896_v54 = vsel %vm1875_vm2, %v1894_v39, %v1895_v4  ;;  %v1995_v63 = vrot.slane %v1953_v46, 3 }
 0x1b1   : > { %v1728_v17 = vadd.f32 %v1691_v25, %v1624_v53  ;;  %v1729_v19 = vadd.f32 %v1690_v24, %v1625_v37  ;;  %v2094_v55 = vrot.slane %v2052_v28, 3  ;;  %v2152_v33 = vmul.f32 %v7202_v49, %v7192_v10  ;;  %v7216_v10 = vld [vmem:[#allocation47_spill] sm:$0xff] }
 0x1b2   : > { %v2095_v22 = vrot.slane %v2053_v12, 3  ;;  %v2153_v44 = vmul.f32 %v7202_v49, %v7194_v36  ;;  %v1996_v60 = vsel %vm1875_vm2, %v1994_v41, %v1995_v63  ;;  %v2252_v52 = vmul.f32 %v7203_v21, %v7195_v16  ;;  %v7204_v12 = vld [vmem:[#allocation42_spill] sm:$0xff] }
 0x1b3   : > { %v1832_v58 = vadd.f32 %v1795_v7, %v1728_v17  ;;  %v1833_v35 = vadd.f32 %v1794_v62, %v1729_v19  ;;  %v2194_v25 = vrot.slane %v2152_v33, 3  ;;  %v2253_v53 = vmul.f32 %v7203_v21, %v7197_v48  ;;  %v7205_v19 = vld [vmem:[#allocation43_spill] sm:$0xff] }
 0x1b4   : > { %v2096_v24 = vsel %vm1875_vm2, %v2094_v55, %v2095_v22  ;;  %v2195_v39 = vrot.slane %v2153_v44, 3  ;;  %v2294_v28 = vrot.slane %v2252_v52, 3  ;;  %v2352_v7 = vmul.f32 %v7204_v12, %v5947_v59  ;;  %v7210_v59 = vld [vmem:[#allocation46_spill] sm:$0xff] }
 0x1b5   : > { %v1933_v37 = vadd.f32 %v1896_v54, %v1832_v58  ;;  %v1934_v46 = vadd.f32 %v1895_v4, %v1833_v35  ;;  %v2295_v41 = vrot.slane %v2253_v53, 3  ;;  %v2353_v17 = vmul.f32 %v7204_v12, %v5950_v29  ;;  %v7206_v35 = vld [vmem:[#allocation44_spill] sm:$0xff]  ;;  %v2462_v12 = vld [vmem:[%s4378_s9 + $0x5c] sm:$0x7] }
 0x1b6   : > { %v2196_v62 = vsel %vm1875_vm2, %v2194_v25, %v2195_v39  ;;  %v2500_v55 = vmul.f32 %v7205_v19, %v4964_v50  ;;  %v2394_v21 = vrot.slane %v2352_v7, 3  ;;  %v2501_v4 = vmul.f32 %v7205_v19, %v7127_v8 }
 0x1b7   : > { %v2033_v33 = vadd.f32 %v1996_v60, %v1933_v37  ;;  %v2034_v44 = vadd.f32 %v1995_v63, %v1934_v46  ;;  %v2296_v52 = vsel %vm1875_vm2, %v2294_v28, %v2295_v41  ;;  %v2395_v54 = vrot.slane %v2353_v17, 3  ;;  %v7207_v46 = vld [vmem:[#allocation45_spill] sm:$0xff] }
 0x1b8   : > { %v2543_v58 = vrot.slane %v2500_v55, 4  ;;  %v2605_v25 = vmul.f32 %v7206_v35, %v7128_v6  ;;  %v2544_v29 = vrot.slane %v2501_v4, 4  ;;  %v2606_v60 = vmul.f32 %v7206_v35, %v7130_v18 }
 0x1b9   : > { %v2133_v53 = vadd.f32 %v2096_v24, %v2033_v33  ;;  %v2134_v49 = vadd.f32 %v2095_v22, %v2034_v44  ;;  %v2396_v63 = vsel %vm1875_vm2, %v2394_v21, %v2395_v54  ;;  %v2709_v7 = vmul.f32 %v7207_v46, %v7170_v31 }
 0x1ba   : > { %v2647_v37 = vrot.slane %v2605_v25, 4  ;;  %v2710_v28 = vmul.f32 %v7207_v46, %v7133_v56  ;;  %v2545_v24 = vsel %vm2524_vm3, %v2543_v58, %v2544_v29  ;;  %v2648_v22 = vrot.slane %v2606_v60, 4  ;;  %v7213_v58 = vld [vmem:[#allocation48_spill] sm:$0xff]  ;;  %v7214_v60 = vld [vmem:[#allocation22_spill] sm:$0xff] }
 0x1bb   : > { %v2233_v17 = vadd.f32 %v2196_v62, %v2133_v53  ;;  %v2234_v55 = vadd.f32 %v2195_v39, %v2134_v49  ;;  %v2751_v33 = vrot.slane %v2709_v7, 4  ;;  %v6013_v4 = vunpack.c.l.bf16 %v2461_v40  ;;  %v7211_v62 = vld [vmem:[#allocation8_spill] sm:$0xff]  ;;  %v7212_v39 = vld [vmem:[#allocation30_spill] sm:$0xff] }
 0x1bc   : > { %v2752_v44 = vrot.slane %v2710_v28, 4  ;;  %v6015_v19 = vunpack.c.l.bf16 %v2462_v12  ;;  %v2649_v25 = vsel %vm2524_vm3, %v2647_v37, %v2648_v22  ;;  %v2813_v48 = vmul.f32 %v7210_v59, %v7172_v20 }
 0x1bd   : > { %7208 = vst [vmem:[#allocation24_spill] sm:$0xff] %v6013_v4  ;;  %v2333_v35 = vadd.f32 %v2296_v52, %v2233_v17  ;;  %v2334_v21 = vadd.f32 %v2295_v41, %v2234_v55  ;;  %v2814_v49 = vmul.f32 %v7210_v59, %v7211_v62  ;;  %v2917_v53 = vmul.f32 %v7213_v58, %v7212_v39  ;;  %v7215_v41 = vld [vmem:[#allocation49_spill] sm:$0xff] }
 0x1be   : > { %7209 = vst [vmem:[#allocation16_spill] sm:$0xff] %v6015_v19  ;;  %v2753_v46 = vsel %vm2524_vm3, %v2751_v33, %v2752_v44  ;;  %v2918_v40 = vmul.f32 %v7213_v58, %v7214_v60  ;;  %v2855_v52 = vrot.slane %v2813_v48, 4  ;;  %v3021_v37 = vmul.f32 %v7215_v41, %v6013_v4 }
 0x1bf   : > { %v2433_v12 = vadd.f32 %v2396_v63, %v2333_v35  ;;  %v2434_v7 = vadd.f32 %v2395_v54, %v2334_v21  ;;  %v2856_v28 = vrot.slane %v2814_v49, 4  ;;  %v2959_v17 = vrot.slane %v2917_v53, 4  ;;  %v7217_v53 = vld [vmem:[#allocation50_spill] sm:$0xff] }
 0x1c0   : > { %v2960_v55 = vrot.slane %v2918_v40, 4  ;;  %v3022_v33 = vmul.f32 %v7215_v41, %v6015_v19  ;;  %v3063_v36 = vrot.slane %v3021_v37, 4  ;;  %v3121_v13 = vmul.f32 %v7216_v10, %v4964_v50 }
 0x1c1   : > { %v2582_v16 = vadd.f32 %v2545_v24, %v2433_v12  ;;  %v2583_v59 = vadd.f32 %v2544_v29, %v2434_v7  ;;  %v2857_v58 = vsel %vm2524_vm3, %v2855_v52, %v2856_v28  ;;  %v3122_v35 = vmul.f32 %v7216_v10, %v7127_v8  ;;  %v7218_v12 = vld [vmem:[#allocation51_spill] sm:$0xff]  ;;  %v298_v10 = vld [vmem:[%s4378_s9 + $0x64] sm:$0x1] }
 0x1c2   : > { %v2961_v54 = vsel %vm2524_vm3, %v2959_v17, %v2960_v55  ;;  %v3064_v48 = vrot.slane %v3022_v33, 4  ;;  %v3164_v49 = vrot.slane %v3121_v13, 5  ;;  %v3222_v40 = vmul.f32 %v7217_v53, %v7128_v6 }
 0x1c3   : > { %v2686_v63 = vadd.f32 %v2649_v25, %v2582_v16  ;;  %v2687_v21 = vadd.f32 %v2648_v22, %v2583_v59  ;;  %v3165_v24 = vrot.slane %v3122_v35, 5  ;;  %v3223_v50 = vmul.f32 %v7217_v53, %v7130_v18  ;;  %v7219_v22 = vld [vmem:[#allocation52_spill] sm:$0xff] }
 0x1c4   : > { %v3065_v29 = vsel %vm2524_vm3, %v3063_v36, %v3064_v48  ;;  %v3322_v7 = vmul.f32 %v7218_v12, %v7170_v31  ;;  %v3264_v17 = vrot.slane %v3222_v40, 5  ;;  %v3323_v8 = vmul.f32 %v7218_v12, %v7133_v56 }
 0x1c5   : > { %v2790_v52 = vadd.f32 %v2753_v46, %v2686_v63  ;;  %v2791_v37 = vadd.f32 %v2752_v44, %v2687_v21  ;;  %v3166_v13 = vsel %vm3145_vm4, %v3164_v49, %v3165_v24  ;;  %v3265_v59 = vrot.slane %v3223_v50, 5  ;;  %v7220_v63 = vld [vmem:[#allocation53_spill] sm:$0xff] }
 0x1c6   : > { %v3364_v16 = vrot.slane %v3322_v7, 5  ;;  %v3422_v36 = vmul.f32 %v7219_v22, %v7172_v20  ;;  %v3365_v35 = vrot.slane %v3323_v8, 5  ;;  %v3423_v53 = vmul.f32 %v7219_v22, %v7211_v62 }
 0x1c7   : > { %v2894_v25 = vadd.f32 %v2857_v58, %v2790_v52  ;;  %v2895_v33 = vadd.f32 %v2856_v28, %v2791_v37  ;;  %v3266_v46 = vsel %vm3145_vm4, %v3264_v17, %v3265_v59  ;;  %v3522_v21 = vmul.f32 %v7220_v63, %v7212_v39  ;;  %v7221_v37 = vld [vmem:[#allocation54_spill] sm:$0xff] }
 0x1c8   : > { %v3464_v44 = vrot.slane %v3422_v36, 5  ;;  %v3523_v49 = vmul.f32 %v7220_v63, %v7214_v60  ;;  %v3366_v7 = vsel %vm3145_vm4, %v3364_v16, %v3365_v35  ;;  %v3465_v58 = vrot.slane %v3423_v53, 5  ;;  %v297_v63 = vld [vmem:[%s4378_s9 + $0x60] sm:$0xf] }
 0x1c9   : > { %v2998_v40 = vadd.f32 %v2961_v54, %v2894_v25  ;;  %v2999_v50 = vadd.f32 %v2960_v55, %v2895_v33  ;;  %v3564_v28 = vrot.slane %v3522_v21, 5  ;;  %v3622_v8 = vmul.f32 %v7221_v37, %v6013_v4  ;;  %v7222_v54 = vld [vmem:[#allocation9_spill] sm:$0xff] }
 0x1ca   : > { %v3565_v52 = vrot.slane %v3523_v49, 5  ;;  %v3623_v17 = vmul.f32 %v7221_v37, %v6015_v19  ;;  %v3466_v12 = vsel %vm3145_vm4, %v3464_v44, %v3465_v58  ;;  %v336_v55 = vmul.f32 %v7222_v54, %v5058_v23  ;;  %v7223_v37 = vld [vmem:[#allocation10_spill] sm:$0xff] }
 0x1cb   : > { %v3102_v36 = vadd.f32 %v3065_v29, %v2998_v40  ;;  %v3103_v22 = vadd.f32 %v3064_v48, %v2999_v50  ;;  %v3664_v25 = vrot.slane %v3622_v8, 5  ;;  %v337_v33 = vmul.f32 %v7222_v54, %v5060_v43  ;;  %v7224_v40 = vld [vmem:[#allocation11_spill] sm:$0xff] }
 0x1cc   : > { %v3566_v16 = vsel %vm3145_vm4, %v3564_v28, %v3565_v52  ;;  %v3665_v53 = vrot.slane %v3623_v17, 5  ;;  %v378_v29 = vmul.f32 %v7223_v37, %v7102_v5  ;;  %v379_v48 = vmul.f32 %v7223_v37, %v7104_v27 }
 0x1cd   : > { %v3203_v21 = vadd.f32 %v3166_v13, %v3102_v36  ;;  %v3204_v49 = vadd.f32 %v3165_v24, %v3103_v22  ;;  %v420_v50 = vmul.f32 %v7224_v40, %v5478_v47  ;;  %v421_v28 = vmul.f32 %v7224_v40, %v5480_v26 }
 0x1ce   : > { %v3666_v44 = vsel %vm3145_vm4, %v3664_v25, %v3665_v53  ;;  %v462_v13 = vmul.f32 %v7185_v0, %v5679_v15  ;;  %v396_v8 = vadd.f32 %v378_v29, %v336_v55  ;;  %v397_v17 = vadd.f32 %v379_v48, %v337_v33 }
 0x1cf   : > { %v3303_v24 = vadd.f32 %v3266_v46, %v3203_v21  ;;  %v3304_v22 = vadd.f32 %v3265_v59, %v3204_v49  ;;  %v463_v36 = vmul.f32 %v7185_v0, %v5681_v9  ;;  %v6082_v54 = vunpack.c.l.bf16 %v297_v63 }
 0x1d0   : > { %v6084_v37 = vunpack.c.l.bf16 %v298_v10  ;;  %v504_v25 = vmul.f32 %v7186_v11, %v5885_v42  ;;  %v438_v40 = vadd.f32 %v420_v50, %v396_v8  ;;  %v439_v4 = vadd.f32 %v421_v28, %v397_v17 }
 0x1d1   : > { %v3403_v41 = vadd.f32 %v3366_v7, %v3303_v24  ;;  %v3404_v19 = vadd.f32 %v3365_v35, %v3304_v22  ;;  %v505_v46 = vmul.f32 %v7186_v11, %v5887_v61  ;;  %v546_v59 = vmul.f32 %v7187_v51, %v6082_v54 }
 0x1d2   : > { %v547_v55 = vmul.f32 %v7187_v51, %v6084_v37  ;;  %v583_v10 = vmul.f32 %v7147_v14, %v5058_v23  ;;  %v480_v21 = vadd.f32 %v462_v13, %v438_v40  ;;  %v481_v49 = vadd.f32 %v463_v36, %v439_v4 }
 0x1d3   : > { %v3503_v63 = vadd.f32 %v3466_v12, %v3403_v41  ;;  %v3504_v33 = vadd.f32 %v3465_v58, %v3404_v19  ;;  %v584_v35 = vmul.f32 %v7147_v14, %v5060_v43  ;;  %v684_v29 = vmul.f32 %v7107_v34, %v7102_v5 }
 0x1d4   : > { %v627_v7 = vrot.slane %v583_v10, 1  ;;  %v685_v48 = vmul.f32 %v7107_v34, %v7104_v27  ;;  %v522_v24 = vadd.f32 %v504_v25, %v480_v21  ;;  %v523_v22 = vadd.f32 %v505_v46, %v481_v49 }
 0x1d5   : > { %v3603_v50 = vadd.f32 %v3566_v16, %v3503_v63  ;;  %v3604_v28 = vadd.f32 %v3565_v52, %v3504_v33  ;;  %v628_v8 = vrot.slane %v584_v35, 1  ;;  %v727_v23 = vrot.slane %v684_v29, 1 }
 0x1d6   : > { %v728_v41 = vrot.slane %v685_v48, 1  ;;  %v784_v19 = vmul.f32 %v7108_v38, %v5478_v47  ;;  %v564_v43 = vadd.f32 %v546_v59, %v522_v24  ;;  %v565_v58 = vadd.f32 %v547_v55, %v523_v22 }
 0x1d7   : > { %v3703_v4 = vadd.f32 %v3666_v44, %v3603_v50  ;;  %v3704_v12 = vadd.f32 %v3665_v53, %v3604_v28  ;;  %v629_v40 = vsel %vm605_vm0, %v627_v7, %v628_v8  ;;  %v785_v16 = vmul.f32 %v7108_v38, %v5480_v26 }
 0x1d8   : > { %v729_v13 = vsel %vm605_vm0, %v727_v23, %v728_v41  ;;  %v827_v52 = vrot.slane %v784_v19, 1  ;;  %v665_v36 = vadd.f32 %v629_v40, %v564_v43  ;;  %v666_v25 = vadd.f32 %v628_v8, %v565_v58  ;;  %v7225_v43 = vld [vmem:[#allocation32_spill] sm:$0xff] }
 0x1d9   : > { %v4006_v17 = vpack.c.bf16 %v3704_v12, %v3703_v4  ;;  %v884_v46 = vmul.f32 %v7109_v32, %v5679_v15  ;;  %v828_v10 = vrot.slane %v785_v16, 1  ;;  %v885_v53 = vmul.f32 %v7109_v32, %v5681_v9  ;;  %v7226_v16 = vld [vmem:[#allocation28_spill] sm:$0xff] }
 0x1da   : > { %v984_v44 = vmul.f32 %v7110_v1, %v5885_v42  ;;  %v985_v59 = vmul.f32 %v7110_v1, %v5887_v61  ;;  %v765_v55 = vadd.f32 %v729_v13, %v665_v36  ;;  %v766_v63 = vadd.f32 %v728_v41, %v666_v25  ;;  %v7228_v36 = vld [vmem:[#allocation33_spill] sm:$0xff] }
 0x1db   : > { %4261 = vmatmul.msk.bf16.vlgmr.msrb.gmra.mxu1 %vm3743_vm5, %v4006_v17  ;;  %v927_v33 = vrot.slane %v884_v46, 1  ;;  %v1084_v21 = vmul.f32 %v7111_v45, %v6082_v54  ;;  %v829_v49 = vsel %vm605_vm0, %v827_v52, %v828_v10  ;;  %v928_v35 = vrot.slane %v885_v53, 1  ;;  %v7227_v17 = vld [vmem:[#allocation5_spill] sm:$0xff] }
 0x1dc   : > { %v1027_v7 = vrot.slane %v984_v44, 1  ;;  %v1028_v29 = vrot.slane %v985_v59, 1  ;;  %v865_v48 = vadd.f32 %v829_v49, %v765_v55  ;;  %v866_v50 = vadd.f32 %v828_v10, %v766_v63  ;;  %v1193_v44 = vld [vmem:[%s4378_s9 + $0x60] sm:$0xe]  ;;  %v1194_v59 = vld [vmem:[%s4378_s9 + $0x64] sm:$0x3] }
 0x1dd   : > { %v1085_v28 = vmul.f32 %v7111_v45, %v6084_v37  ;;  %v1127_v24 = vrot.slane %v1084_v21, 1  ;;  %v929_v22 = vsel %vm605_vm0, %v927_v33, %v928_v35  ;;  %v1232_v23 = vmul.f32 %v7112_v30, %v5130_v3  ;;  %v7229_v21 = vld [vmem:[#allocation6_spill] sm:$0xff] }
 0x1de   : > { %v1029_v8 = vsel %vm605_vm0, %v1027_v7, %v1028_v29  ;;  %v1233_v41 = vmul.f32 %v7112_v30, %v7151_v57  ;;  %v965_v19 = vadd.f32 %v929_v22, %v865_v48  ;;  %v966_v4 = vadd.f32 %v928_v35, %v866_v50  ;;  %v7230_v50 = vld [vmem:[#allocation55_spill] sm:$0xff] }
 0x1df   : > { %v1128_v12 = vrot.slane %v1085_v28, 1  ;;  %v1337_v58 = vmul.f32 %v7225_v43, %v7152_v2  ;;  %v1276_v40 = vrot.slane %v1232_v23, 2  ;;  %v1338_v52 = vmul.f32 %v7225_v43, %v7226_v16  ;;  %v7231_v28 = vld [vmem:[#allocation34_spill] sm:$0xff]  ;;  %v7232_v23 = vld [vmem:[#allocation56_spill] sm:$0xff] }
 0x1e0   : > { %v1277_v13 = vrot.slane %v1233_v41, 2  ;;  %v1441_v25 = vmul.f32 %v7228_v36, %v7227_v17  ;;  %v1065_v46 = vadd.f32 %v1029_v8, %v965_v19  ;;  %v1066_v10 = vadd.f32 %v1028_v29, %v966_v4 }
 0x1e1   : > { %v1129_v53 = vsel %vm605_vm0, %v1127_v24, %v1128_v12  ;;  %v1380_v55 = vrot.slane %v1337_v58, 2  ;;  %v1381_v33 = vrot.slane %v1338_v52, 2  ;;  %v1442_v49 = vmul.f32 %v7228_v36, %v7229_v21 }
 0x1e2   : > { %v1278_v63 = vsel %vm1254_vm1, %v1276_v40, %v1277_v13  ;;  %v1484_v35 = vrot.slane %v1441_v25, 2  ;;  %v1165_v7 = vadd.f32 %v1129_v53, %v1065_v46  ;;  %v1166_v48 = vadd.f32 %v1128_v12, %v1066_v10  ;;  %v7235_v12 = vld [vmem:[#allocation2_spill] sm:$0xff]  ;;  %v7236_v46 = vld [vmem:[#allocation35_spill] sm:$0xff] }
 0x1e3   : > { %v1545_v22 = vmul.f32 %v7231_v28, %v7230_v50  ;;  %v1546_v29 = vmul.f32 %v7231_v28, %v7232_v23  ;;  %v1382_v24 = vsel %vm1254_vm1, %v1380_v55, %v1381_v33  ;;  %v1485_v8 = vrot.slane %v1442_v49, 2  ;;  %v7237_v53 = vld [vmem:[#allocation23_spill] sm:$0xff]  ;;  %v7238_v28 = vld [vmem:[#allocation37_spill] sm:$0xff] }
 0x1e4   : > { %v6145_v41 = vunpack.c.l.bf16 %v1193_v44  ;;  %v6147_v19 = vunpack.c.l.bf16 %v1194_v59  ;;  %v1314_v4 = vadd.f32 %v1278_v63, %v1165_v7  ;;  %v1315_v58 = vadd.f32 %v1277_v13, %v1166_v48 }
 0x1e5   : > { %v1588_v40 = vrot.slane %v1545_v22, 2  ;;  %v1589_v52 = vrot.slane %v1546_v29, 2  ;;  %v1486_v25 = vsel %vm1254_vm1, %v1484_v35, %v1485_v8  ;;  %v1649_v10 = vmul.f32 %v7236_v46, %v7235_v12  ;;  %v7239_v35 = vld [vmem:[#allocation36_spill] sm:$0xff] }
 0x1e6   : > { %7233 = vst [vmem:[#allocation17_spill] sm:$0xff] %v6145_v41  ;;  %v1650_v36 = vmul.f32 %v7236_v46, %v7237_v53  ;;  %v1753_v55 = vmul.f32 %v7238_v28, %v6145_v41  ;;  %v1418_v49 = vadd.f32 %v1382_v24, %v1314_v4  ;;  %v1419_v44 = vadd.f32 %v1381_v33, %v1315_v58  ;;  %v7240_v4 = vld [vmem:[#allocation38_spill] sm:$0xff] }
 0x1e7   : > { %7234 = vst [vmem:[#allocation18_spill] sm:$0xff] %v6147_v19  ;;  %v1590_v59 = vsel %vm1254_vm1, %v1588_v40, %v1589_v52  ;;  %v1754_v13 = vmul.f32 %v7238_v28, %v6147_v19  ;;  %v1692_v63 = vrot.slane %v1649_v10, 2  ;;  %v1853_v22 = vmul.f32 %v7239_v35, %v5130_v3  ;;  %v7242_v28 = vld [vmem:[#allocation40_spill] sm:$0xff] }
 0x1e8   : > { %v1693_v7 = vrot.slane %v1650_v36, 2  ;;  %v1796_v48 = vrot.slane %v1753_v55, 2  ;;  %v1522_v29 = vadd.f32 %v1486_v25, %v1418_v49  ;;  %v1523_v43 = vadd.f32 %v1485_v8, %v1419_v44  ;;  %v7241_v49 = vld [vmem:[#allocation39_spill] sm:$0xff] }
 0x1e9   : > { %v1797_v30 = vrot.slane %v1754_v13, 2  ;;  %v1854_v46 = vmul.f32 %v7239_v35, %v7151_v57  ;;  %v1897_v33 = vrot.slane %v1853_v22, 3  ;;  %v1954_v58 = vmul.f32 %v7240_v4, %v7152_v2 }
 0x1ea   : > { %v1694_v24 = vsel %vm1254_vm1, %v1692_v63, %v1693_v7  ;;  %v1955_v40 = vmul.f32 %v7240_v4, %v7226_v16  ;;  %v1626_v36 = vadd.f32 %v1590_v59, %v1522_v29  ;;  %v1627_v10 = vadd.f32 %v1589_v52, %v1523_v43 }
 0x1eb   : > { %v1798_v55 = vsel %vm1254_vm1, %v1796_v48, %v1797_v30  ;;  %v1898_v3 = vrot.slane %v1854_v46, 3  ;;  %v1997_v25 = vrot.slane %v1954_v58, 3  ;;  %v2054_v44 = vmul.f32 %v7241_v49, %v7227_v17 }
 0x1ec   : > { %v1998_v8 = vrot.slane %v1955_v40, 3  ;;  %v2055_v57 = vmul.f32 %v7241_v49, %v7229_v21  ;;  %v1730_v13 = vadd.f32 %v1694_v24, %v1626_v36  ;;  %v1731_v63 = vadd.f32 %v1693_v7, %v1627_v10  ;;  %v7243_v40 = vld [vmem:[#allocation41_spill] sm:$0xff]  ;;  %v7244_v36 = vld [vmem:[#allocation42_spill] sm:$0xff] }
 0x1ed   : > { %v1899_v22 = vsel %vm1875_vm2, %v1897_v33, %v1898_v3  ;;  %v2154_v4 = vmul.f32 %v7242_v28, %v7230_v50  ;;  %v2097_v52 = vrot.slane %v2054_v44, 3  ;;  %v2155_v46 = vmul.f32 %v7242_v28, %v7232_v23 }
 0x1ee   : > { %v1999_v43 = vsel %vm1875_vm2, %v1997_v25, %v1998_v8  ;;  %v2098_v59 = vrot.slane %v2055_v57, 3  ;;  %v1834_v48 = vadd.f32 %v1798_v55, %v1730_v13  ;;  %v1835_v29 = vadd.f32 %v1797_v30, %v1731_v63  ;;  %v7245_v63 = vld [vmem:[#allocation43_spill] sm:$0xff] }
 0x1ef   : > { %v2197_v58 = vrot.slane %v2154_v4, 3  ;;  %v2254_v49 = vmul.f32 %v7243_v40, %v7235_v12  ;;  %v2198_v24 = vrot.slane %v2155_v46, 3  ;;  %v2255_v33 = vmul.f32 %v7243_v40, %v7237_v53 }
 0x1f0   : > { %v2099_v7 = vsel %vm1875_vm2, %v2097_v52, %v2098_v59  ;;  %v2354_v10 = vmul.f32 %v7244_v36, %v6145_v41  ;;  %v1935_v25 = vadd.f32 %v1899_v22, %v1834_v48  ;;  %v1936_v44 = vadd.f32 %v1898_v3, %v1835_v29  ;;  %v7246_v22 = vld [vmem:[#allocation44_spill] sm:$0xff] }
 0x1f1   : > { %v2297_v57 = vrot.slane %v2254_v49, 3  ;;  %v2355_v55 = vmul.f32 %v7244_v36, %v6147_v19  ;;  %v2199_v30 = vsel %vm1875_vm2, %v2197_v58, %v2198_v24  ;;  %v2298_v4 = vrot.slane %v2255_v33, 3  ;;  %v2464_v19 = vld [vmem:[%s4378_s9 + $0x64] sm:$0x7] }
 0x1f2   : > { %v2397_v13 = vrot.slane %v2354_v10, 3  ;;  %v2502_v52 = vmul.f32 %v7245_v63, %v7128_v6  ;;  %v2035_v46 = vadd.f32 %v1999_v43, %v1935_v25  ;;  %v2036_v28 = vadd.f32 %v1998_v8, %v1936_v44  ;;  %v2463_v8 = vld [vmem:[%s4378_s9 + $0x60] sm:$0xc] }
 0x1f3   : > { %v2398_v40 = vrot.slane %v2355_v55, 3  ;;  %v2503_v35 = vmul.f32 %v7245_v63, %v7130_v18  ;;  %v2299_v3 = vsel %vm1875_vm2, %v2297_v57, %v2298_v4  ;;  %v2607_v48 = vmul.f32 %v7246_v22, %v7170_v31  ;;  %v7247_v55 = vld [vmem:[#allocation45_spill] sm:$0xff] }
 0x1f4   : > { %v2546_v49 = vrot.slane %v2502_v52, 4  ;;  %v2608_v29 = vmul.f32 %v7246_v22, %v7133_v56  ;;  %v2135_v58 = vadd.f32 %v2099_v7, %v2035_v46  ;;  %v2136_v33 = vadd.f32 %v2098_v59, %v2036_v28  ;;  %v7248_v7 = vld [vmem:[#allocation46_spill] sm:$0xff] }
 0x1f5   : > { %v2399_v10 = vsel %vm1875_vm2, %v2397_v13, %v2398_v40  ;;  %v2547_v43 = vrot.slane %v2503_v35, 4  ;;  %v2650_v25 = vrot.slane %v2607_v48, 4  ;;  %v2711_v63 = vmul.f32 %v7247_v55, %v7172_v20 }
 0x1f6   : > { %v2651_v44 = vrot.slane %v2608_v29, 4  ;;  %v2712_v57 = vmul.f32 %v7247_v55, %v7211_v62  ;;  %v2235_v52 = vadd.f32 %v2199_v30, %v2135_v58  ;;  %v2236_v36 = vadd.f32 %v2198_v24, %v2136_v33  ;;  %v7252_v33 = vld [vmem:[#allocation48_spill] sm:$0xff] }
 0x1f7   : > { %v2548_v41 = vsel %vm2524_vm3, %v2546_v49, %v2547_v43  ;;  %v2815_v28 = vmul.f32 %v7248_v7, %v7212_v39  ;;  %v2754_v35 = vrot.slane %v2711_v63, 4  ;;  %v2816_v46 = vmul.f32 %v7248_v7, %v7214_v60  ;;  %v7251_v49 = vld [vmem:[#allocation24_spill] sm:$0xff]  ;;  %v7254_v7 = vld [vmem:[#allocation49_spill] sm:$0xff] }
 0x1f8   : > { %v2652_v59 = vsel %vm2524_vm3, %v2650_v25, %v2651_v44  ;;  %v2755_v13 = vrot.slane %v2712_v57, 4  ;;  %v2335_v48 = vadd.f32 %v2299_v3, %v2235_v52  ;;  %v2336_v29 = vadd.f32 %v2298_v4, %v2236_v36  ;;  %v7253_v63 = vld [vmem:[#allocation16_spill] sm:$0xff] }
 0x1f9   : > { %v2858_v22 = vrot.slane %v2815_v28, 4  ;;  %v6211_v53 = vunpack.c.l.bf16 %v2463_v8  ;;  %v2859_v30 = vrot.slane %v2816_v46, 4  ;;  %v6214_v58 = vunpack.c.l.bf16 %v2464_v19  ;;  %v7255_v19 = vld [vmem:[#allocation47_spill] sm:$0xff] }
 0x1fa   : > { %v2756_v24 = vsel %vm2524_vm3, %v2754_v35, %v2755_v13  ;;  %v2919_v55 = vmul.f32 %v7252_v33, %v7251_v49  ;;  %v2435_v12 = vadd.f32 %v2399_v10, %v2335_v48  ;;  %v2436_v25 = vadd.f32 %v2398_v40, %v2336_v29 }
 0x1fb   : > { %7249 = vst [vmem:[#allocation19_spill] sm:$0xff] %v6211_v53  ;;  %v2920_v57 = vmul.f32 %v7252_v33, %v7253_v63  ;;  %v3023_v3 = vmul.f32 %v7254_v7, %v6211_v53  ;;  %v2860_v36 = vsel %vm2524_vm3, %v2858_v22, %v2859_v30  ;;  %v3024_v8 = vmul.f32 %v7254_v7, %v6214_v58  ;;  %v7256_v33 = vld [vmem:[#allocation50_spill] sm:$0xff] }
 0x1fc   : > { %7250 = vst [vmem:[#allocation20_spill] sm:$0xff] %v6214_v58  ;;  %v2962_v4 = vrot.slane %v2919_v55, 4  ;;  %v3123_v52 = vmul.f32 %v7255_v19, %v7128_v6  ;;  %v2584_v28 = vadd.f32 %v2548_v41, %v2435_v12  ;;  %v2585_v35 = vadd.f32 %v2547_v43, %v2436_v25  ;;  %v7257_v43 = vld [vmem:[#allocation51_spill] sm:$0xff] }
 0x1fd   : > { %v2963_v46 = vrot.slane %v2920_v57, 4  ;;  %v3066_v10 = vrot.slane %v3023_v3, 4  ;;  %v3067_v40 = vrot.slane %v3024_v8, 4  ;;  %v3124_v48 = vmul.f32 %v7255_v19, %v7130_v18 }
 0x1fe   : > { %v3167_v29 = vrot.slane %v3123_v52, 5  ;;  %v3224_v23 = vmul.f32 %v7256_v33, %v7170_v31  ;;  %v2688_v22 = vadd.f32 %v2652_v59, %v2584_v28  ;;  %v2689_v55 = vadd.f32 %v2651_v44, %v2585_v35 }
 0x1ff   : > { %v2964_v50 = vsel %vm2524_vm3, %v2962_v4, %v2963_v46  ;;  %v3225_v7 = vmul.f32 %v7256_v33, %v7133_v56  ;;  %v3068_v6 = vsel %vm2524_vm3, %v3066_v10, %v3067_v40  ;;  %v3168_v41 = vrot.slane %v3124_v48, 5  ;;  %v7258_v4 = vld [vmem:[#allocation52_spill] sm:$0xff]  ;;  %v7260_v33 = vld [vmem:[#allocation54_spill] sm:$0xff] }
 0x200   : > { %v3267_v12 = vrot.slane %v3224_v23, 5  ;;  %v3324_v25 = vmul.f32 %v7257_v43, %v7172_v20  ;;  %v2792_v57 = vadd.f32 %v2756_v24, %v2688_v22  ;;  %v2793_v18 = vadd.f32 %v2755_v13, %v2689_v55 }
 0x201   : > { %v3268_v3 = vrot.slane %v3225_v7, 5  ;;  %v3325_v8 = vmul.f32 %v7257_v43, %v7211_v62  ;;  %v3169_v44 = vsel %vm3145_vm4, %v3167_v29, %v3168_v41  ;;  %v3424_v52 = vmul.f32 %v7258_v4, %v7212_v39  ;;  %v7259_v7 = vld [vmem:[#allocation53_spill] sm:$0xff] }
 0x202   : > { %v3367_v59 = vrot.slane %v3324_v25, 5  ;;  %v3425_v28 = vmul.f32 %v7258_v4, %v7214_v60  ;;  %v2896_v35 = vadd.f32 %v2860_v36, %v2792_v57  ;;  %v2897_v23 = vadd.f32 %v2859_v30, %v2793_v18  ;;  %v299_v4 = vld [vmem:[%s4378_s9 + $0x68] sm:$0xf] }
 0x203   : > { %v3269_v10 = vsel %vm3145_vm4, %v3267_v12, %v3268_v3  ;;  %v3368_v48 = vrot.slane %v3325_v8, 5  ;;  %v3467_v24 = vrot.slane %v3424_v52, 5  ;;  %v3524_v22 = vmul.f32 %v7259_v7, %v7251_v49 }
 0x204   : > { %v3468_v13 = vrot.slane %v3425_v28, 5  ;;  %v3525_v29 = vmul.f32 %v7259_v7, %v7253_v63  ;;  %v3000_v55 = vadd.f32 %v2964_v50, %v2896_v35  ;;  %v3001_v25 = vadd.f32 %v2963_v46, %v2897_v23  ;;  %v7261_v50 = vld [vmem:[#allocation9_spill] sm:$0xff] }
 0x205   : > { %v3369_v43 = vsel %vm3145_vm4, %v3367_v59, %v3368_v48  ;;  %v3624_v36 = vmul.f32 %v7260_v33, %v6211_v53  ;;  %v3567_v12 = vrot.slane %v3524_v22, 5  ;;  %v3625_v18 = vmul.f32 %v7260_v33, %v6214_v58 }
 0x206   : > { %v3469_v30 = vsel %vm3145_vm4, %v3467_v24, %v3468_v13  ;;  %v3568_v57 = vrot.slane %v3525_v29, 5  ;;  %v3104_v8 = vadd.f32 %v3068_v6, %v3000_v55  ;;  %v3105_v52 = vadd.f32 %v3067_v40, %v3001_v25  ;;  %v7262_v24 = vld [vmem:[#allocation10_spill] sm:$0xff]  ;;  %v7263_v40 = vld [vmem:[#allocation11_spill] sm:$0xff] }
 0x207   : > { %v3667_v28 = vrot.slane %v3624_v36, 5  ;;  %v338_v46 = vmul.f32 %v7261_v50, %v7102_v5  ;;  %v3668_v35 = vrot.slane %v3625_v18, 5  ;;  %v339_v23 = vmul.f32 %v7261_v50, %v7104_v27  ;;  %v300_v36 = vld [vmem:[%s4378_s9 + $0x6c] sm:$0x1] }
 0x208   : > { %v3569_v59 = vsel %vm3145_vm4, %v3567_v12, %v3568_v57  ;;  %v380_v22 = vmul.f32 %v7262_v24, %v5478_v47  ;;  %v3205_v29 = vadd.f32 %v3169_v44, %v3104_v8  ;;  %v3206_v7 = vadd.f32 %v3168_v41, %v3105_v52 }
 0x209   : > { %v381_v6 = vmul.f32 %v7262_v24, %v5480_v26  ;;  %v422_v55 = vmul.f32 %v7263_v40, %v5679_v15  ;;  %v3669_v25 = vsel %vm3145_vm4, %v3667_v28, %v3668_v35  ;;  %v423_v18 = vmul.f32 %v7263_v40, %v5681_v9 }
 0x20a   : > { %v398_v12 = vadd.f32 %v380_v22, %v338_v46  ;;  %v464_v50 = vmul.f32 %v7185_v0, %v5885_v42  ;;  %v3305_v33 = vadd.f32 %v3269_v10, %v3205_v29  ;;  %v3306_v44 = vadd.f32 %v3268_v3, %v3206_v7 }
 0x20b   : > { %v399_v41 = vadd.f32 %v381_v6, %v339_v23  ;;  %v465_v8 = vmul.f32 %v7185_v0, %v5887_v61  ;;  %v506_v24 = vmul.f32 %v7186_v11, %v6082_v54  ;;  %v507_v28 = vmul.f32 %v7186_v11, %v6084_v37 }
 0x20c   : > { %v440_v52 = vadd.f32 %v422_v55, %v398_v12  ;;  %v529_v46 = vunpack.c.l.bf16 %v299_v4  ;;  %v3405_v22 = vadd.f32 %v3369_v43, %v3305_v33  ;;  %v3406_v19 = vadd.f32 %v3368_v48, %v3306_v44 }
 0x20d   : > { %v441_v40 = vadd.f32 %v423_v18, %v399_v41  ;;  %v530_v58 = vunpack.c.l.bf16 %v300_v36  ;;  %v585_v3 = vmul.f32 %v7147_v14, %v7102_v5  ;;  %v586_v0 = vmul.f32 %v7147_v14, %v7104_v27 }
 0x20e   : > { %v482_v53 = vadd.f32 %v464_v50, %v440_v52  ;;  %v548_v10 = vmul.f32 %v7187_v51, %v529_v46  ;;  %v3505_v7 = vadd.f32 %v3469_v30, %v3405_v22  ;;  %v3506_v23 = vadd.f32 %v3468_v13, %v3406_v19 }
 0x20f   : > { %v483_v29 = vadd.f32 %v465_v8, %v441_v40  ;;  %v549_v6 = vmul.f32 %v7187_v51, %v530_v58  ;;  %v630_v4 = vrot.slane %v585_v3, 1  ;;  %v631_v33 = vrot.slane %v586_v0, 1 }
 0x210   : > { %v524_v11 = vadd.f32 %v506_v24, %v482_v53  ;;  %v686_v43 = vmul.f32 %v7107_v34, %v5478_v47  ;;  %v3605_v48 = vadd.f32 %v3569_v59, %v3505_v7  ;;  %v3606_v55 = vadd.f32 %v3568_v57, %v3506_v23 }
 0x211   : > { %v525_v36 = vadd.f32 %v507_v28, %v483_v29  ;;  %v687_v5 = vmul.f32 %v7107_v34, %v5480_v26  ;;  %v632_v27 = vsel %vm605_vm0, %v630_v4, %v631_v33  ;;  %v786_v19 = vmul.f32 %v7108_v38, %v5679_v15  ;;  %v7266_v4 = vld [vmem:[#allocation55_spill] sm:$0xff] }
 0x212   : > { %v566_v12 = vadd.f32 %v548_v10, %v524_v11  ;;  %v730_v14 = vrot.slane %v686_v43, 1  ;;  %v3705_v51 = vadd.f32 %v3669_v25, %v3605_v48  ;;  %v3706_v53 = vadd.f32 %v3668_v35, %v3606_v55 }
 0x213   : > { %v567_v13 = vadd.f32 %v549_v6, %v525_v36  ;;  %v731_v30 = vrot.slane %v687_v5, 1  ;;  %v787_v47 = vmul.f32 %v7108_v38, %v5681_v9  ;;  %v830_v57 = vrot.slane %v786_v19, 1  ;;  %v7268_v5 = vld [vmem:[#allocation56_spill] sm:$0xff] }
 0x214   : > { %v667_v18 = vadd.f32 %v632_v27, %v566_v12  ;;  %v886_v59 = vmul.f32 %v7109_v32, %v5885_v42  ;;  %v4047_v26 = vpack.c.bf16 %v3706_v53, %v3705_v51  ;;  %v887_v44 = vmul.f32 %v7109_v32, %v5887_v61  ;;  %v7264_v61 = vld [vmem:[#allocation31_spill] sm:$0xff]  ;;  %v7269_v51 = vld [vmem:[#allocation2_spill] sm:$0xff] }
 0x215   : > { %v668_v34 = vadd.f32 %v631_v33, %v567_v13  ;;  %v732_v50 = vsel %vm605_vm0, %v730_v14, %v731_v30  ;;  %v831_v25 = vrot.slane %v787_v47, 1  ;;  %v986_v41 = vmul.f32 %v7110_v1, %v6082_v54  ;;  %v7267_v33 = vld [vmem:[#allocation33_spill] sm:$0xff]  ;;  %v7270_v53 = vld [vmem:[#allocation34_spill] sm:$0xff]  ;;  %v1195_v47 = vld [vmem:[%s4378_s9 + $0x68] sm:$0xe] }
 0x216   : > { %v767_v15 = vadd.f32 %v732_v50, %v667_v18  ;;  %v930_v35 = vrot.slane %v886_v59, 1  ;;  %4265 = vmatmul.msk.bf16.vlgmr.msrb.gmra.mxu0 %vm3743_vm5, %v4047_v26  ;;  %v931_v9 = vrot.slane %v887_v44, 1  ;;  %v987_v42 = vmul.f32 %v7110_v1, %v6084_v37  ;;  %v7271_v26 = vld [vmem:[#allocation23_spill] sm:$0xff] }
 0x217   : > { %v768_v38 = vadd.f32 %v731_v30, %v668_v34  ;;  %v1086_v8 = vmul.f32 %v7111_v45, %v529_v46  ;;  %v832_v52 = vsel %vm605_vm0, %v830_v57, %v831_v25  ;;  %v1030_v24 = vrot.slane %v986_v41, 1  ;;  %v1196_v57 = vld [vmem:[%s4378_s9 + $0x6c] sm:$0x3]  ;;  %v7274_v41 = vld [vmem:[#allocation18_spill] sm:$0xff] }
 0x218   : > { %v1087_v32 = vmul.f32 %v7111_v45, %v530_v58  ;;  %v1234_v28 = vmul.f32 %v7264_v61, %v7152_v2  ;;  %v867_v22 = vadd.f32 %v832_v52, %v767_v15  ;;  %v932_v54 = vsel %vm605_vm0, %v930_v35, %v931_v9  ;;  %v7265_v45 = vld [vmem:[#allocation32_spill] sm:$0xff]  ;;  %v7272_v15 = vld [vmem:[#allocation17_spill] sm:$0xff] }
 0x219   : > { %v868_v40 = vadd.f32 %v831_v25, %v768_v38  ;;  %v1031_v10 = vrot.slane %v987_v42, 1  ;;  %v1130_v3 = vrot.slane %v1086_v8, 1  ;;  %v1235_v1 = vmul.f32 %v7264_v61, %v7226_v16  ;;  %v7273_v25 = vld [vmem:[#allocation35_spill] sm:$0xff] }
 0x21a   : > { %v1131_v0 = vrot.slane %v1087_v32, 1  ;;  %v1279_v37 = vrot.slane %v1234_v28, 2  ;;  %v967_v46 = vadd.f32 %v932_v54, %v867_v22  ;;  %v1339_v58 = vmul.f32 %v7265_v45, %v7227_v17 }
 0x21b   : > { %v968_v7 = vadd.f32 %v931_v9, %v868_v40  ;;  %v1032_v23 = vsel %vm605_vm0, %v1030_v24, %v1031_v10  ;;  %v1280_v6 = vrot.slane %v1235_v1, 2  ;;  %v1340_v11 = vmul.f32 %v7265_v45, %v7229_v21  ;;  %v7276_v1 = vld [vmem:[#allocation37_spill] sm:$0xff] }
 0x21c   : > { %v1132_v29 = vsel %vm605_vm0, %v1130_v3, %v1131_v0  ;;  %v1443_v43 = vmul.f32 %v7267_v33, %v7266_v4  ;;  %v1067_v48 = vadd.f32 %v1032_v23, %v967_v46  ;;  %v1383_v36 = vrot.slane %v1339_v58, 2 }
 0x21d   : > { %v1068_v55 = vadd.f32 %v1031_v10, %v968_v7  ;;  %v1444_v12 = vmul.f32 %v7267_v33, %v7268_v5  ;;  %v1281_v27 = vsel %vm1254_vm1, %v1279_v37, %v1280_v6  ;;  %v1384_v14 = vrot.slane %v1340_v11, 2  ;;  %v7275_v10 = vld [vmem:[#allocation36_spill] sm:$0xff] }
 0x21e   : > { %v1487_v19 = vrot.slane %v1443_v43, 2  ;;  %v1547_v13 = vmul.f32 %v7270_v53, %v7269_v51  ;;  %v1167_v30 = vadd.f32 %v1132_v29, %v1067_v48  ;;  %v1548_v34 = vmul.f32 %v7270_v53, %v7271_v26  ;;  %v7277_v29 = vld [vmem:[#allocation38_spill] sm:$0xff] }
 0x21f   : > { %v1168_v18 = vadd.f32 %v1131_v0, %v1068_v55  ;;  %v1488_v59 = vrot.slane %v1444_v12, 2  ;;  %v1385_v50 = vsel %vm1254_vm1, %v1383_v36, %v1384_v14  ;;  %v1651_v35 = vmul.f32 %v7273_v25, %v7272_v15  ;;  %v7278_v36 = vld [vmem:[#allocation39_spill] sm:$0xff] }
 0x220   : > { %v1591_v44 = vrot.slane %v1547_v13, 2  ;;  %v1652_v38 = vmul.f32 %v7273_v25, %v7274_v41  ;;  %v1316_v9 = vadd.f32 %v1281_v27, %v1167_v30  ;;  %v1592_v52 = vrot.slane %v1548_v34, 2  ;;  %v7279_v30 = vld [vmem:[#allocation40_spill] sm:$0xff] }
 0x221   : > { %v1317_v42 = vadd.f32 %v1280_v6, %v1168_v18  ;;  %v1489_v8 = vsel %vm1254_vm1, %v1487_v19, %v1488_v59  ;;  %v1695_v24 = vrot.slane %v1651_v35, 2  ;;  %v1736_v61 = vunpack.c.l.bf16 %v1195_v47 }
 0x222   : > { %v1696_v32 = vrot.slane %v1652_v38, 2  ;;  %v1737_v28 = vunpack.c.l.bf16 %v1196_v57  ;;  %v1420_v22 = vadd.f32 %v1385_v50, %v1316_v9  ;;  %v1593_v54 = vsel %vm1254_vm1, %v1591_v44, %v1592_v52  ;;  %v7281_v38 = vld [vmem:[#allocation42_spill] sm:$0xff] }
 0x223   : > { %v1421_v40 = vadd.f32 %v1384_v14, %v1317_v42  ;;  %v1855_v3 = vmul.f32 %v7275_v10, %v7152_v2  ;;  %v1755_v37 = vmul.f32 %v7276_v1, %v1736_v61  ;;  %v1856_v7 = vmul.f32 %v7275_v10, %v7226_v16 }
 0x224   : > { %v1697_v0 = vsel %vm1254_vm1, %v1695_v24, %v1696_v32  ;;  %v1756_v46 = vmul.f32 %v7276_v1, %v1737_v28  ;;  %v1524_v23 = vadd.f32 %v1489_v8, %v1420_v22  ;;  %v1956_v6 = vmul.f32 %v7277_v29, %v7227_v17 }
 0x225   : > { %v1525_v45 = vadd.f32 %v1488_v59, %v1421_v40  ;;  %v1900_v58 = vrot.slane %v1855_v3, 3  ;;  %v1799_v11 = vrot.slane %v1755_v37, 2  ;;  %v1901_v43 = vrot.slane %v1856_v7, 3 }
 0x226   : > { %v1800_v33 = vrot.slane %v1756_v46, 2  ;;  %v1957_v2 = vmul.f32 %v7277_v29, %v7229_v21  ;;  %v1628_v48 = vadd.f32 %v1593_v54, %v1524_v23  ;;  %v2056_v12 = vmul.f32 %v7278_v36, %v7266_v4  ;;  %v7280_v4 = vld [vmem:[#allocation41_spill] sm:$0xff] }
 0x227   : > { %v1629_v55 = vadd.f32 %v1592_v52, %v1525_v45  ;;  %v2000_v16 = vrot.slane %v1956_v6, 3  ;;  %v2057_v19 = vmul.f32 %v7278_v36, %v7268_v5  ;;  %v2156_v18 = vmul.f32 %v7279_v30, %v7269_v51  ;;  %v7284_v23 = vld [vmem:[#allocation45_spill] sm:$0xff]  ;;  %v6384_v36 = vpop.f32.mrf.mxu1 }
 0x228   : > { %v1801_v27 = vsel %vm1254_vm1, %v1799_v11, %v1800_v33  ;;  %v2001_v14 = vrot.slane %v1957_v2, 3  ;;  %v1732_v53 = vadd.f32 %v1697_v0, %v1628_v48  ;;  %v2100_v13 = vrot.slane %v2056_v12, 3  ;;  %v7283_v0 = vld [vmem:[#allocation44_spill] sm:$0xff]  ;;  %v7285_v48 = vld [vmem:[#allocation46_spill] sm:$0xff] }
 0x229   : > { %v1733_v17 = vadd.f32 %v1696_v32, %v1629_v55  ;;  %v1902_v21 = vsel %vm1875_vm2, %v1900_v58, %v1901_v43  ;;  %v2101_v47 = vrot.slane %v2057_v19, 3  ;;  %v2157_v57 = vmul.f32 %v7279_v30, %v7271_v26 }
 0x22a   : > { %v2256_v59 = vmul.f32 %v7280_v4, %v7272_v15  ;;  %v1836_v34 = vadd.f32 %v1801_v27, %v1732_v53  ;;  %v2200_v44 = vrot.slane %v2156_v18, 3  ;;  %v2257_v5 = vmul.f32 %v7280_v4, %v7274_v41  ;;  %v7282_v15 = vld [vmem:[#allocation43_spill] sm:$0xff]  ;;  %v6392_v53 = vpop.f32.mrf.mxu0 }
 0x22b   : > { %v1837_v50 = vadd.f32 %v1800_v33, %v1733_v17  ;;  %v2002_v25 = vsel %vm1875_vm2, %v2000_v16, %v2001_v14  ;;  %v2201_v35 = vrot.slane %v2157_v57, 3  ;;  %v2356_v51 = vmul.f32 %v7281_v38, %v1736_v61  ;;  %v6388_v27 = vld [vmem:[%s4378_s9 + $0x6c] sm:$0x7] }
 0x22c   : > { %v1937_v9 = vadd.f32 %v1902_v21, %v1836_v34  ;;  %v2102_v8 = vsel %vm1875_vm2, %v2100_v13, %v2101_v47  ;;  %v2357_v26 = vmul.f32 %v7281_v38, %v1737_v28  ;;  %v2300_v52 = vrot.slane %v2256_v59, 3  ;;  %v7286_v18 = vld [vmem:[#allocation19_spill] sm:$0xff]  ;;  %v7287_v21 = vld [vmem:[#allocation48_spill] sm:$0xff] }
 0x22d   : > { %v1938_v42 = vadd.f32 %v1901_v43, %v1837_v50  ;;  %v2301_v24 = vrot.slane %v2257_v5, 3  ;;  %v2504_v32 = vmul.f32 %v7282_v15, %v7170_v31  ;;  %v2505_v22 = vmul.f32 %v7282_v15, %v7133_v56  ;;  %v6380_v43 = vld [vmem:[%s4378_s9 + $0x68] sm:$0xc]  ;;  %v7288_v59 = vld [vmem:[#allocation20_spill] sm:$0xff]  ;;  %s4282_s9 = smul.u32 144, %s7297_s22 }
 0x22e   : > { %v2037_v41 = vadd.f32 %v2002_v25, %v1937_v9  ;;  %v2202_v54 = vsel %vm1875_vm2, %v2200_v44, %v2201_v35  ;;  %v2400_v61 = vrot.slane %v2356_v51, 3  ;;  %v2401_v10 = vrot.slane %v2357_v26, 3  ;;  %v3814_v44 = vpop.f32.mrf.mxu2  ;;  %v7289_v9 = vld [vmem:[#allocation49_spill] sm:$0xff] }
 0x22f   : > { %v2038_v40 = vadd.f32 %v2001_v14, %v1938_v42  ;;  %v2549_v3 = vrot.slane %v2504_v32, 4  ;;  %v2609_v1 = vmul.f32 %v7283_v0, %v7172_v20  ;;  %v2610_v28 = vmul.f32 %v7283_v0, %v7211_v62  ;;  %s6447_s15 = scalar_lea.vmem %s6548_s6, %s4282_s9 }
 0x230   : > { %v2137_v37 = vadd.f32 %v2102_v8, %v2037_v41  ;;  %v2550_v7 = vrot.slane %v2505_v22, 4  ;;  %v2713_v45 = vmul.f32 %v7284_v23, %v7212_v39  ;;  %v2302_v58 = vsel %vm1875_vm2, %v2300_v52, %v2301_v24  ;;  %v7290_v8 = vld [vmem:[#allocation47_spill] sm:$0xff] }
 0x231   : > { %v2138_v46 = vadd.f32 %v2101_v47, %v2038_v40  ;;  %v2653_v29 = vrot.slane %v2609_v1, 4  ;;  %v2714_v6 = vmul.f32 %v7284_v23, %v7214_v60  ;;  %v2654_v2 = vrot.slane %v2610_v28, 4  ;;  %v3794_v28 = vpop.f32.mrf.mxu1 }
 0x232   : > { %v2237_v11 = vadd.f32 %v2202_v54, %v2137_v37  ;;  %v2817_v55 = vmul.f32 %v7285_v48, %v7251_v49  ;;  %v2402_v12 = vsel %vm1875_vm2, %v2400_v61, %v2401_v10  ;;  %v2757_v16 = vrot.slane %v2713_v45, 4  ;;  %v7291_v61 = vld [vmem:[#allocation50_spill] sm:$0xff]  ;;  %v3898_v45 = vpop.f32.mrf.mxu0 }
 0x233   : > { %v2238_v33 = vadd.f32 %v2201_v35, %v2138_v46  ;;  %v2758_v14 = vrot.slane %v2714_v6, 4  ;;  %v2818_v19 = vmul.f32 %v7285_v48, %v7253_v63  ;;  %v2551_v30 = vsel %vm2524_vm3, %v2549_v3, %v2550_v7  ;;  %v7292_v46 = vld [vmem:[#allocation51_spill] sm:$0xff] }
 0x234   : > { %v2337_v17 = vadd.f32 %v2302_v58, %v2237_v11  ;;  %v2921_v47 = vmul.f32 %v7287_v21, %v7286_v18  ;;  %v2861_v57 = vrot.slane %v2817_v55, 4  ;;  %v2922_v34 = vmul.f32 %v7287_v21, %v7288_v59 }
 0x235   : > { %v2338_v13 = vadd.f32 %v2301_v24, %v2238_v33  ;;  %v2862_v4 = vrot.slane %v2818_v19, 4  ;;  %v3006_v50 = vunpack.c.l.bf16 %v6380_v43  ;;  %v2655_v35 = vsel %vm2524_vm3, %v2653_v29, %v2654_v2 }
 0x236   : > { %v2437_v5 = vadd.f32 %v2402_v12, %v2337_v17  ;;  %v3007_v38 = vunpack.c.l.bf16 %v6388_v27  ;;  %v2759_v51 = vsel %vm2524_vm3, %v2757_v16, %v2758_v14  ;;  %v3125_v26 = vmul.f32 %v7290_v8, %v7170_v31  ;;  %v3816_v27 = vpop.f32.mrf.mxu2  ;;  %v6429_v16 = vld [vmem:[%s6547_s5] ss:$0 sm:$0xff]  ;;  %v7294_v17 = vld [vmem:[#allocation53_spill] sm:$0xff] }
 0x237   : > { %v2438_v25 = vadd.f32 %v2401_v10, %v2338_v13  ;;  %v3025_v42 = vmul.f32 %v7289_v9, %v3006_v50  ;;  %v3126_v52 = vmul.f32 %v7290_v8, %v7133_v56  ;;  %v2965_v32 = vrot.slane %v2921_v47, 4  ;;  %v6440_v47 = vld [vmem:[%s6545_s3] ss:$0 sm:$0xff] }
 0x238   : > { %v2586_v24 = vadd.f32 %v2551_v30, %v2437_v5  ;;  %v3026_v22 = vmul.f32 %v7289_v9, %v3007_v38  ;;  %v2863_v41 = vsel %vm2524_vm3, %v2861_v57, %v2862_v4  ;;  %v2966_v40 = vrot.slane %v2922_v34, 4 }
 0x239   : > { %v2587_v15 = vadd.f32 %v2550_v7, %v2438_v25  ;;  %v3069_v54 = vrot.slane %v3025_v42, 4  ;;  %v3226_v10 = vmul.f32 %v7291_v61, %v7172_v20  ;;  %v3170_v1 = vrot.slane %v3125_v26, 5 }
 0x23a   : > { %v2690_v3 = vadd.f32 %v2655_v35, %v2586_v24  ;;  %v3227_v31 = vmul.f32 %v7291_v61, %v7211_v62  ;;  %v3070_v56 = vrot.slane %v3026_v22, 4  ;;  %v3171_v37 = vrot.slane %v3126_v52, 5  ;;  %v7293_v62 = vld [vmem:[#allocation52_spill] sm:$0xff]  ;;  %v3978_v52 = vpop.f32.mrf.mxu0 }
 0x23b   : > { %v2691_v0 = vadd.f32 %v2654_v2, %v2587_v15  ;;  %v3326_v7 = vmul.f32 %v7292_v46, %v7212_v39  ;;  %v3327_v23 = vmul.f32 %v7292_v46, %v7214_v60  ;;  %v3270_v20 = vrot.slane %v3226_v10, 5 }
 0x23c   : > { %v2794_v58 = vadd.f32 %v2759_v51, %v2690_v3  ;;  %v3271_v6 = vrot.slane %v3227_v31, 5  ;;  %v2967_v11 = vsel %vm2524_vm3, %v2965_v32, %v2966_v40  ;;  %v3426_v2 = vmul.f32 %v7293_v62, %v7251_v49 }
 0x23d   : > { %v2795_v29 = vadd.f32 %v2758_v14, %v2691_v0  ;;  %v3370_v33 = vrot.slane %v3326_v7, 5  ;;  %v3371_v43 = vrot.slane %v3327_v23, 5  ;;  %v3427_v39 = vmul.f32 %v7293_v62, %v7253_v63 }
 0x23e   : > { %v2898_v48 = vadd.f32 %v2863_v41, %v2794_v58  ;;  %v3071_v60 = vsel %vm2524_vm3, %v3069_v54, %v3070_v56  ;;  %v3172_v12 = vsel %vm3145_vm4, %v3170_v1, %v3171_v37  ;;  %v3272_v49 = vsel %vm3145_vm4, %v3270_v20, %v3271_v6 }
 0x23f   : > { %v2899_v55 = vadd.f32 %v2862_v4, %v2795_v29  ;;  %v3526_v13 = vmul.f32 %v7294_v17, %v7286_v18  ;;  %v3372_v63 = vsel %vm3145_vm4, %v3370_v33, %v3371_v43  ;;  %v3470_v30 = vrot.slane %v3426_v2, 5  ;;  %v3855_v18 = vpop.f32.mrf.mxu1  ;;  %v4301_v29 = vld [vmem:[%s6546_s4] sm:$0xff] }
 0x240   : > { %v3002_v14 = vadd.f32 %v2967_v11, %v2898_v48  ;;  %v3527_v21 = vmul.f32 %v7294_v17, %v7288_v59  ;;  %v3815_v57 = vadd.f32 %v6440_v47, %v3814_v44  ;;  %v3471_v5 = vrot.slane %v3427_v39, 5  ;;  %v7295_v59 = vld [vmem:[#allocation54_spill] sm:$0xff] }
 0x241   : > { %v3003_v19 = vadd.f32 %v2966_v40, %v2899_v55  ;;  %v3817_v25 = vadd.f32 %v6440_v47, %v3816_v27  ;;  %v3626_v35 = vmul.f32 %v7295_v59, %v3006_v50  ;;  %v3627_v51 = vmul.f32 %v7295_v59, %v3007_v38 }
 0x242   : > { %v3106_v4 = vadd.f32 %v3071_v60, %v3002_v14  ;;  %v3819_v9 = vmax.f32 %v3815_v57, 0.0  ;;  %v3793_v44 = vadd.f32 %v6429_v16, %v6384_v36  ;;  %v3570_v24 = vrot.slane %v3526_v13, 5  ;;  %v3980_v33 = vpop.f32.mrf.mxu0 }
 0x243   : > { %v3107_v34 = vadd.f32 %v3070_v56, %v3003_v19  ;;  %v3820_v26 = vmax.f32 %v3817_v25, 0.0  ;;  %v3571_v15 = vrot.slane %v3527_v21, 5  ;;  %v3795_v32 = vadd.f32 %v6429_v16, %v3794_v28 }
 0x244   : > { %v3207_v42 = vadd.f32 %v3172_v12, %v3106_v4  ;;  %3798 = vst.msk [vmem:[%s6447_s15] sm:$0xff] %vm3797_vm7, %v3793_v44  ;;  %v3897_v41 = vadd.f32 %v6440_v47, %v6392_v53  ;;  %v3472_v36 = vsel %vm3145_vm4, %v3470_v30, %v3471_v5  ;;  %v3670_v40 = vrot.slane %v3626_v35, 5  ;;  %v4300_v53 = vld [vmem:[%s6546_s4 + $0x8] sm:$0xff] }
 0x245   : > { %v3208_v8 = vadd.f32 %v3171_v37, %v3107_v34  ;;  %v3821_v38 = vpack.c.bf16 %v3820_v26, %v3819_v9  ;;  %v3671_v54 = vrot.slane %v3627_v51, 5  ;;  %3800 = vst.msk [vmem:[%s6447_s15 + $0x8] sm:$0x1] %vm3799_vm8, %v3795_v32  ;;  %v3899_v61 = vadd.f32 %v6440_v47, %v3898_v45 }
 0x246   : > { %v3307_v50 = vadd.f32 %v3272_v49, %v3207_v42  ;;  %v3901_v0 = vmax.f32 %v3897_v41, 0.0  ;;  %v3572_v1 = vsel %vm3145_vm4, %v3570_v24, %v3571_v15  ;;  %v3856_v11 = vadd.f32 %v6440_v47, %v3855_v18 }
 0x247   : > { %v3308_v22 = vadd.f32 %v3271_v6, %v3208_v8  ;;  %4242 = vmatmul.msk.bf16.vlgmr.msra.gmra.mxu3 %vm3779_vm6, %v3821_v38  ;;  %v3902_v31 = vmax.f32 %v3899_v61, 0.0  ;;  %v3857_v37 = vpop.f32.mrf.mxu1  ;;  %v3672_v46 = vsel %vm3145_vm4, %v3670_v40, %v3671_v54  ;;  %v3979_v2 = vadd.f32 %v6440_v47, %v3978_v52 }
 0x248   : > { %v3407_v10 = vadd.f32 %v3372_v63, %v3307_v50  ;;  %3954 = vmatpush.bf16.msra.mxu3 %v4300_v53  ;;  %v3858_v58 = vadd.f32 %v6440_v47, %v3857_v37  ;;  %v3981_v48 = vadd.f32 %v6440_v47, %v3980_v33  ;;  %v3860_v55 = vmax.f32 %v3856_v11, 0.0 }
 0x249   : > { %v3408_v3 = vadd.f32 %v3371_v43, %v3308_v22  ;;  %v3903_v7 = vpack.c.bf16 %v3902_v31, %v3901_v0  ;;  %v3983_v12 = vmax.f32 %v3979_v2, 0.0 }
 0x24a   : > { %v3507_v28 = vadd.f32 %v3472_v36, %v3407_v10  ;;  %v3861_v62 = vmax.f32 %v3858_v58, 0.0  ;;  %v3984_v27 = vmax.f32 %v3981_v48, 0.0 }
 0x24b   : > { %v3508_v56 = vadd.f32 %v3471_v5, %v3408_v3  ;;  %4250 = vmatmul.msk.bf16.vlgmr.msrb.gmra.mxu2 %vm3779_vm6, %v3903_v7 }
 0x24c   : > { %v3607_v23 = vadd.f32 %v3572_v1, %v3507_v28  ;;  %3955 = vmatpush.bf16.msra.mxu3 %v4301_v29  ;;  %4077 = vmatpush.bf16.msrb.mxu2 %v4300_v53  ;;  %v3862_v60 = vpack.c.bf16 %v3861_v62, %v3860_v55  ;;  %v3985_v14 = vpack.c.bf16 %v3984_v27, %v3983_v12 }
 0x24d   : > { %v3608_v45 = vadd.f32 %v3571_v15, %v3508_v56 }
 0x24e   : > { %v3707_v20 = vadd.f32 %v3672_v46, %v3607_v23 }
 0x24f   : > { %v3708_v6 = vadd.f32 %v3671_v54, %v3608_v45  ;;  %v3937_v39 = vpop.f32.mrf.mxu1 }
 0x250   : > { %4078 = vmatpush.bf16.msrb.mxu2 %v4301_v29  ;;  %v3938_v17 = vadd.f32 %v6440_v47, %v3937_v39 }
 0x251   : > { %v4088_v43 = vpack.c.bf16 %v3708_v6, %v3707_v20 }
 0x252   : > { %v3942_v63 = vmax.f32 %v3938_v17, 0.0 }
 0x253   : > { %4269 = vmatmul.msk.bf16.vlgmr.msra.gmra.mxu1 %vm3743_vm5, %v4088_v43 }
 0x257   : > { %4246 = vmatmul.msk.bf16.vlgmr.msrb.gmra.mxu3 %vm3779_vm6, %v3862_v60  ;;  %v3939_v19 = vpop.f32.mrf.mxu1 }
 0x258   : > { %4036 = vmatpush.bf16.msrb.mxu3 %v4300_v53  ;;  %v3940_v49 = vadd.f32 %v6440_v47, %v3939_v19 }
 0x25a   : > { %v3943_v13 = vmax.f32 %v3940_v49, 0.0 }
 0x25b   : > { %4258 = vmatmul.msk.bf16.vlgmr.msra.gmra.mxu2 %vm3779_vm6, %v3985_v14 }
 0x25c   : > { %4037 = vmatpush.bf16.msrb.mxu3 %v4301_v29  ;;  %v3944_v30 = vpack.c.bf16 %v3943_v13, %v3942_v63 }
 0x25f   : > { %v4019_v21 = vpop.f32.mrf.mxu1 }
 0x260   : > { %v4020_v57 = vadd.f32 %v6440_v47, %v4019_v21 }
 0x262   : > { %v4024_v5 = vmax.f32 %v4020_v57, 0.0 }
 0x267   : > { %4254 = vmatmul.msk.bf16.vlgmr.msra.gmra.mxu3 %vm3779_vm6, %v3944_v30  ;;  %v4021_v4 = vpop.f32.mrf.mxu1 }
 0x268   : > { %4118 = vmatpush.bf16.msra.mxu3 %v4300_v53  ;;  %v4022_v34 = vadd.f32 %v6440_v47, %v4021_v4 }
 0x26a   : > { %v4025_v25 = vmax.f32 %v4022_v34, 0.0 }
 0x26c   : > { %4119 = vmatpush.bf16.msra.mxu3 %v4301_v29  ;;  %v4026_v18 = vpack.c.bf16 %v4025_v25, %v4024_v5 }
 0x277   : > { %4262 = vmatmul.msk.bf16.vlgmr.msrb.gmra.mxu3 %vm3779_vm6, %v4026_v18 }
 0x293   : > { %v4060_v59 = vpop.f32.mrf.mxu0 }
 0x294   : > { %v4061_v35 = vadd.f32 %v6440_v47, %v4060_v59 }
 0x296   : > { %v4065_v9 = vmax.f32 %v4061_v35, 0.0 }
 0x29b   : > { %v4062_v51 = vpop.f32.mrf.mxu0 }
 0x29c   : > { %v4063_v44 = vadd.f32 %v6440_v47, %v4062_v51 }
 0x29e   : > { %v4066_v42 = vmax.f32 %v4063_v44, 0.0 }
 0x2a0   : > { %v4067_v8 = vpack.c.bf16 %v4066_v42, %v4065_v9 }
 0x2a2   : > { %4266 = vmatmul.msk.bf16.vlgmr.msrb.gmra.mxu2 %vm3779_vm6, %v4067_v8 }
 0x2ca   : > { %v3834_v26 = vpop.f32.mrf.mxu3 }
 0x2cb   : > { %v3835_v52 = vadd.f32 %v6429_v16, %v3834_v26 }
 0x2cd   : > { %4243 = vst.msk [vmem:[%s6447_s15 + $0x10] sm:$0xff] %vm3797_vm7, %v3835_v52 }
 0x2ce   : > { %v3916_v15 = vpop.f32.mrf.mxu2 }
 0x2cf   : > { %v3917_v32 = vadd.f32 %v6429_v16, %v3916_v15 }
 0x2d0   : > { %v4101_v24 = vpop.f32.mrf.mxu1 }
 0x2d1   : > { %4251 = vst.msk [vmem:[%s6447_s15 + $0x30] sm:$0xff] %vm3797_vm7, %v3917_v32  ;;  %v4102_v38 = vadd.f32 %v6440_v47, %v4101_v24 }
 0x2d2   : > { %v3836_v50 = vpop.f32.mrf.mxu3 }
 0x2d3   : > { %v3837_v22 = vadd.f32 %v6429_v16, %v3836_v50  ;;  %v4106_v61 = vmax.f32 %v4102_v38, 0.0 }
 0x2d5   : > { %4244 = vst.msk [vmem:[%s6447_s15 + $0x18] sm:$0x1] %vm3799_vm8, %v3837_v22 }
 0x2d6   : > { %v3918_v40 = vpop.f32.mrf.mxu2 }
 0x2d7   : > { %v3919_v54 = vadd.f32 %v6429_v16, %v3918_v40 }
 0x2d8   : > { %v4103_v41 = vpop.f32.mrf.mxu1 }
 0x2d9   : > { %v4104_v36 = vadd.f32 %v6440_v47, %v4103_v41  ;;  %4252 = vst.msk [vmem:[%s6447_s15 + $0x38] sm:$0x1] %vm3799_vm8, %v3919_v54 }
 0x2da   : > { %v3875_v3 = vpop.f32.mrf.mxu3 }
 0x2db   : > { %v4107_v10 = vmax.f32 %v4104_v36, 0.0  ;;  %v3876_v1 = vadd.f32 %v6429_v16, %v3875_v3 }
 0x2dd   : > { %v4108_v0 = vpack.c.bf16 %v4107_v10, %v4106_v61  ;;  %4247 = vst.msk [vmem:[%s6447_s15 + $0x20] sm:$0xff] %vm3797_vm7, %v3876_v1 }
 0x2de   : > { %v3998_v47 = vpop.f32.mrf.mxu2 }
 0x2df   : > { %4270 = vmatmul.msk.bf16.vlgmr.msra.gmra.mxu3 %vm3779_vm6, %v4108_v0  ;;  %v3999_v31 = vadd.f32 %v6429_v16, %v3998_v47 }
 0x2e1   : > { %4259 = vst.msk [vmem:[%s6447_s15 + $0x50] sm:$0xff] %vm3797_vm7, %v3999_v31 }
 0x2e2   : > { %v3877_v53 = vpop.f32.mrf.mxu3 }
 0x2e3   : > { %v3878_v28 = vadd.f32 %v6429_v16, %v3877_v53 }
 0x2e5   : > { %4248 = vst.msk [vmem:[%s6447_s15 + $0x28] sm:$0x1] %vm3799_vm8, %v3878_v28 }
 0x2e6   : > { %v4000_v56 = vpop.f32.mrf.mxu2 }
 0x2e7   : > { %v4001_v37 = vadd.f32 %v6429_v16, %v4000_v56 }
 0x2e9   : > { %4260 = vst.msk [vmem:[%s6447_s15 + $0x58] sm:$0x1] %vm3799_vm8, %v4001_v37 }
 0x2ea   : > { %v3957_v46 = vpop.f32.mrf.mxu3 }
 0x2eb   : > { %v3958_v7 = vadd.f32 %v6429_v16, %v3957_v46 }
 0x2ed   : > { %4255 = vst.msk [vmem:[%s6447_s15 + $0x40] sm:$0xff] %vm3797_vm7, %v3958_v7 }
 0x2f2   : > { %v3959_v23 = vpop.f32.mrf.mxu3 }
 0x2f3   : > { %v3960_v45 = vadd.f32 %v6429_v16, %v3959_v23 }
 0x2f5   : > { %4256 = vst.msk [vmem:[%s6447_s15 + $0x48] sm:$0x1] %vm3799_vm8, %v3960_v45 }
 0x2fa   : > { %v4039_v58 = vpop.f32.mrf.mxu3 }
 0x2fb   : > { %v4040_v29 = vadd.f32 %v6429_v16, %v4039_v58 }
 0x2fd   : > { %4263 = vst.msk [vmem:[%s6447_s15 + $0x60] sm:$0xff] %vm3797_vm7, %v4040_v29 }
 0x302   : > { %v4041_v20 = vpop.f32.mrf.mxu3 }
 0x303   : > { %v4042_v6 = vadd.f32 %v6429_v16, %v4041_v20 }
 0x305   : > { %4264 = vst.msk [vmem:[%s6447_s15 + $0x68] sm:$0x1] %vm3799_vm8, %v4042_v6 }
 0x325   : > { %v4080_v11 = vpop.f32.mrf.mxu2 }
 0x326   : > { %v4081_v33 = vadd.f32 %v6429_v16, %v4080_v11 }
 0x328   : > { %4267 = vst.msk [vmem:[%s6447_s15 + $0x70] sm:$0xff] %vm3797_vm7, %v4081_v33 }
 0x32d   : > { %v4082_v43 = vpop.f32.mrf.mxu2 }
 0x32e   : > { %v4083_v62 = vadd.f32 %v6429_v16, %v4082_v43 }
 0x330   : > { %4268 = vst.msk [vmem:[%s6447_s15 + $0x78] sm:$0x1] %vm3799_vm8, %v4083_v62 }
 0x362   : > { %v4121_v2 = vpop.f32.mrf.mxu3 }
 0x363   : > { %v4122_v48 = vadd.f32 %v6429_v16, %v4121_v2 }
 0x365   : > { %4271 = vst.msk [vmem:[%s6447_s15 + $0x80] sm:$0xff] %vm3797_vm7, %v4122_v48 }
 0x36a   : > { %v4123_v55 = vpop.f32.mrf.mxu3 }
 0x36b   : > { %v4124_v39 = vadd.f32 %v6429_v16, %v4123_v55 }
 0x36d   : > { %4272 = vst.msk [vmem:[%s6447_s15 + $0x88] sm:$0x1] %vm3799_vm8, %v4124_v39 }
 0x36e PF: > { %s16_s21 = sadd.s32 1, %s4308_s21  }
 0x36f   : > { %p13_p4 = scmp.ge.s32.totalorder %s16_s21, 4  }
 0x371   :  { %15 = sbr.rel (!%p13_p4) target bundleno = 1 (0x1), region = 90 }

</bundles_post_ra>
